<compile_context>
chip_gen: v5e
topology: v5e:2x2
jax: 0.10.0
libtpu: 0.0.40
codegen_flags: <defaults>
</compile_context>

<pallas_src>
import functools

import jax
import jax.numpy as jnp
from jax import lax
from jax.experimental import pallas as pl
from jax.experimental.pallas import tpu as pltpu

LANE = 128
BN_EPS = 1e-5  # PyTorch BatchNorm2d default eps


# ---------------------------------------------------------------------------
# Pallas kernels
# ---------------------------------------------------------------------------
def _conv_gemm_bn_relu_kernel(p_ref, w_ref, scale_ref, shift_ref, o_ref):
    # p_ref: [M, K] bf16 (im2col patches), w_ref: [K, Np] bf16 (Np lane-padded),
    # scale/shift: [1, Np] f32 (BN eval affine with conv bias folded in),
    # o_ref: [M, Np] bf16.
    acc = jnp.dot(p_ref[...], w_ref[...], preferred_element_type=jnp.float32)
    y = acc * scale_ref[...] + shift_ref[...]
    o_ref[...] = jnp.maximum(y, 0.0).astype(o_ref.dtype)


def _head_kernel(x_ref, wfc_ref, bfc_ref, wcls_ref, bcls_ref, o_ref):
    # Fused Encoder.fc (in_linear -> 512) + Classifier.l1 (512 -> n_classes_pad).
    # Dropout(p=0.5) is identity at inference, so nothing to apply here.
    h = jnp.dot(x_ref[...], wfc_ref[...], preferred_element_type=jnp.float32)
    h = (h + bfc_ref[...]).astype(jnp.bfloat16)
    logits = jnp.dot(h, wcls_ref[...], preferred_element_type=jnp.float32)
    o_ref[...] = (logits + bcls_ref[...]).astype(o_ref.dtype)


def _vmem_call(kernel, out_shape, n_in):
    # Whole-array, no grid, everything VMEM-resident: these problems are tiny,
    # so the pipelined-grid machinery would be pure per-step overhead.
    return pl.pallas_call(
        kernel,
        out_shape=out_shape,
        in_specs=[pl.BlockSpec(memory_space=pltpu.MemorySpace.VMEM)] * n_in,
        out_specs=pl.BlockSpec(memory_space=pltpu.MemorySpace.VMEM),
    )


# ---------------------------------------------------------------------------
# Wrappers (layout glue around the kernels)
# ---------------------------------------------------------------------------
def _pad_lanes(a, n_to):
    pad = n_to - a.shape[-1]
    if pad == 0:
        return a
    widths = [(0, 0)] * (a.ndim - 1) + [(0, pad)]
    return jnp.pad(a, widths)


def _im2col(x_nhwc, kh, kw, pad):
    B, H, W, C = x_nhwc.shape
    xp = jnp.pad(x_nhwc, ((0, 0), (pad, pad), (pad, pad), (0, 0)))
    Ho = H + 2 * pad - kh + 1
    Wo = W + 2 * pad - kw + 1
    cols = []
    for i in range(kh):
        for j in range(kw):
            cols.append(xp[:, i:i + Ho, j:j + Wo, :])
    patches = jnp.concatenate(cols, axis=-1)          # [B, Ho, Wo, kh*kw*C]
    return patches.reshape(B * Ho * Wo, kh * kw * C), Ho, Wo


def conv_bn_relu(x_nhwc, w_oihw, scale, shift, pad):
    """One Encoder block: Conv2d -> BatchNorm2d(eval) -> ReLU (GEMM fused in Pallas)."""
    C_out, C_in, kh, kw = w_oihw.shape
    B = x_nhwc.shape[0]
    patches, Ho, Wo = _im2col(x_nhwc, kh, kw, pad)

    # [C_out, C_in, kh, kw] -> [kh*kw*C_in, C_out] to match the im2col channel
    # ordering, then zero-pad the lane dim to a multiple of 128.
    n_pad = ((C_out + LANE - 1) // LANE) * LANE
    w_flat = jnp.transpose(w_oihw, (2, 3, 1, 0)).reshape(kh * kw * C_in, C_out)
    w_p = _pad_lanes(w_flat, n_pad).astype(jnp.bfloat16)
    scale_p = _pad_lanes(scale.reshape(1, -1), n_pad).astype(jnp.float32)
    shift_p = _pad_lanes(shift.reshape(1, -1), n_pad).astype(jnp.float32)

    out = _vmem_call(
        _conv_gemm_bn_relu_kernel,
        jax.ShapeDtypeStruct((B * Ho * Wo, n_pad), jnp.bfloat16),
        n_in=4,
    )(patches.astype(jnp.bfloat16), w_p, scale_p, shift_p)

    return out[:, :C_out].reshape(B, Ho, Wo, C_out)


def head_forward(flat, w_fc, b_fc, w_cls, b_cls):
    """Fused Encoder.fc + Classifier.l1. flat: [B, in_linear]."""
    B = flat.shape[0]
    n_classes = w_cls.shape[0]
    n_pad = ((n_classes + LANE - 1) // LANE) * LANE  # lane-dense classifier output

    wfc_t = w_fc.T.astype(jnp.bfloat16)                        # [in_linear, 512]
    bfc = b_fc.reshape(1, -1).astype(jnp.float32)              # [1, 512]
    wcls_t = _pad_lanes(w_cls.T, n_pad).astype(jnp.bfloat16)   # [512, n_pad]
    bcls = _pad_lanes(b_cls.reshape(1, -1), n_pad).astype(jnp.float32)

    out = _vmem_call(
        _head_kernel,
        jax.ShapeDtypeStruct((B, n_pad), jnp.float32),
        n_in=5,
    )(flat.astype(jnp.bfloat16), wfc_t, bfc, wcls_t, bcls)
    return out[:, :n_classes]


def cnn_ex_forward(x_nchw, params):
    """Full CNNEx forward (inference)."""
    B = x_nchw.shape[0]
    a = jnp.transpose(x_nchw, (0, 2, 3, 1))  # NCHW -> NHWC (channels on lanes)
    for layer in params["convs"]:
        a = conv_bn_relu(a, layer["w"], layer["scale"], layer["shift"], layer["pad"])
    # PyTorch flattens in NCHW order: x.view(bs, -1)
    flat = jnp.transpose(a, (0, 3, 1, 2)).reshape(B, -1)
    # Dropout(p=0.5) is identity at inference.
    # TODO(synk): training-mode dropout mask not implemented (inference-only forward).
    return head_forward(flat, params["w_fc"], params["b_fc"],
                        params["w_cls"], params["b_cls"])


# ---------------------------------------------------------------------------
# Parameter init mirroring the PyTorch module (kaiming_normal_ weights, default
# uniform biases, BatchNorm in inference mode with running stats).
# ---------------------------------------------------------------------------
def init_params(key, in_channels, n_classes, cfg):
    keys = iter(jax.random.split(key, 32))
    convs = []
    c_in = in_channels
    s = cfg["size"]
    for (c_out, k, pad) in cfg["convs"]:
        fan_in = c_in * k * k
        w = jax.random.normal(next(keys), (c_out, c_in, k, k), jnp.float32) * (2.0 / fan_in) ** 0.5
        bound = 1.0 / fan_in ** 0.5
        b = jax.random.uniform(next(keys), (c_out,), jnp.float32, -bound, bound)
        # BatchNorm2d eval-mode params (PyTorch defaults would be gamma=1, beta=0,
        # mean=0, var=1; mildly randomized here so the BN math is exercised).
        gamma = jax.random.uniform(next(keys), (c_out,), jnp.float32, 0.5, 1.5)
        beta = jax.random.normal(next(keys), (c_out,), jnp.float32) * 0.1
        mean = jax.random.normal(next(keys), (c_out,), jnp.float32) * 0.1
        var = jax.random.uniform(next(keys), (c_out,), jnp.float32, 0.5, 1.5)
        scale = gamma / jnp.sqrt(var + BN_EPS)
        shift = beta + scale * (b - mean)  # conv bias folded into the BN shift
        convs.append(dict(w=w, scale=scale, shift=shift, pad=pad))
        c_in = c_out
        s = s - (k - 1) + 2 * pad
    in_linear = c_in * s * s

    # Encoder.fc: Linear(in_linear, 512)
    w_fc = jax.random.normal(next(keys), (512, in_linear), jnp.float32) * (2.0 / in_linear) ** 0.5
    b_fc = jax.random.uniform(next(keys), (512,), jnp.float32,
                              -1.0 / in_linear ** 0.5, 1.0 / in_linear ** 0.5)
    # Classifier.l1: Linear(512, n_classes)
    w_cls = jax.random.normal(next(keys), (n_classes, 512), jnp.float32) * (2.0 / 512.0) ** 0.5
    b_cls = jax.random.uniform(next(keys), (n_classes,), jnp.float32,
                               -1.0 / 512.0 ** 0.5, 1.0 / 512.0 ** 0.5)
    return dict(convs=convs, w_fc=w_fc, b_fc=b_fc, w_cls=w_cls, b_cls=b_cls,
                in_linear=in_linear)


# ---------------------------------------------------------------------------
# Pure-JAX reference (lax.conv), same bf16-in / f32-accumulate arithmetic.
# ---------------------------------------------------------------------------
def ref_forward(x_nchw, params):
    a = x_nchw
    for layer in params["convs"]:
        pad = layer["pad"]
        y = lax.conv_general_dilated(
            a.astype(jnp.bfloat16), layer["w"].astype(jnp.bfloat16),
            window_strides=(1, 1), padding=[(pad, pad), (pad, pad)],
            dimension_numbers=("NCHW", "OIHW", "NCHW"),
            preferred_element_type=jnp.float32)
        y = y * layer["scale"].reshape(1, -1, 1, 1) + layer["shift"].reshape(1, -1, 1, 1)
        a = jnp.maximum(y, 0.0)
    B = x_nchw.shape[0]
    flat = a.reshape(B, -1)
    h = jnp.dot(flat.astype(jnp.bfloat16), params["w_fc"].T.astype(jnp.bfloat16),
                preferred_element_type=jnp.float32) + params["b_fc"]
    h = h.astype(jnp.bfloat16)
    logits = jnp.dot(h, params["w_cls"].T.astype(jnp.bfloat16),
                     preferred_element_type=jnp.float32) + params["b_cls"]
    return logits


if __name__ == "__main__":
    key = jax.random.PRNGKey(0)
    k_x, k_p = jax.random.split(key)

    batch, in_channels, size, n_classes = 2, 4, 16, 10
    cfg = dict(
        size=size,
        convs=[(8, 3, 1),    # (o_channels_l1, kernel_l1, padding_l1)
               (16, 3, 1),   # (o_channels_l2, kernel_l2, padding_l2)
               (16, 3, 0)])  # (o_channels_l3, kernel_l3, padding_l3)

    params = init_params(k_p, in_channels, n_classes, cfg)
    assert params["in_linear"] == 16 * 14 * 14  # matches Encoder.in_linear formula

    x = jax.random.normal(k_x, (batch, in_channels, size, size), jnp.float32)

    fwd = jax.jit(functools.partial(cnn_ex_forward, params=params))
    out = fwd(x)
    jax.block_until_ready(out)

    ref = ref_forward(x, params)
    assert out.shape == (batch, n_classes)
    max_err = float(jnp.max(jnp.abs(out - ref)))
    assert jnp.allclose(out, ref, atol=2e-2, rtol=2e-2), f"max abs err {max_err}"

    print("KERNEL_OK")
</pallas_src>

<mosaic_0001>
module attributes {stable_mosaic.version = 11 : i64} {
  func.func @_conv_gemm_bn_relu_kernel(%arg0: memref<512x36xbf16, #tpu.memory_space<vmem>>, %arg1: memref<36x128xbf16, #tpu.memory_space<vmem>>, %arg2: memref<1x128xf32, #tpu.memory_space<vmem>>, %arg3: memref<1x128xf32, #tpu.memory_space<vmem>>, %arg4: memref<512x128xbf16, #tpu.memory_space<vmem>>) attributes {dimension_semantics = [], scalar_prefetch = 0 : i64, scratch_operands = 0 : i64, tpu.core_type = #tpu.core_type<tc>} {
    %c0 = arith.constant 0 : index
    %c0_0 = arith.constant 0 : index
    %0 = vector.load %arg0[%c0, %c0_0] : memref<512x36xbf16, #tpu.memory_space<vmem>>, vector<512x36xbf16>
    %c0_1 = arith.constant 0 : index
    %c0_2 = arith.constant 0 : index
    %1 = vector.load %arg1[%c0_1, %c0_2] : memref<36x128xbf16, #tpu.memory_space<vmem>>, vector<36x128xbf16>
    %cst = arith.constant dense<0.000000e+00> : vector<512x128xf32>
    %2 = tpu.matmul %0, %1, %cst {dimension_numbers = #tpu.dot_dimension_numbers<[1], [0], [0], [1], [0, 0, 1, 1], [], []>} : vector<512x36xbf16>, vector<36x128xbf16>, vector<512x128xf32> -> vector<512x128xf32>
    %c0_3 = arith.constant 0 : index
    %c0_4 = arith.constant 0 : index
    %3 = vector.load %arg2[%c0_3, %c0_4] : memref<1x128xf32, #tpu.memory_space<vmem>>, vector<1x128xf32>
    %4 = vector.broadcast %3 : vector<1x128xf32> to vector<512x128xf32>
    %5 = arith.mulf %2, %4 : vector<512x128xf32>
    %c0_5 = arith.constant 0 : index
    %c0_6 = arith.constant 0 : index
    %6 = vector.load %arg3[%c0_5, %c0_6] : memref<1x128xf32, #tpu.memory_space<vmem>>, vector<1x128xf32>
    %7 = vector.broadcast %6 : vector<1x128xf32> to vector<512x128xf32>
    %8 = arith.addf %5, %7 : vector<512x128xf32>
    %cst_7 = arith.constant 0.000000e+00 : f32
    %9 = vector.broadcast %cst_7 : f32 to vector<512x128xf32>
    %10 = arith.maximumf %8, %9 : vector<512x128xf32>
    %11 = arith.truncf %10 : vector<512x128xf32> to vector<512x128xbf16>
    %c0_8 = arith.constant 0 : index
    %c0_9 = arith.constant 0 : index
    %12 = vector.load %arg4[%c0_8, %c0_9] : memref<512x128xbf16, #tpu.memory_space<vmem>>, vector<512x128xbf16>
    tpu.vector_store %arg4[%c0_8, %c0_9], %11 {strides = array<i32>} : memref<512x128xbf16, #tpu.memory_space<vmem>>, vector<512x128xbf16>,
    return
  }
}

module attributes {stable_mosaic.version = 11 : i64} {
  func.func @_conv_gemm_bn_relu_kernel(%arg0: memref<512x72xbf16, #tpu.memory_space<vmem>>, %arg1: memref<72x128xbf16, #tpu.memory_space<vmem>>, %arg2: memref<1x128xf32, #tpu.memory_space<vmem>>, %arg3: memref<1x128xf32, #tpu.memory_space<vmem>>, %arg4: memref<512x128xbf16, #tpu.memory_space<vmem>>) attributes {dimension_semantics = [], scalar_prefetch = 0 : i64, scratch_operands = 0 : i64, tpu.core_type = #tpu.core_type<tc>} {
    %c0 = arith.constant 0 : index
    %c0_0 = arith.constant 0 : index
    %0 = vector.load %arg0[%c0, %c0_0] : memref<512x72xbf16, #tpu.memory_space<vmem>>, vector<512x72xbf16>
    %c0_1 = arith.constant 0 : index
    %c0_2 = arith.constant 0 : index
    %1 = vector.load %arg1[%c0_1, %c0_2] : memref<72x128xbf16, #tpu.memory_space<vmem>>, vector<72x128xbf16>
    %cst = arith.constant dense<0.000000e+00> : vector<512x128xf32>
    %2 = tpu.matmul %0, %1, %cst {dimension_numbers = #tpu.dot_dimension_numbers<[1], [0], [0], [1], [0, 0, 1, 1], [], []>} : vector<512x72xbf16>, vector<72x128xbf16>, vector<512x128xf32> -> vector<512x128xf32>
    %c0_3 = arith.constant 0 : index
    %c0_4 = arith.constant 0 : index
    %3 = vector.load %arg2[%c0_3, %c0_4] : memref<1x128xf32, #tpu.memory_space<vmem>>, vector<1x128xf32>
    %4 = vector.broadcast %3 : vector<1x128xf32> to vector<512x128xf32>
    %5 = arith.mulf %2, %4 : vector<512x128xf32>
    %c0_5 = arith.constant 0 : index
    %c0_6 = arith.constant 0 : index
    %6 = vector.load %arg3[%c0_5, %c0_6] : memref<1x128xf32, #tpu.memory_space<vmem>>, vector<1x128xf32>
    %7 = vector.broadcast %6 : vector<1x128xf32> to vector<512x128xf32>
    %8 = arith.addf %5, %7 : vector<512x128xf32>
    %cst_7 = arith.constant 0.000000e+00 : f32
    %9 = vector.broadcast %cst_7 : f32 to vector<512x128xf32>
    %10 = arith.maximumf %8, %9 : vector<512x128xf32>
    %11 = arith.truncf %10 : vector<512x128xf32> to vector<512x128xbf16>
    %c0_8 = arith.constant 0 : index
    %c0_9 = arith.constant 0 : index
    %12 = vector.load %arg4[%c0_8, %c0_9] : memref<512x128xbf16, #tpu.memory_space<vmem>>, vector<512x128xbf16>
    tpu.vector_store %arg4[%c0_8, %c0_9], %11 {strides = array<i32>} : memref<512x128xbf16, #tpu.memory_space<vmem>>, vector<512x128xbf16>,
    return
  }
}

module attributes {stable_mosaic.version = 11 : i64} {
  func.func @_conv_gemm_bn_relu_kernel(%arg0: memref<392x144xbf16, #tpu.memory_space<vmem>>, %arg1: memref<144x128xbf16, #tpu.memory_space<vmem>>, %arg2: memref<1x128xf32, #tpu.memory_space<vmem>>, %arg3: memref<1x128xf32, #tpu.memory_space<vmem>>, %arg4: memref<392x128xbf16, #tpu.memory_space<vmem>>) attributes {dimension_semantics = [], scalar_prefetch = 0 : i64, scratch_operands = 0 : i64, tpu.core_type = #tpu.core_type<tc>} {
    %c0 = arith.constant 0 : index
    %c0_0 = arith.constant 0 : index
    %0 = vector.load %arg0[%c0, %c0_0] : memref<392x144xbf16, #tpu.memory_space<vmem>>, vector<392x144xbf16>
    %c0_1 = arith.constant 0 : index
    %c0_2 = arith.constant 0 : index
    %1 = vector.load %arg1[%c0_1, %c0_2] : memref<144x128xbf16, #tpu.memory_space<vmem>>, vector<144x128xbf16>
    %cst = arith.constant dense<0.000000e+00> : vector<392x128xf32>
    %2 = tpu.matmul %0, %1, %cst {dimension_numbers = #tpu.dot_dimension_numbers<[1], [0], [0], [1], [0, 0, 1, 1], [], []>} : vector<392x144xbf16>, vector<144x128xbf16>, vector<392x128xf32> -> vector<392x128xf32>
    %c0_3 = arith.constant 0 : index
    %c0_4 = arith.constant 0 : index
    %3 = vector.load %arg2[%c0_3, %c0_4] : memref<1x128xf32, #tpu.memory_space<vmem>>, vector<1x128xf32>
    %4 = vector.broadcast %3 : vector<1x128xf32> to vector<392x128xf32>
    %5 = arith.mulf %2, %4 : vector<392x128xf32>
    %c0_5 = arith.constant 0 : index
    %c0_6 = arith.constant 0 : index
    %6 = vector.load %arg3[%c0_5, %c0_6] : memref<1x128xf32, #tpu.memory_space<vmem>>, vector<1x128xf32>
    %7 = vector.broadcast %6 : vector<1x128xf32> to vector<392x128xf32>
    %8 = arith.addf %5, %7 : vector<392x128xf32>
    %cst_7 = arith.constant 0.000000e+00 : f32
    %9 = vector.broadcast %cst_7 : f32 to vector<392x128xf32>
    %10 = arith.maximumf %8, %9 : vector<392x128xf32>
    %11 = arith.truncf %10 : vector<392x128xf32> to vector<392x128xbf16>
    %c0_8 = arith.constant 0 : index
    %c0_9 = arith.constant 0 : index
    %12 = vector.load %arg4[%c0_8, %c0_9] : memref<392x128xbf16, #tpu.memory_space<vmem>>, vector<392x128xbf16>
    tpu.vector_store %arg4[%c0_8, %c0_9], %11 {strides = array<i32>} : memref<392x128xbf16, #tpu.memory_space<vmem>>, vector<392x128xbf16>,
    return
  }
}

module attributes {stable_mosaic.version = 11 : i64} {
  func.func @_head_kernel(%arg0: memref<2x3136xbf16, #tpu.memory_space<vmem>>, %arg1: memref<3136x512xbf16, #tpu.memory_space<vmem>>, %arg2: memref<1x512xf32, #tpu.memory_space<vmem>>, %arg3: memref<512x128xbf16, #tpu.memory_space<vmem>>, %arg4: memref<1x128xf32, #tpu.memory_space<vmem>>, %arg5: memref<2x128xf32, #tpu.memory_space<vmem>>) attributes {dimension_semantics = [], scalar_prefetch = 0 : i64, scratch_operands = 0 : i64, tpu.core_type = #tpu.core_type<tc>} {
    %c0 = arith.constant 0 : index
    %c0_0 = arith.constant 0 : index
    %0 = vector.load %arg0[%c0, %c0_0] : memref<2x3136xbf16, #tpu.memory_space<vmem>>, vector<2x3136xbf16>
    %c0_1 = arith.constant 0 : index
    %c0_2 = arith.constant 0 : index
    %1 = vector.load %arg1[%c0_1, %c0_2] : memref<3136x512xbf16, #tpu.memory_space<vmem>>, vector<3136x512xbf16>
    %cst = arith.constant dense<0.000000e+00> : vector<2x512xf32>
    %2 = tpu.matmul %0, %1, %cst {dimension_numbers = #tpu.dot_dimension_numbers<[1], [0], [0], [1], [0, 0, 1, 1], [], []>} : vector<2x3136xbf16>, vector<3136x512xbf16>, vector<2x512xf32> -> vector<2x512xf32>
    %c0_3 = arith.constant 0 : index
    %c0_4 = arith.constant 0 : index
    %3 = vector.load %arg2[%c0_3, %c0_4] : memref<1x512xf32, #tpu.memory_space<vmem>>, vector<1x512xf32>
    %4 = vector.broadcast %3 : vector<1x512xf32> to vector<2x512xf32>
    %5 = arith.addf %2, %4 : vector<2x512xf32>
    %6 = arith.truncf %5 : vector<2x512xf32> to vector<2x512xbf16>
    %c0_5 = arith.constant 0 : index
    %c0_6 = arith.constant 0 : index
    %7 = vector.load %arg3[%c0_5, %c0_6] : memref<512x128xbf16, #tpu.memory_space<vmem>>, vector<512x128xbf16>
    %cst_7 = arith.constant dense<0.000000e+00> : vector<2x128xf32>
    %8 = tpu.matmul %6, %7, %cst_7 {dimension_numbers = #tpu.dot_dimension_numbers<[1], [0], [0], [1], [0, 0, 1, 1], [], []>} : vector<2x512xbf16>, vector<512x128xbf16>, vector<2x128xf32> -> vector<2x128xf32>
    %c0_8 = arith.constant 0 : index
    %c0_9 = arith.constant 0 : index
    %9 = vector.load %arg4[%c0_8, %c0_9] : memref<1x128xf32, #tpu.memory_space<vmem>>, vector<1x128xf32>
    %10 = vector.broadcast %9 : vector<1x128xf32> to vector<2x128xf32>
    %11 = arith.addf %8, %10 : vector<2x128xf32>
    %c0_10 = arith.constant 0 : index
    %c0_11 = arith.constant 0 : index
    %12 = vector.load %arg5[%c0_10, %c0_11] : memref<2x128xf32, #tpu.memory_space<vmem>>, vector<2x128xf32>
    tpu.vector_store %arg5[%c0_10, %c0_11], %11 {strides = array<i32>} : memref<2x128xf32, #tpu.memory_space<vmem>>, vector<2x128xf32>,
    return
  }
}

</mosaic_0001>

<bundles_post_ra>
// kernel: cnn_ex_forward.4
= control target key start
LH: loop header
LB: loop body
LE: loop exit
PB: predicated region body
PF: predicated region fallthrough
CT: control target
= control target key end

     0   :  { %vm359_vm0 = vcmask 1041408   ;;  %vm262_vm1 = vcmask 293888   ;;  %s1664_s1 = inlined_call_operand.vmem [shape: bf16[36,128], index: 1, kind: input, shape index: {}]   ;;  %s1665_s2 = inlined_call_operand.vmem [shape: f32[1,128], index: 2, kind: input, shape index: {}]   ;;  %s1666_s3 = inlined_call_operand.vmem [shape: f32[1,128], index: 3, kind: input, shape index: {}]   ;;  %s1667_s0 = inlined_call_operand.vmem [shape: bf16[512,36], index: 0, kind: input, shape index: {}]   ;;  %s1668_s4 = inlined_call_operand.vmem [shape: bf16[512,128], index: 4, kind: output, shape index: {}]  }
   0x1   :  { %v86_v0 = vld [vmem:[%s1664_s1 + $0x10] sm:$0x3]  ;;  %v1065_v4 = vld [vmem:[%s1664_s1 + $0x8] sm:$0xff]  ;;  %v1064_v5 = vld [vmem:[%s1664_s1] sm:$0xff] }
   0x2   :  { %v256_v1 = vunpack.c.l.b16 %v86_v0  ;;  %v1032_v6 = vld [vmem:[%s1667_s0] sm:$0xff]  ;;  %v1033_v10 = vld [vmem:[%s1667_s0 + $0x8] sm:$0xff]  ;;  %v1034_v14 = vld [vmem:[%s1667_s0 + $0x10] sm:$0xff] }
   0x3   :  { %v1040_v7 = vld [vmem:[%s1667_s0 + $0x40] sm:$0xff]  ;;  %v1041_v11 = vld [vmem:[%s1667_s0 + $0x48] sm:$0xff]  ;;  %v1042_v15 = vld [vmem:[%s1667_s0 + $0x50] sm:$0xff] }
   0x4   :  { %v259_v2 = vpack.c.b16 %v256_v1, %v256_v1  ;;  %v1048_v8 = vld [vmem:[%s1667_s0 + $0x80] sm:$0xff]  ;;  %v1049_v12 = vld [vmem:[%s1667_s0 + $0x88] sm:$0xff]  ;;  %v1050_v16 = vld [vmem:[%s1667_s0 + $0x90] sm:$0xff] }
   0x5   :  { %v1056_v9 = vld [vmem:[%s1667_s0 + $0xc0] sm:$0xff]  ;;  %v1057_v13 = vld [vmem:[%s1667_s0 + $0xc8] sm:$0xff]  ;;  %v1058_v17 = vld [vmem:[%s1667_s0 + $0xd0] sm:$0xff] }
   0x6   :  { %v361_v3 = vsel %vm359_vm0, %v259_v2, 0  ;;  %v1035_v18 = vld [vmem:[%s1667_s0 + $0x18] sm:$0xff]  ;;  %v1036_v22 = vld [vmem:[%s1667_s0 + $0x20] sm:$0xff]  ;;  %v1037_v26 = vld [vmem:[%s1667_s0 + $0x28] sm:$0xff] }
   0x7   :  { %368 = vmatpush.bf16.msra.mxu0 %v361_v3  ;;  %1257 = vmatpush.bf16.msra.mxu1 %v361_v3  ;;  %v1043_v19 = vld [vmem:[%s1667_s0 + $0x58] sm:$0xff]  ;;  %v1044_v23 = vld [vmem:[%s1667_s0 + $0x60] sm:$0xff]  ;;  %v1045_v27 = vld [vmem:[%s1667_s0 + $0x68] sm:$0xff] }
   0x8   :  { %1258 = vmatpush.bf16.msra.mxu2 %v361_v3  ;;  %1259 = vmatpush.bf16.msra.mxu3 %v361_v3  ;;  %v1051_v20 = vld [vmem:[%s1667_s0 + $0x98] sm:$0xff]  ;;  %v1052_v24 = vld [vmem:[%s1667_s0 + $0xa0] sm:$0xff]  ;;  %v1053_v28 = vld [vmem:[%s1667_s0 + $0xa8] sm:$0xff] }
   0x9   :  { %v1059_v21 = vld [vmem:[%s1667_s0 + $0xd8] sm:$0xff]  ;;  %v1060_v25 = vld [vmem:[%s1667_s0 + $0xe0] sm:$0xff]  ;;  %v1061_v29 = vld [vmem:[%s1667_s0 + $0xe8] sm:$0xff] }
   0xa   :  { %v1038_v30 = vld [vmem:[%s1667_s0 + $0x30] sm:$0xff]  ;;  %v1039_v34 = vld [vmem:[%s1667_s0 + $0x38] sm:$0xff]  ;;  %v1433_v40 = vld [vmem:[%s1665_s2] ss:$0 sm:$0xff] }
   0xb   :  { %369 = vmatpush.bf16.msra.mxu0 %v1065_v4  ;;  %1260 = vmatpush.bf16.msra.mxu1 %v1065_v4  ;;  %v1046_v31 = vld [vmem:[%s1667_s0 + $0x70] sm:$0xff]  ;;  %v1047_v35 = vld [vmem:[%s1667_s0 + $0x78] sm:$0xff]  ;;  %v1439_v42 = vld [vmem:[%s1666_s3] ss:$0 sm:$0xff] }
   0xc   :  { %1261 = vmatpush.bf16.msra.mxu2 %v1065_v4  ;;  %1262 = vmatpush.bf16.msra.mxu3 %v1065_v4  ;;  %v1054_v32 = vld [vmem:[%s1667_s0 + $0xb0] sm:$0xff]  ;;  %v1055_v36 = vld [vmem:[%s1667_s0 + $0xb8] sm:$0xff] }
   0xd   :  { %v1062_v33 = vld [vmem:[%s1667_s0 + $0xf0] sm:$0xff]  ;;  %v1063_v37 = vld [vmem:[%s1667_s0 + $0xf8] sm:$0xff] }
   0xf   :  { %370 = vmatpush.bf16.msra.mxu0 %v1064_v5  ;;  %1263 = vmatpush.bf16.msra.mxu1 %v1064_v5 }
  0x10   :  { %1264 = vmatpush.bf16.msra.mxu2 %v1064_v5  ;;  %1265 = vmatpush.bf16.msra.mxu3 %v1064_v5 }
  0x12   :  { %1000 = vmatmul.msk.bf16.vlgmr.msra.gmra.mxu0 %vm262_vm1, %v1032_v6  ;;  %1008 = vmatmul.msk.bf16.vlgmr.msra.gmra.mxu1 %vm262_vm1, %v1040_v7 }
  0x13   :  { %1016 = vmatmul.msk.bf16.vlgmr.msra.gmra.mxu2 %vm262_vm1, %v1048_v8  ;;  %1024 = vmatmul.msk.bf16.vlgmr.msra.gmra.mxu3 %vm262_vm1, %v1056_v9 }
  0x22   :  { %1001 = vmatmul.msk.bf16.gmra.mxu0 %vm262_vm1, %v1033_v10  ;;  %1009 = vmatmul.msk.bf16.gmra.mxu1 %vm262_vm1, %v1041_v11 }
  0x23   :  { %1017 = vmatmul.msk.bf16.gmra.mxu2 %vm262_vm1, %v1049_v12  ;;  %1025 = vmatmul.msk.bf16.gmra.mxu3 %vm262_vm1, %v1057_v13 }
  0x32   :  { %1002 = vmatmul.msk.bf16.gmra.mxu0 %vm262_vm1, %v1034_v14  ;;  %1010 = vmatmul.msk.bf16.gmra.mxu1 %vm262_vm1, %v1042_v15 }
  0x33   :  { %1018 = vmatmul.msk.bf16.gmra.mxu2 %vm262_vm1, %v1050_v16  ;;  %1026 = vmatmul.msk.bf16.gmra.mxu3 %vm262_vm1, %v1058_v17 }
  0x42   :  { %1003 = vmatmul.msk.bf16.gmra.mxu0 %vm262_vm1, %v1035_v18  ;;  %1011 = vmatmul.msk.bf16.gmra.mxu1 %vm262_vm1, %v1043_v19 }
  0x43   :  { %1019 = vmatmul.msk.bf16.gmra.mxu2 %vm262_vm1, %v1051_v20  ;;  %1027 = vmatmul.msk.bf16.gmra.mxu3 %vm262_vm1, %v1059_v21 }
  0x52   :  { %1004 = vmatmul.msk.bf16.gmra.mxu0 %vm262_vm1, %v1036_v22  ;;  %1012 = vmatmul.msk.bf16.gmra.mxu1 %vm262_vm1, %v1044_v23 }
  0x53   :  { %1020 = vmatmul.msk.bf16.gmra.mxu2 %vm262_vm1, %v1052_v24  ;;  %1028 = vmatmul.msk.bf16.gmra.mxu3 %vm262_vm1, %v1060_v25 }
  0x62   :  { %1005 = vmatmul.msk.bf16.gmra.mxu0 %vm262_vm1, %v1037_v26  ;;  %1013 = vmatmul.msk.bf16.gmra.mxu1 %vm262_vm1, %v1045_v27 }
  0x63   :  { %1021 = vmatmul.msk.bf16.gmra.mxu2 %vm262_vm1, %v1053_v28  ;;  %1029 = vmatmul.msk.bf16.gmra.mxu3 %vm262_vm1, %v1061_v29 }
  0x72   :  { %1006 = vmatmul.msk.bf16.gmra.mxu0 %vm262_vm1, %v1038_v30  ;;  %1014 = vmatmul.msk.bf16.gmra.mxu1 %vm262_vm1, %v1046_v31 }
  0x73   :  { %1022 = vmatmul.msk.bf16.gmra.mxu2 %vm262_vm1, %v1054_v32  ;;  %1030 = vmatmul.msk.bf16.gmra.mxu3 %vm262_vm1, %v1062_v33 }
  0x82   :  { %1007 = vmatmul.msk.bf16.gmra.mxu0 %vm262_vm1, %v1039_v34  ;;  %1015 = vmatmul.msk.bf16.gmra.mxu1 %vm262_vm1, %v1047_v35 }
  0x83   :  { %1023 = vmatmul.msk.bf16.gmra.mxu2 %vm262_vm1, %v1055_v36  ;;  %1031 = vmatmul.msk.bf16.gmra.mxu3 %vm262_vm1, %v1063_v37 }
  0x8f   :  { %v372_v38 = vpop.f32.mrf.mxu0  ;;  %v412_v39 = vpop.f32.mrf.mxu1 }
  0x90   :  { %v536_v41 = vmul.f32 %v1433_v40, %v372_v38  ;;  %v552_v43 = vmul.f32 %v1433_v40, %v412_v39 }
  0x92   :  { %v604_v48 = vadd.f32 %v1439_v42, %v536_v41  ;;  %v620_v49 = vadd.f32 %v1439_v42, %v552_v43 }
  0x94   :  { %v668_v56 = vmax.f32 %v604_v48, 0.0  ;;  %v684_v57 = vmax.f32 %v620_v49, 0.0 }
  0x96   :  { %v452_v44 = vpop.f32.mrf.mxu2  ;;  %v492_v45 = vpop.f32.mrf.mxu3 }
  0x97   :  { %v374_v46 = vpop.f32.mrf.mxu0  ;;  %v414_v47 = vpop.f32.mrf.mxu1  ;;  %v568_v54 = vmul.f32 %v1433_v40, %v452_v44  ;;  %v584_v55 = vmul.f32 %v1433_v40, %v492_v45 }
  0x98   :  { %v537_v50 = vmul.f32 %v1433_v40, %v374_v46  ;;  %v553_v51 = vmul.f32 %v1433_v40, %v414_v47 }
  0x99   :  { %v636_v0 = vadd.f32 %v1439_v42, %v568_v54  ;;  %v652_v1 = vadd.f32 %v1439_v42, %v584_v55 }
  0x9a   :  { %v605_v52 = vadd.f32 %v1439_v42, %v537_v50  ;;  %v621_v53 = vadd.f32 %v1439_v42, %v553_v51 }
  0x9b   :  { %v700_v8 = vmax.f32 %v636_v0, 0.0  ;;  %v716_v9 = vmax.f32 %v652_v1, 0.0 }
  0x9c   :  { %v669_v58 = vmax.f32 %v605_v52, 0.0  ;;  %v685_v59 = vmax.f32 %v621_v53, 0.0 }
  0x9e   :  { %v1069_v60 = vpack.c.bf16 %v669_v58, %v668_v56  ;;  %v1109_v61 = vpack.c.bf16 %v685_v59, %v684_v57  ;;  %v454_v62 = vpop.f32.mrf.mxu2  ;;  %v494_v63 = vpop.f32.mrf.mxu3 }
  0x9f   :  { %v569_v2 = vmul.f32 %v1433_v40, %v454_v62  ;;  %v585_v3 = vmul.f32 %v1433_v40, %v494_v63  ;;  %v377_v4 = vpop.f32.mrf.mxu0  ;;  %v417_v5 = vpop.f32.mrf.mxu1 }
  0xa0   :  { %1070 = vst [vmem:[%s1668_s4] sm:$0xff] %v1069_v60   ;;  %v538_v12 = vmul.f32 %v1433_v40, %v377_v4  ;;  %v554_v13 = vmul.f32 %v1433_v40, %v417_v5 }
  0xa1   :  { %1233 = vst [vmem:[%s1668_s4 + $0x40] sm:$0xff] %v1109_v61   ;;  %v637_v6 = vadd.f32 %v1439_v42, %v569_v2  ;;  %v653_v7 = vadd.f32 %v1439_v42, %v585_v3 }
  0xa2   :  { %v606_v20 = vadd.f32 %v1439_v42, %v538_v12  ;;  %v622_v21 = vadd.f32 %v1439_v42, %v554_v13 }
  0xa3   :  { %v701_v10 = vmax.f32 %v637_v6, 0.0  ;;  %v717_v11 = vmax.f32 %v653_v7, 0.0 }
  0xa4   :  { %v670_v28 = vmax.f32 %v606_v20, 0.0  ;;  %v686_v29 = vmax.f32 %v622_v21, 0.0 }
  0xa5   :  { %v1149_v14 = vpack.c.bf16 %v701_v10, %v700_v8  ;;  %v1189_v15 = vpack.c.bf16 %v717_v11, %v716_v9 }
  0xa6   :  { %v457_v16 = vpop.f32.mrf.mxu2  ;;  %v497_v17 = vpop.f32.mrf.mxu3 }
  0xa7   :  { %1241 = vst [vmem:[%s1668_s4 + $0x80] sm:$0xff] %v1149_v14   ;;  %v379_v18 = vpop.f32.mrf.mxu0  ;;  %v419_v19 = vpop.f32.mrf.mxu1  ;;  %v570_v26 = vmul.f32 %v1433_v40, %v457_v16  ;;  %v586_v27 = vmul.f32 %v1433_v40, %v497_v17 }
  0xa8   :  { %1249 = vst [vmem:[%s1668_s4 + $0xc0] sm:$0xff] %v1189_v15   ;;  %v539_v22 = vmul.f32 %v1433_v40, %v379_v18  ;;  %v555_v23 = vmul.f32 %v1433_v40, %v419_v19 }
  0xa9   :  { %v638_v36 = vadd.f32 %v1439_v42, %v570_v26  ;;  %v654_v37 = vadd.f32 %v1439_v42, %v586_v27 }
  0xaa   :  { %v607_v24 = vadd.f32 %v1439_v42, %v539_v22  ;;  %v623_v25 = vadd.f32 %v1439_v42, %v555_v23 }
  0xab   :  { %v702_v46 = vmax.f32 %v638_v36, 0.0  ;;  %v718_v47 = vmax.f32 %v654_v37, 0.0 }
  0xac   :  { %v671_v30 = vmax.f32 %v607_v24, 0.0  ;;  %v687_v31 = vmax.f32 %v623_v25, 0.0 }
  0xae   :  { %v1074_v32 = vpack.c.bf16 %v671_v30, %v670_v28  ;;  %v1114_v33 = vpack.c.bf16 %v687_v31, %v686_v29  ;;  %v459_v34 = vpop.f32.mrf.mxu2  ;;  %v499_v35 = vpop.f32.mrf.mxu3 }
  0xaf   :  { %v571_v38 = vmul.f32 %v1433_v40, %v459_v34  ;;  %v587_v39 = vmul.f32 %v1433_v40, %v499_v35  ;;  %v382_v41 = vpop.f32.mrf.mxu0  ;;  %v422_v43 = vpop.f32.mrf.mxu1 }
  0xb0   :  { %1226 = vst [vmem:[%s1668_s4 + $0x8] sm:$0xff] %v1074_v32   ;;  %v540_v50 = vmul.f32 %v1433_v40, %v382_v41  ;;  %v556_v51 = vmul.f32 %v1433_v40, %v422_v43 }
  0xb1   :  { %1234 = vst [vmem:[%s1668_s4 + $0x48] sm:$0xff] %v1114_v33   ;;  %v639_v44 = vadd.f32 %v1439_v42, %v571_v38  ;;  %v655_v45 = vadd.f32 %v1439_v42, %v587_v39 }
  0xb2   :  { %v608_v58 = vadd.f32 %v1439_v42, %v540_v50  ;;  %v624_v59 = vadd.f32 %v1439_v42, %v556_v51 }
  0xb3   :  { %v703_v48 = vmax.f32 %v639_v44, 0.0  ;;  %v719_v49 = vmax.f32 %v655_v45, 0.0 }
  0xb4   :  { %v672_v2 = vmax.f32 %v608_v58, 0.0  ;;  %v688_v3 = vmax.f32 %v624_v59, 0.0 }
  0xb5   :  { %v1154_v52 = vpack.c.bf16 %v703_v48, %v702_v46  ;;  %v1194_v53 = vpack.c.bf16 %v719_v49, %v718_v47 }
  0xb6   :  { %v462_v54 = vpop.f32.mrf.mxu2  ;;  %v502_v55 = vpop.f32.mrf.mxu3 }
  0xb7   :  { %1242 = vst [vmem:[%s1668_s4 + $0x88] sm:$0xff] %v1154_v52   ;;  %v384_v56 = vpop.f32.mrf.mxu0  ;;  %v424_v57 = vpop.f32.mrf.mxu1  ;;  %v572_v0 = vmul.f32 %v1433_v40, %v462_v54  ;;  %v588_v1 = vmul.f32 %v1433_v40, %v502_v55 }
  0xb8   :  { %1250 = vst [vmem:[%s1668_s4 + $0xc8] sm:$0xff] %v1194_v53   ;;  %v541_v60 = vmul.f32 %v1433_v40, %v384_v56  ;;  %v557_v61 = vmul.f32 %v1433_v40, %v424_v57 }
  0xb9   :  { %v640_v10 = vadd.f32 %v1439_v42, %v572_v0  ;;  %v656_v11 = vadd.f32 %v1439_v42, %v588_v1 }
  0xba   :  { %v609_v62 = vadd.f32 %v1439_v42, %v541_v60  ;;  %v625_v63 = vadd.f32 %v1439_v42, %v557_v61 }
  0xbb   :  { %v704_v18 = vmax.f32 %v640_v10, 0.0  ;;  %v720_v19 = vmax.f32 %v656_v11, 0.0 }
  0xbc   :  { %v673_v4 = vmax.f32 %v609_v62, 0.0  ;;  %v689_v5 = vmax.f32 %v625_v63, 0.0 }
  0xbe   :  { %v1079_v6 = vpack.c.bf16 %v673_v4, %v672_v2  ;;  %v1119_v7 = vpack.c.bf16 %v689_v5, %v688_v3  ;;  %v464_v8 = vpop.f32.mrf.mxu2  ;;  %v504_v9 = vpop.f32.mrf.mxu3 }
  0xbf   :  { %v573_v12 = vmul.f32 %v1433_v40, %v464_v8  ;;  %v589_v13 = vmul.f32 %v1433_v40, %v504_v9  ;;  %v387_v14 = vpop.f32.mrf.mxu0  ;;  %v427_v15 = vpop.f32.mrf.mxu1 }
  0xc0   :  { %1227 = vst [vmem:[%s1668_s4 + $0x10] sm:$0xff] %v1079_v6   ;;  %v542_v22 = vmul.f32 %v1433_v40, %v387_v14  ;;  %v558_v23 = vmul.f32 %v1433_v40, %v427_v15 }
  0xc1   :  { %1235 = vst [vmem:[%s1668_s4 + $0x50] sm:$0xff] %v1119_v7   ;;  %v641_v16 = vadd.f32 %v1439_v42, %v573_v12  ;;  %v657_v17 = vadd.f32 %v1439_v42, %v589_v13 }
  0xc2   :  { %v610_v30 = vadd.f32 %v1439_v42, %v542_v22  ;;  %v626_v31 = vadd.f32 %v1439_v42, %v558_v23 }
  0xc3   :  { %v705_v20 = vmax.f32 %v641_v16, 0.0  ;;  %v721_v21 = vmax.f32 %v657_v17, 0.0 }
  0xc4   :  { %v674_v38 = vmax.f32 %v610_v30, 0.0  ;;  %v690_v39 = vmax.f32 %v626_v31, 0.0 }
  0xc5   :  { %v1159_v24 = vpack.c.bf16 %v705_v20, %v704_v18  ;;  %v1199_v25 = vpack.c.bf16 %v721_v21, %v720_v19 }
  0xc6   :  { %v467_v26 = vpop.f32.mrf.mxu2  ;;  %v507_v27 = vpop.f32.mrf.mxu3 }
  0xc7   :  { %1243 = vst [vmem:[%s1668_s4 + $0x90] sm:$0xff] %v1159_v24   ;;  %v389_v28 = vpop.f32.mrf.mxu0  ;;  %v429_v29 = vpop.f32.mrf.mxu1  ;;  %v574_v36 = vmul.f32 %v1433_v40, %v467_v26  ;;  %v590_v37 = vmul.f32 %v1433_v40, %v507_v27 }
  0xc8   :  { %1251 = vst [vmem:[%s1668_s4 + $0xd0] sm:$0xff] %v1199_v25   ;;  %v543_v32 = vmul.f32 %v1433_v40, %v389_v28  ;;  %v559_v33 = vmul.f32 %v1433_v40, %v429_v29 }
  0xc9   :  { %v642_v48 = vadd.f32 %v1439_v42, %v574_v36  ;;  %v658_v49 = vadd.f32 %v1439_v42, %v590_v37 }
  0xca   :  { %v611_v34 = vadd.f32 %v1439_v42, %v543_v32  ;;  %v627_v35 = vadd.f32 %v1439_v42, %v559_v33 }
  0xcb   :  { %v706_v56 = vmax.f32 %v642_v48, 0.0  ;;  %v722_v57 = vmax.f32 %v658_v49, 0.0 }
  0xcc   :  { %v675_v41 = vmax.f32 %v611_v34, 0.0  ;;  %v691_v43 = vmax.f32 %v627_v35, 0.0 }
  0xce   :  { %v1084_v44 = vpack.c.bf16 %v675_v41, %v674_v38  ;;  %v1124_v45 = vpack.c.bf16 %v691_v43, %v690_v39  ;;  %v469_v46 = vpop.f32.mrf.mxu2  ;;  %v509_v47 = vpop.f32.mrf.mxu3 }
  0xcf   :  { %v575_v50 = vmul.f32 %v1433_v40, %v469_v46  ;;  %v591_v51 = vmul.f32 %v1433_v40, %v509_v47  ;;  %v392_v52 = vpop.f32.mrf.mxu0  ;;  %v432_v53 = vpop.f32.mrf.mxu1 }
  0xd0   :  { %1228 = vst [vmem:[%s1668_s4 + $0x18] sm:$0xff] %v1084_v44   ;;  %v544_v60 = vmul.f32 %v1433_v40, %v392_v52  ;;  %v560_v61 = vmul.f32 %v1433_v40, %v432_v53 }
  0xd1   :  { %1236 = vst [vmem:[%s1668_s4 + $0x58] sm:$0xff] %v1124_v45   ;;  %v643_v54 = vadd.f32 %v1439_v42, %v575_v50  ;;  %v659_v55 = vadd.f32 %v1439_v42, %v591_v51 }
  0xd2   :  { %v612_v4 = vadd.f32 %v1439_v42, %v544_v60  ;;  %v628_v5 = vadd.f32 %v1439_v42, %v560_v61 }
  0xd3   :  { %v707_v58 = vmax.f32 %v643_v54, 0.0  ;;  %v723_v59 = vmax.f32 %v659_v55, 0.0 }
  0xd4   :  { %v676_v12 = vmax.f32 %v612_v4, 0.0  ;;  %v692_v13 = vmax.f32 %v628_v5, 0.0 }
  0xd5   :  { %v1164_v62 = vpack.c.bf16 %v707_v58, %v706_v56  ;;  %v1204_v63 = vpack.c.bf16 %v723_v59, %v722_v57 }
  0xd6   :  { %v472_v0 = vpop.f32.mrf.mxu2  ;;  %v512_v1 = vpop.f32.mrf.mxu3 }
  0xd7   :  { %1244 = vst [vmem:[%s1668_s4 + $0x98] sm:$0xff] %v1164_v62   ;;  %v394_v2 = vpop.f32.mrf.mxu0  ;;  %v434_v3 = vpop.f32.mrf.mxu1  ;;  %v576_v10 = vmul.f32 %v1433_v40, %v472_v0  ;;  %v592_v11 = vmul.f32 %v1433_v40, %v512_v1 }
  0xd8   :  { %1252 = vst [vmem:[%s1668_s4 + $0xd8] sm:$0xff] %v1204_v63   ;;  %v545_v6 = vmul.f32 %v1433_v40, %v394_v2  ;;  %v561_v7 = vmul.f32 %v1433_v40, %v434_v3 }
  0xd9   :  { %v644_v20 = vadd.f32 %v1439_v42, %v576_v10  ;;  %v660_v21 = vadd.f32 %v1439_v42, %v592_v11 }
  0xda   :  { %v613_v8 = vadd.f32 %v1439_v42, %v545_v6  ;;  %v629_v9 = vadd.f32 %v1439_v42, %v561_v7 }
  0xdb   :  { %v708_v28 = vmax.f32 %v644_v20, 0.0  ;;  %v724_v29 = vmax.f32 %v660_v21, 0.0 }
  0xdc   :  { %v677_v14 = vmax.f32 %v613_v8, 0.0  ;;  %v693_v15 = vmax.f32 %v629_v9, 0.0 }
  0xde   :  { %v1089_v16 = vpack.c.bf16 %v677_v14, %v676_v12  ;;  %v1129_v17 = vpack.c.bf16 %v693_v15, %v692_v13  ;;  %v474_v18 = vpop.f32.mrf.mxu2  ;;  %v514_v19 = vpop.f32.mrf.mxu3 }
  0xdf   :  { %v577_v22 = vmul.f32 %v1433_v40, %v474_v18  ;;  %v593_v23 = vmul.f32 %v1433_v40, %v514_v19  ;;  %v397_v24 = vpop.f32.mrf.mxu0  ;;  %v437_v25 = vpop.f32.mrf.mxu1 }
  0xe0   :  { %1229 = vst [vmem:[%s1668_s4 + $0x20] sm:$0xff] %v1089_v16   ;;  %v546_v32 = vmul.f32 %v1433_v40, %v397_v24  ;;  %v562_v33 = vmul.f32 %v1433_v40, %v437_v25 }
  0xe1   :  { %1237 = vst [vmem:[%s1668_s4 + $0x60] sm:$0xff] %v1129_v17   ;;  %v645_v26 = vadd.f32 %v1439_v42, %v577_v22  ;;  %v661_v27 = vadd.f32 %v1439_v42, %v593_v23 }
  0xe2   :  { %v614_v41 = vadd.f32 %v1439_v42, %v546_v32  ;;  %v630_v43 = vadd.f32 %v1439_v42, %v562_v33 }
  0xe3   :  { %v709_v30 = vmax.f32 %v645_v26, 0.0  ;;  %v725_v31 = vmax.f32 %v661_v27, 0.0 }
  0xe4   :  { %v678_v50 = vmax.f32 %v614_v41, 0.0  ;;  %v694_v51 = vmax.f32 %v630_v43, 0.0 }
  0xe5   :  { %v1169_v34 = vpack.c.bf16 %v709_v30, %v708_v28  ;;  %v1209_v35 = vpack.c.bf16 %v725_v31, %v724_v29 }
  0xe6   :  { %v477_v36 = vpop.f32.mrf.mxu2  ;;  %v517_v37 = vpop.f32.mrf.mxu3 }
  0xe7   :  { %1245 = vst [vmem:[%s1668_s4 + $0xa0] sm:$0xff] %v1169_v34   ;;  %v399_v38 = vpop.f32.mrf.mxu0  ;;  %v439_v39 = vpop.f32.mrf.mxu1  ;;  %v578_v48 = vmul.f32 %v1433_v40, %v477_v36  ;;  %v594_v49 = vmul.f32 %v1433_v40, %v517_v37 }
  0xe8   :  { %1253 = vst [vmem:[%s1668_s4 + $0xe0] sm:$0xff] %v1209_v35   ;;  %v547_v44 = vmul.f32 %v1433_v40, %v399_v38  ;;  %v563_v45 = vmul.f32 %v1433_v40, %v439_v39 }
  0xe9   :  { %v646_v58 = vadd.f32 %v1439_v42, %v578_v48  ;;  %v662_v59 = vadd.f32 %v1439_v42, %v594_v49 }
  0xea   :  { %v615_v46 = vadd.f32 %v1439_v42, %v547_v44  ;;  %v631_v47 = vadd.f32 %v1439_v42, %v563_v45 }
  0xeb   :  { %v710_v2 = vmax.f32 %v646_v58, 0.0  ;;  %v726_v3 = vmax.f32 %v662_v59, 0.0 }
  0xec   :  { %v679_v52 = vmax.f32 %v615_v46, 0.0  ;;  %v695_v53 = vmax.f32 %v631_v47, 0.0 }
  0xee   :  { %v1094_v54 = vpack.c.bf16 %v679_v52, %v678_v50  ;;  %v1134_v55 = vpack.c.bf16 %v695_v53, %v694_v51  ;;  %v479_v56 = vpop.f32.mrf.mxu2  ;;  %v519_v57 = vpop.f32.mrf.mxu3 }
  0xef   :  { %v579_v60 = vmul.f32 %v1433_v40, %v479_v56  ;;  %v595_v61 = vmul.f32 %v1433_v40, %v519_v57  ;;  %v402_v62 = vpop.f32.mrf.mxu0  ;;  %v442_v63 = vpop.f32.mrf.mxu1 }
  0xf0   :  { %1230 = vst [vmem:[%s1668_s4 + $0x28] sm:$0xff] %v1094_v54   ;;  %v548_v6 = vmul.f32 %v1433_v40, %v402_v62  ;;  %v564_v7 = vmul.f32 %v1433_v40, %v442_v63 }
  0xf1   :  { %1238 = vst [vmem:[%s1668_s4 + $0x68] sm:$0xff] %v1134_v55   ;;  %v647_v0 = vadd.f32 %v1439_v42, %v579_v60  ;;  %v663_v1 = vadd.f32 %v1439_v42, %v595_v61 }
  0xf2   :  { %v616_v14 = vadd.f32 %v1439_v42, %v548_v6  ;;  %v632_v15 = vadd.f32 %v1439_v42, %v564_v7 }
  0xf3   :  { %v711_v4 = vmax.f32 %v647_v0, 0.0  ;;  %v727_v5 = vmax.f32 %v663_v1, 0.0 }
  0xf4   :  { %v680_v22 = vmax.f32 %v616_v14, 0.0  ;;  %v696_v23 = vmax.f32 %v632_v15, 0.0 }
  0xf5   :  { %v1174_v8 = vpack.c.bf16 %v711_v4, %v710_v2  ;;  %v1214_v9 = vpack.c.bf16 %v727_v5, %v726_v3 }
  0xf6   :  { %v482_v10 = vpop.f32.mrf.mxu2  ;;  %v522_v11 = vpop.f32.mrf.mxu3 }
  0xf7   :  { %1246 = vst [vmem:[%s1668_s4 + $0xa8] sm:$0xff] %v1174_v8   ;;  %v404_v12 = vpop.f32.mrf.mxu0  ;;  %v444_v13 = vpop.f32.mrf.mxu1  ;;  %v580_v20 = vmul.f32 %v1433_v40, %v482_v10  ;;  %v596_v21 = vmul.f32 %v1433_v40, %v522_v11 }
  0xf8   :  { %1254 = vst [vmem:[%s1668_s4 + $0xe8] sm:$0xff] %v1214_v9   ;;  %v549_v16 = vmul.f32 %v1433_v40, %v404_v12  ;;  %v565_v17 = vmul.f32 %v1433_v40, %v444_v13 }
  0xf9   :  { %v648_v30 = vadd.f32 %v1439_v42, %v580_v20  ;;  %v664_v31 = vadd.f32 %v1439_v42, %v596_v21 }
  0xfa   :  { %v617_v18 = vadd.f32 %v1439_v42, %v549_v16  ;;  %v633_v19 = vadd.f32 %v1439_v42, %v565_v17 }
  0xfb   :  { %v712_v38 = vmax.f32 %v648_v30, 0.0  ;;  %v728_v39 = vmax.f32 %v664_v31, 0.0 }
  0xfc   :  { %v681_v24 = vmax.f32 %v617_v18, 0.0  ;;  %v697_v25 = vmax.f32 %v633_v19, 0.0 }
  0xfe   :  { %v1099_v26 = vpack.c.bf16 %v681_v24, %v680_v22  ;;  %v1139_v27 = vpack.c.bf16 %v697_v25, %v696_v23  ;;  %v484_v28 = vpop.f32.mrf.mxu2  ;;  %v524_v29 = vpop.f32.mrf.mxu3 }
  0xff   :  { %v581_v32 = vmul.f32 %v1433_v40, %v484_v28  ;;  %v597_v33 = vmul.f32 %v1433_v40, %v524_v29  ;;  %v407_v34 = vpop.f32.mrf.mxu0  ;;  %v447_v35 = vpop.f32.mrf.mxu1 }
 0x100   :  { %1231 = vst [vmem:[%s1668_s4 + $0x30] sm:$0xff] %v1099_v26   ;;  %v550_v44 = vmul.f32 %v1433_v40, %v407_v34  ;;  %v566_v45 = vmul.f32 %v1433_v40, %v447_v35 }
 0x101   :  { %1239 = vst [vmem:[%s1668_s4 + $0x70] sm:$0xff] %v1139_v27   ;;  %v649_v36 = vadd.f32 %v1439_v42, %v581_v32  ;;  %v665_v37 = vadd.f32 %v1439_v42, %v597_v33 }
 0x102   :  { %v618_v52 = vadd.f32 %v1439_v42, %v550_v44  ;;  %v634_v53 = vadd.f32 %v1439_v42, %v566_v45 }
 0x103   :  { %v713_v41 = vmax.f32 %v649_v36, 0.0  ;;  %v729_v43 = vmax.f32 %v665_v37, 0.0 }
 0x104   :  { %v682_v60 = vmax.f32 %v618_v52, 0.0  ;;  %v698_v61 = vmax.f32 %v634_v53, 0.0 }
 0x105   :  { %v1179_v46 = vpack.c.bf16 %v713_v41, %v712_v38  ;;  %v1219_v47 = vpack.c.bf16 %v729_v43, %v728_v39 }
 0x106   :  { %v487_v48 = vpop.f32.mrf.mxu2  ;;  %v527_v49 = vpop.f32.mrf.mxu3 }
 0x107   :  { %1247 = vst [vmem:[%s1668_s4 + $0xb0] sm:$0xff] %v1179_v46   ;;  %v409_v50 = vpop.f32.mrf.mxu0  ;;  %v449_v51 = vpop.f32.mrf.mxu1  ;;  %v582_v58 = vmul.f32 %v1433_v40, %v487_v48  ;;  %v598_v59 = vmul.f32 %v1433_v40, %v527_v49 }
 0x108   :  { %1255 = vst [vmem:[%s1668_s4 + $0xf0] sm:$0xff] %v1219_v47   ;;  %v551_v54 = vmul.f32 %v1433_v40, %v409_v50  ;;  %v567_v55 = vmul.f32 %v1433_v40, %v449_v51 }
 0x109   :  { %v650_v4 = vadd.f32 %v1439_v42, %v582_v58  ;;  %v666_v5 = vadd.f32 %v1439_v42, %v598_v59 }
 0x10a   :  { %v619_v56 = vadd.f32 %v1439_v42, %v551_v54  ;;  %v635_v57 = vadd.f32 %v1439_v42, %v567_v55 }
 0x10b   :  { %v714_v10 = vmax.f32 %v650_v4, 0.0  ;;  %v730_v11 = vmax.f32 %v666_v5, 0.0 }
 0x10c   :  { %v683_v62 = vmax.f32 %v619_v56, 0.0  ;;  %v699_v63 = vmax.f32 %v635_v57, 0.0 }
 0x10e   :  { %v1104_v0 = vpack.c.bf16 %v683_v62, %v682_v60  ;;  %v1144_v1 = vpack.c.bf16 %v699_v63, %v698_v61  ;;  %v489_v2 = vpop.f32.mrf.mxu2  ;;  %v529_v3 = vpop.f32.mrf.mxu3 }
 0x10f   :  { %v583_v6 = vmul.f32 %v1433_v40, %v489_v2  ;;  %v599_v7 = vmul.f32 %v1433_v40, %v529_v3 }
 0x110   :  { %1232 = vst [vmem:[%s1668_s4 + $0x38] sm:$0xff] %v1104_v0  }
 0x111   :  { %1240 = vst [vmem:[%s1668_s4 + $0x78] sm:$0xff] %v1144_v1   ;;  %v651_v8 = vadd.f32 %v1439_v42, %v583_v6  ;;  %v667_v9 = vadd.f32 %v1439_v42, %v599_v7 }
 0x113   :  { %v715_v12 = vmax.f32 %v651_v8, 0.0  ;;  %v731_v13 = vmax.f32 %v667_v9, 0.0 }
 0x115   :  { %v1184_v14 = vpack.c.bf16 %v715_v12, %v714_v10  ;;  %v1224_v15 = vpack.c.bf16 %v731_v13, %v730_v11 }
 0x117   :  { %1248 = vst [vmem:[%s1668_s4 + $0xb8] sm:$0xff] %v1184_v14  }
 0x118   :  { %1256 = vst [vmem:[%s1668_s4 + $0xf8] sm:$0xff] %v1224_v15  }

// kernel: cnn_ex_forward.5
= control target key start
LH: loop header
LB: loop body
LE: loop exit
PB: predicated region body
PF: predicated region fallthrough
CT: control target
= control target key end

     0   :  { %vm375_vm0 = vcmask 1043456   ;;  %vm278_vm1 = vcmask 588800   ;;  %s1702_s1 = inlined_call_operand.vmem [shape: bf16[72,128], index: 1, kind: input, shape index: {}]   ;;  %s1703_s2 = inlined_call_operand.vmem [shape: f32[1,128], index: 2, kind: input, shape index: {}]   ;;  %s1704_s3 = inlined_call_operand.vmem [shape: f32[1,128], index: 3, kind: input, shape index: {}]   ;;  %s1705_s0 = inlined_call_operand.vmem [shape: bf16[512,72], index: 0, kind: input, shape index: {}]   ;;  %s1706_s4 = inlined_call_operand.vmem [shape: bf16[512,128], index: 4, kind: output, shape index: {}]  }
   0x1   :  { %v90_v0 = vld [vmem:[%s1702_s1 + $0x20] sm:$0xf]  ;;  %v1091_v4 = vld [vmem:[%s1702_s1 + $0x18] sm:$0xff]  ;;  %v1090_v5 = vld [vmem:[%s1702_s1 + $0x10] sm:$0xff] }
   0x2   :  { %v268_v1 = vunpack.c.l.b16 %v90_v0  ;;  %v1089_v6 = vld [vmem:[%s1702_s1 + $0x8] sm:$0xff]  ;;  %v1088_v7 = vld [vmem:[%s1702_s1] sm:$0xff]  ;;  %v1058_v16 = vld [vmem:[%s1705_s0 + $0x10] sm:$0xff] }
   0x3   :  { %v1056_v8 = vld [vmem:[%s1705_s0] sm:$0xff]  ;;  %v1057_v12 = vld [vmem:[%s1705_s0 + $0x8] sm:$0xff]  ;;  %v1066_v17 = vld [vmem:[%s1705_s0 + $0x50] sm:$0xff] }
   0x4   :  { %v273_v2 = vpack.c.b16 %v268_v1, %v268_v1  ;;  %v1064_v9 = vld [vmem:[%s1705_s0 + $0x40] sm:$0xff]  ;;  %v1065_v13 = vld [vmem:[%s1705_s0 + $0x48] sm:$0xff]  ;;  %v1074_v18 = vld [vmem:[%s1705_s0 + $0x90] sm:$0xff] }
   0x5   :  { %v1072_v10 = vld [vmem:[%s1705_s0 + $0x80] sm:$0xff]  ;;  %v1073_v14 = vld [vmem:[%s1705_s0 + $0x88] sm:$0xff]  ;;  %v1082_v19 = vld [vmem:[%s1705_s0 + $0xd0] sm:$0xff] }
   0x6   :  { %v377_v3 = vsel %vm375_vm0, %v273_v2, 0  ;;  %v1080_v11 = vld [vmem:[%s1705_s0 + $0xc0] sm:$0xff]  ;;  %v1081_v15 = vld [vmem:[%s1705_s0 + $0xc8] sm:$0xff]  ;;  %v1059_v20 = vld [vmem:[%s1705_s0 + $0x18] sm:$0xff] }
   0x7   :  { %382 = vmatpush.bf16.msra.mxu0 %v377_v3  ;;  %1283 = vmatpush.bf16.msra.mxu1 %v377_v3  ;;  %v1067_v21 = vld [vmem:[%s1705_s0 + $0x58] sm:$0xff]  ;;  %v1060_v24 = vld [vmem:[%s1705_s0 + $0x20] sm:$0xff]  ;;  %v1061_v28 = vld [vmem:[%s1705_s0 + $0x28] sm:$0xff] }
   0x8   :  { %1284 = vmatpush.bf16.msra.mxu2 %v377_v3  ;;  %1285 = vmatpush.bf16.msra.mxu3 %v377_v3  ;;  %v1075_v22 = vld [vmem:[%s1705_s0 + $0x98] sm:$0xff]  ;;  %v1068_v25 = vld [vmem:[%s1705_s0 + $0x60] sm:$0xff]  ;;  %v1069_v29 = vld [vmem:[%s1705_s0 + $0x68] sm:$0xff] }
   0x9   :  { %v1083_v23 = vld [vmem:[%s1705_s0 + $0xd8] sm:$0xff]  ;;  %v1076_v26 = vld [vmem:[%s1705_s0 + $0xa0] sm:$0xff]  ;;  %v1077_v30 = vld [vmem:[%s1705_s0 + $0xa8] sm:$0xff] }
   0xa   :  { %v1084_v27 = vld [vmem:[%s1705_s0 + $0xe0] sm:$0xff]  ;;  %v1085_v31 = vld [vmem:[%s1705_s0 + $0xe8] sm:$0xff]  ;;  %v1062_v32 = vld [vmem:[%s1705_s0 + $0x30] sm:$0xff] }
   0xb   :  { %383 = vmatpush.bf16.msra.mxu0 %v1091_v4  ;;  %1286 = vmatpush.bf16.msra.mxu1 %v1091_v4  ;;  %v1070_v33 = vld [vmem:[%s1705_s0 + $0x70] sm:$0xff]  ;;  %v1063_v36 = vld [vmem:[%s1705_s0 + $0x38] sm:$0xff]  ;;  %v1471_v42 = vld [vmem:[%s1703_s2] ss:$0 sm:$0xff] }
   0xc   :  { %1287 = vmatpush.bf16.msra.mxu2 %v1091_v4  ;;  %1288 = vmatpush.bf16.msra.mxu3 %v1091_v4  ;;  %v1078_v34 = vld [vmem:[%s1705_s0 + $0xb0] sm:$0xff]  ;;  %v1071_v37 = vld [vmem:[%s1705_s0 + $0x78] sm:$0xff]  ;;  %v1477_v44 = vld [vmem:[%s1704_s3] ss:$0 sm:$0xff] }
   0xd   :  { %v1086_v35 = vld [vmem:[%s1705_s0 + $0xf0] sm:$0xff]  ;;  %v1079_v38 = vld [vmem:[%s1705_s0 + $0xb8] sm:$0xff] }
   0xe   :  { %v1087_v39 = vld [vmem:[%s1705_s0 + $0xf8] sm:$0xff] }
   0xf   :  { %384 = vmatpush.bf16.msra.mxu0 %v1090_v5  ;;  %1289 = vmatpush.bf16.msra.mxu1 %v1090_v5 }
  0x10   :  { %1290 = vmatpush.bf16.msra.mxu2 %v1090_v5  ;;  %1291 = vmatpush.bf16.msra.mxu3 %v1090_v5 }
  0x13   :  { %385 = vmatpush.bf16.msra.mxu0 %v1089_v6  ;;  %1292 = vmatpush.bf16.msra.mxu1 %v1089_v6 }
  0x14   :  { %1293 = vmatpush.bf16.msra.mxu2 %v1089_v6  ;;  %1294 = vmatpush.bf16.msra.mxu3 %v1089_v6 }
  0x17   :  { %386 = vmatpush.bf16.msra.mxu0 %v1088_v7  ;;  %1295 = vmatpush.bf16.msra.mxu1 %v1088_v7 }
  0x18   :  { %1296 = vmatpush.bf16.msra.mxu2 %v1088_v7  ;;  %1297 = vmatpush.bf16.msra.mxu3 %v1088_v7 }
  0x1a   :  { %1024 = vmatmul.msk.bf16.vlgmr.msra.gmra.mxu0 %vm278_vm1, %v1056_v8  ;;  %1032 = vmatmul.msk.bf16.vlgmr.msra.gmra.mxu1 %vm278_vm1, %v1064_v9 }
  0x1b   :  { %1040 = vmatmul.msk.bf16.vlgmr.msra.gmra.mxu2 %vm278_vm1, %v1072_v10  ;;  %1048 = vmatmul.msk.bf16.vlgmr.msra.gmra.mxu3 %vm278_vm1, %v1080_v11 }
  0x2a   :  { %1025 = vmatmul.msk.bf16.gmra.mxu0 %vm278_vm1, %v1057_v12  ;;  %1033 = vmatmul.msk.bf16.gmra.mxu1 %vm278_vm1, %v1065_v13 }
  0x2b   :  { %1041 = vmatmul.msk.bf16.gmra.mxu2 %vm278_vm1, %v1073_v14  ;;  %1049 = vmatmul.msk.bf16.gmra.mxu3 %vm278_vm1, %v1081_v15 }
  0x3a   :  { %1026 = vmatmul.msk.bf16.gmra.mxu0 %vm278_vm1, %v1058_v16  ;;  %1034 = vmatmul.msk.bf16.gmra.mxu1 %vm278_vm1, %v1066_v17 }
  0x3b   :  { %1042 = vmatmul.msk.bf16.gmra.mxu2 %vm278_vm1, %v1074_v18  ;;  %1050 = vmatmul.msk.bf16.gmra.mxu3 %vm278_vm1, %v1082_v19 }
  0x4a   :  { %1027 = vmatmul.msk.bf16.gmra.mxu0 %vm278_vm1, %v1059_v20  ;;  %1035 = vmatmul.msk.bf16.gmra.mxu1 %vm278_vm1, %v1067_v21 }
  0x4b   :  { %1043 = vmatmul.msk.bf16.gmra.mxu2 %vm278_vm1, %v1075_v22  ;;  %1051 = vmatmul.msk.bf16.gmra.mxu3 %vm278_vm1, %v1083_v23 }
  0x5a   :  { %1028 = vmatmul.msk.bf16.gmra.mxu0 %vm278_vm1, %v1060_v24  ;;  %1036 = vmatmul.msk.bf16.gmra.mxu1 %vm278_vm1, %v1068_v25 }
  0x5b   :  { %1044 = vmatmul.msk.bf16.gmra.mxu2 %vm278_vm1, %v1076_v26  ;;  %1052 = vmatmul.msk.bf16.gmra.mxu3 %vm278_vm1, %v1084_v27 }
  0x6a   :  { %1029 = vmatmul.msk.bf16.gmra.mxu0 %vm278_vm1, %v1061_v28  ;;  %1037 = vmatmul.msk.bf16.gmra.mxu1 %vm278_vm1, %v1069_v29 }
  0x6b   :  { %1045 = vmatmul.msk.bf16.gmra.mxu2 %vm278_vm1, %v1077_v30  ;;  %1053 = vmatmul.msk.bf16.gmra.mxu3 %vm278_vm1, %v1085_v31 }
  0x7a   :  { %1030 = vmatmul.msk.bf16.gmra.mxu0 %vm278_vm1, %v1062_v32  ;;  %1038 = vmatmul.msk.bf16.gmra.mxu1 %vm278_vm1, %v1070_v33 }
  0x7b   :  { %1046 = vmatmul.msk.bf16.gmra.mxu2 %vm278_vm1, %v1078_v34  ;;  %1054 = vmatmul.msk.bf16.gmra.mxu3 %vm278_vm1, %v1086_v35 }
  0x8a   :  { %1031 = vmatmul.msk.bf16.gmra.mxu0 %vm278_vm1, %v1063_v36  ;;  %1039 = vmatmul.msk.bf16.gmra.mxu1 %vm278_vm1, %v1071_v37 }
  0x8b   :  { %1047 = vmatmul.msk.bf16.gmra.mxu2 %vm278_vm1, %v1079_v38  ;;  %1055 = vmatmul.msk.bf16.gmra.mxu3 %vm278_vm1, %v1087_v39 }
  0x97   :  { %v388_v40 = vpop.f32.mrf.mxu0  ;;  %v428_v41 = vpop.f32.mrf.mxu1 }
  0x98   :  { %v552_v43 = vmul.f32 %v1471_v42, %v388_v40  ;;  %v568_v45 = vmul.f32 %v1471_v42, %v428_v41 }
  0x9a   :  { %v620_v50 = vadd.f32 %v1477_v44, %v552_v43  ;;  %v636_v51 = vadd.f32 %v1477_v44, %v568_v45 }
  0x9c   :  { %v684_v58 = vmax.f32 %v620_v50, 0.0  ;;  %v700_v59 = vmax.f32 %v636_v51, 0.0 }
  0x9e   :  { %v468_v46 = vpop.f32.mrf.mxu2  ;;  %v508_v47 = vpop.f32.mrf.mxu3 }
  0x9f   :  { %v390_v48 = vpop.f32.mrf.mxu0  ;;  %v430_v49 = vpop.f32.mrf.mxu1  ;;  %v584_v56 = vmul.f32 %v1471_v42, %v468_v46  ;;  %v600_v57 = vmul.f32 %v1471_v42, %v508_v47 }
  0xa0   :  { %v553_v52 = vmul.f32 %v1471_v42, %v390_v48  ;;  %v569_v53 = vmul.f32 %v1471_v42, %v430_v49 }
  0xa1   :  { %v652_v2 = vadd.f32 %v1477_v44, %v584_v56  ;;  %v668_v3 = vadd.f32 %v1477_v44, %v600_v57 }
  0xa2   :  { %v621_v54 = vadd.f32 %v1477_v44, %v553_v52  ;;  %v637_v55 = vadd.f32 %v1477_v44, %v569_v53 }
  0xa3   :  { %v716_v10 = vmax.f32 %v652_v2, 0.0  ;;  %v732_v11 = vmax.f32 %v668_v3, 0.0 }
  0xa4   :  { %v685_v60 = vmax.f32 %v621_v54, 0.0  ;;  %v701_v61 = vmax.f32 %v637_v55, 0.0 }
  0xa6   :  { %v1095_v62 = vpack.c.bf16 %v685_v60, %v684_v58  ;;  %v1135_v63 = vpack.c.bf16 %v701_v61, %v700_v59  ;;  %v470_v0 = vpop.f32.mrf.mxu2  ;;  %v510_v1 = vpop.f32.mrf.mxu3 }
  0xa7   :  { %v585_v4 = vmul.f32 %v1471_v42, %v470_v0  ;;  %v601_v5 = vmul.f32 %v1471_v42, %v510_v1  ;;  %v393_v6 = vpop.f32.mrf.mxu0  ;;  %v433_v7 = vpop.f32.mrf.mxu1 }
  0xa8   :  { %1096 = vst [vmem:[%s1706_s4] sm:$0xff] %v1095_v62   ;;  %v554_v14 = vmul.f32 %v1471_v42, %v393_v6  ;;  %v570_v15 = vmul.f32 %v1471_v42, %v433_v7 }
  0xa9   :  { %1259 = vst [vmem:[%s1706_s4 + $0x40] sm:$0xff] %v1135_v63   ;;  %v653_v8 = vadd.f32 %v1477_v44, %v585_v4  ;;  %v669_v9 = vadd.f32 %v1477_v44, %v601_v5 }
  0xaa   :  { %v622_v22 = vadd.f32 %v1477_v44, %v554_v14  ;;  %v638_v23 = vadd.f32 %v1477_v44, %v570_v15 }
  0xab   :  { %v717_v12 = vmax.f32 %v653_v8, 0.0  ;;  %v733_v13 = vmax.f32 %v669_v9, 0.0 }
  0xac   :  { %v686_v30 = vmax.f32 %v622_v22, 0.0  ;;  %v702_v31 = vmax.f32 %v638_v23, 0.0 }
  0xad   :  { %v1175_v16 = vpack.c.bf16 %v717_v12, %v716_v10  ;;  %v1215_v17 = vpack.c.bf16 %v733_v13, %v732_v11 }
  0xae   :  { %v473_v18 = vpop.f32.mrf.mxu2  ;;  %v513_v19 = vpop.f32.mrf.mxu3 }
  0xaf   :  { %1267 = vst [vmem:[%s1706_s4 + $0x80] sm:$0xff] %v1175_v16   ;;  %v395_v20 = vpop.f32.mrf.mxu0  ;;  %v435_v21 = vpop.f32.mrf.mxu1  ;;  %v586_v28 = vmul.f32 %v1471_v42, %v473_v18  ;;  %v602_v29 = vmul.f32 %v1471_v42, %v513_v19 }
  0xb0   :  { %1275 = vst [vmem:[%s1706_s4 + $0xc0] sm:$0xff] %v1215_v17   ;;  %v555_v24 = vmul.f32 %v1471_v42, %v395_v20  ;;  %v571_v25 = vmul.f32 %v1471_v42, %v435_v21 }
  0xb1   :  { %v654_v38 = vadd.f32 %v1477_v44, %v586_v28  ;;  %v670_v39 = vadd.f32 %v1477_v44, %v602_v29 }
  0xb2   :  { %v623_v26 = vadd.f32 %v1477_v44, %v555_v24  ;;  %v639_v27 = vadd.f32 %v1477_v44, %v571_v25 }
  0xb3   :  { %v718_v48 = vmax.f32 %v654_v38, 0.0  ;;  %v734_v49 = vmax.f32 %v670_v39, 0.0 }
  0xb4   :  { %v687_v32 = vmax.f32 %v623_v26, 0.0  ;;  %v703_v33 = vmax.f32 %v639_v27, 0.0 }
  0xb6   :  { %v1100_v34 = vpack.c.bf16 %v687_v32, %v686_v30  ;;  %v1140_v35 = vpack.c.bf16 %v703_v33, %v702_v31  ;;  %v475_v36 = vpop.f32.mrf.mxu2  ;;  %v515_v37 = vpop.f32.mrf.mxu3 }
  0xb7   :  { %v587_v40 = vmul.f32 %v1471_v42, %v475_v36  ;;  %v603_v41 = vmul.f32 %v1471_v42, %v515_v37  ;;  %v398_v43 = vpop.f32.mrf.mxu0  ;;  %v438_v45 = vpop.f32.mrf.mxu1 }
  0xb8   :  { %1252 = vst [vmem:[%s1706_s4 + $0x8] sm:$0xff] %v1100_v34   ;;  %v556_v52 = vmul.f32 %v1471_v42, %v398_v43  ;;  %v572_v53 = vmul.f32 %v1471_v42, %v438_v45 }
  0xb9   :  { %1260 = vst [vmem:[%s1706_s4 + $0x48] sm:$0xff] %v1140_v35   ;;  %v655_v46 = vadd.f32 %v1477_v44, %v587_v40  ;;  %v671_v47 = vadd.f32 %v1477_v44, %v603_v41 }
  0xba   :  { %v624_v60 = vadd.f32 %v1477_v44, %v556_v52  ;;  %v640_v61 = vadd.f32 %v1477_v44, %v572_v53 }
  0xbb   :  { %v719_v50 = vmax.f32 %v655_v46, 0.0  ;;  %v735_v51 = vmax.f32 %v671_v47, 0.0 }
  0xbc   :  { %v688_v4 = vmax.f32 %v624_v60, 0.0  ;;  %v704_v5 = vmax.f32 %v640_v61, 0.0 }
  0xbd   :  { %v1180_v54 = vpack.c.bf16 %v719_v50, %v718_v48  ;;  %v1220_v55 = vpack.c.bf16 %v735_v51, %v734_v49 }
  0xbe   :  { %v478_v56 = vpop.f32.mrf.mxu2  ;;  %v518_v57 = vpop.f32.mrf.mxu3 }
  0xbf   :  { %1268 = vst [vmem:[%s1706_s4 + $0x88] sm:$0xff] %v1180_v54   ;;  %v400_v58 = vpop.f32.mrf.mxu0  ;;  %v440_v59 = vpop.f32.mrf.mxu1  ;;  %v588_v2 = vmul.f32 %v1471_v42, %v478_v56  ;;  %v604_v3 = vmul.f32 %v1471_v42, %v518_v57 }
  0xc0   :  { %1276 = vst [vmem:[%s1706_s4 + $0xc8] sm:$0xff] %v1220_v55   ;;  %v557_v62 = vmul.f32 %v1471_v42, %v400_v58  ;;  %v573_v63 = vmul.f32 %v1471_v42, %v440_v59 }
  0xc1   :  { %v656_v12 = vadd.f32 %v1477_v44, %v588_v2  ;;  %v672_v13 = vadd.f32 %v1477_v44, %v604_v3 }
  0xc2   :  { %v625_v0 = vadd.f32 %v1477_v44, %v557_v62  ;;  %v641_v1 = vadd.f32 %v1477_v44, %v573_v63 }
  0xc3   :  { %v720_v20 = vmax.f32 %v656_v12, 0.0  ;;  %v736_v21 = vmax.f32 %v672_v13, 0.0 }
  0xc4   :  { %v689_v6 = vmax.f32 %v625_v0, 0.0  ;;  %v705_v7 = vmax.f32 %v641_v1, 0.0 }
  0xc6   :  { %v1105_v8 = vpack.c.bf16 %v689_v6, %v688_v4  ;;  %v1145_v9 = vpack.c.bf16 %v705_v7, %v704_v5  ;;  %v480_v10 = vpop.f32.mrf.mxu2  ;;  %v520_v11 = vpop.f32.mrf.mxu3 }
  0xc7   :  { %v589_v14 = vmul.f32 %v1471_v42, %v480_v10  ;;  %v605_v15 = vmul.f32 %v1471_v42, %v520_v11  ;;  %v403_v16 = vpop.f32.mrf.mxu0  ;;  %v443_v17 = vpop.f32.mrf.mxu1 }
  0xc8   :  { %1253 = vst [vmem:[%s1706_s4 + $0x10] sm:$0xff] %v1105_v8   ;;  %v558_v24 = vmul.f32 %v1471_v42, %v403_v16  ;;  %v574_v25 = vmul.f32 %v1471_v42, %v443_v17 }
  0xc9   :  { %1261 = vst [vmem:[%s1706_s4 + $0x50] sm:$0xff] %v1145_v9   ;;  %v657_v18 = vadd.f32 %v1477_v44, %v589_v14  ;;  %v673_v19 = vadd.f32 %v1477_v44, %v605_v15 }
  0xca   :  { %v626_v32 = vadd.f32 %v1477_v44, %v558_v24  ;;  %v642_v33 = vadd.f32 %v1477_v44, %v574_v25 }
  0xcb   :  { %v721_v22 = vmax.f32 %v657_v18, 0.0  ;;  %v737_v23 = vmax.f32 %v673_v19, 0.0 }
  0xcc   :  { %v690_v40 = vmax.f32 %v626_v32, 0.0  ;;  %v706_v41 = vmax.f32 %v642_v33, 0.0 }
  0xcd   :  { %v1185_v26 = vpack.c.bf16 %v721_v22, %v720_v20  ;;  %v1225_v27 = vpack.c.bf16 %v737_v23, %v736_v21 }
  0xce   :  { %v483_v28 = vpop.f32.mrf.mxu2  ;;  %v523_v29 = vpop.f32.mrf.mxu3 }
  0xcf   :  { %1269 = vst [vmem:[%s1706_s4 + $0x90] sm:$0xff] %v1185_v26   ;;  %v405_v30 = vpop.f32.mrf.mxu0  ;;  %v445_v31 = vpop.f32.mrf.mxu1  ;;  %v590_v38 = vmul.f32 %v1471_v42, %v483_v28  ;;  %v606_v39 = vmul.f32 %v1471_v42, %v523_v29 }
  0xd0   :  { %1277 = vst [vmem:[%s1706_s4 + $0xd0] sm:$0xff] %v1225_v27   ;;  %v559_v34 = vmul.f32 %v1471_v42, %v405_v30  ;;  %v575_v35 = vmul.f32 %v1471_v42, %v445_v31 }
  0xd1   :  { %v658_v50 = vadd.f32 %v1477_v44, %v590_v38  ;;  %v674_v51 = vadd.f32 %v1477_v44, %v606_v39 }
  0xd2   :  { %v627_v36 = vadd.f32 %v1477_v44, %v559_v34  ;;  %v643_v37 = vadd.f32 %v1477_v44, %v575_v35 }
  0xd3   :  { %v722_v58 = vmax.f32 %v658_v50, 0.0  ;;  %v738_v59 = vmax.f32 %v674_v51, 0.0 }
  0xd4   :  { %v691_v43 = vmax.f32 %v627_v36, 0.0  ;;  %v707_v45 = vmax.f32 %v643_v37, 0.0 }
  0xd6   :  { %v1110_v46 = vpack.c.bf16 %v691_v43, %v690_v40  ;;  %v1150_v47 = vpack.c.bf16 %v707_v45, %v706_v41  ;;  %v485_v48 = vpop.f32.mrf.mxu2  ;;  %v525_v49 = vpop.f32.mrf.mxu3 }
  0xd7   :  { %v591_v52 = vmul.f32 %v1471_v42, %v485_v48  ;;  %v607_v53 = vmul.f32 %v1471_v42, %v525_v49  ;;  %v408_v54 = vpop.f32.mrf.mxu0  ;;  %v448_v55 = vpop.f32.mrf.mxu1 }
  0xd8   :  { %1254 = vst [vmem:[%s1706_s4 + $0x18] sm:$0xff] %v1110_v46   ;;  %v560_v62 = vmul.f32 %v1471_v42, %v408_v54  ;;  %v576_v63 = vmul.f32 %v1471_v42, %v448_v55 }
  0xd9   :  { %1262 = vst [vmem:[%s1706_s4 + $0x58] sm:$0xff] %v1150_v47   ;;  %v659_v56 = vadd.f32 %v1477_v44, %v591_v52  ;;  %v675_v57 = vadd.f32 %v1477_v44, %v607_v53 }
  0xda   :  { %v628_v6 = vadd.f32 %v1477_v44, %v560_v62  ;;  %v644_v7 = vadd.f32 %v1477_v44, %v576_v63 }
  0xdb   :  { %v723_v60 = vmax.f32 %v659_v56, 0.0  ;;  %v739_v61 = vmax.f32 %v675_v57, 0.0 }
  0xdc   :  { %v692_v14 = vmax.f32 %v628_v6, 0.0  ;;  %v708_v15 = vmax.f32 %v644_v7, 0.0 }
  0xdd   :  { %v1190_v0 = vpack.c.bf16 %v723_v60, %v722_v58  ;;  %v1230_v1 = vpack.c.bf16 %v739_v61, %v738_v59 }
  0xde   :  { %v488_v2 = vpop.f32.mrf.mxu2  ;;  %v528_v3 = vpop.f32.mrf.mxu3 }
  0xdf   :  { %1270 = vst [vmem:[%s1706_s4 + $0x98] sm:$0xff] %v1190_v0   ;;  %v410_v4 = vpop.f32.mrf.mxu0  ;;  %v450_v5 = vpop.f32.mrf.mxu1  ;;  %v592_v12 = vmul.f32 %v1471_v42, %v488_v2  ;;  %v608_v13 = vmul.f32 %v1471_v42, %v528_v3 }
  0xe0   :  { %1278 = vst [vmem:[%s1706_s4 + $0xd8] sm:$0xff] %v1230_v1   ;;  %v561_v8 = vmul.f32 %v1471_v42, %v410_v4  ;;  %v577_v9 = vmul.f32 %v1471_v42, %v450_v5 }
  0xe1   :  { %v660_v22 = vadd.f32 %v1477_v44, %v592_v12  ;;  %v676_v23 = vadd.f32 %v1477_v44, %v608_v13 }
  0xe2   :  { %v629_v10 = vadd.f32 %v1477_v44, %v561_v8  ;;  %v645_v11 = vadd.f32 %v1477_v44, %v577_v9 }
  0xe3   :  { %v724_v30 = vmax.f32 %v660_v22, 0.0  ;;  %v740_v31 = vmax.f32 %v676_v23, 0.0 }
  0xe4   :  { %v693_v16 = vmax.f32 %v629_v10, 0.0  ;;  %v709_v17 = vmax.f32 %v645_v11, 0.0 }
  0xe6   :  { %v1115_v18 = vpack.c.bf16 %v693_v16, %v692_v14  ;;  %v1155_v19 = vpack.c.bf16 %v709_v17, %v708_v15  ;;  %v490_v20 = vpop.f32.mrf.mxu2  ;;  %v530_v21 = vpop.f32.mrf.mxu3 }
  0xe7   :  { %v593_v24 = vmul.f32 %v1471_v42, %v490_v20  ;;  %v609_v25 = vmul.f32 %v1471_v42, %v530_v21  ;;  %v413_v26 = vpop.f32.mrf.mxu0  ;;  %v453_v27 = vpop.f32.mrf.mxu1 }
  0xe8   :  { %1255 = vst [vmem:[%s1706_s4 + $0x20] sm:$0xff] %v1115_v18   ;;  %v562_v34 = vmul.f32 %v1471_v42, %v413_v26  ;;  %v578_v35 = vmul.f32 %v1471_v42, %v453_v27 }
  0xe9   :  { %1263 = vst [vmem:[%s1706_s4 + $0x60] sm:$0xff] %v1155_v19   ;;  %v661_v28 = vadd.f32 %v1477_v44, %v593_v24  ;;  %v677_v29 = vadd.f32 %v1477_v44, %v609_v25 }
  0xea   :  { %v630_v43 = vadd.f32 %v1477_v44, %v562_v34  ;;  %v646_v45 = vadd.f32 %v1477_v44, %v578_v35 }
  0xeb   :  { %v725_v32 = vmax.f32 %v661_v28, 0.0  ;;  %v741_v33 = vmax.f32 %v677_v29, 0.0 }
  0xec   :  { %v694_v52 = vmax.f32 %v630_v43, 0.0  ;;  %v710_v53 = vmax.f32 %v646_v45, 0.0 }
  0xed   :  { %v1195_v36 = vpack.c.bf16 %v725_v32, %v724_v30  ;;  %v1235_v37 = vpack.c.bf16 %v741_v33, %v740_v31 }
  0xee   :  { %v493_v38 = vpop.f32.mrf.mxu2  ;;  %v533_v39 = vpop.f32.mrf.mxu3 }
  0xef   :  { %1271 = vst [vmem:[%s1706_s4 + $0xa0] sm:$0xff] %v1195_v36   ;;  %v415_v40 = vpop.f32.mrf.mxu0  ;;  %v455_v41 = vpop.f32.mrf.mxu1  ;;  %v594_v50 = vmul.f32 %v1471_v42, %v493_v38  ;;  %v610_v51 = vmul.f32 %v1471_v42, %v533_v39 }
  0xf0   :  { %1279 = vst [vmem:[%s1706_s4 + $0xe0] sm:$0xff] %v1235_v37   ;;  %v563_v46 = vmul.f32 %v1471_v42, %v415_v40  ;;  %v579_v47 = vmul.f32 %v1471_v42, %v455_v41 }
  0xf1   :  { %v662_v60 = vadd.f32 %v1477_v44, %v594_v50  ;;  %v678_v61 = vadd.f32 %v1477_v44, %v610_v51 }
  0xf2   :  { %v631_v48 = vadd.f32 %v1477_v44, %v563_v46  ;;  %v647_v49 = vadd.f32 %v1477_v44, %v579_v47 }
  0xf3   :  { %v726_v4 = vmax.f32 %v662_v60, 0.0  ;;  %v742_v5 = vmax.f32 %v678_v61, 0.0 }
  0xf4   :  { %v695_v54 = vmax.f32 %v631_v48, 0.0  ;;  %v711_v55 = vmax.f32 %v647_v49, 0.0 }
  0xf6   :  { %v1120_v56 = vpack.c.bf16 %v695_v54, %v694_v52  ;;  %v1160_v57 = vpack.c.bf16 %v711_v55, %v710_v53  ;;  %v495_v58 = vpop.f32.mrf.mxu2  ;;  %v535_v59 = vpop.f32.mrf.mxu3 }
  0xf7   :  { %v595_v62 = vmul.f32 %v1471_v42, %v495_v58  ;;  %v611_v63 = vmul.f32 %v1471_v42, %v535_v59  ;;  %v418_v0 = vpop.f32.mrf.mxu0  ;;  %v458_v1 = vpop.f32.mrf.mxu1 }
  0xf8   :  { %1256 = vst [vmem:[%s1706_s4 + $0x28] sm:$0xff] %v1120_v56   ;;  %v564_v8 = vmul.f32 %v1471_v42, %v418_v0  ;;  %v580_v9 = vmul.f32 %v1471_v42, %v458_v1 }
  0xf9   :  { %1264 = vst [vmem:[%s1706_s4 + $0x68] sm:$0xff] %v1160_v57   ;;  %v663_v2 = vadd.f32 %v1477_v44, %v595_v62  ;;  %v679_v3 = vadd.f32 %v1477_v44, %v611_v63 }
  0xfa   :  { %v632_v16 = vadd.f32 %v1477_v44, %v564_v8  ;;  %v648_v17 = vadd.f32 %v1477_v44, %v580_v9 }
  0xfb   :  { %v727_v6 = vmax.f32 %v663_v2, 0.0  ;;  %v743_v7 = vmax.f32 %v679_v3, 0.0 }
  0xfc   :  { %v696_v24 = vmax.f32 %v632_v16, 0.0  ;;  %v712_v25 = vmax.f32 %v648_v17, 0.0 }
  0xfd   :  { %v1200_v10 = vpack.c.bf16 %v727_v6, %v726_v4  ;;  %v1240_v11 = vpack.c.bf16 %v743_v7, %v742_v5 }
  0xfe   :  { %v498_v12 = vpop.f32.mrf.mxu2  ;;  %v538_v13 = vpop.f32.mrf.mxu3 }
  0xff   :  { %1272 = vst [vmem:[%s1706_s4 + $0xa8] sm:$0xff] %v1200_v10   ;;  %v420_v14 = vpop.f32.mrf.mxu0  ;;  %v460_v15 = vpop.f32.mrf.mxu1  ;;  %v596_v22 = vmul.f32 %v1471_v42, %v498_v12  ;;  %v612_v23 = vmul.f32 %v1471_v42, %v538_v13 }
 0x100   :  { %1280 = vst [vmem:[%s1706_s4 + $0xe8] sm:$0xff] %v1240_v11   ;;  %v565_v18 = vmul.f32 %v1471_v42, %v420_v14  ;;  %v581_v19 = vmul.f32 %v1471_v42, %v460_v15 }
 0x101   :  { %v664_v32 = vadd.f32 %v1477_v44, %v596_v22  ;;  %v680_v33 = vadd.f32 %v1477_v44, %v612_v23 }
 0x102   :  { %v633_v20 = vadd.f32 %v1477_v44, %v565_v18  ;;  %v649_v21 = vadd.f32 %v1477_v44, %v581_v19 }
 0x103   :  { %v728_v40 = vmax.f32 %v664_v32, 0.0  ;;  %v744_v41 = vmax.f32 %v680_v33, 0.0 }
 0x104   :  { %v697_v26 = vmax.f32 %v633_v20, 0.0  ;;  %v713_v27 = vmax.f32 %v649_v21, 0.0 }
 0x106   :  { %v1125_v28 = vpack.c.bf16 %v697_v26, %v696_v24  ;;  %v1165_v29 = vpack.c.bf16 %v713_v27, %v712_v25  ;;  %v500_v30 = vpop.f32.mrf.mxu2  ;;  %v540_v31 = vpop.f32.mrf.mxu3 }
 0x107   :  { %v597_v34 = vmul.f32 %v1471_v42, %v500_v30  ;;  %v613_v35 = vmul.f32 %v1471_v42, %v540_v31  ;;  %v423_v36 = vpop.f32.mrf.mxu0  ;;  %v463_v37 = vpop.f32.mrf.mxu1 }
 0x108   :  { %1257 = vst [vmem:[%s1706_s4 + $0x30] sm:$0xff] %v1125_v28   ;;  %v566_v46 = vmul.f32 %v1471_v42, %v423_v36  ;;  %v582_v47 = vmul.f32 %v1471_v42, %v463_v37 }
 0x109   :  { %1265 = vst [vmem:[%s1706_s4 + $0x70] sm:$0xff] %v1165_v29   ;;  %v665_v38 = vadd.f32 %v1477_v44, %v597_v34  ;;  %v681_v39 = vadd.f32 %v1477_v44, %v613_v35 }
 0x10a   :  { %v634_v54 = vadd.f32 %v1477_v44, %v566_v46  ;;  %v650_v55 = vadd.f32 %v1477_v44, %v582_v47 }
 0x10b   :  { %v729_v43 = vmax.f32 %v665_v38, 0.0  ;;  %v745_v45 = vmax.f32 %v681_v39, 0.0 }
 0x10c   :  { %v698_v62 = vmax.f32 %v634_v54, 0.0  ;;  %v714_v63 = vmax.f32 %v650_v55, 0.0 }
 0x10d   :  { %v1205_v48 = vpack.c.bf16 %v729_v43, %v728_v40  ;;  %v1245_v49 = vpack.c.bf16 %v745_v45, %v744_v41 }
 0x10e   :  { %v503_v50 = vpop.f32.mrf.mxu2  ;;  %v543_v51 = vpop.f32.mrf.mxu3 }
 0x10f   :  { %1273 = vst [vmem:[%s1706_s4 + $0xb0] sm:$0xff] %v1205_v48   ;;  %v425_v52 = vpop.f32.mrf.mxu0  ;;  %v465_v53 = vpop.f32.mrf.mxu1  ;;  %v598_v60 = vmul.f32 %v1471_v42, %v503_v50  ;;  %v614_v61 = vmul.f32 %v1471_v42, %v543_v51 }
 0x110   :  { %1281 = vst [vmem:[%s1706_s4 + $0xf0] sm:$0xff] %v1245_v49   ;;  %v567_v56 = vmul.f32 %v1471_v42, %v425_v52  ;;  %v583_v57 = vmul.f32 %v1471_v42, %v465_v53 }
 0x111   :  { %v666_v6 = vadd.f32 %v1477_v44, %v598_v60  ;;  %v682_v7 = vadd.f32 %v1477_v44, %v614_v61 }
 0x112   :  { %v635_v58 = vadd.f32 %v1477_v44, %v567_v56  ;;  %v651_v59 = vadd.f32 %v1477_v44, %v583_v57 }
 0x113   :  { %v730_v12 = vmax.f32 %v666_v6, 0.0  ;;  %v746_v13 = vmax.f32 %v682_v7, 0.0 }
 0x114   :  { %v699_v0 = vmax.f32 %v635_v58, 0.0  ;;  %v715_v1 = vmax.f32 %v651_v59, 0.0 }
 0x116   :  { %v1130_v2 = vpack.c.bf16 %v699_v0, %v698_v62  ;;  %v1170_v3 = vpack.c.bf16 %v715_v1, %v714_v63  ;;  %v505_v4 = vpop.f32.mrf.mxu2  ;;  %v545_v5 = vpop.f32.mrf.mxu3 }
 0x117   :  { %v599_v8 = vmul.f32 %v1471_v42, %v505_v4  ;;  %v615_v9 = vmul.f32 %v1471_v42, %v545_v5 }
 0x118   :  { %1258 = vst [vmem:[%s1706_s4 + $0x38] sm:$0xff] %v1130_v2  }
 0x119   :  { %1266 = vst [vmem:[%s1706_s4 + $0x78] sm:$0xff] %v1170_v3   ;;  %v667_v10 = vadd.f32 %v1477_v44, %v599_v8  ;;  %v683_v11 = vadd.f32 %v1477_v44, %v615_v9 }
 0x11b   :  { %v731_v14 = vmax.f32 %v667_v10, 0.0  ;;  %v747_v15 = vmax.f32 %v683_v11, 0.0 }
 0x11d   :  { %v1210_v16 = vpack.c.bf16 %v731_v14, %v730_v12  ;;  %v1250_v17 = vpack.c.bf16 %v747_v15, %v746_v13 }
 0x11f   :  { %1274 = vst [vmem:[%s1706_s4 + $0xb8] sm:$0xff] %v1210_v16  }
 0x120   :  { %1282 = vst [vmem:[%s1706_s4 + $0xf8] sm:$0xff] %v1250_v17  }

// kernel: cnn_ex_forward.6
= control target key start
LH: loop header
LB: loop body
LE: loop exit
PB: predicated region body
PF: predicated region fallthrough
CT: control target
= control target key end

     0   :  { %vm361_vm0 = vcmask 130048   ;;  %s2069_s1 = inlined_call_operand.vmem [shape: bf16[144,128], index: 1, kind: input, shape index: {}]   ;;  %s2070_s0 = inlined_call_operand.vmem [shape: bf16[392,144], index: 0, kind: input, shape index: {}]   ;;  %s2071_s2 = inlined_call_operand.vmem [shape: f32[1,128], index: 2, kind: input, shape index: {}]   ;;  %s2072_s3 = inlined_call_operand.vmem [shape: f32[1,128], index: 3, kind: input, shape index: {}]   ;;  %s2073_s4 = inlined_call_operand.vmem [shape: bf16[392,128], index: 4, kind: output, shape index: {}]  }
   0x1   :  { %v1268_v0 = vld [vmem:[%s2069_s1 + $0x38] sm:$0xff]  ;;  %v1269_v1 = vld [vmem:[%s2069_s1 + $0x40] sm:$0xff]  ;;  %v964_v3 = vld [vmem:[%s2070_s0 + $0x8] sm:$0xf0] }
   0x2   :  { %v1213_v2 = vld [vmem:[%s2070_s0 + $0x4] sm:$0xf]  ;;  %437 = vmatpush.bf16.msra.mxu0 %v1268_v0  ;;  %1413 = vmatpush.bf16.msra.mxu2 %v1268_v0  ;;  %v1267_v5 = vld [vmem:[%s2069_s1 + $0x30] sm:$0xff]  ;;  %v1266_v6 = vld [vmem:[%s2069_s1 + $0x28] sm:$0xff] }
   0x3   :  { %v967_v4 = vor.u32 %v1213_v2, %v964_v3  ;;  %577 = vmatpush.bf16.msra.mxu1 %v1269_v1  ;;  %1421 = vmatpush.bf16.msra.mxu3 %v1269_v1  ;;  %v1265_v7 = vld [vmem:[%s2069_s1 + $0x20] sm:$0xff]  ;;  %v1264_v8 = vld [vmem:[%s2069_s1 + $0x18] sm:$0xff]  ;;  %v1215_v9 = vld [vmem:[%s2070_s0 + $0x14] sm:$0xf] }
   0x4   :  { %v972_v10 = vld [vmem:[%s2070_s0 + $0x18] sm:$0xf0]  ;;  %v1263_v12 = vld [vmem:[%s2069_s1 + $0x10] sm:$0xff]  ;;  %v1262_v13 = vld [vmem:[%s2069_s1 + $0x8] sm:$0xff] }
   0x5   :  { %v975_v11 = vor.u32 %v1215_v9, %v972_v10  ;;  %v1241_v14 = vld [vmem:[%s2070_s0 + $0xe4] sm:$0xf]  ;;  %v1076_v15 = vld [vmem:[%s2070_s0 + $0xe8] sm:$0xf0]  ;;  %v962_v18 = vld [vmem:[%s2070_s0] sm:$0xf] }
   0x6   :  { %1188 = vmatmul.msk.bf16.vlgmr.msra.gmra.mxu1 %vm361_vm0, %v967_v4  ;;  %438 = vmatpush.bf16.msra.mxu0 %v1267_v5  ;;  %v1079_v16 = vor.u32 %v1241_v14, %v1076_v15  ;;  %v1261_v17 = vld [vmem:[%s2069_s1] sm:$0xff]  ;;  %v1214_v19 = vld [vmem:[%s2070_s0 + $0x4] sm:$0xf0]  ;;  %v980_v25 = vld [vmem:[%s2070_s0 + $0x28] sm:$0xf0] }
   0x7   :  { %1414 = vmatpush.bf16.msra.mxu2 %v1267_v5  ;;  %v1058_v20 = vld [vmem:[%s2070_s0 + $0xc0] sm:$0xf]  ;;  %v1238_v21 = vld [vmem:[%s2070_s0 + $0xc4] sm:$0xf0]  ;;  %v963_v22 = vor.u32 %v1214_v19, %v962_v18  ;;  %v1217_v24 = vld [vmem:[%s2070_s0 + $0x24] sm:$0xf] }
   0x8   :  { %1202 = vmatmul.msk.bf16.vlgmr.msra.gmra.mxu3 %vm361_vm0, %v1079_v16  ;;  %v1059_v23 = vor.u32 %v1238_v21, %v1058_v20  ;;  %v983_v26 = vor.u32 %v1217_v24, %v980_v25  ;;  %v1243_v27 = vld [vmem:[%s2070_s0 + $0xf4] sm:$0xf]  ;;  %v1084_v28 = vld [vmem:[%s2070_s0 + $0xf8] sm:$0xf0]  ;;  %v970_v30 = vld [vmem:[%s2070_s0 + $0x10] sm:$0xf] }
   0x9   :  { %v1087_v29 = vor.u32 %v1243_v27, %v1084_v28  ;;  %v1216_v31 = vld [vmem:[%s2070_s0 + $0x14] sm:$0xf0]  ;;  %v1066_v32 = vld [vmem:[%s2070_s0 + $0xd0] sm:$0xf]  ;;  %v1219_v36 = vld [vmem:[%s2070_s0 + $0x34] sm:$0xf] }
   0xa   :  { %439 = vmatpush.bf16.msra.mxu0 %v1266_v6  ;;  %v1240_v33 = vld [vmem:[%s2070_s0 + $0xd4] sm:$0xf0]  ;;  %v971_v34 = vor.u32 %v1216_v31, %v970_v30  ;;  %v988_v37 = vld [vmem:[%s2070_s0 + $0x38] sm:$0xf0]  ;;  %v1245_v39 = vld [vmem:[%s2070_s0 + $0x104] sm:$0xf] }
   0xb   :  { %1415 = vmatpush.bf16.msra.mxu2 %v1266_v6  ;;  %v1067_v35 = vor.u32 %v1240_v33, %v1066_v32  ;;  %v991_v38 = vor.u32 %v1219_v36, %v988_v37  ;;  %v1092_v40 = vld [vmem:[%s2070_s0 + $0x108] sm:$0xf0]  ;;  %v978_v42 = vld [vmem:[%s2070_s0 + $0x20] sm:$0xf]  ;;  %v1218_v43 = vld [vmem:[%s2070_s0 + $0x24] sm:$0xf0] }
   0xc   :  { %v1095_v41 = vor.u32 %v1245_v39, %v1092_v40  ;;  %v1074_v44 = vld [vmem:[%s2070_s0 + $0xe0] sm:$0xf]  ;;  %v1242_v45 = vld [vmem:[%s2070_s0 + $0xe4] sm:$0xf0]  ;;  %v979_v46 = vor.u32 %v1218_v43, %v978_v42  ;;  %v1221_v48 = vld [vmem:[%s2070_s0 + $0x44] sm:$0xf] }
   0xd   :  { %v1075_v47 = vor.u32 %v1242_v45, %v1074_v44  ;;  %v996_v49 = vld [vmem:[%s2070_s0 + $0x48] sm:$0xf0]  ;;  %v1247_v51 = vld [vmem:[%s2070_s0 + $0x114] sm:$0xf]  ;;  %v1100_v52 = vld [vmem:[%s2070_s0 + $0x118] sm:$0xf0] }
   0xe   :  { %440 = vmatpush.bf16.msra.mxu0 %v1265_v7  ;;  %v999_v50 = vor.u32 %v1221_v48, %v996_v49  ;;  %v1103_v53 = vor.u32 %v1247_v51, %v1100_v52  ;;  %v986_v54 = vld [vmem:[%s2070_s0 + $0x30] sm:$0xf]  ;;  %v1220_v55 = vld [vmem:[%s2070_s0 + $0x34] sm:$0xf0]  ;;  %v1223_v60 = vld [vmem:[%s2070_s0 + $0x54] sm:$0xf] }
   0xf   :  { %1416 = vmatpush.bf16.msra.mxu2 %v1265_v7  ;;  %v1082_v56 = vld [vmem:[%s2070_s0 + $0xf0] sm:$0xf]  ;;  %v1244_v57 = vld [vmem:[%s2070_s0 + $0xf4] sm:$0xf0]  ;;  %v987_v58 = vor.u32 %v1220_v55, %v986_v54  ;;  %v1004_v61 = vld [vmem:[%s2070_s0 + $0x58] sm:$0xf0] }
  0x10   :  { %v1083_v59 = vor.u32 %v1244_v57, %v1082_v56  ;;  %v1007_v62 = vor.u32 %v1223_v60, %v1004_v61  ;;  %v1249_v63 = vld [vmem:[%s2070_s0 + $0x124] sm:$0xf]  ;;  %v1108_v0 = vld [vmem:[%s2070_s0 + $0x128] sm:$0xf0]  ;;  %v994_v2 = vld [vmem:[%s2070_s0 + $0x40] sm:$0xf] }
  0x11   :  { %v1111_v1 = vor.u32 %v1249_v63, %v1108_v0  ;;  %v1222_v3 = vld [vmem:[%s2070_s0 + $0x44] sm:$0xf0]  ;;  %v1090_v4 = vld [vmem:[%s2070_s0 + $0x100] sm:$0xf]  ;;  %v1012_v9 = vld [vmem:[%s2070_s0 + $0x68] sm:$0xf0] }
  0x12   :  { %441 = vmatpush.bf16.msra.mxu0 %v1264_v8  ;;  %v1246_v5 = vld [vmem:[%s2070_s0 + $0x104] sm:$0xf0]  ;;  %v995_v6 = vor.u32 %v1222_v3, %v994_v2  ;;  %v1002_v14 = vld [vmem:[%s2070_s0 + $0x50] sm:$0xf]  ;;  %v1224_v15 = vld [vmem:[%s2070_s0 + $0x54] sm:$0xf0] }
  0x13   :  { %1417 = vmatpush.bf16.msra.mxu2 %v1264_v8  ;;  %v1091_v7 = vor.u32 %v1246_v5, %v1090_v4  ;;  %v1225_v8 = vld [vmem:[%s2070_s0 + $0x64] sm:$0xf]  ;;  %v1098_v16 = vld [vmem:[%s2070_s0 + $0x110] sm:$0xf]  ;;  %v1003_v18 = vor.u32 %v1224_v15, %v1002_v14  ;;  %v1227_v20 = vld [vmem:[%s2070_s0 + $0x74] sm:$0xf] }
  0x14   :  { %v1015_v10 = vor.u32 %v1225_v8, %v1012_v9  ;;  %v1020_v21 = vld [vmem:[%s2070_s0 + $0x78] sm:$0xf0]  ;;  %v1124_v24 = vld [vmem:[%s2070_s0 + $0x148] sm:$0xf0]  ;;  %v1226_v27 = vld [vmem:[%s2070_s0 + $0x64] sm:$0xf0] }
  0x15   :  { %v1106_v28 = vld [vmem:[%s2070_s0 + $0x120] sm:$0xf]  ;;  %v1229_v32 = vld [vmem:[%s2070_s0 + $0x84] sm:$0xf]  ;;  %v1028_v33 = vld [vmem:[%s2070_s0 + $0x88] sm:$0xf0] }
  0x16   :  { %1189 = vmatmul.msk.bf16.gmra.mxu1 %vm361_vm0, %v975_v11  ;;  %442 = vmatpush.bf16.msra.mxu0 %v1263_v12  ;;  %v1251_v11 = vld [vmem:[%s2070_s0 + $0x134] sm:$0xf]  ;;  %v1132_v37 = vld [vmem:[%s2070_s0 + $0x158] sm:$0xf0]  ;;  %v1018_v39 = vld [vmem:[%s2070_s0 + $0x70] sm:$0xf] }
  0x17   :  { %1418 = vmatpush.bf16.msra.mxu2 %v1263_v12  ;;  %v1116_v12 = vld [vmem:[%s2070_s0 + $0x138] sm:$0xf0]  ;;  %v1255_v36 = vld [vmem:[%s2070_s0 + $0x154] sm:$0xf]  ;;  %v1228_v40 = vld [vmem:[%s2070_s0 + $0x74] sm:$0xf0] }
  0x18   :  { %1203 = vmatmul.msk.bf16.gmra.mxu3 %vm361_vm0, %v1087_v29  ;;  %v1250_v29 = vld [vmem:[%s2070_s0 + $0x124] sm:$0xf0]  ;;  %v1114_v42 = vld [vmem:[%s2070_s0 + $0x130] sm:$0xf]  ;;  %v1252_v43 = vld [vmem:[%s2070_s0 + $0x134] sm:$0xf0]  ;;  %v1019_v44 = vor.u32 %v1228_v40, %v1018_v39 }
  0x19   :  { %v1107_v31 = vor.u32 %v1250_v29, %v1106_v28  ;;  %v1115_v45 = vor.u32 %v1252_v43, %v1114_v42  ;;  %v1140_v51 = vld [vmem:[%s2070_s0 + $0x168] sm:$0xf0]  ;;  %v1230_v54 = vld [vmem:[%s2070_s0 + $0x84] sm:$0xf0]  ;;  %v1122_v56 = vld [vmem:[%s2070_s0 + $0x140] sm:$0xf] }
  0x1a   :  { %443 = vmatpush.bf16.msra.mxu0 %v1262_v13  ;;  %v1254_v57 = vld [vmem:[%s2070_s0 + $0x144] sm:$0xf0]  ;;  %v1044_v63 = vld [vmem:[%s2070_s0 + $0xa8] sm:$0xf0]  ;;  %v1736_v5 = vld [vmem:[%s2072_s3] ss:$0 sm:$0xff] }
  0x1b   :  { %1419 = vmatpush.bf16.msra.mxu2 %v1262_v13  ;;  %v1119_v13 = vor.u32 %v1251_v11, %v1116_v12  ;;  %v1123_v61 = vor.u32 %v1254_v57, %v1122_v56  ;;  %v1148_v11 = vld [vmem:[%s2070_s0 + $0x178] sm:$0xf0]  ;;  %v1034_v15 = vld [vmem:[%s2070_s0 + $0x90] sm:$0xf]  ;;  %v1235_v29 = vld [vmem:[%s2070_s0 + $0xb4] sm:$0xf] }
  0x1e   :  { %444 = vmatpush.bf16.msra.mxu0 %v1261_v17 }
  0x1f   :  { %1420 = vmatpush.bf16.msra.mxu2 %v1261_v17  ;;  %v1248_v17 = vld [vmem:[%s2070_s0 + $0x114] sm:$0xf0] }
  0x20   :  { %v1099_v19 = vor.u32 %v1248_v17, %v1098_v16  ;;  %v1232_v16 = vld [vmem:[%s2070_s0 + $0x94] sm:$0xf0] }
  0x21   :  { %445 = vmatmul.bf16.vlgmr.msra.gmra.mxu0 %v963_v22  ;;  %v1023_v22 = vor.u32 %v1227_v20, %v1020_v21  ;;  %v1256_v20 = vld [vmem:[%s2070_s0 + $0x154] sm:$0xf0] }
  0x22   :  { %505 = vmatmul.bf16.vlgmr.msra.gmra.mxu2 %v1059_v23  ;;  %v1253_v23 = vld [vmem:[%s2070_s0 + $0x144] sm:$0xf] }
  0x23   :  { %v1127_v25 = vor.u32 %v1253_v23, %v1124_v24  ;;  %v1035_v24 = vor.u32 %v1232_v16, %v1034_v15  ;;  %v1260_v16 = vld [vmem:[%s2070_s0 + $0x174] sm:$0xf0] }
  0x26   :  { %1190 = vmatmul.msk.bf16.gmra.mxu1 %vm361_vm0, %v983_v26  ;;  %v1010_v26 = vld [vmem:[%s2070_s0 + $0x60] sm:$0xf] }
  0x27   :  { %v1011_v30 = vor.u32 %v1226_v27, %v1010_v26 }
  0x28   :  { %1204 = vmatmul.msk.bf16.gmra.mxu3 %vm361_vm0, %v1095_v41 }
  0x31   :  { %450 = vmatmul.bf16.gmra.mxu0 %v971_v34  ;;  %v1031_v34 = vor.u32 %v1229_v32, %v1028_v33 }
  0x32   :  { %510 = vmatmul.bf16.gmra.mxu2 %v1067_v35 }
  0x36   :  { %1191 = vmatmul.msk.bf16.gmra.mxu1 %vm361_vm0, %v991_v38  ;;  %v1135_v38 = vor.u32 %v1255_v36, %v1132_v37  ;;  %v1788_v37 = vld [vmem:[%s2070_s0 + $0x180] sm:$0xff] }
  0x37   :  { %v231_v39 = vunpack.c.h.b16 %v1788_v37 }
  0x38   :  { %1205 = vmatmul.msk.bf16.gmra.mxu3 %vm361_vm0, %v1103_v53  ;;  %v1026_v53 = vld [vmem:[%s2070_s0 + $0x80] sm:$0xf] }
  0x41   :  { %455 = vmatmul.bf16.gmra.mxu0 %v979_v46  ;;  %v1231_v46 = vld [vmem:[%s2070_s0 + $0x94] sm:$0xf] }
  0x42   :  { %515 = vmatmul.bf16.gmra.mxu2 %v1075_v47  ;;  %v1036_v47 = vld [vmem:[%s2070_s0 + $0x98] sm:$0xf0] }
  0x43   :  { %v1039_v48 = vor.u32 %v1231_v46, %v1036_v47 }
  0x46   :  { %1192 = vmatmul.msk.bf16.gmra.mxu1 %vm361_vm0, %v999_v50  ;;  %v1257_v50 = vld [vmem:[%s2070_s0 + $0x164] sm:$0xf] }
  0x47   :  { %v1143_v52 = vor.u32 %v1257_v50, %v1140_v51 }
  0x48   :  { %1206 = vmatmul.msk.bf16.gmra.mxu3 %vm361_vm0, %v1111_v1  ;;  %v1728_v1 = vld [vmem:[%s2071_s2] ss:$0 sm:$0xff] }
  0x51   :  { %460 = vmatmul.bf16.gmra.mxu0 %v987_v58  ;;  %v1027_v58 = vor.u32 %v1230_v54, %v1026_v53 }
  0x52   :  { %520 = vmatmul.bf16.gmra.mxu2 %v1083_v59 }
  0x56   :  { %1193 = vmatmul.msk.bf16.gmra.mxu1 %vm361_vm0, %v1007_v62  ;;  %v1233_v62 = vld [vmem:[%s2070_s0 + $0xa4] sm:$0xf] }
  0x57   :  { %v1047_v2 = vor.u32 %v1233_v62, %v1044_v63 }
  0x58   :  { %1207 = vmatmul.msk.bf16.gmra.mxu3 %vm361_vm0, %v1119_v13 }
  0x61   :  { %465 = vmatmul.bf16.gmra.mxu0 %v995_v6 }
  0x62   :  { %525 = vmatmul.bf16.gmra.mxu2 %v1091_v7 }
  0x66   :  { %1194 = vmatmul.msk.bf16.gmra.mxu1 %vm361_vm0, %v1015_v10  ;;  %v1259_v10 = vld [vmem:[%s2070_s0 + $0x174] sm:$0xf] }
  0x67   :  { %v1151_v12 = vor.u32 %v1259_v10, %v1148_v11 }
  0x68   :  { %1208 = vmatmul.msk.bf16.gmra.mxu3 %vm361_vm0, %v1127_v25 }
  0x71   :  { %470 = vmatmul.bf16.gmra.mxu0 %v1003_v18 }
  0x72   :  { %530 = vmatmul.bf16.gmra.mxu2 %v1099_v19  ;;  %v1130_v19 = vld [vmem:[%s2070_s0 + $0x150] sm:$0xf] }
  0x73   :  { %v1131_v27 = vor.u32 %v1256_v20, %v1130_v19 }
  0x76   :  { %1195 = vmatmul.msk.bf16.gmra.mxu1 %vm361_vm0, %v1023_v22 }
  0x78   :  { %1209 = vmatmul.msk.bf16.gmra.mxu3 %vm361_vm0, %v1135_v38 }
  0x81   :  { %475 = vmatmul.bf16.gmra.mxu0 %v1011_v30  ;;  %v1052_v30 = vld [vmem:[%s2070_s0 + $0xb8] sm:$0xf0] }
  0x82   :  { %535 = vmatmul.bf16.gmra.mxu2 %v1107_v31  ;;  %v1055_v32 = vor.u32 %v1235_v29, %v1052_v30  ;;  %v1239_v29 = vld [vmem:[%s2070_s0 + $0xd4] sm:$0xf]  ;;  %v1068_v30 = vld [vmem:[%s2070_s0 + $0xd8] sm:$0xf0] }
  0x83   :  { %v579_v35 = vpop.f32.mrf.mxu1 }
  0x86   :  { %1196 = vmatmul.msk.bf16.gmra.mxu1 %vm361_vm0, %v1031_v34 }
  0x88   :  { %1210 = vmatmul.msk.bf16.gmra.mxu3 %vm361_vm0, %v1143_v52 }
  0x8b   :  { %v581_v41 = vpop.f32.mrf.mxu1  ;;  %v1717_v59 = vpop.f32.mrf.mxu3 }
  0x91   :  { %480 = vmatmul.bf16.gmra.mxu0 %v1019_v44  ;;  %v1042_v44 = vld [vmem:[%s2070_s0 + $0xa0] sm:$0xf] }
  0x92   :  { %540 = vmatmul.bf16.gmra.mxu2 %v1115_v45  ;;  %v1234_v45 = vld [vmem:[%s2070_s0 + $0xa4] sm:$0xf0] }
  0x93   :  { %v584_v49 = vpop.f32.mrf.mxu1  ;;  %v1740_v7 = vpop.f32.mrf.mxu3  ;;  %v1043_v53 = vor.u32 %v1234_v45, %v1042_v44 }
  0x96   :  { %1197 = vmatmul.msk.bf16.gmra.mxu1 %vm361_vm0, %v1039_v48  ;;  %v1138_v48 = vld [vmem:[%s2070_s0 + $0x160] sm:$0xf] }
  0x98   :  { %1211 = vmatmul.msk.bf16.gmra.mxu3 %vm361_vm0, %v1151_v12  ;;  %v1050_v12 = vld [vmem:[%s2070_s0 + $0xb0] sm:$0xf] }
  0x9b   :  { %v586_v55 = vpop.f32.mrf.mxu1  ;;  %v1767_v25 = vpop.f32.mrf.mxu3 }
  0x9e   :  { %v446_v60 = vpop.f32.mrf.mxu0 }
  0x9f   :  { %v580_v0 = vadd.f32 %v579_v35, %v446_v60  ;;  %v1060_v60 = vld [vmem:[%s2070_s0 + $0xc8] sm:$0xf0] }
  0xa1   :  { %485 = vmatmul.bf16.gmra.mxu0 %v1027_v58  ;;  %v707_v4 = vmul.f32 %v1728_v1, %v580_v0  ;;  %v1237_v58 = vld [vmem:[%s2070_s0 + $0xc4] sm:$0xf] }
  0xa2   :  { %545 = vmatmul.bf16.gmra.mxu2 %v1123_v61  ;;  %v1063_v62 = vor.u32 %v1237_v58, %v1060_v60 }
  0xa3   :  { %v1730_v3 = vpop.f32.mrf.mxu1  ;;  %v760_v13 = vadd.f32 %v1736_v5, %v707_v4  ;;  %v1783_v36 = vpop.f32.mrf.mxu3 }
  0xa5   :  { %v1738_v6 = vpop.f32.mrf.mxu2  ;;  %v809_v21 = vmax.f32 %v760_v13, 0.0  ;;  %v1236_v13 = vld [vmem:[%s2070_s0 + $0xb4] sm:$0xf0] }
  0xa6   :  { %1198 = vmatmul.msk.bf16.gmra.mxu1 %vm361_vm0, %v1047_v2  ;;  %v448_v8 = vpop.f32.mrf.mxu0 }
  0xa7   :  { %v582_v9 = vadd.f32 %v581_v41, %v448_v8  ;;  %v281_v41 = vpack.c.b16 %v231_v39, %v231_v39 }
  0xa9   :  { %v708_v14 = vmul.f32 %v1728_v1, %v582_v9  ;;  %1212 = vmatmul.msk.bf16.gmra.mxu3 %vm361_vm0, %v281_v41 }
  0xab   :  { %v761_v17 = vadd.f32 %v1736_v5, %v708_v14  ;;  %v591_v18 = vpop.f32.mrf.mxu1  ;;  %v1812_v54 = vpop.f32.mrf.mxu3 }
  0xad   :  { %v810_v22 = vmax.f32 %v761_v17, 0.0  ;;  %v1765_v23 = vpop.f32.mrf.mxu2 }
  0xae   :  { %v451_v26 = vpop.f32.mrf.mxu0 }
  0xaf   :  { %v1273_v28 = vpack.c.bf16 %v810_v22, %v809_v21  ;;  %v585_v31 = vadd.f32 %v584_v49, %v451_v26  ;;  %v1258_v49 = vld [vmem:[%s2070_s0 + $0x164] sm:$0xf0]  ;;  %v1051_v21 = vor.u32 %v1236_v13, %v1050_v12 }
  0xb0   :  { %v1139_v56 = vor.u32 %v1258_v49, %v1138_v48 }
  0xb1   :  { %1274 = vst [vmem:[%s2073_s4] sm:$0xff] %v1273_v28   ;;  %490 = vmatmul.bf16.gmra.mxu0 %v1035_v24  ;;  %v709_v34 = vmul.f32 %v1728_v1, %v585_v31 }
  0xb2   :  { %550 = vmatmul.bf16.gmra.mxu2 %v1131_v27 }
  0xb3   :  { %v1778_v33 = vpop.f32.mrf.mxu1  ;;  %v762_v42 = vadd.f32 %v1736_v5, %v709_v34  ;;  %v1827_v4 = vpop.f32.mrf.mxu3 }
  0xb5   :  { %v1781_v35 = vpop.f32.mrf.mxu2  ;;  %v811_v50 = vmax.f32 %v762_v42, 0.0 }
  0xb6   :  { %1199 = vmatmul.msk.bf16.gmra.mxu1 %vm361_vm0, %v1055_v32  ;;  %v453_v38 = vpop.f32.mrf.mxu0 }
  0xb7   :  { %v587_v40 = vadd.f32 %v586_v55, %v453_v38  ;;  %v1071_v38 = vor.u32 %v1239_v29, %v1068_v30 }
  0xb9   :  { %v710_v43 = vmul.f32 %v1728_v1, %v587_v40 }
  0xbb   :  { %v763_v46 = vadd.f32 %v1736_v5, %v710_v43  ;;  %v1802_v47 = vpop.f32.mrf.mxu1  ;;  %v1849_v22 = vpop.f32.mrf.mxu3 }
  0xbd   :  { %v812_v51 = vmax.f32 %v763_v46, 0.0  ;;  %v1810_v52 = vpop.f32.mrf.mxu2 }
  0xbe   :  { %v456_v55 = vpop.f32.mrf.mxu0 }
  0xbf   :  { %v1278_v57 = vpack.c.bf16 %v812_v51, %v811_v50  ;;  %v590_v61 = vadd.f32 %v1730_v3, %v456_v55  ;;  %v230_v51 = vunpack.c.l.b16 %v1788_v37 }
  0xc1   :  { %1390 = vst [vmem:[%s2073_s4 + $0x8] sm:$0xff] %v1278_v57   ;;  %495 = vmatmul.bf16.gmra.mxu0 %v1043_v53  ;;  %v711_v0 = vmul.f32 %v1728_v1, %v590_v61 }
  0xc2   :  { %555 = vmatmul.bf16.gmra.mxu2 %v1139_v56 }
  0xc3   :  { %v1824_v63 = vpop.f32.mrf.mxu1  ;;  %v764_v11 = vadd.f32 %v1736_v5, %v711_v0  ;;  %v1866_v44 = vpop.f32.mrf.mxu3 }
  0xc5   :  { %v516_v2 = vpop.f32.mrf.mxu2 }
  0xc6   :  { %1200 = vmatmul.msk.bf16.gmra.mxu1 %vm361_vm0, %v1063_v62  ;;  %v458_v8 = vpop.f32.mrf.mxu0  ;;  %v650_v10 = vadd.f32 %v1717_v59, %v516_v2  ;;  %v1146_v59 = vld [vmem:[%s2070_s0 + $0x170] sm:$0xf] }
  0xc7   :  { %v592_v9 = vadd.f32 %v591_v18, %v458_v8  ;;  %v813_v18 = vmax.f32 %v764_v11, 0.0  ;;  %v1147_v27 = vor.u32 %v1260_v16, %v1146_v59 }
  0xc8   :  { %v735_v17 = vmul.f32 %v1728_v1, %v650_v10 }
  0xc9   :  { %v712_v3 = vmul.f32 %v1728_v1, %v592_v9 }
  0xca   :  { %v788_v31 = vadd.f32 %v1736_v5, %v735_v17 }
  0xcb   :  { %v765_v14 = vadd.f32 %v1736_v5, %v712_v3  ;;  %v1840_v15 = vpop.f32.mrf.mxu1  ;;  %v1879_v60 = vpop.f32.mrf.mxu3 }
  0xcc   :  { %v837_v40 = vmax.f32 %v788_v31, 0.0 }
  0xcd   :  { %v814_v19 = vmax.f32 %v765_v14, 0.0  ;;  %v518_v20 = vpop.f32.mrf.mxu2 }
  0xce   :  { %v652_v24 = vadd.f32 %v1740_v7, %v518_v20  ;;  %v461_v26 = vpop.f32.mrf.mxu0 }
  0xcf   :  { %v1283_v28 = vpack.c.bf16 %v814_v19, %v813_v18  ;;  %v595_v7 = vadd.f32 %v1778_v33, %v461_v26 }
  0xd0   :  { %v736_v32 = vmul.f32 %v1728_v1, %v652_v24 }
  0xd1   :  { %1391 = vst [vmem:[%s2073_s4 + $0x10] sm:$0xff] %v1283_v28   ;;  %500 = vmatmul.bf16.gmra.mxu0 %v1051_v21  ;;  %v713_v42 = vmul.f32 %v1728_v1, %v595_v7 }
  0xd2   :  { %v789_v34 = vadd.f32 %v1736_v5, %v736_v32  ;;  %560 = vmatmul.bf16.gmra.mxu2 %v1147_v27 }
  0xd3   :  { %v604_v39 = vpop.f32.mrf.mxu1  ;;  %v766_v49 = vadd.f32 %v1736_v5, %v713_v42  ;;  %v1890_v13 = vpop.f32.mrf.mxu3 }
  0xd4   :  { %v838_v41 = vmax.f32 %v789_v34, 0.0 }
  0xd5   :  { %v521_v43 = vpop.f32.mrf.mxu2  ;;  %v815_v57 = vmax.f32 %v766_v49, 0.0 }
  0xd6   :  { %v1343_v45 = vpack.c.bf16 %v838_v41, %v837_v40  ;;  %1201 = vmatmul.msk.bf16.gmra.mxu1 %vm361_vm0, %v1071_v38  ;;  %v463_v46 = vpop.f32.mrf.mxu0  ;;  %v655_v33 = vadd.f32 %v1767_v25, %v521_v43  ;;  %v280_v25 = vpack.c.b16 %v230_v51, %v230_v51 }
  0xd7   :  { %v597_v48 = vadd.f32 %v1802_v47, %v463_v46 }
  0xd8   :  { %1403 = vst [vmem:[%s2073_s4 + $0x70] sm:$0xff] %v1343_v45   ;;  %v737_v56 = vmul.f32 %v1728_v1, %v655_v33 }
  0xd9   :  { %v714_v50 = vmul.f32 %v1728_v1, %v597_v48 }
  0xda   :  { %v790_v2 = vadd.f32 %v1736_v5, %v737_v56 }
  0xdb   :  { %v767_v53 = vadd.f32 %v1736_v5, %v714_v50  ;;  %v606_v55 = vpop.f32.mrf.mxu1  ;;  %v1901_v28 = vpop.f32.mrf.mxu3 }
  0xdc   :  { %v839_v11 = vmax.f32 %v790_v2, 0.0 }
  0xdd   :  { %v816_v58 = vmax.f32 %v767_v53, 0.0  ;;  %v523_v47 = vpop.f32.mrf.mxu2 }
  0xde   :  { %v657_v61 = vadd.f32 %v1783_v36, %v523_v47  ;;  %v466_v62 = vpop.f32.mrf.mxu0 }
  0xdf   :  { %v1288_v0 = vpack.c.bf16 %v816_v58, %v815_v57  ;;  %v600_v37 = vadd.f32 %v1824_v63, %v466_v62 }
  0xe0   :  { %v738_v8 = vmul.f32 %v1728_v1, %v657_v61 }
  0xe1   :  { %1392 = vst [vmem:[%s2073_s4 + $0x18] sm:$0xff] %v1288_v0   ;;  %v715_v36 = vmul.f32 %v1728_v1, %v600_v37 }
  0xe2   :  { %v791_v9 = vadd.f32 %v1736_v5, %v738_v8  ;;  %565 = vmatmul.bf16.gmra.mxu2 %v280_v25 }
  0xe3   :  { %v609_v10 = vpop.f32.mrf.mxu1  ;;  %v768_v17 = vadd.f32 %v1736_v5, %v715_v36 }
  0xe4   :  { %v840_v3 = vmax.f32 %v791_v9, 0.0 }
  0xe5   :  { %v526_v12 = vpop.f32.mrf.mxu2  ;;  %v817_v24 = vmax.f32 %v768_v17, 0.0 }
  0xe6   :  { %v1348_v14 = vpack.c.bf16 %v840_v3, %v839_v11  ;;  %v468_v59 = vpop.f32.mrf.mxu0  ;;  %v660_v63 = vadd.f32 %v1812_v54, %v526_v12 }
  0xe7   :  { %v602_v16 = vadd.f32 %v1840_v15, %v468_v59 }
  0xe8   :  { %1404 = vst [vmem:[%s2073_s4 + $0x78] sm:$0xff] %v1348_v14   ;;  %v739_v21 = vmul.f32 %v1728_v1, %v660_v63 }
  0xe9   :  { %v716_v18 = vmul.f32 %v1728_v1, %v602_v16 }
  0xea   :  { %v792_v54 = vadd.f32 %v1736_v5, %v739_v21 }
  0xeb   :  { %v769_v19 = vadd.f32 %v1736_v5, %v716_v18  ;;  %v611_v20 = vpop.f32.mrf.mxu1 }
  0xec   :  { %v841_v38 = vmax.f32 %v792_v54, 0.0 }
  0xed   :  { %v818_v26 = vmax.f32 %v769_v19, 0.0  ;;  %v528_v27 = vpop.f32.mrf.mxu2 }
  0xee   :  { %v662_v15 = vadd.f32 %v1827_v4, %v528_v27  ;;  %v471_v29 = vpop.f32.mrf.mxu0  ;;  %v1911_v4 = vpop.f32.mrf.mxu3 }
  0xef   :  { %v1293_v30 = vpack.c.bf16 %v818_v26, %v817_v24  ;;  %v605_v32 = vadd.f32 %v604_v39, %v471_v29 }
  0xf0   :  { %v740_v31 = vmul.f32 %v1728_v1, %v662_v15 }
  0xf1   :  { %1393 = vst [vmem:[%s2073_s4 + $0x20] sm:$0xff] %v1293_v30   ;;  %v717_v41 = vmul.f32 %v1728_v1, %v605_v32 }
  0xf2   :  { %v793_v7 = vadd.f32 %v1736_v5, %v740_v31 }
  0xf3   :  { %v614_v34 = vpop.f32.mrf.mxu1  ;;  %v770_v39 = vadd.f32 %v1736_v5, %v717_v41 }
  0xf4   :  { %v842_v40 = vmax.f32 %v793_v7, 0.0 }
  0xf5   :  { %v531_v42 = vpop.f32.mrf.mxu2  ;;  %v819_v53 = vmax.f32 %v770_v39, 0.0 }
  0xf6   :  { %v1353_v43 = vpack.c.bf16 %v842_v40, %v841_v38  ;;  %v473_v45 = vpop.f32.mrf.mxu0  ;;  %v665_v48 = vadd.f32 %v1849_v22, %v531_v42  ;;  %v1921_v58 = vpop.f32.mrf.mxu3 }
  0xf7   :  { %v607_v46 = vadd.f32 %v606_v55, %v473_v45 }
  0xf8   :  { %1405 = vst [vmem:[%s2073_s4 + $0x80] sm:$0xff] %v1353_v43   ;;  %v741_v51 = vmul.f32 %v1728_v1, %v665_v48 }
  0xf9   :  { %v718_v33 = vmul.f32 %v1728_v1, %v607_v46 }
  0xfa   :  { %v794_v22 = vadd.f32 %v1736_v5, %v741_v51 }
  0xfb   :  { %v771_v49 = vadd.f32 %v1736_v5, %v718_v33  ;;  %v616_v50 = vpop.f32.mrf.mxu1 }
  0xfc   :  { %v843_v8 = vmax.f32 %v794_v22, 0.0 }
  0xfd   :  { %v820_v56 = vmax.f32 %v771_v49, 0.0  ;;  %v533_v57 = vpop.f32.mrf.mxu2 }
  0xfe   :  { %v667_v55 = vadd.f32 %v1866_v44, %v533_v57  ;;  %v476_v47 = vpop.f32.mrf.mxu0  ;;  %v1931_v44 = vpop.f32.mrf.mxu3 }
  0xff   :  { %v1298_v61 = vpack.c.bf16 %v820_v56, %v819_v53  ;;  %v610_v25 = vadd.f32 %v609_v10, %v476_v47 }
 0x100   :  { %v742_v62 = vmul.f32 %v1728_v1, %v667_v55 }
 0x101   :  { %1394 = vst [vmem:[%s2073_s4 + $0x28] sm:$0xff] %v1298_v61   ;;  %v719_v9 = vmul.f32 %v1728_v1, %v610_v25 }
 0x102   :  { %v795_v0 = vadd.f32 %v1736_v5, %v742_v62 }
 0x103   :  { %v619_v2 = vpop.f32.mrf.mxu1  ;;  %v772_v10 = vadd.f32 %v1736_v5, %v719_v9 }
 0x104   :  { %v844_v37 = vmax.f32 %v795_v0, 0.0 }
 0x105   :  { %v536_v11 = vpop.f32.mrf.mxu2  ;;  %v821_v18 = vmax.f32 %v772_v10, 0.0 }
 0x106   :  { %v1358_v3 = vpack.c.bf16 %v844_v37, %v843_v8  ;;  %v478_v36 = vpop.f32.mrf.mxu0  ;;  %v670_v14 = vadd.f32 %v1879_v60, %v536_v11  ;;  %v1941_v24 = vpop.f32.mrf.mxu3 }
 0x107   :  { %v612_v12 = vadd.f32 %v611_v20, %v478_v36 }
 0x108   :  { %1406 = vst [vmem:[%s2073_s4 + $0x88] sm:$0xff] %v1358_v3   ;;  %v743_v17 = vmul.f32 %v1728_v1, %v670_v14 }
 0x109   :  { %v720_v59 = vmul.f32 %v1728_v1, %v612_v12 }
 0x10a   :  { %v796_v60 = vadd.f32 %v1736_v5, %v743_v17 }
 0x10b   :  { %v773_v16 = vadd.f32 %v1736_v5, %v720_v59  ;;  %v621_v63 = vpop.f32.mrf.mxu1 }
 0x10c   :  { %v845_v31 = vmax.f32 %v796_v60, 0.0 }
 0x10d   :  { %v822_v19 = vmax.f32 %v773_v16, 0.0  ;;  %v538_v21 = vpop.f32.mrf.mxu2 }
 0x10e   :  { %v672_v20 = vadd.f32 %v1890_v13, %v538_v21  ;;  %v481_v26 = vpop.f32.mrf.mxu0  ;;  %v1951_v13 = vpop.f32.mrf.mxu3 }
 0x10f   :  { %v1303_v27 = vpack.c.bf16 %v822_v19, %v821_v18  ;;  %v615_v29 = vadd.f32 %v614_v34, %v481_v26 }
 0x110   :  { %v744_v15 = vmul.f32 %v1728_v1, %v672_v20 }
 0x111   :  { %1395 = vst [vmem:[%s2073_s4 + $0x30] sm:$0xff] %v1303_v27   ;;  %v721_v7 = vmul.f32 %v1728_v1, %v615_v29 }
 0x112   :  { %v797_v30 = vadd.f32 %v1736_v5, %v744_v15 }
 0x113   :  { %v624_v54 = vpop.f32.mrf.mxu1  ;;  %v774_v34 = vadd.f32 %v1736_v5, %v721_v7 }
 0x114   :  { %v846_v32 = vmax.f32 %v797_v30, 0.0 }
 0x115   :  { %v541_v38 = vpop.f32.mrf.mxu2  ;;  %v823_v33 = vmax.f32 %v774_v34, 0.0 }
 0x116   :  { %v1363_v40 = vpack.c.bf16 %v846_v32, %v845_v31  ;;  %v483_v41 = vpop.f32.mrf.mxu0  ;;  %v675_v43 = vadd.f32 %v1901_v28, %v541_v38  ;;  %v1961_v53 = vpop.f32.mrf.mxu3 }
 0x117   :  { %v617_v42 = vadd.f32 %v616_v50, %v483_v41 }
 0x118   :  { %1407 = vst [vmem:[%s2073_s4 + $0x90] sm:$0xff] %v1363_v40   ;;  %v745_v39 = vmul.f32 %v1728_v1, %v675_v43 }
 0x119   :  { %v722_v45 = vmul.f32 %v1728_v1, %v617_v42 }
 0x11a   :  { %v798_v28 = vadd.f32 %v1736_v5, %v745_v39 }
 0x11b   :  { %v775_v46 = vadd.f32 %v1736_v5, %v722_v45  ;;  %v626_v48 = vpop.f32.mrf.mxu1 }
 0x11c   :  { %v847_v62 = vmax.f32 %v798_v28, 0.0 }
 0x11d   :  { %v824_v49 = vmax.f32 %v775_v46, 0.0  ;;  %v543_v51 = vpop.f32.mrf.mxu2 }
 0x11e   :  { %v677_v50 = vadd.f32 %v1911_v4, %v543_v51  ;;  %v486_v56 = vpop.f32.mrf.mxu0  ;;  %v1971_v4 = vpop.f32.mrf.mxu3 }
 0x11f   :  { %v1308_v57 = vpack.c.bf16 %v824_v49, %v823_v33  ;;  %v620_v47 = vadd.f32 %v619_v2, %v486_v56 }
 0x120   :  { %v746_v55 = vmul.f32 %v1728_v1, %v677_v50 }
 0x121   :  { %1396 = vst [vmem:[%s2073_s4 + $0x38] sm:$0xff] %v1308_v57   ;;  %v723_v0 = vmul.f32 %v1728_v1, %v620_v47 }
 0x122   :  { %v799_v61 = vadd.f32 %v1736_v5, %v746_v55 }
 0x123   :  { %v629_v22 = vpop.f32.mrf.mxu1  ;;  %v776_v2 = vadd.f32 %v1736_v5, %v723_v0 }
 0x124   :  { %v848_v25 = vmax.f32 %v799_v61, 0.0 }
 0x125   :  { %v546_v8 = vpop.f32.mrf.mxu2  ;;  %v825_v59 = vmax.f32 %v776_v2, 0.0 }
 0x126   :  { %v1368_v37 = vpack.c.bf16 %v848_v25, %v847_v62  ;;  %v488_v9 = vpop.f32.mrf.mxu0  ;;  %v680_v3 = vadd.f32 %v1921_v58, %v546_v8  ;;  %v1981_v18 = vpop.f32.mrf.mxu3 }
 0x127   :  { %v622_v11 = vadd.f32 %v621_v63, %v488_v9 }
 0x128   :  { %1408 = vst [vmem:[%s2073_s4 + $0x98] sm:$0xff] %v1368_v37   ;;  %v747_v10 = vmul.f32 %v1728_v1, %v680_v3 }
 0x129   :  { %v724_v36 = vmul.f32 %v1728_v1, %v622_v11 }
 0x12a   :  { %v800_v58 = vadd.f32 %v1736_v5, %v747_v10 }
 0x12b   :  { %v777_v12 = vadd.f32 %v1736_v5, %v724_v36  ;;  %v631_v14 = vpop.f32.mrf.mxu1 }
 0x12c   :  { %v849_v15 = vmax.f32 %v800_v58, 0.0 }
 0x12d   :  { %v826_v16 = vmax.f32 %v777_v12, 0.0  ;;  %v548_v17 = vpop.f32.mrf.mxu2 }
 0x12e   :  { %v682_v63 = vadd.f32 %v1931_v44, %v548_v17  ;;  %v491_v19 = vpop.f32.mrf.mxu0  ;;  %v1991_v44 = vpop.f32.mrf.mxu3 }
 0x12f   :  { %v1313_v21 = vpack.c.bf16 %v826_v16, %v825_v59  ;;  %v625_v26 = vadd.f32 %v624_v54, %v491_v19 }
 0x130   :  { %v748_v20 = vmul.f32 %v1728_v1, %v682_v63 }
 0x131   :  { %1397 = vst [vmem:[%s2073_s4 + $0x40] sm:$0xff] %v1313_v21   ;;  %v725_v30 = vmul.f32 %v1728_v1, %v625_v26 }
 0x132   :  { %v801_v27 = vadd.f32 %v1736_v5, %v748_v20 }
 0x133   :  { %v634_v60 = vpop.f32.mrf.mxu1  ;;  %v778_v54 = vadd.f32 %v1736_v5, %v725_v30 }
 0x134   :  { %v850_v29 = vmax.f32 %v801_v27, 0.0 }
 0x135   :  { %v551_v31 = vpop.f32.mrf.mxu2  ;;  %v827_v45 = vmax.f32 %v778_v54, 0.0 }
 0x136   :  { %v1373_v32 = vpack.c.bf16 %v850_v29, %v849_v15  ;;  %v493_v7 = vpop.f32.mrf.mxu0  ;;  %v685_v40 = vadd.f32 %v1941_v24, %v551_v31  ;;  %v2001_v33 = vpop.f32.mrf.mxu3 }
 0x137   :  { %v627_v38 = vadd.f32 %v626_v48, %v493_v7 }
 0x138   :  { %1409 = vst [vmem:[%s2073_s4 + $0xa0] sm:$0xff] %v1373_v32   ;;  %v749_v34 = vmul.f32 %v1728_v1, %v685_v40 }
 0x139   :  { %v726_v41 = vmul.f32 %v1728_v1, %v627_v38 }
 0x13a   :  { %v802_v24 = vadd.f32 %v1736_v5, %v749_v34 }
 0x13b   :  { %v779_v42 = vadd.f32 %v1736_v5, %v726_v41  ;;  %v636_v43 = vpop.f32.mrf.mxu1 }
 0x13c   :  { %v851_v55 = vmax.f32 %v802_v24, 0.0 }
 0x13d   :  { %v828_v46 = vmax.f32 %v779_v42, 0.0  ;;  %v553_v39 = vpop.f32.mrf.mxu2 }
 0x13e   :  { %v687_v48 = vadd.f32 %v1951_v13, %v553_v39  ;;  %v496_v49 = vpop.f32.mrf.mxu0  ;;  %v701_v13 = vpop.f32.mrf.mxu3 }
 0x13f   :  { %v1318_v51 = vpack.c.bf16 %v828_v46, %v827_v45  ;;  %v630_v56 = vadd.f32 %v629_v22, %v496_v49 }
 0x140   :  { %v750_v50 = vmul.f32 %v1728_v1, %v687_v48 }
 0x141   :  { %1398 = vst [vmem:[%s2073_s4 + $0x48] sm:$0xff] %v1318_v51   ;;  %v727_v61 = vmul.f32 %v1728_v1, %v630_v56 }
 0x142   :  { %v803_v57 = vadd.f32 %v1736_v5, %v750_v50 }
 0x143   :  { %v639_v28 = vpop.f32.mrf.mxu1  ;;  %v780_v9 = vadd.f32 %v1736_v5, %v727_v61 }
 0x144   :  { %v852_v47 = vmax.f32 %v803_v57, 0.0  ;;  %v640_v0 = vadd.f32 %v639_v28, %v1738_v6 }
 0x145   :  { %v556_v62 = vpop.f32.mrf.mxu2 }
 0x146   :  { %v1378_v25 = vpack.c.bf16 %v852_v47, %v851_v55  ;;  %v498_v8 = vpop.f32.mrf.mxu0  ;;  %v690_v22 = vadd.f32 %v1961_v53, %v556_v62  ;;  %v731_v3 = vmul.f32 %v1728_v1, %v640_v0 }
 0x147   :  { %v632_v37 = vadd.f32 %v631_v14, %v498_v8  ;;  %v829_v14 = vmax.f32 %v780_v9, 0.0 }
 0x148   :  { %1410 = vst [vmem:[%s2073_s4 + $0xa8] sm:$0xff] %v1378_v25   ;;  %v751_v12 = vmul.f32 %v1728_v1, %v690_v22  ;;  %v784_v16 = vadd.f32 %v1736_v5, %v731_v3 }
 0x149   :  { %v728_v11 = vmul.f32 %v1728_v1, %v632_v37 }
 0x14a   :  { %v804_v21 = vadd.f32 %v1736_v5, %v751_v12  ;;  %v833_v26 = vmax.f32 %v784_v16, 0.0 }
 0x14b   :  { %v781_v2 = vadd.f32 %v1736_v5, %v728_v11  ;;  %v641_v36 = vpop.f32.mrf.mxu1 }
 0x14c   :  { %v642_v6 = vadd.f32 %v641_v36, %v1765_v23  ;;  %v853_v30 = vmax.f32 %v804_v21, 0.0 }
 0x14d   :  { %v830_v10 = vmax.f32 %v781_v2, 0.0  ;;  %v558_v59 = vpop.f32.mrf.mxu2 }
 0x14e   :  { %v732_v53 = vmul.f32 %v1728_v1, %v642_v6  ;;  %v692_v17 = vadd.f32 %v1971_v4, %v558_v59  ;;  %v501_v63 = vpop.f32.mrf.mxu0 }
 0x14f   :  { %v1323_v19 = vpack.c.bf16 %v830_v10, %v829_v14  ;;  %v635_v23 = vadd.f32 %v634_v60, %v501_v63 }
 0x150   :  { %v785_v58 = vadd.f32 %v1736_v5, %v732_v53  ;;  %v752_v20 = vmul.f32 %v1728_v1, %v692_v17 }
 0x151   :  { %1399 = vst [vmem:[%s2073_s4 + $0x50] sm:$0xff] %v1323_v19   ;;  %v729_v32 = vmul.f32 %v1728_v1, %v635_v23 }
 0x152   :  { %v834_v27 = vmax.f32 %v785_v58, 0.0  ;;  %v805_v15 = vadd.f32 %v1736_v5, %v752_v20 }
 0x153   :  { %v644_v29 = vpop.f32.mrf.mxu1  ;;  %v782_v42 = vadd.f32 %v1736_v5, %v729_v32 }
 0x154   :  { %v1333_v4 = vpack.c.bf16 %v834_v27, %v833_v26  ;;  %v854_v31 = vmax.f32 %v805_v15, 0.0  ;;  %v645_v40 = vadd.f32 %v644_v29, %v1781_v35 }
 0x155   :  { %v561_v7 = vpop.f32.mrf.mxu2 }
 0x156   :  { %1401 = vst [vmem:[%s2073_s4 + $0x60] sm:$0xff] %v1333_v4   ;;  %v1383_v38 = vpack.c.bf16 %v854_v31, %v853_v30  ;;  %v503_v54 = vpop.f32.mrf.mxu0  ;;  %v695_v41 = vadd.f32 %v1981_v18, %v561_v7  ;;  %v733_v45 = vmul.f32 %v1728_v1, %v645_v40 }
 0x157   :  { %v637_v60 = vadd.f32 %v636_v43, %v503_v54  ;;  %v831_v43 = vmax.f32 %v782_v42, 0.0 }
 0x158   :  { %1411 = vst [vmem:[%s2073_s4 + $0xb0] sm:$0xff] %v1383_v38   ;;  %v753_v48 = vmul.f32 %v1728_v1, %v695_v41  ;;  %v786_v24 = vadd.f32 %v1736_v5, %v733_v45 }
 0x159   :  { %v730_v34 = vmul.f32 %v1728_v1, %v637_v60 }
 0x15a   :  { %v806_v57 = vadd.f32 %v1736_v5, %v753_v48 }
 0x15b   :  { %v783_v46 = vadd.f32 %v1736_v5, %v730_v34  ;;  %v646_v39 = vpop.f32.mrf.mxu1 }
 0x15c   :  { %v647_v35 = vadd.f32 %v646_v39, %v1810_v52  ;;  %v835_v52 = vmax.f32 %v786_v24, 0.0  ;;  %v855_v62 = vmax.f32 %v806_v57, 0.0 }
 0x15d   :  { %v832_v49 = vmax.f32 %v783_v46, 0.0  ;;  %v563_v51 = vpop.f32.mrf.mxu2 }
 0x15e   :  { %v734_v18 = vmul.f32 %v1728_v1, %v647_v35  ;;  %v697_v50 = vadd.f32 %v1991_v44, %v563_v51 }
 0x15f   :  { %v1328_v56 = vpack.c.bf16 %v832_v49, %v831_v43 }
 0x160   :  { %v787_v28 = vadd.f32 %v1736_v5, %v734_v18  ;;  %v754_v55 = vmul.f32 %v1728_v1, %v697_v50 }
 0x161   :  { %1400 = vst [vmem:[%s2073_s4 + $0x58] sm:$0xff] %v1328_v56  }
 0x162   :  { %v836_v47 = vmax.f32 %v787_v28, 0.0  ;;  %v807_v61 = vadd.f32 %v1736_v5, %v754_v55 }
 0x164   :  { %v1338_v13 = vpack.c.bf16 %v836_v47, %v835_v52  ;;  %v856_v25 = vmax.f32 %v807_v61, 0.0 }
 0x165   :  { %v566_v0 = vpop.f32.mrf.mxu2 }
 0x166   :  { %1402 = vst [vmem:[%s2073_s4 + $0x68] sm:$0xff] %v1338_v13   ;;  %v1388_v44 = vpack.c.bf16 %v856_v25, %v855_v62  ;;  %v700_v8 = vadd.f32 %v2001_v33, %v566_v0 }
 0x168   :  { %1412 = vst [vmem:[%s2073_s4 + $0xb8] sm:$0xff] %v1388_v44   ;;  %v755_v37 = vmul.f32 %v1728_v1, %v700_v8 }
 0x16a   :  { %v808_v22 = vadd.f32 %v1736_v5, %v755_v37 }
 0x16c   :  { %v857_v9 = vmax.f32 %v808_v22, 0.0 }
 0x16d   :  { %v568_v11 = vpop.f32.mrf.mxu2 }
 0x16e   :  { %v906_v3 = vpack.c.bf16 %v857_v9, %v857_v9 }
 0x170   :  { %955 = vst [vmem:[%s2073_s4 + $0xc0] sm:$0xf] %v906_v3 }

// kernel: cnn_ex_forward.7
= control target key start
LH: loop header
LB: loop body
LE: loop exit
PB: predicated region body
PF: predicated region fallthrough
CT: control target
= control target key end

     0   :  { %s15617_s0 = inlined_call_operand.vmem [shape: bf16[2,3136], index: 0, kind: input, shape index: {}]   ;;  %s15618_s1 = inlined_call_operand.vmem [shape: bf16[3136,512], index: 1, kind: input, shape index: {}]   ;;  %s15619_s2 = inlined_call_operand.vmem [shape: f32[1,512], index: 2, kind: input, shape index: {}]   ;;  %s15620_s3 = inlined_call_operand.vmem [shape: bf16[512,128], index: 3, kind: input, shape index: {}]   ;;  %s15621_s4 = inlined_call_operand.vmem [shape: f32[1,128], index: 4, kind: input, shape index: {}]   ;;  %s15622_s5 = inlined_call_operand.hbm [shape: f32[2,128], index: 5, kind: output, shape index: {}]  }
   0x1   :  { %v6547_v0 = vld [vmem:[%s15618_s1 + $0xe0] sm:$0xf]  ;;  %v9731_v1 = vld [vmem:[%s15618_s1 + $0xec] sm:$0xf0] }
   0x2   :  { %v6675_v2 = vld [vmem:[%s15618_s1 + $0x1e0] sm:$0xf]  ;;  %v6548_v3 = vor.u32 %v9731_v1, %v6547_v0  ;;  %v9763_v4 = vld [vmem:[%s15618_s1 + $0x1ec] sm:$0xf0] }
   0x3   :  { %v6803_v5 = vld [vmem:[%s15618_s1 + $0x2e0] sm:$0xf]  ;;  %v9795_v6 = vld [vmem:[%s15618_s1 + $0x2ec] sm:$0xf0]  ;;  %v6676_v7 = vor.u32 %v9763_v4, %v6675_v2 }
   0x4   :  { %v6804_v8 = vor.u32 %v9795_v6, %v6803_v5  ;;  %v6931_v9 = vld [vmem:[%s15618_s1 + $0x3e0] sm:$0xf]  ;;  %v9827_v10 = vld [vmem:[%s15618_s1 + $0x3ec] sm:$0xf0]  ;;  %4800 = vmatpush.bf16.msra.mxu0 %v6548_v3 }
   0x5   :  { %v6531_v11 = vld [vmem:[%s15618_s1 + $0xc0] sm:$0xf]  ;;  %v6932_v12 = vor.u32 %v9827_v10, %v6931_v9  ;;  %v9727_v13 = vld [vmem:[%s15618_s1 + $0xcc] sm:$0xf0]  ;;  %4813 = vmatpush.bf16.msra.mxu1 %v6676_v7 }
   0x6   :  { %v6659_v14 = vld [vmem:[%s15618_s1 + $0x1c0] sm:$0xf]  ;;  %v9759_v15 = vld [vmem:[%s15618_s1 + $0x1cc] sm:$0xf0]  ;;  %4826 = vmatpush.bf16.msra.mxu2 %v6804_v8  ;;  %v6532_v16 = vor.u32 %v9727_v13, %v6531_v11 }
   0x7   :  { %v6660_v17 = vor.u32 %v9759_v15, %v6659_v14  ;;  %v6787_v18 = vld [vmem:[%s15618_s1 + $0x2c0] sm:$0xf]  ;;  %v9791_v19 = vld [vmem:[%s15618_s1 + $0x2cc] sm:$0xf0]  ;;  %4839 = vmatpush.bf16.msra.mxu3 %v6932_v12 }
   0x8   :  { %v6915_v20 = vld [vmem:[%s15618_s1 + $0x3c0] sm:$0xf]  ;;  %v6788_v21 = vor.u32 %v9791_v19, %v6787_v18  ;;  %v9823_v22 = vld [vmem:[%s15618_s1 + $0x3cc] sm:$0xf0]  ;;  %4801 = vmatpush.bf16.msra.mxu0 %v6532_v16 }
   0x9   :  { %v6515_v23 = vld [vmem:[%s15618_s1 + $0xa0] sm:$0xf]  ;;  %v9723_v24 = vld [vmem:[%s15618_s1 + $0xac] sm:$0xf0]  ;;  %v6916_v25 = vor.u32 %v9823_v22, %v6915_v20  ;;  %4814 = vmatpush.bf16.msra.mxu1 %v6660_v17 }
   0xa   :  { %v6643_v26 = vld [vmem:[%s15618_s1 + $0x1a0] sm:$0xf]  ;;  %v9755_v27 = vld [vmem:[%s15618_s1 + $0x1ac] sm:$0xf0]  ;;  %v6516_v29 = vor.u32 %v9723_v24, %v6515_v23  ;;  %4827 = vmatpush.bf16.msra.mxu2 %v6788_v21 }
   0xb   :  { %v6771_v28 = vld [vmem:[%s15618_s1 + $0x2a0] sm:$0xf]  ;;  %v9787_v30 = vld [vmem:[%s15618_s1 + $0x2ac] sm:$0xf0]  ;;  %v6644_v33 = vor.u32 %v9755_v27, %v6643_v26  ;;  %4840 = vmatpush.bf16.msra.mxu3 %v6916_v25 }
   0xc   :  { %v6899_v31 = vld [vmem:[%s15618_s1 + $0x3a0] sm:$0xf]  ;;  %v9819_v32 = vld [vmem:[%s15618_s1 + $0x3ac] sm:$0xf0]  ;;  %v6772_v34 = vor.u32 %v9787_v30, %v6771_v28  ;;  %4802 = vmatpush.bf16.msra.mxu0 %v6516_v29 }
   0xd   :  { %v6499_v35 = vld [vmem:[%s15618_s1 + $0x80] sm:$0xf]  ;;  %v9719_v36 = vld [vmem:[%s15618_s1 + $0x8c] sm:$0xf0]  ;;  %v6900_v38 = vor.u32 %v9819_v32, %v6899_v31  ;;  %4815 = vmatpush.bf16.msra.mxu1 %v6644_v33 }
   0xe   :  { %v6627_v37 = vld [vmem:[%s15618_s1 + $0x180] sm:$0xf]  ;;  %v9751_v39 = vld [vmem:[%s15618_s1 + $0x18c] sm:$0xf0]  ;;  %v6500_v44 = vor.u32 %v9719_v36, %v6499_v35  ;;  %4828 = vmatpush.bf16.msra.mxu2 %v6772_v34 }
   0xf   :  { %v6755_v40 = vld [vmem:[%s15618_s1 + $0x280] sm:$0xf]  ;;  %v9783_v41 = vld [vmem:[%s15618_s1 + $0x28c] sm:$0xf0]  ;;  %v6628_v45 = vor.u32 %v9751_v39, %v6627_v37  ;;  %4841 = vmatpush.bf16.msra.mxu3 %v6900_v38 }
  0x10   :  { %v6883_v42 = vld [vmem:[%s15618_s1 + $0x380] sm:$0xf]  ;;  %v9815_v43 = vld [vmem:[%s15618_s1 + $0x38c] sm:$0xf0]  ;;  %v6756_v46 = vor.u32 %v9783_v41, %v6755_v40  ;;  %4803 = vmatpush.bf16.msra.mxu0 %v6500_v44 }
  0x11   :  { %v6483_v47 = vld [vmem:[%s15618_s1 + $0x60] sm:$0xf]  ;;  %v9715_v48 = vld [vmem:[%s15618_s1 + $0x6c] sm:$0xf0]  ;;  %v6884_v50 = vor.u32 %v9815_v43, %v6883_v42  ;;  %4816 = vmatpush.bf16.msra.mxu1 %v6628_v45 }
  0x12   :  { %v6611_v49 = vld [vmem:[%s15618_s1 + $0x160] sm:$0xf]  ;;  %v9747_v51 = vld [vmem:[%s15618_s1 + $0x16c] sm:$0xf0]  ;;  %v6484_v56 = vor.u32 %v9715_v48, %v6483_v47  ;;  %4829 = vmatpush.bf16.msra.mxu2 %v6756_v46 }
  0x13   :  { %v6739_v52 = vld [vmem:[%s15618_s1 + $0x260] sm:$0xf]  ;;  %v9779_v53 = vld [vmem:[%s15618_s1 + $0x26c] sm:$0xf0]  ;;  %v6612_v57 = vor.u32 %v9747_v51, %v6611_v49  ;;  %4842 = vmatpush.bf16.msra.mxu3 %v6884_v50 }
  0x14   :  { %v6867_v54 = vld [vmem:[%s15618_s1 + $0x360] sm:$0xf]  ;;  %v9811_v55 = vld [vmem:[%s15618_s1 + $0x36c] sm:$0xf0]  ;;  %v6740_v58 = vor.u32 %v9779_v53, %v6739_v52  ;;  %4804 = vmatpush.bf16.msra.mxu0 %v6484_v56 }
  0x15   :  { %v6467_v59 = vld [vmem:[%s15618_s1 + $0x40] sm:$0xf]  ;;  %v9711_v60 = vld [vmem:[%s15618_s1 + $0x4c] sm:$0xf0]  ;;  %v6868_v62 = vor.u32 %v9811_v55, %v6867_v54  ;;  %4817 = vmatpush.bf16.msra.mxu1 %v6612_v57 }
  0x16   :  { %v6595_v61 = vld [vmem:[%s15618_s1 + $0x140] sm:$0xf]  ;;  %v9743_v63 = vld [vmem:[%s15618_s1 + $0x14c] sm:$0xf0]  ;;  %v6468_v4 = vor.u32 %v9711_v60, %v6467_v59  ;;  %4830 = vmatpush.bf16.msra.mxu2 %v6740_v58 }
  0x17   :  { %v6723_v0 = vld [vmem:[%s15618_s1 + $0x240] sm:$0xf]  ;;  %v9775_v1 = vld [vmem:[%s15618_s1 + $0x24c] sm:$0xf0]  ;;  %v6596_v5 = vor.u32 %v9743_v63, %v6595_v61  ;;  %4843 = vmatpush.bf16.msra.mxu3 %v6868_v62 }
  0x18   :  { %v6851_v2 = vld [vmem:[%s15618_s1 + $0x340] sm:$0xf]  ;;  %v9807_v3 = vld [vmem:[%s15618_s1 + $0x34c] sm:$0xf0]  ;;  %v6724_v6 = vor.u32 %v9775_v1, %v6723_v0  ;;  %4805 = vmatpush.bf16.msra.mxu0 %v6468_v4 }
  0x19   :  { %v6451_v7 = vld [vmem:[%s15618_s1 + $0x20] sm:$0xf]  ;;  %v9707_v8 = vld [vmem:[%s15618_s1 + $0x2c] sm:$0xf0]  ;;  %v6852_v10 = vor.u32 %v9807_v3, %v6851_v2  ;;  %4818 = vmatpush.bf16.msra.mxu1 %v6596_v5 }
  0x1a   :  { %v6579_v9 = vld [vmem:[%s15618_s1 + $0x120] sm:$0xf]  ;;  %v9739_v11 = vld [vmem:[%s15618_s1 + $0x12c] sm:$0xf0]  ;;  %v6452_v16 = vor.u32 %v9707_v8, %v6451_v7  ;;  %4831 = vmatpush.bf16.msra.mxu2 %v6724_v6 }
  0x1b   :  { %v6707_v12 = vld [vmem:[%s15618_s1 + $0x220] sm:$0xf]  ;;  %v9771_v13 = vld [vmem:[%s15618_s1 + $0x22c] sm:$0xf0]  ;;  %v6580_v19 = vor.u32 %v9739_v11, %v6579_v9  ;;  %4844 = vmatpush.bf16.msra.mxu3 %v6852_v10 }
  0x1c   :  { %v6835_v14 = vld [vmem:[%s15618_s1 + $0x320] sm:$0xf]  ;;  %v9803_v15 = vld [vmem:[%s15618_s1 + $0x32c] sm:$0xf0]  ;;  %v6708_v20 = vor.u32 %v9771_v13, %v6707_v12  ;;  %4806 = vmatpush.bf16.msra.mxu0 %v6452_v16 }
  0x1d   :  { %v6435_v17 = vld [vmem:[%s15618_s1] sm:$0xf]  ;;  %v9703_v18 = vld [vmem:[%s15618_s1 + $0xc] sm:$0xf0]  ;;  %v6836_v24 = vor.u32 %v9803_v15, %v6835_v14  ;;  %4819 = vmatpush.bf16.msra.mxu1 %v6580_v19 }
  0x1e   :  { %v6563_v21 = vld [vmem:[%s15618_s1 + $0x100] sm:$0xf]  ;;  %v9735_v22 = vld [vmem:[%s15618_s1 + $0x10c] sm:$0xf0]  ;;  %v6436_v31 = vor.u32 %v9703_v18, %v6435_v17  ;;  %4832 = vmatpush.bf16.msra.mxu2 %v6708_v20 }
  0x1f   :  { %v6691_v23 = vld [vmem:[%s15618_s1 + $0x200] sm:$0xf]  ;;  %v9767_v25 = vld [vmem:[%s15618_s1 + $0x20c] sm:$0xf0]  ;;  %v6564_v35 = vor.u32 %v9735_v22, %v6563_v21  ;;  %4845 = vmatpush.bf16.msra.mxu3 %v6836_v24 }
  0x20   :  { %v6819_v26 = vld [vmem:[%s15618_s1 + $0x300] sm:$0xf]  ;;  %v9799_v27 = vld [vmem:[%s15618_s1 + $0x30c] sm:$0xf0]  ;;  %v6692_v36 = vor.u32 %v9767_v25, %v6691_v23  ;;  %4807 = vmatpush.bf16.msra.mxu0 %v6436_v31 }
  0x21   :  { %v7059_v28 = vld [vmem:[%s15618_s1 + $0x4e0] sm:$0xf]  ;;  %v9859_v29 = vld [vmem:[%s15618_s1 + $0x4ec] sm:$0xf0]  ;;  %v6820_v39 = vor.u32 %v9799_v27, %v6819_v26  ;;  %4820 = vmatpush.bf16.msra.mxu1 %v6564_v35 }
  0x22   :  { %v7187_v30 = vld [vmem:[%s15618_s1 + $0x5e0] sm:$0xf]  ;;  %v9891_v32 = vld [vmem:[%s15618_s1 + $0x5ec] sm:$0xf0]  ;;  %v7060_v40 = vor.u32 %v9859_v29, %v7059_v28  ;;  %4833 = vmatpush.bf16.msra.mxu2 %v6692_v36 }
  0x23   :  { %v7315_v33 = vld [vmem:[%s15618_s1 + $0x6e0] sm:$0xf]  ;;  %v9923_v34 = vld [vmem:[%s15618_s1 + $0x6ec] sm:$0xf0]  ;;  %v7188_v41 = vor.u32 %v9891_v32, %v7187_v30  ;;  %4846 = vmatpush.bf16.msra.mxu3 %v6820_v39 }
  0x24   :  { %v7443_v37 = vld [vmem:[%s15618_s1 + $0x7e0] sm:$0xf]  ;;  %v9955_v38 = vld [vmem:[%s15618_s1 + $0x7ec] sm:$0xf0]  ;;  %v7316_v42 = vor.u32 %v9923_v34, %v7315_v33  ;;  %4852 = vmatpush.bf16.msrb.mxu0 %v7060_v40 }
  0x25   :  { %v7043_v43 = vld [vmem:[%s15618_s1 + $0x4c0] sm:$0xf]  ;;  %v9855_v44 = vld [vmem:[%s15618_s1 + $0x4cc] sm:$0xf0]  ;;  %v7444_v46 = vor.u32 %v9955_v38, %v7443_v37  ;;  %4865 = vmatpush.bf16.msrb.mxu1 %v7188_v41 }
  0x26   :  { %v7171_v45 = vld [vmem:[%s15618_s1 + $0x5c0] sm:$0xf]  ;;  %v9887_v47 = vld [vmem:[%s15618_s1 + $0x5cc] sm:$0xf0]  ;;  %v7044_v52 = vor.u32 %v9855_v44, %v7043_v43  ;;  %4878 = vmatpush.bf16.msrb.mxu2 %v7316_v42 }
  0x27   :  { %v7299_v48 = vld [vmem:[%s15618_s1 + $0x6c0] sm:$0xf]  ;;  %v9919_v49 = vld [vmem:[%s15618_s1 + $0x6cc] sm:$0xf0]  ;;  %v7172_v55 = vor.u32 %v9887_v47, %v7171_v45  ;;  %4891 = vmatpush.bf16.msrb.mxu3 %v7444_v46 }
  0x28   :  { %v7427_v50 = vld [vmem:[%s15618_s1 + $0x7c0] sm:$0xf]  ;;  %v9951_v51 = vld [vmem:[%s15618_s1 + $0x7cc] sm:$0xf0]  ;;  %v7300_v56 = vor.u32 %v9919_v49, %v7299_v48  ;;  %4853 = vmatpush.bf16.msrb.mxu0 %v7044_v52 }
  0x29   :  { %v7027_v53 = vld [vmem:[%s15618_s1 + $0x4a0] sm:$0xf]  ;;  %v9851_v54 = vld [vmem:[%s15618_s1 + $0x4ac] sm:$0xf0]  ;;  %v7428_v60 = vor.u32 %v9951_v51, %v7427_v50  ;;  %4866 = vmatpush.bf16.msrb.mxu1 %v7172_v55 }
  0x2a   :  { %v7155_v57 = vld [vmem:[%s15618_s1 + $0x5a0] sm:$0xf]  ;;  %v9883_v58 = vld [vmem:[%s15618_s1 + $0x5ac] sm:$0xf0]  ;;  %v7028_v1 = vor.u32 %v9851_v54, %v7027_v53  ;;  %4879 = vmatpush.bf16.msrb.mxu2 %v7300_v56 }
  0x2b   :  { %v22_v59 = vld [vmem:[%s15617_s0] sm:$0xff]  ;;  %v9915_v62 = vld [vmem:[%s15618_s1 + $0x6ac] sm:$0xf0]  ;;  %v7156_v2 = vor.u32 %v9883_v58, %v7155_v57  ;;  %4892 = vmatpush.bf16.msrb.mxu3 %v7428_v60 }
  0x2c   :  { %v7283_v61 = vld [vmem:[%s15618_s1 + $0x6a0] sm:$0xf]  ;;  %821 = vst [vmem:[#allocation1] ss:$9 sm:$0xff] %v22_v59  ;;  %v9947_v0 = vld [vmem:[%s15618_s1 + $0x7ac] sm:$0xf0]  ;;  %4854 = vmatpush.bf16.msrb.mxu0 %v7028_v1 }
  0x2d   :  { %v7411_v63 = vld [vmem:[%s15618_s1 + $0x7a0] sm:$0xf]  ;;  %v7284_v3 = vor.u32 %v9915_v62, %v7283_v61  ;;  %v9847_v5 = vld [vmem:[%s15618_s1 + $0x48c] sm:$0xf0]  ;;  %4867 = vmatpush.bf16.msrb.mxu1 %v7156_v2  ;;  %v23_v61 = vld [vmem:[%s15617_s0 + $0x8] sm:$0xff] }
  0x2e   :  { %v7011_v4 = vld [vmem:[%s15618_s1 + $0x480] sm:$0xf]  ;;  %v7412_v7 = vor.u32 %v9947_v0, %v7411_v63  ;;  %v9879_v8 = vld [vmem:[%s15618_s1 + $0x58c] sm:$0xf0] }
  0x2f   :  { %v7139_v6 = vld [vmem:[%s15618_s1 + $0x580] sm:$0xf]  ;;  %v9911_v10 = vld [vmem:[%s15618_s1 + $0x68c] sm:$0xf0]  ;;  %v7012_v14 = vor.u32 %v9847_v5, %v7011_v4  ;;  %4880 = vmatpush.bf16.msrb.mxu2 %v7284_v3 }
  0x30   :  { %v7267_v9 = vld [vmem:[%s15618_s1 + $0x680] sm:$0xf]  ;;  %v9943_v12 = vld [vmem:[%s15618_s1 + $0x78c] sm:$0xf0]  ;;  %v7140_v18 = vor.u32 %v9879_v8, %v7139_v6  ;;  %4893 = vmatpush.bf16.msrb.mxu3 %v7412_v7 }
  0x31   :  { %v7395_v11 = vld [vmem:[%s15618_s1 + $0x780] sm:$0xf]  ;;  %v9843_v15 = vld [vmem:[%s15618_s1 + $0x46c] sm:$0xf0]  ;;  %v7268_v19 = vor.u32 %v9911_v10, %v7267_v9  ;;  %4855 = vmatpush.bf16.msrb.mxu0 %v7012_v14 }
  0x32   :  { %v6995_v13 = vld [vmem:[%s15618_s1 + $0x460] sm:$0xf]  ;;  %v9875_v17 = vld [vmem:[%s15618_s1 + $0x56c] sm:$0xf0]  ;;  %v7396_v23 = vor.u32 %v9943_v12, %v7395_v11  ;;  %4868 = vmatpush.bf16.msrb.mxu1 %v7140_v18 }
  0x33   :  { %v7123_v16 = vld [vmem:[%s15618_s1 + $0x560] sm:$0xf]  ;;  %v10885_v20 = vld [vmem:[#allocation1 + $0x12] sm:$0xff]  ;;  %v10898_v26 = vld [vmem:[#allocation1 + $0x9] sm:$0xff]  ;;  %v6996_v29 = vor.u32 %v9843_v15, %v6995_v13  ;;  %4881 = vmatpush.bf16.msrb.mxu2 %v7268_v19 }
  0x34   :  { %v10887_v21 = vld [vmem:[#allocation1] sm:$0xff]  ;;  %v9907_v25 = vld [vmem:[%s15618_s1 + $0x66c] sm:$0xf0]  ;;  %4834 = vmatmul.bf16.vlgmr.msra.gmra.mxu2 %v10885_v20  ;;  %4821 = vmatmul.bf16.vlgmr.msra.gmra.mxu1 %v10898_v26  ;;  %v7124_v30 = vor.u32 %v9875_v17, %v7123_v16  ;;  %v10975_v60 = vld [vmem:[#allocation1 + $0x36] sm:$0xff] }
  0x35   :  { %v10889_v22 = vld [vmem:[#allocation1 + $0x1b] sm:$0xff]  ;;  %v9939_v28 = vld [vmem:[%s15618_s1 + $0x76c] sm:$0xf0]  ;;  %4808 = vmatmul.bf16.vlgmr.msra.gmra.mxu0 %v10887_v21  ;;  %4894 = vmatpush.bf16.msrb.mxu3 %v7396_v23  ;;  %v10980_v0 = vld [vmem:[#allocation1 + $0x24] sm:$0xff] }
  0x36   :  { %v7251_v24 = vld [vmem:[%s15618_s1 + $0x660] sm:$0xf]  ;;  %4847 = vmatmul.bf16.vlgmr.msra.gmra.mxu3 %v10889_v22  ;;  %v9839_v33 = vld [vmem:[%s15618_s1 + $0x44c] sm:$0xf0]  ;;  %4856 = vmatpush.bf16.msrb.mxu0 %v6996_v29 }
  0x37   :  { %v7379_v27 = vld [vmem:[%s15618_s1 + $0x760] sm:$0xf]  ;;  %v7252_v31 = vor.u32 %v9907_v25, %v7251_v24  ;;  %v9871_v36 = vld [vmem:[%s15618_s1 + $0x54c] sm:$0xf0]  ;;  %4869 = vmatpush.bf16.msrb.mxu1 %v7124_v30 }
  0x38   :  { %v6979_v32 = vld [vmem:[%s15618_s1 + $0x440] sm:$0xf]  ;;  %v7380_v35 = vor.u32 %v9939_v28, %v7379_v27  ;;  %v9903_v38 = vld [vmem:[%s15618_s1 + $0x64c] sm:$0xf0] }
  0x39   :  { %v7107_v34 = vld [vmem:[%s15618_s1 + $0x540] sm:$0xf]  ;;  %v9935_v40 = vld [vmem:[%s15618_s1 + $0x74c] sm:$0xf0]  ;;  %v6980_v41 = vor.u32 %v9839_v33, %v6979_v32  ;;  %4882 = vmatpush.bf16.msrb.mxu2 %v7252_v31 }
  0x3a   :  { %v7235_v37 = vld [vmem:[%s15618_s1 + $0x640] sm:$0xf]  ;;  %v7108_v43 = vor.u32 %v9871_v36, %v7107_v34  ;;  %v9835_v45 = vld [vmem:[%s15618_s1 + $0x42c] sm:$0xf0]  ;;  %4895 = vmatpush.bf16.msrb.mxu3 %v7380_v35 }
  0x3b   :  { %v7363_v39 = vld [vmem:[%s15618_s1 + $0x740] sm:$0xf]  ;;  %v7236_v44 = vor.u32 %v9903_v38, %v7235_v37  ;;  %v9867_v47 = vld [vmem:[%s15618_s1 + $0x52c] sm:$0xf0]  ;;  %4857 = vmatpush.bf16.msrb.mxu0 %v6980_v41 }
  0x3c   :  { %v6963_v42 = vld [vmem:[%s15618_s1 + $0x420] sm:$0xf]  ;;  %v7364_v48 = vor.u32 %v9935_v40, %v7363_v39  ;;  %v9899_v50 = vld [vmem:[%s15618_s1 + $0x62c] sm:$0xf0]  ;;  %4870 = vmatpush.bf16.msrb.mxu1 %v7108_v43 }
  0x3d   :  { %v7091_v46 = vld [vmem:[%s15618_s1 + $0x520] sm:$0xf]  ;;  %v9931_v52 = vld [vmem:[%s15618_s1 + $0x72c] sm:$0xf0]  ;;  %v6964_v55 = vor.u32 %v9835_v45, %v6963_v42  ;;  %4883 = vmatpush.bf16.msrb.mxu2 %v7236_v44 }
  0x3e   :  { %v7219_v49 = vld [vmem:[%s15618_s1 + $0x620] sm:$0xf]  ;;  %v9831_v54 = vld [vmem:[%s15618_s1 + $0x40c] sm:$0xf0]  ;;  %v7092_v62 = vor.u32 %v9867_v47, %v7091_v46  ;;  %4896 = vmatpush.bf16.msrb.mxu3 %v7364_v48 }
  0x3f   :  { %v7347_v51 = vld [vmem:[%s15618_s1 + $0x720] sm:$0xf]  ;;  %v9863_v57 = vld [vmem:[%s15618_s1 + $0x50c] sm:$0xf0]  ;;  %v7220_v63 = vor.u32 %v9899_v50, %v7219_v49  ;;  %4858 = vmatpush.bf16.msrb.mxu0 %v6964_v55 }
  0x40   :  { %v6947_v53 = vld [vmem:[%s15618_s1 + $0x400] sm:$0xf]  ;;  %v9895_v59 = vld [vmem:[%s15618_s1 + $0x60c] sm:$0xf0]  ;;  %v7348_v3 = vor.u32 %v9931_v52, %v7347_v51  ;;  %4871 = vmatpush.bf16.msrb.mxu1 %v7092_v62 }
  0x41   :  { %v7075_v56 = vld [vmem:[%s15618_s1 + $0x500] sm:$0xf]  ;;  %v10984_v2 = vld [vmem:[#allocation1 + $0x2d] sm:$0xff]  ;;  %v6948_v9 = vor.u32 %v9831_v54, %v6947_v53  ;;  %4884 = vmatpush.bf16.msrb.mxu2 %v7220_v63 }
  0x42   :  { %v7203_v58 = vld [vmem:[%s15618_s1 + $0x600] sm:$0xf]  ;;  %v9927_v5 = vld [vmem:[%s15618_s1 + $0x70c] sm:$0xf0]  ;;  %v7076_v13 = vor.u32 %v9863_v57, %v7075_v56  ;;  %4897 = vmatpush.bf16.msrb.mxu3 %v7348_v3 }
  0x43   :  { %v10982_v1 = vld [vmem:[#allocation1 + $0x3f] sm:$0xff]  ;;  %v9987_v7 = vld [vmem:[%s15618_s1 + $0x8ec] sm:$0xf0]  ;;  %v7204_v14 = vor.u32 %v9895_v59, %v7203_v58  ;;  %4859 = vmatpush.bf16.msrb.mxu0 %v6948_v9 }
  0x44   :  { %v7331_v4 = vld [vmem:[%s15618_s1 + $0x700] sm:$0xf]  ;;  %831 = vst [vmem:[#allocation1] ss:$9 sm:$0xff] %v23_v61  ;;  %v10019_v10 = vld [vmem:[%s15618_s1 + $0x9ec] sm:$0xf0]  ;;  %4872 = vmatpush.bf16.msrb.mxu1 %v7076_v13 }
  0x45   :  { %v7571_v6 = vld [vmem:[%s15618_s1 + $0x8e0] sm:$0xf]  ;;  %v10051_v12 = vld [vmem:[%s15618_s1 + $0xaec] sm:$0xf0]  ;;  %v7332_v17 = vor.u32 %v9927_v5, %v7331_v4  ;;  %4885 = vmatpush.bf16.msrb.mxu2 %v7204_v14 }
  0x46   :  { %v7699_v8 = vld [vmem:[%s15618_s1 + $0x9e0] sm:$0xf]  ;;  %v10083_v16 = vld [vmem:[%s15618_s1 + $0xbec] sm:$0xf0]  ;;  %v7572_v18 = vor.u32 %v9987_v7, %v7571_v6  ;;  %4860 = vmatmul.bf16.vlgmr.msrb.gmra.mxu0 %v10980_v0 }
  0x47   :  { %v7827_v11 = vld [vmem:[%s15618_s1 + $0xae0] sm:$0xf]  ;;  %v7700_v19 = vor.u32 %v10019_v10, %v7699_v8  ;;  %v9983_v25 = vld [vmem:[%s15618_s1 + $0x8cc] sm:$0xf0]  ;;  %4898 = vmatpush.bf16.msrb.mxu3 %v7332_v17  ;;  %4873 = vmatmul.bf16.vlgmr.msrb.gmra.mxu1 %v10984_v2 }
  0x48   :  { %v7955_v15 = vld [vmem:[%s15618_s1 + $0xbe0] sm:$0xf]  ;;  %v7828_v23 = vor.u32 %v10051_v12, %v7827_v11  ;;  %v10015_v29 = vld [vmem:[%s15618_s1 + $0x9cc] sm:$0xf0]  ;;  %4904 = vmatpush.bf16.msra.mxu0 %v7572_v18  ;;  %4886 = vmatmul.bf16.vlgmr.msrb.gmra.mxu2 %v10975_v60 }
  0x49   :  { %v7555_v24 = vld [vmem:[%s15618_s1 + $0x8c0] sm:$0xf]  ;;  %v7956_v28 = vor.u32 %v10083_v16, %v7955_v15  ;;  %v10047_v31 = vld [vmem:[%s15618_s1 + $0xacc] sm:$0xf0]  ;;  %4917 = vmatpush.bf16.msra.mxu1 %v7700_v19 }
  0x4a   :  { %v7683_v27 = vld [vmem:[%s15618_s1 + $0x9c0] sm:$0xf]  ;;  %v10079_v33 = vld [vmem:[%s15618_s1 + $0xbcc] sm:$0xf0]  ;;  %v7556_v34 = vor.u32 %v9983_v25, %v7555_v24  ;;  %4930 = vmatpush.bf16.msra.mxu2 %v7828_v23  ;;  %4899 = vmatmul.bf16.vlgmr.msrb.gmra.mxu3 %v10982_v1 }
  0x4b   :  { %v7811_v30 = vld [vmem:[%s15618_s1 + $0xac0] sm:$0xf]  ;;  %v7684_v35 = vor.u32 %v10015_v29, %v7683_v27  ;;  %v9979_v38 = vld [vmem:[%s15618_s1 + $0x8ac] sm:$0xf0]  ;;  %4943 = vmatpush.bf16.msra.mxu3 %v7956_v28 }
  0x4c   :  { %v7939_v32 = vld [vmem:[%s15618_s1 + $0xbc0] sm:$0xf]  ;;  %v7812_v36 = vor.u32 %v10047_v31, %v7811_v30  ;;  %v10011_v41 = vld [vmem:[%s15618_s1 + $0x9ac] sm:$0xf0]  ;;  %4905 = vmatpush.bf16.msra.mxu0 %v7556_v34 }
  0x4d   :  { %v7539_v37 = vld [vmem:[%s15618_s1 + $0x8a0] sm:$0xf]  ;;  %v7940_v40 = vor.u32 %v10079_v33, %v7939_v32  ;;  %v10043_v43 = vld [vmem:[%s15618_s1 + $0xaac] sm:$0xf0]  ;;  %4918 = vmatpush.bf16.msra.mxu1 %v7684_v35 }
  0x4e   :  { %v7667_v39 = vld [vmem:[%s15618_s1 + $0x9a0] sm:$0xf]  ;;  %v10075_v45 = vld [vmem:[%s15618_s1 + $0xbac] sm:$0xf0]  ;;  %v7540_v46 = vor.u32 %v9979_v38, %v7539_v37  ;;  %4931 = vmatpush.bf16.msra.mxu2 %v7812_v36 }
  0x4f   :  { %v7795_v42 = vld [vmem:[%s15618_s1 + $0xaa0] sm:$0xf]  ;;  %v7668_v47 = vor.u32 %v10011_v41, %v7667_v39  ;;  %v9975_v50 = vld [vmem:[%s15618_s1 + $0x88c] sm:$0xf0]  ;;  %4944 = vmatpush.bf16.msra.mxu3 %v7940_v40 }
  0x50   :  { %v7923_v44 = vld [vmem:[%s15618_s1 + $0xba0] sm:$0xf]  ;;  %v7796_v48 = vor.u32 %v10043_v43, %v7795_v42  ;;  %v10007_v53 = vld [vmem:[%s15618_s1 + $0x98c] sm:$0xf0]  ;;  %4906 = vmatpush.bf16.msra.mxu0 %v7540_v46 }
  0x51   :  { %v7523_v49 = vld [vmem:[%s15618_s1 + $0x880] sm:$0xf]  ;;  %v7924_v52 = vor.u32 %v10075_v45, %v7923_v44  ;;  %v10039_v55 = vld [vmem:[%s15618_s1 + $0xa8c] sm:$0xf0]  ;;  %4919 = vmatpush.bf16.msra.mxu1 %v7668_v47 }
  0x52   :  { %v7651_v51 = vld [vmem:[%s15618_s1 + $0x980] sm:$0xf]  ;;  %v10071_v57 = vld [vmem:[%s15618_s1 + $0xb8c] sm:$0xf0]  ;;  %v7524_v58 = vor.u32 %v9975_v50, %v7523_v49  ;;  %4932 = vmatpush.bf16.msra.mxu2 %v7796_v48 }
  0x53   :  { %v7779_v54 = vld [vmem:[%s15618_s1 + $0xa80] sm:$0xf]  ;;  %v7652_v59 = vor.u32 %v10007_v53, %v7651_v51  ;;  %v9971_v63 = vld [vmem:[%s15618_s1 + $0x86c] sm:$0xf0]  ;;  %4945 = vmatpush.bf16.msra.mxu3 %v7924_v52 }
  0x54   :  { %v7907_v56 = vld [vmem:[%s15618_s1 + $0xb80] sm:$0xf]  ;;  %v7780_v61 = vor.u32 %v10039_v55, %v7779_v54  ;;  %v10003_v5 = vld [vmem:[%s15618_s1 + $0x96c] sm:$0xf0]  ;;  %4907 = vmatpush.bf16.msra.mxu0 %v7524_v58 }
  0x55   :  { %v7507_v62 = vld [vmem:[%s15618_s1 + $0x860] sm:$0xf]  ;;  %v7908_v4 = vor.u32 %v10071_v57, %v7907_v56  ;;  %v10035_v7 = vld [vmem:[%s15618_s1 + $0xa6c] sm:$0xf0]  ;;  %4920 = vmatpush.bf16.msra.mxu1 %v7652_v59 }
  0x56   :  { %v7635_v3 = vld [vmem:[%s15618_s1 + $0x960] sm:$0xf]  ;;  %v10067_v9 = vld [vmem:[%s15618_s1 + $0xb6c] sm:$0xf0]  ;;  %v7508_v10 = vor.u32 %v9971_v63, %v7507_v62  ;;  %4933 = vmatpush.bf16.msra.mxu2 %v7780_v61 }
  0x57   :  { %v7763_v6 = vld [vmem:[%s15618_s1 + $0xa60] sm:$0xf]  ;;  %v7636_v11 = vor.u32 %v10003_v5, %v7635_v3  ;;  %v9967_v14 = vld [vmem:[%s15618_s1 + $0x84c] sm:$0xf0]  ;;  %4946 = vmatpush.bf16.msra.mxu3 %v7908_v4 }
  0x58   :  { %v7891_v8 = vld [vmem:[%s15618_s1 + $0xb60] sm:$0xf]  ;;  %v7764_v12 = vor.u32 %v10035_v7, %v7763_v6  ;;  %v9999_v17 = vld [vmem:[%s15618_s1 + $0x94c] sm:$0xf0]  ;;  %4908 = vmatpush.bf16.msra.mxu0 %v7508_v10 }
  0x59   :  { %v7491_v13 = vld [vmem:[%s15618_s1 + $0x840] sm:$0xf]  ;;  %v7892_v16 = vor.u32 %v10067_v9, %v7891_v8  ;;  %v10031_v19 = vld [vmem:[%s15618_s1 + $0xa4c] sm:$0xf0]  ;;  %4921 = vmatpush.bf16.msra.mxu1 %v7636_v11 }
  0x5a   :  { %v7619_v15 = vld [vmem:[%s15618_s1 + $0x940] sm:$0xf]  ;;  %v10063_v24 = vld [vmem:[%s15618_s1 + $0xb4c] sm:$0xf0]  ;;  %v7492_v25 = vor.u32 %v9967_v14, %v7491_v13  ;;  %4934 = vmatpush.bf16.msra.mxu2 %v7764_v12 }
  0x5b   :  { %v7747_v18 = vld [vmem:[%s15618_s1 + $0xa40] sm:$0xf]  ;;  %v7620_v27 = vor.u32 %v9999_v17, %v7619_v15  ;;  %v9963_v30 = vld [vmem:[%s15618_s1 + $0x82c] sm:$0xf0]  ;;  %4947 = vmatpush.bf16.msra.mxu3 %v7892_v16 }
  0x5c   :  { %v7875_v23 = vld [vmem:[%s15618_s1 + $0xb40] sm:$0xf]  ;;  %v7748_v28 = vor.u32 %v10031_v19, %v7747_v18  ;;  %v9995_v33 = vld [vmem:[%s15618_s1 + $0x92c] sm:$0xf0]  ;;  %4909 = vmatpush.bf16.msra.mxu0 %v7492_v25 }
  0x5d   :  { %v7475_v29 = vld [vmem:[%s15618_s1 + $0x820] sm:$0xf]  ;;  %v7876_v32 = vor.u32 %v10063_v24, %v7875_v23  ;;  %v10027_v35 = vld [vmem:[%s15618_s1 + $0xa2c] sm:$0xf0]  ;;  %4922 = vmatpush.bf16.msra.mxu1 %v7620_v27 }
  0x5e   :  { %v7603_v31 = vld [vmem:[%s15618_s1 + $0x920] sm:$0xf]  ;;  %v10059_v37 = vld [vmem:[%s15618_s1 + $0xb2c] sm:$0xf0]  ;;  %v7476_v38 = vor.u32 %v9963_v30, %v7475_v29  ;;  %4935 = vmatpush.bf16.msra.mxu2 %v7748_v28 }
  0x5f   :  { %v7731_v34 = vld [vmem:[%s15618_s1 + $0xa20] sm:$0xf]  ;;  %v9959_v40 = vld [vmem:[%s15618_s1 + $0x80c] sm:$0xf0]  ;;  %v7604_v41 = vor.u32 %v9995_v33, %v7603_v31  ;;  %4948 = vmatpush.bf16.msra.mxu3 %v7876_v32 }
  0x60   :  { %v7859_v36 = vld [vmem:[%s15618_s1 + $0xb20] sm:$0xf]  ;;  %v7732_v42 = vor.u32 %v10027_v35, %v7731_v34  ;;  %v9991_v44 = vld [vmem:[%s15618_s1 + $0x90c] sm:$0xf0]  ;;  %4910 = vmatpush.bf16.msra.mxu0 %v7476_v38 }
  0x61   :  { %v7459_v39 = vld [vmem:[%s15618_s1 + $0x800] sm:$0xf]  ;;  %v7860_v46 = vor.u32 %v10059_v37, %v7859_v36  ;;  %v10023_v47 = vld [vmem:[%s15618_s1 + $0xa0c] sm:$0xf0]  ;;  %4923 = vmatpush.bf16.msra.mxu1 %v7604_v41 }
  0x62   :  { %v7587_v43 = vld [vmem:[%s15618_s1 + $0x900] sm:$0xf]  ;;  %v10055_v49 = vld [vmem:[%s15618_s1 + $0xb0c] sm:$0xf0]  ;;  %v7460_v53 = vor.u32 %v9959_v40, %v7459_v39  ;;  %4936 = vmatpush.bf16.msra.mxu2 %v7732_v42 }
  0x63   :  { %v7715_v45 = vld [vmem:[%s15618_s1 + $0xa00] sm:$0xf]  ;;  %v10115_v51 = vld [vmem:[%s15618_s1 + $0xcec] sm:$0xf0]  ;;  %v7588_v57 = vor.u32 %v9991_v44, %v7587_v43  ;;  %4949 = vmatpush.bf16.msra.mxu3 %v7860_v46 }
  0x64   :  { %v7843_v48 = vld [vmem:[%s15618_s1 + $0xb00] sm:$0xf]  ;;  %v10147_v54 = vld [vmem:[%s15618_s1 + $0xdec] sm:$0xf0]  ;;  %v7716_v58 = vor.u32 %v10023_v47, %v7715_v45  ;;  %4911 = vmatpush.bf16.msra.mxu0 %v7460_v53 }
  0x65   :  { %v8083_v50 = vld [vmem:[%s15618_s1 + $0xce0] sm:$0xf]  ;;  %v10179_v56 = vld [vmem:[%s15618_s1 + $0xeec] sm:$0xf0]  ;;  %v7844_v62 = vor.u32 %v10055_v49, %v7843_v48  ;;  %4924 = vmatpush.bf16.msra.mxu1 %v7588_v57 }
  0x66   :  { %v8211_v52 = vld [vmem:[%s15618_s1 + $0xde0] sm:$0xf]  ;;  %v10211_v61 = vld [vmem:[%s15618_s1 + $0xfec] sm:$0xf0]  ;;  %v8084_v63 = vor.u32 %v10115_v51, %v8083_v50  ;;  %4937 = vmatpush.bf16.msra.mxu2 %v7716_v58 }
  0x67   :  { %v8339_v55 = vld [vmem:[%s15618_s1 + $0xee0] sm:$0xf]  ;;  %v8212_v3 = vor.u32 %v10147_v54, %v8211_v52  ;;  %v10111_v6 = vld [vmem:[%s15618_s1 + $0xccc] sm:$0xf0]  ;;  %4950 = vmatpush.bf16.msra.mxu3 %v7844_v62 }
  0x68   :  { %v8467_v59 = vld [vmem:[%s15618_s1 + $0xfe0] sm:$0xf]  ;;  %v8340_v4 = vor.u32 %v10179_v56, %v8339_v55  ;;  %v10143_v9 = vld [vmem:[%s15618_s1 + $0xdcc] sm:$0xf0]  ;;  %4956 = vmatpush.bf16.msrb.mxu0 %v8084_v63 }
  0x69   :  { %v8067_v5 = vld [vmem:[%s15618_s1 + $0xcc0] sm:$0xf]  ;;  %v8468_v8 = vor.u32 %v10211_v61, %v8467_v59  ;;  %v10175_v11 = vld [vmem:[%s15618_s1 + $0xecc] sm:$0xf0]  ;;  %4969 = vmatpush.bf16.msrb.mxu1 %v8212_v3 }
  0x6a   :  { %v8195_v7 = vld [vmem:[%s15618_s1 + $0xdc0] sm:$0xf]  ;;  %v10207_v14 = vld [vmem:[%s15618_s1 + $0xfcc] sm:$0xf0]  ;;  %v8068_v18 = vor.u32 %v10111_v6, %v8067_v5  ;;  %4982 = vmatpush.bf16.msrb.mxu2 %v8340_v4 }
  0x6b   :  { %v8323_v10 = vld [vmem:[%s15618_s1 + $0xec0] sm:$0xf]  ;;  %v11238_v15 = vld [vmem:[#allocation1 + $0x12] sm:$0xff]  ;;  %v11240_v16 = vld [vmem:[#allocation1 + $0x9] sm:$0xff]  ;;  %v8196_v19 = vor.u32 %v10143_v9, %v8195_v7  ;;  %4995 = vmatpush.bf16.msrb.mxu3 %v8468_v8 }
  0x6c   :  { %v11230_v12 = vld [vmem:[#allocation1] sm:$0xff]  ;;  %v8324_v23 = vor.u32 %v10175_v11, %v8323_v10  ;;  %v10107_v25 = vld [vmem:[%s15618_s1 + $0xcac] sm:$0xf0]  ;;  %4938 = vmatmul.bf16.vlgmr.msra.gmra.mxu2 %v11238_v15  ;;  %4925 = vmatmul.bf16.vlgmr.msra.gmra.mxu1 %v11240_v16 }
  0x6d   :  { %v8451_v13 = vld [vmem:[%s15618_s1 + $0xfc0] sm:$0xf]  ;;  %4912 = vmatmul.bf16.vlgmr.msra.gmra.mxu0 %v11230_v12  ;;  %v10139_v29 = vld [vmem:[%s15618_s1 + $0xdac] sm:$0xf0]  ;;  %4970 = vmatpush.bf16.msrb.mxu1 %v8196_v19 }
  0x6e   :  { %v11242_v17 = vld [vmem:[#allocation1 + $0x1b] sm:$0xff]  ;;  %v8452_v28 = vor.u32 %v10207_v14, %v8451_v13  ;;  %v10171_v31 = vld [vmem:[%s15618_s1 + $0xeac] sm:$0xf0]  ;;  %4957 = vmatpush.bf16.msrb.mxu0 %v8068_v18  ;;  %4983 = vmatpush.bf16.msrb.mxu2 %v8324_v23 }
  0x6f   :  { %v8051_v24 = vld [vmem:[%s15618_s1 + $0xca0] sm:$0xf]  ;;  %v10203_v33 = vld [vmem:[%s15618_s1 + $0xfac] sm:$0xf0]  ;;  %4951 = vmatmul.bf16.vlgmr.msra.gmra.mxu3 %v11242_v17 }
  0x70   :  { %v8179_v27 = vld [vmem:[%s15618_s1 + $0xda0] sm:$0xf]  ;;  %v8052_v34 = vor.u32 %v10107_v25, %v8051_v24  ;;  %v10103_v38 = vld [vmem:[%s15618_s1 + $0xc8c] sm:$0xf0]  ;;  %4996 = vmatpush.bf16.msrb.mxu3 %v8452_v28 }
  0x71   :  { %v8307_v30 = vld [vmem:[%s15618_s1 + $0xea0] sm:$0xf]  ;;  %v8180_v36 = vor.u32 %v10139_v29, %v8179_v27  ;;  %v10135_v40 = vld [vmem:[%s15618_s1 + $0xd8c] sm:$0xf0] }
  0x72   :  { %v8435_v32 = vld [vmem:[%s15618_s1 + $0xfa0] sm:$0xf]  ;;  %v8308_v37 = vor.u32 %v10171_v31, %v8307_v30  ;;  %v10167_v43 = vld [vmem:[%s15618_s1 + $0xe8c] sm:$0xf0] }
  0x73   :  { %v8035_v35 = vld [vmem:[%s15618_s1 + $0xc80] sm:$0xf]  ;;  %v8436_v41 = vor.u32 %v10203_v33, %v8435_v32  ;;  %v10199_v45 = vld [vmem:[%s15618_s1 + $0xf8c] sm:$0xf0] }
  0x74   :  { %v8163_v39 = vld [vmem:[%s15618_s1 + $0xd80] sm:$0xf] }
  0x75   :  { %v8291_v42 = vld [vmem:[%s15618_s1 + $0xe80] sm:$0xf] }
  0x76   :  { %v8419_v44 = vld [vmem:[%s15618_s1 + $0xf80] sm:$0xf] }
  0x77   :  { %10 = vsyncpa [#allocation3], 0  ;;  %4958 = vmatpush.bf16.msrb.mxu0 %v8052_v34  ;;  %v8036_v46 = vor.u32 %v10103_v38, %v8035_v35  ;;  %4971 = vmatpush.bf16.msrb.mxu1 %v8180_v36  ;;  %v8164_v47 = vor.u32 %v10135_v40, %v8163_v39  ;;  %v8292_v48 = vor.u32 %v10167_v43, %v8291_v42  ;;  %v8019_v49 = vld [vmem:[%s15618_s1 + $0xc60] sm:$0xf]  ;;  %v10099_v50 = vld [vmem:[%s15618_s1 + $0xc6c] sm:$0xf0] }
  0x78   :  { %4984 = vmatpush.bf16.msrb.mxu2 %v8308_v37  ;;  %v8147_v51 = vld [vmem:[%s15618_s1 + $0xd60] sm:$0xf]  ;;  %4997 = vmatpush.bf16.msrb.mxu3 %v8436_v41  ;;  %v8420_v52 = vor.u32 %v10199_v45, %v8419_v44  ;;  %v10131_v53 = vld [vmem:[%s15618_s1 + $0xd6c] sm:$0xf0]  ;;  %v8020_v58 = vor.u32 %v10099_v50, %v8019_v49  ;;  %vm4797_vm0 = vcmask 523264   ;;  %s10551_s30 = smov [#allocation2]  }
  0x79   :  { %v8275_v54 = vld [vmem:[%s15618_s1 + $0xe60] sm:$0xf]  ;;  %v10163_v55 = vld [vmem:[%s15618_s1 + $0xe6c] sm:$0xf0]  ;;  %v8148_v59 = vor.u32 %v10131_v53, %v8147_v51  ;;  %s6422_s6 = sshll.u32 %s10551_s30, 4  ;;  %s6424_s9 = sshll.u32 %s15622_s5, 4  ;;  %s6423_s6 = int_to_ptr.vmem [resolvable:$true] %s6422_s6  ;;  %s6425_s9 = int_to_ptr.hbm [resolvable:$true] %s6424_s9 }
  0x7a   :  { %v8403_v56 = vld [vmem:[%s15618_s1 + $0xf60] sm:$0xf]  ;;  %v10195_v57 = vld [vmem:[%s15618_s1 + $0xf6c] sm:$0xf0]  ;;  %v8276_v61 = vor.u32 %v10163_v55, %v8275_v54 }
  0x7b   :  { %4959 = vmatpush.bf16.msrb.mxu0 %v8036_v46  ;;  %4972 = vmatpush.bf16.msrb.mxu1 %v8164_v47  ;;  %v8003_v62 = vld [vmem:[%s15618_s1 + $0xc40] sm:$0xf]  ;;  %v10095_v63 = vld [vmem:[%s15618_s1 + $0xc4c] sm:$0xf0]  ;;  %v8404_v4 = vor.u32 %v10195_v57, %v8403_v56  ;;  %v11404_v46 = vld [vmem:[#allocation1 + $0x24] sm:$0xff] }
  0x7c   :  { %4985 = vmatpush.bf16.msrb.mxu2 %v8292_v48  ;;  %v8131_v3 = vld [vmem:[%s15618_s1 + $0xd40] sm:$0xf]  ;;  %4998 = vmatpush.bf16.msrb.mxu3 %v8420_v52  ;;  %v10127_v5 = vld [vmem:[%s15618_s1 + $0xd4c] sm:$0xf0]  ;;  %v8004_v10 = vor.u32 %v10095_v63, %v8003_v62  ;;  %v11406_v47 = vld [vmem:[#allocation1 + $0x36] sm:$0xff] }
  0x7d   :  { %v8259_v6 = vld [vmem:[%s15618_s1 + $0xe40] sm:$0xf]  ;;  %v10159_v7 = vld [vmem:[%s15618_s1 + $0xe4c] sm:$0xf0]  ;;  %v8132_v13 = vor.u32 %v10127_v5, %v8131_v3 }
  0x7e   :  { %v8387_v8 = vld [vmem:[%s15618_s1 + $0xf40] sm:$0xf]  ;;  %v10191_v9 = vld [vmem:[%s15618_s1 + $0xf4c] sm:$0xf0]  ;;  %v8260_v14 = vor.u32 %v10159_v7, %v8259_v6 }
  0x7f   :  { %4960 = vmatpush.bf16.msrb.mxu0 %v8020_v58  ;;  %v7987_v11 = vld [vmem:[%s15618_s1 + $0xc20] sm:$0xf]  ;;  %4973 = vmatpush.bf16.msrb.mxu1 %v8148_v59  ;;  %v10091_v18 = vld [vmem:[%s15618_s1 + $0xc2c] sm:$0xf0]  ;;  %v8388_v24 = vor.u32 %v10191_v9, %v8387_v8 }
  0x80   :  { %4986 = vmatpush.bf16.msrb.mxu2 %v8276_v61  ;;  %v8115_v19 = vld [vmem:[%s15618_s1 + $0xd20] sm:$0xf]  ;;  %v10123_v23 = vld [vmem:[%s15618_s1 + $0xd2c] sm:$0xf0]  ;;  %4999 = vmatpush.bf16.msrb.mxu3 %v8404_v4  ;;  %v7988_v32 = vor.u32 %v10091_v18, %v7987_v11 }
  0x81   :  { %v8243_v25 = vld [vmem:[%s15618_s1 + $0xe20] sm:$0xf]  ;;  %v10155_v27 = vld [vmem:[%s15618_s1 + $0xe2c] sm:$0xf0]  ;;  %v8116_v37 = vor.u32 %v10123_v23, %v8115_v19 }
  0x82   :  { %v8371_v28 = vld [vmem:[%s15618_s1 + $0xf20] sm:$0xf]  ;;  %v10187_v29 = vld [vmem:[%s15618_s1 + $0xf2c] sm:$0xf0]  ;;  %v8244_v38 = vor.u32 %v10155_v27, %v8243_v25 }
  0x83   :  { %v7971_v30 = vld [vmem:[%s15618_s1 + $0xc00] sm:$0xf]  ;;  %v10087_v31 = vld [vmem:[%s15618_s1 + $0xc0c] sm:$0xf0]  ;;  %4961 = vmatpush.bf16.msrb.mxu0 %v8004_v10  ;;  %4974 = vmatpush.bf16.msrb.mxu1 %v8132_v13  ;;  %v8372_v43 = vor.u32 %v10187_v29, %v8371_v28 }
  0x84   :  { %v8099_v33 = vld [vmem:[%s15618_s1 + $0xd00] sm:$0xf]  ;;  %v10119_v34 = vld [vmem:[%s15618_s1 + $0xd0c] sm:$0xf0]  ;;  %4987 = vmatpush.bf16.msrb.mxu2 %v8260_v14  ;;  %5000 = vmatpush.bf16.msrb.mxu3 %v8388_v24  ;;  %v7972_v51 = vor.u32 %v10087_v31, %v7971_v30 }
  0x85   :  { %v8227_v35 = vld [vmem:[%s15618_s1 + $0xe00] sm:$0xf]  ;;  %v10151_v36 = vld [vmem:[%s15618_s1 + $0xe0c] sm:$0xf0]  ;;  %v8100_v54 = vor.u32 %v10119_v34, %v8099_v33 }
  0x86   :  { %v8355_v39 = vld [vmem:[%s15618_s1 + $0xf00] sm:$0xf]  ;;  %v10183_v40 = vld [vmem:[%s15618_s1 + $0xf0c] sm:$0xf0]  ;;  %v8228_v55 = vor.u32 %v10151_v36, %v8227_v35 }
  0x87   :  { %v8595_v41 = vld [vmem:[%s15618_s1 + $0x10e0] sm:$0xf]  ;;  %v10243_v42 = vld [vmem:[%s15618_s1 + $0x10ec] sm:$0xf0]  ;;  %4962 = vmatpush.bf16.msrb.mxu0 %v7988_v32  ;;  %4975 = vmatpush.bf16.msrb.mxu1 %v8116_v37  ;;  %v8356_v58 = vor.u32 %v10183_v40, %v8355_v39 }
  0x88   :  { %v8723_v44 = vld [vmem:[%s15618_s1 + $0x11e0] sm:$0xf]  ;;  %v10275_v45 = vld [vmem:[%s15618_s1 + $0x11ec] sm:$0xf0]  ;;  %4988 = vmatpush.bf16.msrb.mxu2 %v8244_v38  ;;  %5001 = vmatpush.bf16.msrb.mxu3 %v8372_v43  ;;  %v8596_v59 = vor.u32 %v10243_v42, %v8595_v41 }
  0x89   :  { %v11408_v48 = vld [vmem:[#allocation1 + $0x2d] sm:$0xff]  ;;  %v11410_v49 = vld [vmem:[#allocation1 + $0x3f] sm:$0xff]  ;;  %v8724_v61 = vor.u32 %v10275_v45, %v8723_v44 }
  0x8a   :  { %v24_v50 = vld [vmem:[%s15617_s0 + $0x10] sm:$0xff]  ;;  %v8851_v52 = vld [vmem:[%s15618_s1 + $0x12e0] sm:$0xf] }
  0x8b   :  { %v10307_v53 = vld [vmem:[%s15618_s1 + $0x12ec] sm:$0xf0]  ;;  %841 = vst [vmem:[#allocation1] ss:$9 sm:$0xff] %v24_v50  ;;  %v8979_v56 = vld [vmem:[%s15618_s1 + $0x13e0] sm:$0xf]  ;;  %4963 = vmatpush.bf16.msrb.mxu0 %v7972_v51  ;;  %4976 = vmatpush.bf16.msrb.mxu1 %v8100_v54 }
  0x8c   :  { %v10339_v57 = vld [vmem:[%s15618_s1 + $0x13ec] sm:$0xf0]  ;;  %v8852_v62 = vor.u32 %v10307_v53, %v8851_v52  ;;  %v8579_v63 = vld [vmem:[%s15618_s1 + $0x10c0] sm:$0xf]  ;;  %4989 = vmatpush.bf16.msrb.mxu2 %v8228_v55  ;;  %5002 = vmatpush.bf16.msrb.mxu3 %v8356_v58 }
  0x8d   :  { %v10239_v3 = vld [vmem:[%s15618_s1 + $0x10cc] sm:$0xf0]  ;;  %v8707_v4 = vld [vmem:[%s15618_s1 + $0x11c0] sm:$0xf]  ;;  %v8980_v5 = vor.u32 %v10339_v57, %v8979_v56 }
  0x8e   :  { %v10271_v6 = vld [vmem:[%s15618_s1 + $0x11cc] sm:$0xf0]  ;;  %v8835_v7 = vld [vmem:[%s15618_s1 + $0x12c0] sm:$0xf]  ;;  %v8580_v11 = vor.u32 %v10239_v3, %v8579_v63  ;;  %4964 = vmatmul.bf16.vlgmr.msrb.gmra.mxu0 %v11404_v46  ;;  %4977 = vmatmul.bf16.vlgmr.msrb.gmra.mxu1 %v11408_v48 }
  0x8f   :  { %v10303_v8 = vld [vmem:[%s15618_s1 + $0x12cc] sm:$0xf0]  ;;  %v8963_v9 = vld [vmem:[%s15618_s1 + $0x13c0] sm:$0xf]  ;;  %5008 = vmatpush.bf16.msra.mxu0 %v8596_v59  ;;  %5021 = vmatpush.bf16.msra.mxu1 %v8724_v61  ;;  %v8708_v13 = vor.u32 %v10271_v6, %v8707_v4 }
  0x90   :  { %v10335_v10 = vld [vmem:[%s15618_s1 + $0x13cc] sm:$0xf0]  ;;  %5034 = vmatpush.bf16.msra.mxu2 %v8852_v62  ;;  %v8836_v14 = vor.u32 %v10303_v8, %v8835_v7  ;;  %v8563_v18 = vld [vmem:[%s15618_s1 + $0x10a0] sm:$0xf]  ;;  %5047 = vmatpush.bf16.msra.mxu3 %v8980_v5 }
  0x91   :  { %v10235_v19 = vld [vmem:[%s15618_s1 + $0x10ac] sm:$0xf0]  ;;  %v8691_v23 = vld [vmem:[%s15618_s1 + $0x11a0] sm:$0xf]  ;;  %v8964_v24 = vor.u32 %v10335_v10, %v8963_v9  ;;  %4990 = vmatmul.bf16.vlgmr.msrb.gmra.mxu2 %v11406_v47  ;;  %5003 = vmatmul.bf16.vlgmr.msrb.gmra.mxu3 %v11410_v49 }
  0x92   :  { %v10267_v25 = vld [vmem:[%s15618_s1 + $0x11ac] sm:$0xf0]  ;;  %v8819_v27 = vld [vmem:[%s15618_s1 + $0x12a0] sm:$0xf]  ;;  %v8564_v31 = vor.u32 %v10235_v19, %v8563_v18 }
  0x93   :  { %v10299_v28 = vld [vmem:[%s15618_s1 + $0x12ac] sm:$0xf0]  ;;  %v8947_v29 = vld [vmem:[%s15618_s1 + $0x13a0] sm:$0xf]  ;;  %5009 = vmatpush.bf16.msra.mxu0 %v8580_v11  ;;  %5022 = vmatpush.bf16.msra.mxu1 %v8708_v13  ;;  %v8692_v32 = vor.u32 %v10267_v25, %v8691_v23 }
  0x94   :  { %v10331_v30 = vld [vmem:[%s15618_s1 + $0x13ac] sm:$0xf0]  ;;  %5035 = vmatpush.bf16.msra.mxu2 %v8836_v14  ;;  %v8820_v33 = vor.u32 %v10299_v28, %v8819_v27  ;;  %v8547_v34 = vld [vmem:[%s15618_s1 + $0x1080] sm:$0xf]  ;;  %5048 = vmatpush.bf16.msra.mxu3 %v8964_v24 }
  0x95   :  { %v10231_v35 = vld [vmem:[%s15618_s1 + $0x108c] sm:$0xf0]  ;;  %v8675_v36 = vld [vmem:[%s15618_s1 + $0x1180] sm:$0xf]  ;;  %v8948_v37 = vor.u32 %v10331_v30, %v8947_v29 }
  0x96   :  { %v10263_v38 = vld [vmem:[%s15618_s1 + $0x118c] sm:$0xf0]  ;;  %v8803_v39 = vld [vmem:[%s15618_s1 + $0x1280] sm:$0xf]  ;;  %v8548_v43 = vor.u32 %v10231_v35, %v8547_v34 }
  0x97   :  { %v10295_v40 = vld [vmem:[%s15618_s1 + $0x128c] sm:$0xf0]  ;;  %v8931_v41 = vld [vmem:[%s15618_s1 + $0x1380] sm:$0xf]  ;;  %5010 = vmatpush.bf16.msra.mxu0 %v8564_v31  ;;  %5023 = vmatpush.bf16.msra.mxu1 %v8692_v32  ;;  %v8676_v44 = vor.u32 %v10263_v38, %v8675_v36 }
  0x98   :  { %v10327_v42 = vld [vmem:[%s15618_s1 + $0x138c] sm:$0xf0]  ;;  %5036 = vmatpush.bf16.msra.mxu2 %v8820_v33  ;;  %v8804_v45 = vor.u32 %v10295_v40, %v8803_v39  ;;  %v8531_v50 = vld [vmem:[%s15618_s1 + $0x1060] sm:$0xf]  ;;  %5049 = vmatpush.bf16.msra.mxu3 %v8948_v37 }
  0x99   :  { %v10227_v51 = vld [vmem:[%s15618_s1 + $0x106c] sm:$0xf0]  ;;  %v8659_v52 = vld [vmem:[%s15618_s1 + $0x1160] sm:$0xf]  ;;  %v8932_v53 = vor.u32 %v10327_v42, %v8931_v41 }
  0x9a   :  { %v10259_v54 = vld [vmem:[%s15618_s1 + $0x116c] sm:$0xf0]  ;;  %v8787_v55 = vld [vmem:[%s15618_s1 + $0x1260] sm:$0xf]  ;;  %v8532_v59 = vor.u32 %v10227_v51, %v8531_v50 }
  0x9b   :  { %v10291_v56 = vld [vmem:[%s15618_s1 + $0x126c] sm:$0xf0]  ;;  %v8915_v57 = vld [vmem:[%s15618_s1 + $0x1360] sm:$0xf]  ;;  %5011 = vmatpush.bf16.msra.mxu0 %v8548_v43  ;;  %5024 = vmatpush.bf16.msra.mxu1 %v8676_v44  ;;  %v8660_v61 = vor.u32 %v10259_v54, %v8659_v52 }
  0x9c   :  { %v10323_v58 = vld [vmem:[%s15618_s1 + $0x136c] sm:$0xf0]  ;;  %5037 = vmatpush.bf16.msra.mxu2 %v8804_v45  ;;  %v8788_v62 = vor.u32 %v10291_v56, %v8787_v55  ;;  %v8515_v63 = vld [vmem:[%s15618_s1 + $0x1040] sm:$0xf]  ;;  %5050 = vmatpush.bf16.msra.mxu3 %v8932_v53 }
  0x9d   :  { %v10223_v3 = vld [vmem:[%s15618_s1 + $0x104c] sm:$0xf0]  ;;  %v8643_v4 = vld [vmem:[%s15618_s1 + $0x1140] sm:$0xf]  ;;  %v8916_v5 = vor.u32 %v10323_v58, %v8915_v57 }
  0x9e   :  { %v10255_v6 = vld [vmem:[%s15618_s1 + $0x114c] sm:$0xf0]  ;;  %v8771_v7 = vld [vmem:[%s15618_s1 + $0x1240] sm:$0xf]  ;;  %v8516_v11 = vor.u32 %v10223_v3, %v8515_v63 }
  0x9f   :  { %v10287_v8 = vld [vmem:[%s15618_s1 + $0x124c] sm:$0xf0]  ;;  %v8899_v9 = vld [vmem:[%s15618_s1 + $0x1340] sm:$0xf]  ;;  %5012 = vmatpush.bf16.msra.mxu0 %v8532_v59  ;;  %5025 = vmatpush.bf16.msra.mxu1 %v8660_v61  ;;  %v8644_v13 = vor.u32 %v10255_v6, %v8643_v4 }
  0xa0   :  { %v10319_v10 = vld [vmem:[%s15618_s1 + $0x134c] sm:$0xf0]  ;;  %5038 = vmatpush.bf16.msra.mxu2 %v8788_v62  ;;  %v8772_v14 = vor.u32 %v10287_v8, %v8771_v7  ;;  %v8499_v18 = vld [vmem:[%s15618_s1 + $0x1020] sm:$0xf]  ;;  %5051 = vmatpush.bf16.msra.mxu3 %v8916_v5 }
  0xa1   :  { %v10219_v19 = vld [vmem:[%s15618_s1 + $0x102c] sm:$0xf0]  ;;  %v8627_v23 = vld [vmem:[%s15618_s1 + $0x1120] sm:$0xf]  ;;  %v8900_v24 = vor.u32 %v10319_v10, %v8899_v9 }
  0xa2   :  { %v10251_v25 = vld [vmem:[%s15618_s1 + $0x112c] sm:$0xf0]  ;;  %v8755_v27 = vld [vmem:[%s15618_s1 + $0x1220] sm:$0xf]  ;;  %v8500_v31 = vor.u32 %v10219_v19, %v8499_v18 }
  0xa3   :  { %v10283_v28 = vld [vmem:[%s15618_s1 + $0x122c] sm:$0xf0]  ;;  %v8883_v29 = vld [vmem:[%s15618_s1 + $0x1320] sm:$0xf]  ;;  %5013 = vmatpush.bf16.msra.mxu0 %v8516_v11  ;;  %5026 = vmatpush.bf16.msra.mxu1 %v8644_v13  ;;  %v8628_v34 = vor.u32 %v10251_v25, %v8627_v23 }
  0xa4   :  { %v10315_v30 = vld [vmem:[%s15618_s1 + $0x132c] sm:$0xf0]  ;;  %v8483_v32 = vld [vmem:[%s15618_s1 + $0x1000] sm:$0xf]  ;;  %5039 = vmatpush.bf16.msra.mxu2 %v8772_v14  ;;  %v8756_v35 = vor.u32 %v10283_v28, %v8755_v27  ;;  %5052 = vmatpush.bf16.msra.mxu3 %v8900_v24 }
  0xa5   :  { %v10215_v33 = vld [vmem:[%s15618_s1 + $0x100c] sm:$0xf0]  ;;  %v8611_v36 = vld [vmem:[%s15618_s1 + $0x1100] sm:$0xf]  ;;  %v8884_v39 = vor.u32 %v10315_v30, %v8883_v29 }
  0xa6   :  { %v10247_v37 = vld [vmem:[%s15618_s1 + $0x110c] sm:$0xf0]  ;;  %v8739_v38 = vld [vmem:[%s15618_s1 + $0x1200] sm:$0xf]  ;;  %v8484_v50 = vor.u32 %v10215_v33, %v8483_v32 }
  0xa7   :  { %v10279_v40 = vld [vmem:[%s15618_s1 + $0x120c] sm:$0xf0]  ;;  %v8867_v41 = vld [vmem:[%s15618_s1 + $0x1300] sm:$0xf]  ;;  %5014 = vmatpush.bf16.msra.mxu0 %v8500_v31  ;;  %5027 = vmatpush.bf16.msra.mxu1 %v8628_v34  ;;  %v8612_v54 = vor.u32 %v10247_v37, %v8611_v36 }
  0xa8   :  { %v10311_v42 = vld [vmem:[%s15618_s1 + $0x130c] sm:$0xf0]  ;;  %v9107_v43 = vld [vmem:[%s15618_s1 + $0x14e0] sm:$0xf]  ;;  %5040 = vmatpush.bf16.msra.mxu2 %v8756_v35  ;;  %v8740_v55 = vor.u32 %v10279_v40, %v8739_v38  ;;  %5053 = vmatpush.bf16.msra.mxu3 %v8884_v39 }
  0xa9   :  { %v10371_v44 = vld [vmem:[%s15618_s1 + $0x14ec] sm:$0xf0]  ;;  %v9235_v45 = vld [vmem:[%s15618_s1 + $0x15e0] sm:$0xf]  ;;  %v8868_v58 = vor.u32 %v10311_v42, %v8867_v41 }
  0xaa   :  { %v10403_v51 = vld [vmem:[%s15618_s1 + $0x15ec] sm:$0xf0]  ;;  %v9363_v52 = vld [vmem:[%s15618_s1 + $0x16e0] sm:$0xf]  ;;  %v9108_v59 = vor.u32 %v10371_v44, %v9107_v43 }
  0xab   :  { %v10435_v53 = vld [vmem:[%s15618_s1 + $0x16ec] sm:$0xf0]  ;;  %v9491_v56 = vld [vmem:[%s15618_s1 + $0x17e0] sm:$0xf]  ;;  %v9236_v61 = vor.u32 %v10403_v51, %v9235_v45  ;;  %5015 = vmatpush.bf16.msra.mxu0 %v8484_v50  ;;  %5028 = vmatpush.bf16.msra.mxu1 %v8612_v54 }
  0xac   :  { %v10467_v57 = vld [vmem:[%s15618_s1 + $0x17ec] sm:$0xf0]  ;;  %v9364_v62 = vor.u32 %v10435_v53, %v9363_v52  ;;  %v9091_v63 = vld [vmem:[%s15618_s1 + $0x14c0] sm:$0xf]  ;;  %5041 = vmatpush.bf16.msra.mxu2 %v8740_v55  ;;  %5054 = vmatpush.bf16.msra.mxu3 %v8868_v58 }
  0xad   :  { %v10367_v3 = vld [vmem:[%s15618_s1 + $0x14cc] sm:$0xf0]  ;;  %v9219_v4 = vld [vmem:[%s15618_s1 + $0x15c0] sm:$0xf]  ;;  %v9492_v5 = vor.u32 %v10467_v57, %v9491_v56 }
  0xae   :  { %v10399_v6 = vld [vmem:[%s15618_s1 + $0x15cc] sm:$0xf0]  ;;  %v9347_v7 = vld [vmem:[%s15618_s1 + $0x16c0] sm:$0xf]  ;;  %v9092_v19 = vor.u32 %v10367_v3, %v9091_v63 }
  0xaf   :  { %v10431_v8 = vld [vmem:[%s15618_s1 + $0x16cc] sm:$0xf0]  ;;  %v11641_v9 = vld [vmem:[#allocation1] sm:$0xff]  ;;  %5060 = vmatpush.bf16.msrb.mxu0 %v9108_v59  ;;  %5073 = vmatpush.bf16.msrb.mxu1 %v9236_v61  ;;  %v9220_v23 = vor.u32 %v10399_v6, %v9219_v4 }
  0xb0   :  { %v9475_v10 = vld [vmem:[%s15618_s1 + $0x17c0] sm:$0xf]  ;;  %v10463_v11 = vld [vmem:[%s15618_s1 + $0x17cc] sm:$0xf0]  ;;  %5086 = vmatpush.bf16.msrb.mxu2 %v9364_v62  ;;  %v9348_v24 = vor.u32 %v10431_v8, %v9347_v7  ;;  %5099 = vmatpush.bf16.msrb.mxu3 %v9492_v5  ;;  %v11734_v4 = vld [vmem:[#allocation1 + $0x24] sm:$0xff] }
  0xb1   :  { %v11649_v13 = vld [vmem:[#allocation1 + $0x12] sm:$0xff]  ;;  %v11651_v14 = vld [vmem:[#allocation1 + $0x9] sm:$0xff]  ;;  %v11653_v18 = vld [vmem:[#allocation1 + $0x1b] sm:$0xff]  ;;  %5016 = vmatmul.bf16.vlgmr.msra.gmra.mxu0 %v11641_v9  ;;  %v9476_v29 = vor.u32 %v10463_v11, %v9475_v10 }
  0xb2   :  { %v9075_v25 = vld [vmem:[%s15618_s1 + $0x14a0] sm:$0xf]  ;;  %v10363_v27 = vld [vmem:[%s15618_s1 + $0x14ac] sm:$0xf0]  ;;  %5042 = vmatmul.bf16.vlgmr.msra.gmra.mxu2 %v11649_v13  ;;  %5029 = vmatmul.bf16.vlgmr.msra.gmra.mxu1 %v11651_v14  ;;  %v11736_v5 = vld [vmem:[#allocation1 + $0x36] sm:$0xff] }
  0xb3   :  { %v9203_v28 = vld [vmem:[%s15618_s1 + $0x15a0] sm:$0xf]  ;;  %v10395_v30 = vld [vmem:[%s15618_s1 + $0x15ac] sm:$0xf0]  ;;  %5055 = vmatmul.bf16.vlgmr.msra.gmra.mxu3 %v11653_v18  ;;  %5061 = vmatpush.bf16.msrb.mxu0 %v9092_v19  ;;  %v9076_v35 = vor.u32 %v10363_v27, %v9075_v25  ;;  %v25_v8 = vld [vmem:[%s15617_s0 + $0x18] sm:$0x1] }
  0xb4   :  { %v9331_v31 = vld [vmem:[%s15618_s1 + $0x16a0] sm:$0xf]  ;;  %v10427_v32 = vld [vmem:[%s15618_s1 + $0x16ac] sm:$0xf0]  ;;  %5074 = vmatpush.bf16.msrb.mxu1 %v9220_v23  ;;  %5087 = vmatpush.bf16.msrb.mxu2 %v9348_v24  ;;  %v9204_v37 = vor.u32 %v10395_v30, %v9203_v28 }
  0xb5   :  { %v9459_v33 = vld [vmem:[%s15618_s1 + $0x17a0] sm:$0xf]  ;;  %v10459_v34 = vld [vmem:[%s15618_s1 + $0x17ac] sm:$0xf0]  ;;  %v9332_v38 = vor.u32 %v10427_v32, %v9331_v31  ;;  %5100 = vmatpush.bf16.msrb.mxu3 %v9476_v29 }
  0xb6   :  { %v9059_v36 = vld [vmem:[%s15618_s1 + $0x1480] sm:$0xf]  ;;  %v10359_v39 = vld [vmem:[%s15618_s1 + $0x148c] sm:$0xf0]  ;;  %v9460_v42 = vor.u32 %v10459_v34, %v9459_v33 }
  0xb7   :  { %v9187_v40 = vld [vmem:[%s15618_s1 + $0x1580] sm:$0xf]  ;;  %v10391_v41 = vld [vmem:[%s15618_s1 + $0x158c] sm:$0xf0]  ;;  %5062 = vmatpush.bf16.msrb.mxu0 %v9076_v35  ;;  %v9060_v53 = vor.u32 %v10359_v39, %v9059_v36  ;;  %v4809_v35 = vpop.f32.mrf.mxu0 }
  0xb8   :  { %v9315_v43 = vld [vmem:[%s15618_s1 + $0x1680] sm:$0xf]  ;;  %v10423_v44 = vld [vmem:[%s15618_s1 + $0x168c] sm:$0xf0]  ;;  %5075 = vmatpush.bf16.msrb.mxu1 %v9204_v37  ;;  %5088 = vmatpush.bf16.msrb.mxu2 %v9332_v38  ;;  %v9188_v57 = vor.u32 %v10391_v41, %v9187_v40 }
  0xb9   :  { %v9443_v45 = vld [vmem:[%s15618_s1 + $0x1780] sm:$0xf]  ;;  %v10455_v50 = vld [vmem:[%s15618_s1 + $0x178c] sm:$0xf0]  ;;  %v9316_v58 = vor.u32 %v10423_v44, %v9315_v43  ;;  %5101 = vmatpush.bf16.msrb.mxu3 %v9460_v42  ;;  %v4822_v42 = vpop.f32.mrf.mxu1 }
  0xba   :  { %v9043_v51 = vld [vmem:[%s15618_s1 + $0x1460] sm:$0xf]  ;;  %v10355_v52 = vld [vmem:[%s15618_s1 + $0x146c] sm:$0xf0]  ;;  %v9444_v63 = vor.u32 %v10455_v50, %v9443_v45 }
  0xbb   :  { %v9171_v54 = vld [vmem:[%s15618_s1 + $0x1560] sm:$0xf]  ;;  %v10387_v55 = vld [vmem:[%s15618_s1 + $0x156c] sm:$0xf0]  ;;  %5063 = vmatpush.bf16.msrb.mxu0 %v9060_v53  ;;  %v9044_v10 = vor.u32 %v10355_v52, %v9043_v51 }
  0xbc   :  { %v9299_v56 = vld [vmem:[%s15618_s1 + $0x1660] sm:$0xf]  ;;  %v10419_v59 = vld [vmem:[%s15618_s1 + $0x166c] sm:$0xf0]  ;;  %5076 = vmatpush.bf16.msrb.mxu1 %v9188_v57  ;;  %5089 = vmatpush.bf16.msrb.mxu2 %v9316_v58  ;;  %v9172_v19 = vor.u32 %v10387_v55, %v9171_v54 }
  0xbd   :  { %v9427_v61 = vld [vmem:[%s15618_s1 + $0x1760] sm:$0xf]  ;;  %v10451_v62 = vld [vmem:[%s15618_s1 + $0x176c] sm:$0xf0]  ;;  %v9300_v23 = vor.u32 %v10419_v59, %v9299_v56  ;;  %5102 = vmatpush.bf16.msrb.mxu3 %v9444_v63  ;;  %v4835_v63 = vpop.f32.mrf.mxu2 }
  0xbe   :  { %v810_v3 = vld [vmem:[%s15619_s2] sm:$0xf]  ;;  %v11738_v6 = vld [vmem:[#allocation1 + $0x2d] sm:$0xff]  ;;  %v9428_v28 = vor.u32 %v10451_v62, %v9427_v61 }
  0xbf   :  { %v11740_v7 = vld [vmem:[#allocation1 + $0x3f] sm:$0xff]  ;;  %v10351_v24 = vld [vmem:[%s15618_s1 + $0x144c] sm:$0xf0]  ;;  %v812_v27 = vperm.slane %v810_v3, 0  ;;  %5064 = vmatpush.bf16.msrb.mxu0 %v9044_v10 }
  0xc0   :  { %v9027_v11 = vld [vmem:[%s15618_s1 + $0x1440] sm:$0xf]  ;;  %851 = vst [vmem:[#allocation1] ss:$9 sm:$0xff] %v25_v8  ;;  %v10383_v29 = vld [vmem:[%s15618_s1 + $0x154c] sm:$0xf0]  ;;  %5077 = vmatpush.bf16.msrb.mxu1 %v9172_v19  ;;  %5090 = vmatpush.bf16.msrb.mxu2 %v9300_v23  ;;  %v4848_v23 = vpop.f32.mrf.mxu3 }
  0xc1   :  { %v9155_v25 = vld [vmem:[%s15618_s1 + $0x1540] sm:$0xf]  ;;  %v10415_v31 = vld [vmem:[%s15618_s1 + $0x164c] sm:$0xf0]  ;;  %v9028_v34 = vor.u32 %v10351_v24, %v9027_v11  ;;  %v4810_v41 = vadd.f32 %v4809_v35, %v812_v27  ;;  %5103 = vmatpush.bf16.msrb.mxu3 %v9428_v28  ;;  %v9729_v27 = vld [vmem:[%s15618_s1 + $0xe4] sm:$0xf] }
  0xc2   :  { %v9283_v30 = vld [vmem:[%s15618_s1 + $0x1640] sm:$0xf]  ;;  %v10447_v33 = vld [vmem:[%s15618_s1 + $0x174c] sm:$0xf0]  ;;  %v9156_v36 = vor.u32 %v10383_v29, %v9155_v25  ;;  %v6549_v29 = vld [vmem:[%s15618_s1 + $0xf0] sm:$0xf0] }
  0xc3   :  { %v9411_v32 = vld [vmem:[%s15618_s1 + $0x1740] sm:$0xf]  ;;  %v9284_v37 = vor.u32 %v10415_v31, %v9283_v30  ;;  %v10347_v39 = vld [vmem:[%s15618_s1 + $0x142c] sm:$0xf0]  ;;  %v4823_v53 = vadd.f32 %v4822_v42, %v4810_v41  ;;  %5065 = vmatpush.bf16.msrb.mxu0 %v9028_v34  ;;  %v9761_v30 = vld [vmem:[%s15618_s1 + $0x1e4] sm:$0xf]  ;;  %v6552_v41 = vor.u32 %v9729_v27, %v6549_v29 }
  0xc4   :  { %v9011_v38 = vld [vmem:[%s15618_s1 + $0x1420] sm:$0xf]  ;;  %v9412_v43 = vor.u32 %v10447_v33, %v9411_v32  ;;  %v10379_v44 = vld [vmem:[%s15618_s1 + $0x152c] sm:$0xf0]  ;;  %5078 = vmatpush.bf16.msrb.mxu1 %v9156_v36  ;;  %v6677_v31 = vld [vmem:[%s15618_s1 + $0x1f0] sm:$0xf0]  ;;  %v4811_v33 = vpop.f32.mrf.mxu0 }
  0xc5   :  { %v9139_v40 = vld [vmem:[%s15618_s1 + $0x1520] sm:$0xf]  ;;  %v10411_v50 = vld [vmem:[%s15618_s1 + $0x162c] sm:$0xf0]  ;;  %v9012_v54 = vor.u32 %v10347_v39, %v9011_v38  ;;  %5091 = vmatpush.bf16.msrb.mxu2 %v9284_v37  ;;  %v4836_v19 = vadd.f32 %v4835_v63, %v4823_v53  ;;  %v9793_v36 = vld [vmem:[%s15618_s1 + $0x2e4] sm:$0xf]  ;;  %v4824_v38 = vpop.f32.mrf.mxu1  ;;  %v6680_v42 = vor.u32 %v9761_v30, %v6677_v31 }
  0xc6   :  { %v9267_v45 = vld [vmem:[%s15618_s1 + $0x1620] sm:$0xf]  ;;  %v10443_v52 = vld [vmem:[%s15618_s1 + $0x172c] sm:$0xf0]  ;;  %v9140_v57 = vor.u32 %v10379_v44, %v9139_v40  ;;  %5104 = vmatpush.bf16.msrb.mxu3 %v9412_v43  ;;  %v6805_v37 = vld [vmem:[%s15618_s1 + $0x2f0] sm:$0xf0] }
  0xc7   :  { %v9395_v51 = vld [vmem:[%s15618_s1 + $0x1720] sm:$0xf]  ;;  %v10343_v56 = vld [vmem:[%s15618_s1 + $0x140c] sm:$0xf0]  ;;  %v9268_v58 = vor.u32 %v10411_v50, %v9267_v45  ;;  %5066 = vmatpush.bf16.msrb.mxu0 %v9012_v54  ;;  %v11835_v32 = vadd.f32 %v4848_v23, %v4836_v19  ;;  %v9725_v45 = vld [vmem:[%s15618_s1 + $0xc4] sm:$0xf]  ;;  %v6808_v50 = vor.u32 %v9793_v36, %v6805_v37 }
  0xc8   :  { %v8995_v55 = vld [vmem:[%s15618_s1 + $0x1400] sm:$0xf]  ;;  %v10375_v61 = vld [vmem:[%s15618_s1 + $0x150c] sm:$0xf0]  ;;  %v9396_v3 = vor.u32 %v10443_v52, %v9395_v51  ;;  %5079 = vmatpush.bf16.msrb.mxu1 %v9140_v57  ;;  %v6533_v51 = vld [vmem:[%s15618_s1 + $0xd0] sm:$0xf0] }
  0xc9   :  { %v9123_v59 = vld [vmem:[%s15618_s1 + $0x1500] sm:$0xf]  ;;  %v10407_v8 = vld [vmem:[%s15618_s1 + $0x160c] sm:$0xf0]  ;;  %v8996_v28 = vor.u32 %v10343_v56, %v8995_v55  ;;  %5092 = vmatpush.bf16.msrb.mxu2 %v9268_v58  ;;  %v9757_v52 = vld [vmem:[%s15618_s1 + $0x1c4] sm:$0xf]  ;;  %v4837_v56 = vpop.f32.mrf.mxu2  ;;  %v4850_v58 = vpop.f32.mrf.mxu3 }
  0xca   :  { %v9251_v62 = vld [vmem:[%s15618_s1 + $0x1600] sm:$0xf]  ;;  %v10439_v11 = vld [vmem:[%s15618_s1 + $0x170c] sm:$0xf0]  ;;  %v9124_v34 = vor.u32 %v10375_v61, %v9123_v59  ;;  %5105 = vmatpush.bf16.msrb.mxu3 %v9396_v3  ;;  %v6661_v53 = vld [vmem:[%s15618_s1 + $0x1d0] sm:$0xf0]  ;;  %v6536_v59 = vor.u32 %v9725_v45, %v6533_v51 }
  0xcb   :  { %v9379_v10 = vld [vmem:[%s15618_s1 + $0x1700] sm:$0xf]  ;;  %v10483_v25 = vld [vmem:[%s15618_s1 + $0x186c] sm:$0xf0]  ;;  %v9252_v35 = vor.u32 %v10407_v8, %v9251_v62  ;;  %5067 = vmatpush.bf16.msrb.mxu0 %v8996_v28  ;;  %v9789_v54 = vld [vmem:[%s15618_s1 + $0x2c4] sm:$0xf]  ;;  %v6664_v61 = vor.u32 %v9757_v52, %v6661_v53 }
  0xcc   :  { %v9555_v24 = vld [vmem:[%s15618_s1 + $0x1860] sm:$0xf]  ;;  %v9380_v39 = vor.u32 %v10439_v11, %v9379_v10  ;;  %v10479_v44 = vld [vmem:[%s15618_s1 + $0x184c] sm:$0xf0]  ;;  %5080 = vmatpush.bf16.msrb.mxu1 %v9124_v34  ;;  %v6789_v55 = vld [vmem:[%s15618_s1 + $0x2d0] sm:$0xf0] }
  0xcd   :  { %v9556_v40 = vor.u32 %v10483_v25, %v9555_v24  ;;  %v9539_v43 = vld [vmem:[%s15618_s1 + $0x1840] sm:$0xf]  ;;  %5093 = vmatpush.bf16.msrb.mxu2 %v9252_v35  ;;  %v10475_v63 = vld [vmem:[%s15618_s1 + $0x182c] sm:$0xf0]  ;;  %v9721_v3 = vld [vmem:[%s15618_s1 + $0xa4] sm:$0xf]  ;;  %v6792_v8 = vor.u32 %v9789_v54, %v6789_v55  ;;  %v4874_v52 = vpop.f32.mrf.mxu1 }
  0xce   :  { %5106 = vmatpush.bf16.msrb.mxu3 %v9380_v39  ;;  %v9540_v57 = vor.u32 %v10479_v44, %v9539_v43  ;;  %v9523_v62 = vld [vmem:[%s15618_s1 + $0x1820] sm:$0xf]  ;;  %5068 = vmatmul.bf16.vlgmr.msrb.gmra.mxu0 %v11734_v4  ;;  %v6517_v10 = vld [vmem:[%s15618_s1 + $0xb0] sm:$0xf0]  ;;  %v9753_v11 = vld [vmem:[%s15618_s1 + $0x1a4] sm:$0xf] }
  0xcf   :  { %5116 = vmatpush.bf16.msra.mxu0 %v9556_v40  ;;  %v6645_v19 = vld [vmem:[%s15618_s1 + $0x1b0] sm:$0xf0]  ;;  %5081 = vmatmul.bf16.vlgmr.msrb.gmra.mxu1 %v11738_v6  ;;  %v9785_v23 = vld [vmem:[%s15618_s1 + $0x2a4] sm:$0xf]  ;;  %v9524_v25 = vor.u32 %v10475_v63, %v9523_v62  ;;  %v9507_v27 = vld [vmem:[%s15618_s1 + $0x1800] sm:$0xf]  ;;  %v6520_v28 = vor.u32 %v9721_v3, %v6517_v10 }
  0xd0   :  { %5125 = vmatpush.bf16.msra.mxu1 %v6552_v41  ;;  %5094 = vmatmul.bf16.vlgmr.msrb.gmra.mxu2 %v11736_v5  ;;  %v6773_v24 = vld [vmem:[%s15618_s1 + $0x2b0] sm:$0xf0]  ;;  %v6648_v29 = vor.u32 %v9753_v11, %v6645_v19  ;;  %v10471_v30 = vld [vmem:[%s15618_s1 + $0x180c] sm:$0xf0]  ;;  %v9717_v31 = vld [vmem:[%s15618_s1 + $0x84] sm:$0xf] }
  0xd1   :  { %5138 = vmatpush.bf16.msra.mxu2 %v6680_v42  ;;  %5107 = vmatmul.bf16.vlgmr.msrb.gmra.mxu3 %v11740_v7  ;;  %v6501_v33 = vld [vmem:[%s15618_s1 + $0x90] sm:$0xf0]  ;;  %v6776_v34 = vor.u32 %v9785_v23, %v6773_v24  ;;  %v9749_v35 = vld [vmem:[%s15618_s1 + $0x184] sm:$0xf]  ;;  %v9508_v41 = vor.u32 %v10471_v30, %v9507_v27  ;;  %v4861_v42 = vpop.f32.mrf.mxu0  ;;  %v4887_v10 = vpop.f32.mrf.mxu2 }
  0xd2   :  { %5151 = vmatpush.bf16.msra.mxu3 %v6808_v50  ;;  %v6629_v36 = vld [vmem:[%s15618_s1 + $0x190] sm:$0xf0]  ;;  %v9781_v37 = vld [vmem:[%s15618_s1 + $0x284] sm:$0xf]  ;;  %v6504_v43 = vor.u32 %v9717_v31, %v6501_v33  ;;  %v4862_v51 = vadd.f32 %v4861_v42, %v11835_v32 }
  0xd3   :  { %5117 = vmatpush.bf16.msra.mxu0 %v9540_v57  ;;  %v6757_v38 = vld [vmem:[%s15618_s1 + $0x290] sm:$0xf0]  ;;  %v9825_v39 = vld [vmem:[%s15618_s1 + $0x3e4] sm:$0xf]  ;;  %v6632_v44 = vor.u32 %v9749_v35, %v6629_v36 }
  0xd4   :  { %5126 = vmatpush.bf16.msra.mxu1 %v6536_v59  ;;  %v6933_v40 = vld [vmem:[%s15618_s1 + $0x3f0] sm:$0xf0]  ;;  %v9713_v45 = vld [vmem:[%s15618_s1 + $0x64] sm:$0xf]  ;;  %v6760_v53 = vor.u32 %v9781_v37, %v6757_v38 }
  0xd5   :  { %5139 = vmatpush.bf16.msra.mxu2 %v6664_v61  ;;  %v6485_v50 = vld [vmem:[%s15618_s1 + $0x70] sm:$0xf0]  ;;  %v6936_v54 = vor.u32 %v9825_v39, %v6933_v40  ;;  %v9745_v55 = vld [vmem:[%s15618_s1 + $0x164] sm:$0xf]  ;;  %v4875_v61 = vadd.f32 %v4874_v52, %v4862_v51  ;;  %v4876_v40 = vpop.f32.mrf.mxu1 }
  0xd6   :  { %5152 = vmatpush.bf16.msra.mxu3 %v6792_v8  ;;  %v6613_v56 = vld [vmem:[%s15618_s1 + $0x170] sm:$0xf0]  ;;  %v9777_v57 = vld [vmem:[%s15618_s1 + $0x264] sm:$0xf]  ;;  %v6488_v62 = vor.u32 %v9713_v45, %v6485_v50 }
  0xd7   :  { %5118 = vmatpush.bf16.msra.mxu0 %v9524_v25  ;;  %v6741_v32 = vld [vmem:[%s15618_s1 + $0x270] sm:$0xf0]  ;;  %v9821_v58 = vld [vmem:[%s15618_s1 + $0x3c4] sm:$0xf]  ;;  %v6616_v63 = vor.u32 %v9745_v55, %v6613_v56  ;;  %v4888_v27 = vadd.f32 %v4887_v10, %v4875_v61 }
  0xd8   :  { %5127 = vmatpush.bf16.msra.mxu1 %v6520_v28  ;;  %v6917_v59 = vld [vmem:[%s15618_s1 + $0x3d0] sm:$0xf0]  ;;  %v9709_v3 = vld [vmem:[%s15618_s1 + $0x44] sm:$0xf]  ;;  %v6744_v11 = vor.u32 %v9777_v57, %v6741_v32  ;;  %v4900_v28 = vpop.f32.mrf.mxu3 }
  0xd9   :  { %5140 = vmatpush.bf16.msra.mxu2 %v6648_v29  ;;  %v6469_v8 = vld [vmem:[%s15618_s1 + $0x50] sm:$0xf0]  ;;  %v6920_v19 = vor.u32 %v9821_v58, %v6917_v59  ;;  %v9741_v23 = vld [vmem:[%s15618_s1 + $0x144] sm:$0xf]  ;;  %v4863_v35 = vpop.f32.mrf.mxu0  ;;  %v4889_v32 = vpop.f32.mrf.mxu2 }
  0xda   :  { %5153 = vmatpush.bf16.msra.mxu3 %v6776_v34  ;;  %v6597_v24 = vld [vmem:[%s15618_s1 + $0x150] sm:$0xf0]  ;;  %v9773_v25 = vld [vmem:[%s15618_s1 + $0x244] sm:$0xf]  ;;  %v11974_v34 = vadd.f32 %v4900_v28, %v4888_v27  ;;  %v6472_v36 = vor.u32 %v9709_v3, %v6469_v8 }
  0xdb   :  { %5119 = vmatpush.bf16.msra.mxu0 %v9508_v41  ;;  %v6725_v29 = vld [vmem:[%s15618_s1 + $0x250] sm:$0xf0]  ;;  %v9817_v30 = vld [vmem:[%s15618_s1 + $0x3a4] sm:$0xf]  ;;  %v6600_v37 = vor.u32 %v9741_v23, %v6597_v24 }
  0xdc   :  { %5128 = vmatpush.bf16.msra.mxu1 %v6504_v43  ;;  %v6901_v31 = vld [vmem:[%s15618_s1 + $0x3b0] sm:$0xf0]  ;;  %v852_v33 = vld [vmem:[#allocation1] sm:$0xff]  ;;  %v6728_v41 = vor.u32 %v9773_v25, %v6725_v29 }
  0xdd   :  { %5141 = vmatpush.bf16.msra.mxu2 %v6632_v44  ;;  %v9705_v38 = vld [vmem:[%s15618_s1 + $0x24] sm:$0xf]  ;;  %v6453_v39 = vld [vmem:[%s15618_s1 + $0x30] sm:$0xf0]  ;;  %v6904_v42 = vor.u32 %v9817_v30, %v6901_v31 }
  0xde   :  { %5154 = vmatpush.bf16.msra.mxu3 %v6760_v53  ;;  %v9737_v43 = vld [vmem:[%s15618_s1 + $0x124] sm:$0xf]  ;;  %v6581_v44 = vld [vmem:[%s15618_s1 + $0x130] sm:$0xf0]  ;;  %9569 = vmatmul.msk.bf16.vlgmr.msra.gmra.mxu0 %vm4797_vm0, %v852_v33  ;;  %v6456_v53 = vor.u32 %v9705_v38, %v6453_v39 }
  0xdf   :  { %5164 = vmatpush.bf16.msrb.mxu0 %v6936_v54  ;;  %v9769_v45 = vld [vmem:[%s15618_s1 + $0x224] sm:$0xf]  ;;  %v6709_v50 = vld [vmem:[%s15618_s1 + $0x230] sm:$0xf0]  ;;  %v6584_v54 = vor.u32 %v9737_v43, %v6581_v44 }
  0xe0   :  { %5129 = vmatpush.bf16.msra.mxu1 %v6488_v62  ;;  %v9813_v51 = vld [vmem:[%s15618_s1 + $0x384] sm:$0xf]  ;;  %v6885_v52 = vld [vmem:[%s15618_s1 + $0x390] sm:$0xf0]  ;;  %v6712_v58 = vor.u32 %v9769_v45, %v6709_v50  ;;  %v4902_v3 = vpop.f32.mrf.mxu3 }
  0xe1   :  { %5142 = vmatpush.bf16.msra.mxu2 %v6616_v63  ;;  %v9701_v55 = vld [vmem:[%s15618_s1 + $0x4] sm:$0xf]  ;;  %v6437_v56 = vld [vmem:[%s15618_s1 + $0x10] sm:$0xf0]  ;;  %v6888_v59 = vor.u32 %v9813_v51, %v6885_v52 }
  0xe2   :  { %5155 = vmatpush.bf16.msra.mxu3 %v6744_v11  ;;  %v9733_v57 = vld [vmem:[%s15618_s1 + $0x104] sm:$0xf]  ;;  %v6565_v61 = vld [vmem:[%s15618_s1 + $0x110] sm:$0xf0]  ;;  %v6440_v25 = vor.u32 %v9701_v55, %v6437_v56 }
  0xe3   :  { %5165 = vmatpush.bf16.msrb.mxu0 %v6920_v19  ;;  %v9765_v62 = vld [vmem:[%s15618_s1 + $0x204] sm:$0xf]  ;;  %v6693_v63 = vld [vmem:[%s15618_s1 + $0x210] sm:$0xf0]  ;;  %v6568_v27 = vor.u32 %v9733_v57, %v6565_v61 }
  0xe4   :  { %5130 = vmatpush.bf16.msra.mxu1 %v6472_v36  ;;  %v9809_v8 = vld [vmem:[%s15618_s1 + $0x364] sm:$0xf]  ;;  %v6869_v10 = vld [vmem:[%s15618_s1 + $0x370] sm:$0xf0]  ;;  %v6696_v30 = vor.u32 %v9765_v62, %v6693_v63 }
  0xe5   :  { %5143 = vmatpush.bf16.msra.mxu2 %v6600_v37  ;;  %v9857_v11 = vld [vmem:[%s15618_s1 + $0x4e4] sm:$0xf]  ;;  %v7061_v19 = vld [vmem:[%s15618_s1 + $0x4f0] sm:$0xf0]  ;;  %v6872_v31 = vor.u32 %v9809_v8, %v6869_v10 }
  0xe6   :  { %5156 = vmatpush.bf16.msra.mxu3 %v6728_v41  ;;  %v9889_v23 = vld [vmem:[%s15618_s1 + $0x5e4] sm:$0xf]  ;;  %v7189_v24 = vld [vmem:[%s15618_s1 + $0x5f0] sm:$0xf0]  ;;  %v7064_v33 = vor.u32 %v9857_v11, %v7061_v19 }
  0xe7   :  { %5166 = vmatpush.bf16.msrb.mxu0 %v6904_v42  ;;  %v9921_v28 = vld [vmem:[%s15618_s1 + $0x6e4] sm:$0xf]  ;;  %v7317_v29 = vld [vmem:[%s15618_s1 + $0x6f0] sm:$0xf0]  ;;  %v7192_v35 = vor.u32 %v9889_v23, %v7189_v24 }
  0xe8   :  { %5131 = vmatpush.bf16.msra.mxu1 %v6456_v53  ;;  %v9805_v36 = vld [vmem:[%s15618_s1 + $0x344] sm:$0xf]  ;;  %v6853_v37 = vld [vmem:[%s15618_s1 + $0x350] sm:$0xf0]  ;;  %v7320_v39 = vor.u32 %v9921_v28, %v7317_v29 }
  0xe9   :  { %5144 = vmatpush.bf16.msra.mxu2 %v6584_v54  ;;  %v9853_v38 = vld [vmem:[%s15618_s1 + $0x4c4] sm:$0xf]  ;;  %v7045_v40 = vld [vmem:[%s15618_s1 + $0x4d0] sm:$0xf0]  ;;  %v6856_v45 = vor.u32 %v9805_v36, %v6853_v37 }
  0xea   :  { %5157 = vmatpush.bf16.msra.mxu3 %v6712_v58  ;;  %v9885_v41 = vld [vmem:[%s15618_s1 + $0x5c4] sm:$0xf]  ;;  %v7173_v42 = vld [vmem:[%s15618_s1 + $0x5d0] sm:$0xf0]  ;;  %v7048_v50 = vor.u32 %v9853_v38, %v7045_v40 }
  0xeb   :  { %5167 = vmatpush.bf16.msrb.mxu0 %v6888_v59  ;;  %v9917_v43 = vld [vmem:[%s15618_s1 + $0x6c4] sm:$0xf]  ;;  %v7301_v44 = vld [vmem:[%s15618_s1 + $0x6d0] sm:$0xf0]  ;;  %v7176_v51 = vor.u32 %v9885_v41, %v7173_v42 }
  0xec   :  { %5132 = vmatpush.bf16.msra.mxu1 %v6440_v25  ;;  %v9801_v52 = vld [vmem:[%s15618_s1 + $0x324] sm:$0xf]  ;;  %v6837_v53 = vld [vmem:[%s15618_s1 + $0x330] sm:$0xf0]  ;;  %v7304_v55 = vor.u32 %v9917_v43, %v7301_v44 }
  0xed   :  { %5145 = vmatpush.bf16.msra.mxu2 %v6568_v27  ;;  %v9849_v54 = vld [vmem:[%s15618_s1 + $0x4a4] sm:$0xf]  ;;  %v7029_v56 = vld [vmem:[%s15618_s1 + $0x4b0] sm:$0xf0]  ;;  %v6840_v61 = vor.u32 %v9801_v52, %v6837_v53  ;;  %v4913_v27 = vpop.f32.mrf.mxu0 }
  0xee   :  { %5158 = vmatpush.bf16.msra.mxu3 %v6696_v30  ;;  %v9881_v57 = vld [vmem:[%s15618_s1 + $0x5a4] sm:$0xf]  ;;  %v7157_v32 = vld [vmem:[%s15618_s1 + $0x5b0] sm:$0xf0]  ;;  %v7032_v63 = vor.u32 %v9849_v54, %v7029_v56 }
  0xef   :  { %5168 = vmatpush.bf16.msrb.mxu0 %v6872_v31  ;;  %v9913_v58 = vld [vmem:[%s15618_s1 + $0x6a4] sm:$0xf]  ;;  %v7285_v59 = vld [vmem:[%s15618_s1 + $0x6b0] sm:$0xf0]  ;;  %5133 = vmatmul.bf16.vlgmr.msra.gmra.mxu1 %v10887_v21  ;;  %v7160_v3 = vor.u32 %v9881_v57, %v7157_v32  ;;  %v4914_v31 = vadd.f32 %v4913_v27, %v11974_v34  ;;  %v4939_v57 = vpop.f32.mrf.mxu2 }
  0xf0   :  { %5177 = vmatpush.bf16.msrb.mxu1 %v7064_v33  ;;  %5146 = vmatmul.bf16.vlgmr.msra.gmra.mxu2 %v10898_v26  ;;  %v9797_v62 = vld [vmem:[%s15618_s1 + $0x304] sm:$0xf]  ;;  %v6821_v8 = vld [vmem:[%s15618_s1 + $0x310] sm:$0xf0]  ;;  %v7288_v19 = vor.u32 %v9913_v58, %v7285_v59 }
  0xf1   :  { %5190 = vmatpush.bf16.msrb.mxu2 %v7192_v35  ;;  %5159 = vmatmul.bf16.vlgmr.msra.gmra.mxu3 %v10885_v20  ;;  %v9845_v10 = vld [vmem:[%s15618_s1 + $0x484] sm:$0xf]  ;;  %v7013_v11 = vld [vmem:[%s15618_s1 + $0x490] sm:$0xf0]  ;;  %v6824_v33 = vor.u32 %v9797_v62, %v6821_v8  ;;  %v4926_v35 = vpop.f32.mrf.mxu1 }
  0xf2   :  { %5203 = vmatpush.bf16.msrb.mxu3 %v7320_v39  ;;  %v9877_v23 = vld [vmem:[%s15618_s1 + $0x584] sm:$0xf]  ;;  %v7141_v24 = vld [vmem:[%s15618_s1 + $0x590] sm:$0xf0]  ;;  %v7016_v36 = vor.u32 %v9845_v10, %v7013_v11  ;;  %v4927_v41 = vadd.f32 %v4926_v35, %v4914_v31 }
  0xf3   :  { %5169 = vmatpush.bf16.msrb.mxu0 %v6856_v45  ;;  %v9909_v25 = vld [vmem:[%s15618_s1 + $0x684] sm:$0xf]  ;;  %v7269_v28 = vld [vmem:[%s15618_s1 + $0x690] sm:$0xf0]  ;;  %v7144_v37 = vor.u32 %v9877_v23, %v7141_v24 }
  0xf4   :  { %5178 = vmatpush.bf16.msrb.mxu1 %v7048_v50  ;;  %v9953_v29 = vld [vmem:[%s15618_s1 + $0x7e4] sm:$0xf]  ;;  %v7445_v30 = vld [vmem:[%s15618_s1 + $0x7f0] sm:$0xf0]  ;;  %v7272_v40 = vor.u32 %v9909_v25, %v7269_v28  ;;  %v4940_v62 = vadd.f32 %v4939_v57, %v4927_v41 }
  0xf5   :  { %5191 = vmatpush.bf16.msrb.mxu2 %v7176_v51  ;;  %v9841_v38 = vld [vmem:[%s15618_s1 + $0x464] sm:$0xf]  ;;  %v6997_v39 = vld [vmem:[%s15618_s1 + $0x470] sm:$0xf0]  ;;  %v7448_v42 = vor.u32 %v9953_v29, %v7445_v30  ;;  %v4915_v11 = vpop.f32.mrf.mxu0 }
  0xf6   :  { %5204 = vmatpush.bf16.msrb.mxu3 %v7304_v55  ;;  %v9873_v34 = vld [vmem:[%s15618_s1 + $0x564] sm:$0xf]  ;;  %v7125_v43 = vld [vmem:[%s15618_s1 + $0x570] sm:$0xf0]  ;;  %v7000_v52 = vor.u32 %v9841_v38, %v6997_v39 }
  0xf7   :  { %5170 = vmatpush.bf16.msrb.mxu0 %v6840_v61  ;;  %v9905_v44 = vld [vmem:[%s15618_s1 + $0x664] sm:$0xf]  ;;  %v7253_v45 = vld [vmem:[%s15618_s1 + $0x670] sm:$0xf0]  ;;  %v7128_v53 = vor.u32 %v9873_v34, %v7125_v43 }
  0xf8   :  { %5179 = vmatpush.bf16.msrb.mxu1 %v7032_v63  ;;  %v9949_v50 = vld [vmem:[%s15618_s1 + $0x7c4] sm:$0xf]  ;;  %v7429_v51 = vld [vmem:[%s15618_s1 + $0x7d0] sm:$0xf0]  ;;  %v7256_v56 = vor.u32 %v9905_v44, %v7253_v45  ;;  %v4952_v63 = vpop.f32.mrf.mxu3 }
  0xf9   :  { %5192 = vmatpush.bf16.msrb.mxu2 %v7160_v3  ;;  %v9837_v54 = vld [vmem:[%s15618_s1 + $0x444] sm:$0xf]  ;;  %v6981_v55 = vld [vmem:[%s15618_s1 + $0x450] sm:$0xf0]  ;;  %v7432_v32 = vor.u32 %v9949_v50, %v7429_v51  ;;  %v12174_v23 = vadd.f32 %v4952_v63, %v4940_v62 }
  0xfa   :  { %5205 = vmatpush.bf16.msrb.mxu3 %v7288_v19  ;;  %v9869_v58 = vld [vmem:[%s15618_s1 + $0x544] sm:$0xf]  ;;  %v7109_v59 = vld [vmem:[%s15618_s1 + $0x550] sm:$0xf0]  ;;  %v4928_v19 = vpop.f32.mrf.mxu1  ;;  %v6984_v24 = vor.u32 %v9837_v54, %v6981_v55 }
  0xfb   :  { %5171 = vmatpush.bf16.msrb.mxu0 %v6824_v33  ;;  %v9901_v61 = vld [vmem:[%s15618_s1 + $0x644] sm:$0xf]  ;;  %v7237_v3 = vld [vmem:[%s15618_s1 + $0x650] sm:$0xf0]  ;;  %v7112_v25 = vor.u32 %v9869_v58, %v7109_v59 }
  0xfc   :  { %5180 = vmatpush.bf16.msrb.mxu1 %v7016_v36  ;;  %v9945_v8 = vld [vmem:[%s15618_s1 + $0x7a4] sm:$0xf]  ;;  %v7413_v10 = vld [vmem:[%s15618_s1 + $0x7b0] sm:$0xf0]  ;;  %v7240_v29 = vor.u32 %v9901_v61, %v7237_v3 }
  0xfd   :  { %5193 = vmatpush.bf16.msrb.mxu2 %v7144_v37  ;;  %v9833_v27 = vld [vmem:[%s15618_s1 + $0x424] sm:$0xf]  ;;  %v6965_v28 = vld [vmem:[%s15618_s1 + $0x430] sm:$0xf0]  ;;  %v7416_v30 = vor.u32 %v9945_v8, %v7413_v10 }
  0xfe   :  { %5206 = vmatpush.bf16.msrb.mxu3 %v7272_v40  ;;  %5172 = vmatmul.bf16.vlgmr.msrb.gmra.mxu0 %v10889_v22  ;;  %v9865_v31 = vld [vmem:[%s15618_s1 + $0x524] sm:$0xf]  ;;  %v7093_v33 = vld [vmem:[%s15618_s1 + $0x530] sm:$0xf0]  ;;  %v6968_v39 = vor.u32 %v9833_v27, %v6965_v28 }
  0xff   :  { %5216 = vmatpush.bf16.msra.mxu0 %v7448_v42  ;;  %v9897_v35 = vld [vmem:[%s15618_s1 + $0x624] sm:$0xf]  ;;  %v7221_v36 = vld [vmem:[%s15618_s1 + $0x630] sm:$0xf0]  ;;  %v7096_v40 = vor.u32 %v9865_v31, %v7093_v33 }
 0x100   :  { %5181 = vmatpush.bf16.msrb.mxu1 %v7000_v52  ;;  %v9941_v37 = vld [vmem:[%s15618_s1 + $0x784] sm:$0xf]  ;;  %v7397_v38 = vld [vmem:[%s15618_s1 + $0x790] sm:$0xf0]  ;;  %v7224_v43 = vor.u32 %v9897_v35, %v7221_v36  ;;  %v4941_v52 = vpop.f32.mrf.mxu2 }
 0x101   :  { %5194 = vmatpush.bf16.msrb.mxu2 %v7128_v53  ;;  %v9829_v41 = vld [vmem:[%s15618_s1 + $0x404] sm:$0xf]  ;;  %v6949_v42 = vld [vmem:[%s15618_s1 + $0x410] sm:$0xf0]  ;;  %v7400_v44 = vor.u32 %v9941_v37, %v7397_v38 }
 0x102   :  { %5207 = vmatpush.bf16.msrb.mxu3 %v7256_v56  ;;  %v9861_v34 = vld [vmem:[%s15618_s1 + $0x504] sm:$0xf]  ;;  %v7077_v45 = vld [vmem:[%s15618_s1 + $0x510] sm:$0xf0]  ;;  %v4954_v56 = vpop.f32.mrf.mxu3  ;;  %v6952_v59 = vor.u32 %v9829_v41, %v6949_v42 }
 0x103   :  { %5217 = vmatpush.bf16.msra.mxu0 %v7432_v32  ;;  %v9893_v50 = vld [vmem:[%s15618_s1 + $0x604] sm:$0xf]  ;;  %v7205_v51 = vld [vmem:[%s15618_s1 + $0x610] sm:$0xf0]  ;;  %v7080_v61 = vor.u32 %v9861_v34, %v7077_v45 }
 0x104   :  { %5182 = vmatpush.bf16.msrb.mxu1 %v6984_v24  ;;  %v9937_v53 = vld [vmem:[%s15618_s1 + $0x764] sm:$0xf]  ;;  %v7381_v54 = vld [vmem:[%s15618_s1 + $0x770] sm:$0xf0]  ;;  %v7208_v3 = vor.u32 %v9893_v50, %v7205_v51 }
 0x105   :  { %5195 = vmatpush.bf16.msrb.mxu2 %v7112_v25  ;;  %v9985_v55 = vld [vmem:[%s15618_s1 + $0x8e4] sm:$0xf]  ;;  %v7573_v57 = vld [vmem:[%s15618_s1 + $0x8f0] sm:$0xf0]  ;;  %v7384_v8 = vor.u32 %v9937_v53, %v7381_v54 }
 0x106   :  { %5208 = vmatpush.bf16.msrb.mxu3 %v7240_v29  ;;  %v10017_v32 = vld [vmem:[%s15618_s1 + $0x9e4] sm:$0xf]  ;;  %v7701_v58 = vld [vmem:[%s15618_s1 + $0x9f0] sm:$0xf0]  ;;  %v7576_v10 = vor.u32 %v9985_v55, %v7573_v57 }
 0x107   :  { %5218 = vmatpush.bf16.msra.mxu0 %v7416_v30  ;;  %v10049_v62 = vld [vmem:[%s15618_s1 + $0xae4] sm:$0xf]  ;;  %v7829_v63 = vld [vmem:[%s15618_s1 + $0xaf0] sm:$0xf0]  ;;  %v7704_v11 = vor.u32 %v10017_v32, %v7701_v58 }
 0x108   :  { %5183 = vmatpush.bf16.msrb.mxu1 %v6968_v39  ;;  %v9933_v19 = vld [vmem:[%s15618_s1 + $0x744] sm:$0xf]  ;;  %v7365_v24 = vld [vmem:[%s15618_s1 + $0x750] sm:$0xf0]  ;;  %v7832_v27 = vor.u32 %v10049_v62, %v7829_v63 }
 0x109   :  { %5196 = vmatpush.bf16.msrb.mxu2 %v7096_v40  ;;  %v9981_v25 = vld [vmem:[%s15618_s1 + $0x8c4] sm:$0xf]  ;;  %v7557_v28 = vld [vmem:[%s15618_s1 + $0x8d0] sm:$0xf0]  ;;  %v7368_v35 = vor.u32 %v9933_v19, %v7365_v24 }
 0x10a   :  { %5209 = vmatpush.bf16.msrb.mxu3 %v7224_v43  ;;  %v10013_v29 = vld [vmem:[%s15618_s1 + $0x9c4] sm:$0xf]  ;;  %v7685_v30 = vld [vmem:[%s15618_s1 + $0x9d0] sm:$0xf0]  ;;  %v7560_v36 = vor.u32 %v9981_v25, %v7557_v28 }
 0x10b   :  { %5219 = vmatpush.bf16.msra.mxu0 %v7400_v44  ;;  %v10045_v31 = vld [vmem:[%s15618_s1 + $0xac4] sm:$0xf]  ;;  %v7813_v33 = vld [vmem:[%s15618_s1 + $0xad0] sm:$0xf0]  ;;  %v7688_v37 = vor.u32 %v10013_v29, %v7685_v30 }
 0x10c   :  { %5184 = vmatpush.bf16.msrb.mxu1 %v6952_v59  ;;  %v9929_v38 = vld [vmem:[%s15618_s1 + $0x724] sm:$0xf]  ;;  %v7349_v39 = vld [vmem:[%s15618_s1 + $0x730] sm:$0xf0]  ;;  %v7816_v41 = vor.u32 %v10045_v31, %v7813_v33 }
 0x10d   :  { %5197 = vmatpush.bf16.msrb.mxu2 %v7080_v61  ;;  %v9977_v40 = vld [vmem:[%s15618_s1 + $0x8a4] sm:$0xf]  ;;  %v7541_v42 = vld [vmem:[%s15618_s1 + $0x8b0] sm:$0xf0]  ;;  %v7352_v50 = vor.u32 %v9929_v38, %v7349_v39  ;;  %v4965_v61 = vpop.f32.mrf.mxu0 }
 0x10e   :  { %5210 = vmatpush.bf16.msrb.mxu3 %v7208_v3  ;;  %v10009_v34 = vld [vmem:[%s15618_s1 + $0x9a4] sm:$0xf]  ;;  %v7669_v43 = vld [vmem:[%s15618_s1 + $0x9b0] sm:$0xf0]  ;;  %v7544_v52 = vor.u32 %v9977_v40, %v7541_v42 }
 0x10f   :  { %5220 = vmatpush.bf16.msra.mxu0 %v7384_v8  ;;  %v10041_v44 = vld [vmem:[%s15618_s1 + $0xaa4] sm:$0xf]  ;;  %v7797_v45 = vld [vmem:[%s15618_s1 + $0xab0] sm:$0xf0]  ;;  %5185 = vmatmul.bf16.vlgmr.msrb.gmra.mxu1 %v10980_v0  ;;  %v7672_v53 = vor.u32 %v10009_v34, %v7669_v43  ;;  %v4966_v8 = vadd.f32 %v4965_v61, %v12174_v23 }
 0x110   :  { %5229 = vmatpush.bf16.msra.mxu1 %v7576_v10  ;;  %5198 = vmatmul.bf16.vlgmr.msrb.gmra.mxu2 %v10984_v2  ;;  %v9925_v51 = vld [vmem:[%s15618_s1 + $0x704] sm:$0xf]  ;;  %v7333_v54 = vld [vmem:[%s15618_s1 + $0x710] sm:$0xf0]  ;;  %v7800_v57 = vor.u32 %v10041_v44, %v7797_v45 }
 0x111   :  { %5242 = vmatpush.bf16.msra.mxu2 %v7704_v11  ;;  %5211 = vmatmul.bf16.vlgmr.msrb.gmra.mxu3 %v10975_v60  ;;  %v9973_v55 = vld [vmem:[%s15618_s1 + $0x884] sm:$0xf]  ;;  %v7525_v56 = vld [vmem:[%s15618_s1 + $0x890] sm:$0xf0]  ;;  %v7336_v10 = vor.u32 %v9925_v51, %v7333_v54  ;;  %v4978_v11 = vpop.f32.mrf.mxu1 }
 0x112   :  { %5255 = vmatpush.bf16.msra.mxu3 %v7832_v27  ;;  %v10005_v32 = vld [vmem:[%s15618_s1 + $0x984] sm:$0xf]  ;;  %v7653_v58 = vld [vmem:[%s15618_s1 + $0x990] sm:$0xf0]  ;;  %v7528_v19 = vor.u32 %v9973_v55, %v7525_v56  ;;  %v4979_v29 = vadd.f32 %v4978_v11, %v4966_v8 }
 0x113   :  { %5221 = vmatpush.bf16.msra.mxu0 %v7368_v35  ;;  %v10037_v59 = vld [vmem:[%s15618_s1 + $0xa84] sm:$0xf]  ;;  %v7781_v62 = vld [vmem:[%s15618_s1 + $0xa90] sm:$0xf0]  ;;  %v7656_v24 = vor.u32 %v10005_v32, %v7653_v58 }
 0x114   :  { %5230 = vmatpush.bf16.msra.mxu1 %v7560_v36  ;;  %v10081_v63 = vld [vmem:[%s15618_s1 + $0xbe4] sm:$0xf]  ;;  %v7957_v3 = vld [vmem:[%s15618_s1 + $0xbf0] sm:$0xf0]  ;;  %v7784_v28 = vor.u32 %v10037_v59, %v7781_v62  ;;  %v4991_v34 = vpop.f32.mrf.mxu2 }
 0x115   :  { %5243 = vmatpush.bf16.msra.mxu2 %v7688_v37  ;;  %v9969_v25 = vld [vmem:[%s15618_s1 + $0x864] sm:$0xf]  ;;  %v7509_v27 = vld [vmem:[%s15618_s1 + $0x870] sm:$0xf0]  ;;  %v7960_v30 = vor.u32 %v10081_v63, %v7957_v3  ;;  %v4992_v51 = vadd.f32 %v4991_v34, %v4979_v29  ;;  %v4967_v56 = vpop.f32.mrf.mxu0 }
 0x116   :  { %5256 = vmatpush.bf16.msra.mxu3 %v7816_v41  ;;  %v10001_v23 = vld [vmem:[%s15618_s1 + $0x964] sm:$0xf]  ;;  %v7637_v31 = vld [vmem:[%s15618_s1 + $0x970] sm:$0xf0]  ;;  %v7512_v38 = vor.u32 %v9969_v25, %v7509_v27 }
 0x117   :  { %5222 = vmatpush.bf16.msra.mxu0 %v7352_v50  ;;  %v10033_v33 = vld [vmem:[%s15618_s1 + $0xa64] sm:$0xf]  ;;  %v7765_v35 = vld [vmem:[%s15618_s1 + $0xa70] sm:$0xf0]  ;;  %v7640_v39 = vor.u32 %v10001_v23, %v7637_v31 }
 0x118   :  { %5231 = vmatpush.bf16.msra.mxu1 %v7544_v52  ;;  %v10077_v36 = vld [vmem:[%s15618_s1 + $0xbc4] sm:$0xf]  ;;  %v7941_v37 = vld [vmem:[%s15618_s1 + $0xbd0] sm:$0xf0]  ;;  %v7768_v42 = vor.u32 %v10033_v33, %v7765_v35  ;;  %v5004_v52 = vpop.f32.mrf.mxu3 }
 0x119   :  { %5244 = vmatpush.bf16.msra.mxu2 %v7672_v53  ;;  %v9965_v40 = vld [vmem:[%s15618_s1 + $0x844] sm:$0xf]  ;;  %v7493_v41 = vld [vmem:[%s15618_s1 + $0x850] sm:$0xf0]  ;;  %v7944_v43 = vor.u32 %v10077_v36, %v7941_v37  ;;  %v12373_v32 = vadd.f32 %v5004_v52, %v4992_v51 }
 0x11a   :  { %5257 = vmatpush.bf16.msra.mxu3 %v7800_v57  ;;  %v9997_v44 = vld [vmem:[%s15618_s1 + $0x944] sm:$0xf]  ;;  %v7621_v45 = vld [vmem:[%s15618_s1 + $0x950] sm:$0xf0]  ;;  %v4980_v57 = vpop.f32.mrf.mxu1  ;;  %v7496_v58 = vor.u32 %v9965_v40, %v7493_v41 }
 0x11b   :  { %5223 = vmatpush.bf16.msra.mxu0 %v7336_v10  ;;  %v10029_v50 = vld [vmem:[%s15618_s1 + $0xa44] sm:$0xf]  ;;  %v7749_v53 = vld [vmem:[%s15618_s1 + $0xa50] sm:$0xf0]  ;;  %v7624_v59 = vor.u32 %v9997_v44, %v7621_v45 }
 0x11c   :  { %5232 = vmatpush.bf16.msra.mxu1 %v7528_v19  ;;  %v10073_v54 = vld [vmem:[%s15618_s1 + $0xba4] sm:$0xf]  ;;  %v7925_v55 = vld [vmem:[%s15618_s1 + $0xbb0] sm:$0xf0]  ;;  %v7752_v63 = vor.u32 %v10029_v50, %v7749_v53 }
 0x11d   :  { %5245 = vmatpush.bf16.msra.mxu2 %v7656_v24  ;;  %v9961_v61 = vld [vmem:[%s15618_s1 + $0x824] sm:$0xf]  ;;  %v7477_v62 = vld [vmem:[%s15618_s1 + $0x830] sm:$0xf0]  ;;  %v7928_v3 = vor.u32 %v10073_v54, %v7925_v55 }
 0x11e   :  { %5258 = vmatpush.bf16.msra.mxu3 %v7784_v28  ;;  %5224 = vmatmul.bf16.vlgmr.msra.gmra.mxu0 %v10982_v1  ;;  %v9993_v8 = vld [vmem:[%s15618_s1 + $0x924] sm:$0xf]  ;;  %v7605_v10 = vld [vmem:[%s15618_s1 + $0x930] sm:$0xf0]  ;;  %v7480_v27 = vor.u32 %v9961_v61, %v7477_v62 }
 0x11f   :  { %5268 = vmatpush.bf16.msrb.mxu0 %v7960_v30  ;;  %v10025_v11 = vld [vmem:[%s15618_s1 + $0xa24] sm:$0xf]  ;;  %v7733_v19 = vld [vmem:[%s15618_s1 + $0xa30] sm:$0xf0]  ;;  %v7608_v28 = vor.u32 %v9993_v8, %v7605_v10 }
 0x120   :  { %5233 = vmatpush.bf16.msra.mxu1 %v7512_v38  ;;  %v10069_v24 = vld [vmem:[%s15618_s1 + $0xb84] sm:$0xf]  ;;  %v7909_v25 = vld [vmem:[%s15618_s1 + $0xb90] sm:$0xf0]  ;;  %v7736_v31 = vor.u32 %v10025_v11, %v7733_v19  ;;  %v4993_v38 = vpop.f32.mrf.mxu2 }
 0x121   :  { %5246 = vmatpush.bf16.msra.mxu2 %v7640_v39  ;;  %v9957_v29 = vld [vmem:[%s15618_s1 + $0x804] sm:$0xf]  ;;  %v7461_v30 = vld [vmem:[%s15618_s1 + $0x810] sm:$0xf0]  ;;  %v7912_v33 = vor.u32 %v10069_v24, %v7909_v25 }
 0x122   :  { %5259 = vmatpush.bf16.msra.mxu3 %v7768_v42  ;;  %v9989_v23 = vld [vmem:[%s15618_s1 + $0x904] sm:$0xf]  ;;  %v7589_v35 = vld [vmem:[%s15618_s1 + $0x910] sm:$0xf0]  ;;  %v5006_v42 = vpop.f32.mrf.mxu3  ;;  %v7464_v45 = vor.u32 %v9957_v29, %v7461_v30 }
 0x123   :  { %5269 = vmatpush.bf16.msrb.mxu0 %v7944_v43  ;;  %v10021_v36 = vld [vmem:[%s15618_s1 + $0xa04] sm:$0xf]  ;;  %v7717_v37 = vld [vmem:[%s15618_s1 + $0xa10] sm:$0xf0]  ;;  %v7592_v50 = vor.u32 %v9989_v23, %v7589_v35 }
 0x124   :  { %5234 = vmatpush.bf16.msra.mxu1 %v7496_v58  ;;  %v10065_v39 = vld [vmem:[%s15618_s1 + $0xb64] sm:$0xf]  ;;  %v7893_v40 = vld [vmem:[%s15618_s1 + $0xb70] sm:$0xf0]  ;;  %v7720_v53 = vor.u32 %v10021_v36, %v7717_v37 }
 0x125   :  { %5247 = vmatpush.bf16.msra.mxu2 %v7624_v59  ;;  %v10113_v41 = vld [vmem:[%s15618_s1 + $0xce4] sm:$0xf]  ;;  %v8085_v34 = vld [vmem:[%s15618_s1 + $0xcf0] sm:$0xf0]  ;;  %v7896_v54 = vor.u32 %v10065_v39, %v7893_v40 }
 0x126   :  { %5260 = vmatpush.bf16.msra.mxu3 %v7752_v63  ;;  %v10145_v43 = vld [vmem:[%s15618_s1 + $0xde4] sm:$0xf]  ;;  %v8213_v44 = vld [vmem:[%s15618_s1 + $0xdf0] sm:$0xf0]  ;;  %v8088_v55 = vor.u32 %v10113_v41, %v8085_v34 }
 0x127   :  { %5270 = vmatpush.bf16.msrb.mxu0 %v7928_v3  ;;  %v10177_v51 = vld [vmem:[%s15618_s1 + $0xee4] sm:$0xf]  ;;  %v8341_v52 = vld [vmem:[%s15618_s1 + $0xef0] sm:$0xf0]  ;;  %v8216_v56 = vor.u32 %v10145_v43, %v8213_v44 }
 0x128   :  { %5235 = vmatpush.bf16.msra.mxu1 %v7480_v27  ;;  %v10061_v57 = vld [vmem:[%s15618_s1 + $0xb44] sm:$0xf]  ;;  %v7877_v58 = vld [vmem:[%s15618_s1 + $0xb50] sm:$0xf0]  ;;  %v8344_v61 = vor.u32 %v10177_v51, %v8341_v52 }
 0x129   :  { %5248 = vmatpush.bf16.msra.mxu2 %v7608_v28  ;;  %v10109_v59 = vld [vmem:[%s15618_s1 + $0xcc4] sm:$0xf]  ;;  %v8069_v62 = vld [vmem:[%s15618_s1 + $0xcd0] sm:$0xf0]  ;;  %v7880_v11 = vor.u32 %v10061_v57, %v7877_v58 }
 0x12a   :  { %5261 = vmatpush.bf16.msra.mxu3 %v7736_v31  ;;  %v10141_v63 = vld [vmem:[%s15618_s1 + $0xdc4] sm:$0xf]  ;;  %v8197_v3 = vld [vmem:[%s15618_s1 + $0xdd0] sm:$0xf0]  ;;  %v8072_v19 = vor.u32 %v10109_v59, %v8069_v62 }
 0x12b   :  { %5271 = vmatpush.bf16.msrb.mxu0 %v7912_v33  ;;  %v10173_v8 = vld [vmem:[%s15618_s1 + $0xec4] sm:$0xf]  ;;  %v8325_v10 = vld [vmem:[%s15618_s1 + $0xed0] sm:$0xf0]  ;;  %v8200_v24 = vor.u32 %v10141_v63, %v8197_v3 }
 0x12c   :  { %5236 = vmatpush.bf16.msra.mxu1 %v7464_v45  ;;  %v10057_v25 = vld [vmem:[%s15618_s1 + $0xb24] sm:$0xf]  ;;  %v7861_v27 = vld [vmem:[%s15618_s1 + $0xb30] sm:$0xf0]  ;;  %v8328_v29 = vor.u32 %v10173_v8, %v8325_v10 }
 0x12d   :  { %5249 = vmatpush.bf16.msra.mxu2 %v7592_v50  ;;  %v10105_v28 = vld [vmem:[%s15618_s1 + $0xca4] sm:$0xf]  ;;  %v8053_v30 = vld [vmem:[%s15618_s1 + $0xcb0] sm:$0xf0]  ;;  %v7864_v36 = vor.u32 %v10057_v25, %v7861_v27 }
 0x12e   :  { %5262 = vmatpush.bf16.msra.mxu3 %v7720_v53  ;;  %v10137_v23 = vld [vmem:[%s15618_s1 + $0xda4] sm:$0xf]  ;;  %v8181_v31 = vld [vmem:[%s15618_s1 + $0xdb0] sm:$0xf0]  ;;  %v8056_v38 = vor.u32 %v10105_v28, %v8053_v30  ;;  %v5017_v50 = vpop.f32.mrf.mxu0 }
 0x12f   :  { %5272 = vmatpush.bf16.msrb.mxu0 %v7896_v54  ;;  %5237 = vmatmul.bf16.vlgmr.msra.gmra.mxu1 %v11230_v12  ;;  %v10169_v33 = vld [vmem:[%s15618_s1 + $0xea4] sm:$0xf]  ;;  %v8309_v35 = vld [vmem:[%s15618_s1 + $0xeb0] sm:$0xf0]  ;;  %v8184_v39 = vor.u32 %v10137_v23, %v8181_v31  ;;  %v5018_v54 = vadd.f32 %v5017_v50, %v12373_v32 }
 0x130   :  { %5281 = vmatpush.bf16.msrb.mxu1 %v8088_v55  ;;  %5250 = vmatmul.bf16.vlgmr.msra.gmra.mxu2 %v11240_v16  ;;  %v10053_v37 = vld [vmem:[%s15618_s1 + $0xb04] sm:$0xf]  ;;  %v7845_v40 = vld [vmem:[%s15618_s1 + $0xb10] sm:$0xf0]  ;;  %v8312_v34 = vor.u32 %v10169_v33, %v8309_v35 }
 0x131   :  { %5294 = vmatpush.bf16.msrb.mxu2 %v8216_v56  ;;  %5263 = vmatmul.bf16.vlgmr.msra.gmra.mxu3 %v11238_v15  ;;  %v10101_v41 = vld [vmem:[%s15618_s1 + $0xc84] sm:$0xf]  ;;  %v8037_v42 = vld [vmem:[%s15618_s1 + $0xc90] sm:$0xf0]  ;;  %v7848_v55 = vor.u32 %v10053_v37, %v7845_v40  ;;  %v5030_v56 = vpop.f32.mrf.mxu1 }
 0x132   :  { %5307 = vmatpush.bf16.msrb.mxu3 %v8344_v61  ;;  %v10133_v43 = vld [vmem:[%s15618_s1 + $0xd84] sm:$0xf]  ;;  %v8165_v44 = vld [vmem:[%s15618_s1 + $0xd90] sm:$0xf0]  ;;  %v8040_v57 = vor.u32 %v10101_v41, %v8037_v42  ;;  %v5031_v63 = vadd.f32 %v5030_v56, %v5018_v54 }
 0x133   :  { %5273 = vmatpush.bf16.msrb.mxu0 %v7880_v11  ;;  %v10165_v45 = vld [vmem:[%s15618_s1 + $0xe84] sm:$0xf]  ;;  %v8293_v51 = vld [vmem:[%s15618_s1 + $0xe90] sm:$0xf0]  ;;  %v8168_v58 = vor.u32 %v10133_v43, %v8165_v44 }
 0x134   :  { %5282 = vmatpush.bf16.msrb.mxu1 %v8072_v19  ;;  %v10209_v52 = vld [vmem:[%s15618_s1 + $0xfe4] sm:$0xf]  ;;  %v8469_v53 = vld [vmem:[%s15618_s1 + $0xff0] sm:$0xf0]  ;;  %v8296_v62 = vor.u32 %v10165_v45, %v8293_v51 }
 0x135   :  { %5295 = vmatpush.bf16.msrb.mxu2 %v8200_v24  ;;  %v10097_v59 = vld [vmem:[%s15618_s1 + $0xc64] sm:$0xf]  ;;  %v8021_v61 = vld [vmem:[%s15618_s1 + $0xc70] sm:$0xf0]  ;;  %v8472_v3 = vor.u32 %v10209_v52, %v8469_v53  ;;  %v5043_v23 = vpop.f32.mrf.mxu2 }
 0x136   :  { %5308 = vmatpush.bf16.msrb.mxu3 %v8328_v29  ;;  %v10129_v32 = vld [vmem:[%s15618_s1 + $0xd64] sm:$0xf]  ;;  %v8149_v8 = vld [vmem:[%s15618_s1 + $0xd70] sm:$0xf0]  ;;  %v8024_v25 = vor.u32 %v10097_v59, %v8021_v61  ;;  %v5044_v37 = vadd.f32 %v5043_v23, %v5031_v63  ;;  %v5019_v42 = vpop.f32.mrf.mxu0 }
 0x137   :  { %5274 = vmatpush.bf16.msrb.mxu0 %v7864_v36  ;;  %v10161_v10 = vld [vmem:[%s15618_s1 + $0xe64] sm:$0xf]  ;;  %v8277_v11 = vld [vmem:[%s15618_s1 + $0xe70] sm:$0xf0]  ;;  %v8152_v27 = vor.u32 %v10129_v32, %v8149_v8 }
 0x138   :  { %5283 = vmatpush.bf16.msrb.mxu1 %v8056_v38  ;;  %v10205_v19 = vld [vmem:[%s15618_s1 + $0xfc4] sm:$0xf]  ;;  %v8453_v24 = vld [vmem:[%s15618_s1 + $0xfd0] sm:$0xf0]  ;;  %v8280_v30 = vor.u32 %v10161_v10, %v8277_v11  ;;  %v5056_v38 = vpop.f32.mrf.mxu3 }
 0x139   :  { %5296 = vmatpush.bf16.msrb.mxu2 %v8184_v39  ;;  %v10093_v28 = vld [vmem:[%s15618_s1 + $0xc44] sm:$0xf]  ;;  %v8005_v29 = vld [vmem:[%s15618_s1 + $0xc50] sm:$0xf0]  ;;  %v8456_v31 = vor.u32 %v10205_v19, %v8453_v24  ;;  %v12572_v43 = vadd.f32 %v5056_v38, %v5044_v37 }
 0x13a   :  { %5309 = vmatpush.bf16.msrb.mxu3 %v8312_v34  ;;  %v10125_v33 = vld [vmem:[%s15618_s1 + $0xd44] sm:$0xf]  ;;  %v8133_v35 = vld [vmem:[%s15618_s1 + $0xd50] sm:$0xf0]  ;;  %v5032_v34 = vpop.f32.mrf.mxu1  ;;  %v8008_v44 = vor.u32 %v10093_v28, %v8005_v29 }
 0x13b   :  { %5275 = vmatpush.bf16.msrb.mxu0 %v7848_v55  ;;  %v10157_v36 = vld [vmem:[%s15618_s1 + $0xe44] sm:$0xf]  ;;  %v8261_v39 = vld [vmem:[%s15618_s1 + $0xe50] sm:$0xf0]  ;;  %v8136_v45 = vor.u32 %v10125_v33, %v8133_v35 }
 0x13c   :  { %5284 = vmatpush.bf16.msrb.mxu1 %v8040_v57  ;;  %v10201_v40 = vld [vmem:[%s15618_s1 + $0xfa4] sm:$0xf]  ;;  %v8437_v41 = vld [vmem:[%s15618_s1 + $0xfb0] sm:$0xf0]  ;;  %v8264_v52 = vor.u32 %v10157_v36, %v8261_v39 }
 0x13d   :  { %5297 = vmatpush.bf16.msrb.mxu2 %v8168_v58  ;;  %v10089_v50 = vld [vmem:[%s15618_s1 + $0xc24] sm:$0xf]  ;;  %v7989_v51 = vld [vmem:[%s15618_s1 + $0xc30] sm:$0xf0]  ;;  %v8440_v53 = vor.u32 %v10201_v40, %v8437_v41 }
 0x13e   :  { %5310 = vmatpush.bf16.msrb.mxu3 %v8296_v62  ;;  %5276 = vmatmul.bf16.vlgmr.msrb.gmra.mxu0 %v11242_v17  ;;  %v10121_v54 = vld [vmem:[%s15618_s1 + $0xd24] sm:$0xf]  ;;  %v8117_v55 = vld [vmem:[%s15618_s1 + $0xd30] sm:$0xf0]  ;;  %v7992_v61 = vor.u32 %v10089_v50, %v7989_v51 }
 0x13f   :  { %5320 = vmatpush.bf16.msra.mxu0 %v8472_v3  ;;  %v10153_v56 = vld [vmem:[%s15618_s1 + $0xe24] sm:$0xf]  ;;  %v8245_v57 = vld [vmem:[%s15618_s1 + $0xe30] sm:$0xf0]  ;;  %v8120_v62 = vor.u32 %v10121_v54, %v8117_v55 }
 0x140   :  { %5285 = vmatpush.bf16.msrb.mxu1 %v8024_v25  ;;  %v10197_v58 = vld [vmem:[%s15618_s1 + $0xf84] sm:$0xf]  ;;  %v8421_v59 = vld [vmem:[%s15618_s1 + $0xf90] sm:$0xf0]  ;;  %v8248_v8 = vor.u32 %v10153_v56, %v8245_v57  ;;  %v5045_v25 = vpop.f32.mrf.mxu2 }
 0x141   :  { %5298 = vmatpush.bf16.msrb.mxu2 %v8152_v27  ;;  %v10085_v63 = vld [vmem:[%s15618_s1 + $0xc04] sm:$0xf]  ;;  %v7973_v3 = vld [vmem:[%s15618_s1 + $0xc10] sm:$0xf0]  ;;  %v8424_v10 = vor.u32 %v10197_v58, %v8421_v59 }
 0x142   :  { %5311 = vmatpush.bf16.msrb.mxu3 %v8280_v30  ;;  %v10117_v32 = vld [vmem:[%s15618_s1 + $0xd04] sm:$0xf]  ;;  %v8101_v11 = vld [vmem:[%s15618_s1 + $0xd10] sm:$0xf0]  ;;  %v5058_v30 = vpop.f32.mrf.mxu3  ;;  %v7976_v35 = vor.u32 %v10085_v63, %v7973_v3 }
 0x143   :  { %5321 = vmatpush.bf16.msra.mxu0 %v8456_v31  ;;  %v10149_v19 = vld [vmem:[%s15618_s1 + $0xe04] sm:$0xf]  ;;  %v8229_v24 = vld [vmem:[%s15618_s1 + $0xe10] sm:$0xf0]  ;;  %v8104_v36 = vor.u32 %v10117_v32, %v8101_v11 }
 0x144   :  { %5286 = vmatpush.bf16.msrb.mxu1 %v8008_v44  ;;  %v10193_v27 = vld [vmem:[%s15618_s1 + $0xf64] sm:$0xf]  ;;  %v8405_v28 = vld [vmem:[%s15618_s1 + $0xf70] sm:$0xf0]  ;;  %v8232_v39 = vor.u32 %v10149_v19, %v8229_v24 }
 0x145   :  { %5299 = vmatpush.bf16.msrb.mxu2 %v8136_v45  ;;  %v10241_v29 = vld [vmem:[%s15618_s1 + $0x10e4] sm:$0xf]  ;;  %v8597_v23 = vld [vmem:[%s15618_s1 + $0x10f0] sm:$0xf0]  ;;  %v8408_v40 = vor.u32 %v10193_v27, %v8405_v28 }
 0x146   :  { %5312 = vmatpush.bf16.msrb.mxu3 %v8264_v52  ;;  %v10273_v31 = vld [vmem:[%s15618_s1 + $0x11e4] sm:$0xf]  ;;  %v8725_v33 = vld [vmem:[%s15618_s1 + $0x11f0] sm:$0xf0]  ;;  %v8600_v41 = vor.u32 %v10241_v29, %v8597_v23 }
 0x147   :  { %5322 = vmatpush.bf16.msra.mxu0 %v8440_v53  ;;  %v10305_v37 = vld [vmem:[%s15618_s1 + $0x12e4] sm:$0xf]  ;;  %v8853_v38 = vld [vmem:[%s15618_s1 + $0x12f0] sm:$0xf0]  ;;  %v8728_v42 = vor.u32 %v10273_v31, %v8725_v33 }
 0x148   :  { %5287 = vmatpush.bf16.msrb.mxu1 %v7992_v61  ;;  %v10189_v34 = vld [vmem:[%s15618_s1 + $0xf44] sm:$0xf]  ;;  %v8389_v44 = vld [vmem:[%s15618_s1 + $0xf50] sm:$0xf0]  ;;  %v8856_v50 = vor.u32 %v10305_v37, %v8853_v38 }
 0x149   :  { %5300 = vmatpush.bf16.msrb.mxu2 %v8120_v62  ;;  %v10237_v45 = vld [vmem:[%s15618_s1 + $0x10c4] sm:$0xf]  ;;  %v8581_v51 = vld [vmem:[%s15618_s1 + $0x10d0] sm:$0xf0]  ;;  %v8392_v56 = vor.u32 %v10189_v34, %v8389_v44 }
 0x14a   :  { %5313 = vmatpush.bf16.msrb.mxu3 %v8248_v8  ;;  %v10269_v52 = vld [vmem:[%s15618_s1 + $0x11c4] sm:$0xf]  ;;  %v8709_v53 = vld [vmem:[%s15618_s1 + $0x11d0] sm:$0xf0]  ;;  %v8584_v57 = vor.u32 %v10237_v45, %v8581_v51 }
 0x14b   :  { %5323 = vmatpush.bf16.msra.mxu0 %v8424_v10  ;;  %v10301_v54 = vld [vmem:[%s15618_s1 + $0x12c4] sm:$0xf]  ;;  %v8837_v55 = vld [vmem:[%s15618_s1 + $0x12d0] sm:$0xf0]  ;;  %v8712_v58 = vor.u32 %v10269_v52, %v8709_v53 }
 0x14c   :  { %5288 = vmatpush.bf16.msrb.mxu1 %v7976_v35  ;;  %v10185_v59 = vld [vmem:[%s15618_s1 + $0xf24] sm:$0xf]  ;;  %v8373_v61 = vld [vmem:[%s15618_s1 + $0xf30] sm:$0xf0]  ;;  %v8840_v63 = vor.u32 %v10301_v54, %v8837_v55 }
 0x14d   :  { %5301 = vmatpush.bf16.msrb.mxu2 %v8104_v36  ;;  %v10233_v62 = vld [vmem:[%s15618_s1 + $0x10a4] sm:$0xf]  ;;  %v8565_v3 = vld [vmem:[%s15618_s1 + $0x10b0] sm:$0xf0]  ;;  %v8376_v19 = vor.u32 %v10185_v59, %v8373_v61  ;;  %v5069_v36 = vpop.f32.mrf.mxu0 }
 0x14e   :  { %5314 = vmatpush.bf16.msrb.mxu3 %v8232_v39  ;;  %v10265_v32 = vld [vmem:[%s15618_s1 + $0x11a4] sm:$0xf]  ;;  %v8693_v8 = vld [vmem:[%s15618_s1 + $0x11b0] sm:$0xf0]  ;;  %v8568_v25 = vor.u32 %v10233_v62, %v8565_v3 }
 0x14f   :  { %5324 = vmatpush.bf16.msra.mxu0 %v8408_v40  ;;  %5289 = vmatmul.bf16.vlgmr.msrb.gmra.mxu1 %v11404_v46  ;;  %v10297_v10 = vld [vmem:[%s15618_s1 + $0x12a4] sm:$0xf]  ;;  %v8821_v11 = vld [vmem:[%s15618_s1 + $0x12b0] sm:$0xf0]  ;;  %v8696_v27 = vor.u32 %v10265_v32, %v8693_v8  ;;  %v5070_v40 = vadd.f32 %v5069_v36, %v12572_v43 }
 0x150   :  { %5333 = vmatpush.bf16.msra.mxu1 %v8600_v41  ;;  %5302 = vmatmul.bf16.vlgmr.msrb.gmra.mxu2 %v11408_v48  ;;  %v10181_v24 = vld [vmem:[%s15618_s1 + $0xf04] sm:$0xf]  ;;  %v8357_v28 = vld [vmem:[%s15618_s1 + $0xf10] sm:$0xf0]  ;;  %v8824_v23 = vor.u32 %v10297_v10, %v8821_v11 }
 0x151   :  { %5346 = vmatpush.bf16.msra.mxu2 %v8728_v42  ;;  %5315 = vmatmul.bf16.vlgmr.msrb.gmra.mxu3 %v11406_v47  ;;  %v10229_v29 = vld [vmem:[%s15618_s1 + $0x1084] sm:$0xf]  ;;  %v8549_v30 = vld [vmem:[%s15618_s1 + $0x1090] sm:$0xf0]  ;;  %v8360_v41 = vor.u32 %v10181_v24, %v8357_v28  ;;  %v5082_v42 = vpop.f32.mrf.mxu1 }
 0x152   :  { %5359 = vmatpush.bf16.msra.mxu3 %v8856_v50  ;;  %v10261_v31 = vld [vmem:[%s15618_s1 + $0x1184] sm:$0xf]  ;;  %v8677_v33 = vld [vmem:[%s15618_s1 + $0x1190] sm:$0xf0]  ;;  %v8552_v34 = vor.u32 %v10229_v29, %v8549_v30  ;;  %v5083_v52 = vadd.f32 %v5082_v42, %v5070_v40 }
 0x153   :  { %5325 = vmatpush.bf16.msra.mxu0 %v8392_v56  ;;  %v10293_v35 = vld [vmem:[%s15618_s1 + $0x1284] sm:$0xf]  ;;  %v8805_v37 = vld [vmem:[%s15618_s1 + $0x1290] sm:$0xf0]  ;;  %v8680_v44 = vor.u32 %v10261_v31, %v8677_v33  ;;  %v5095_v32 = vpop.f32.mrf.mxu2 }
 0x154   :  { %5334 = vmatpush.bf16.msra.mxu1 %v8584_v57  ;;  %v10337_v38 = vld [vmem:[%s15618_s1 + $0x13e4] sm:$0xf]  ;;  %v8981_v39 = vld [vmem:[%s15618_s1 + $0x13f0] sm:$0xf0]  ;;  %v8808_v51 = vor.u32 %v10293_v35, %v8805_v37  ;;  %v5096_v24 = vadd.f32 %v5095_v32, %v5083_v52 }
 0x155   :  { %5347 = vmatpush.bf16.msra.mxu2 %v8712_v58  ;;  %v10225_v45 = vld [vmem:[%s15618_s1 + $0x1064] sm:$0xf]  ;;  %v8533_v50 = vld [vmem:[%s15618_s1 + $0x1070] sm:$0xf0]  ;;  %v8984_v53 = vor.u32 %v10337_v38, %v8981_v39 }
 0x156   :  { %5360 = vmatpush.bf16.msra.mxu3 %v8840_v63  ;;  %v10257_v43 = vld [vmem:[%s15618_s1 + $0x1164] sm:$0xf]  ;;  %v8661_v54 = vld [vmem:[%s15618_s1 + $0x1170] sm:$0xf0]  ;;  %v8536_v59 = vor.u32 %v10225_v45, %v8533_v50 }
 0x157   :  { %5326 = vmatpush.bf16.msra.mxu0 %v8376_v19  ;;  %v10289_v55 = vld [vmem:[%s15618_s1 + $0x1264] sm:$0xf]  ;;  %v8789_v56 = vld [vmem:[%s15618_s1 + $0x1270] sm:$0xf0]  ;;  %v8664_v61 = vor.u32 %v10257_v43, %v8661_v54 }
 0x158   :  { %5335 = vmatpush.bf16.msra.mxu1 %v8568_v25  ;;  %v10333_v57 = vld [vmem:[%s15618_s1 + $0x13c4] sm:$0xf]  ;;  %v8965_v58 = vld [vmem:[%s15618_s1 + $0x13d0] sm:$0xf0]  ;;  %v8792_v3 = vor.u32 %v10289_v55, %v8789_v56  ;;  %v5071_v25 = vpop.f32.mrf.mxu0 }
 0x159   :  { %5348 = vmatpush.bf16.msra.mxu2 %v8696_v27  ;;  %v10221_v62 = vld [vmem:[%s15618_s1 + $0x1044] sm:$0xf]  ;;  %v8517_v63 = vld [vmem:[%s15618_s1 + $0x1050] sm:$0xf0]  ;;  %v8968_v8 = vor.u32 %v10333_v57, %v8965_v58  ;;  %v5108_v27 = vpop.f32.mrf.mxu3 }
 0x15a   :  { %5361 = vmatpush.bf16.msra.mxu3 %v8824_v23  ;;  %v10253_v10 = vld [vmem:[%s15618_s1 + $0x1144] sm:$0xf]  ;;  %v8645_v11 = vld [vmem:[%s15618_s1 + $0x1150] sm:$0xf0]  ;;  %v5084_v23 = vpop.f32.mrf.mxu1  ;;  %v5109_v31 = vadd.f32 %v5108_v27, %v5096_v24  ;;  %v8520_v33 = vor.u32 %v10221_v62, %v8517_v63 }
 0x15b   :  { %5327 = vmatpush.bf16.msra.mxu0 %v8360_v41  ;;  %v10285_v19 = vld [vmem:[%s15618_s1 + $0x1244] sm:$0xf]  ;;  %v8773_v28 = vld [vmem:[%s15618_s1 + $0x1250] sm:$0xf0]  ;;  %v8648_v35 = vor.u32 %v10253_v10, %v8645_v11 }
 0x15c   :  { %5336 = vmatpush.bf16.msra.mxu1 %v8552_v34  ;;  %v10329_v29 = vld [vmem:[%s15618_s1 + $0x13a4] sm:$0xf]  ;;  %v8949_v30 = vld [vmem:[%s15618_s1 + $0x13b0] sm:$0xf0]  ;;  %v8776_v38 = vor.u32 %v10285_v19, %v8773_v28 }
 0x15d   :  { %5349 = vmatpush.bf16.msra.mxu2 %v8680_v44  ;;  %v10217_v36 = vld [vmem:[%s15618_s1 + $0x1024] sm:$0xf]  ;;  %v8501_v37 = vld [vmem:[%s15618_s1 + $0x1030] sm:$0xf0]  ;;  %v8952_v39 = vor.u32 %v10329_v29, %v8949_v30 }
 0x15e   :  { %5362 = vmatpush.bf16.msra.mxu3 %v8808_v51  ;;  %5328 = vmatmul.bf16.vlgmr.msra.gmra.mxu0 %v11410_v49  ;;  %v10249_v40 = vld [vmem:[%s15618_s1 + $0x1124] sm:$0xf]  ;;  %v8629_v41 = vld [vmem:[%s15618_s1 + $0x1130] sm:$0xf0]  ;;  %v8504_v50 = vor.u32 %v10217_v36, %v8501_v37 }
 0x15f   :  { %5372 = vmatpush.bf16.msrb.mxu0 %v8984_v53  ;;  %v10281_v42 = vld [vmem:[%s15618_s1 + $0x1224] sm:$0xf]  ;;  %v8757_v34 = vld [vmem:[%s15618_s1 + $0x1230] sm:$0xf0]  ;;  %v8632_v51 = vor.u32 %v10249_v40, %v8629_v41 }
 0x160   :  { %5337 = vmatpush.bf16.msra.mxu1 %v8536_v59  ;;  %v10325_v44 = vld [vmem:[%s15618_s1 + $0x1384] sm:$0xf]  ;;  %v8933_v45 = vld [vmem:[%s15618_s1 + $0x1390] sm:$0xf0]  ;;  %v8760_v54 = vor.u32 %v10281_v42, %v8757_v34  ;;  %v5097_v59 = vpop.f32.mrf.mxu2  ;;  %v5121_v32 = vpop.f32.mrf.mxu0 }
 0x161   :  { %5350 = vmatpush.bf16.msra.mxu2 %v8664_v61  ;;  %v10213_v52 = vld [vmem:[%s15618_s1 + $0x1004] sm:$0xf]  ;;  %v8485_v53 = vld [vmem:[%s15618_s1 + $0x1010] sm:$0xf0]  ;;  %v8936_v55 = vor.u32 %v10325_v44, %v8933_v45  ;;  %v12831_v19 = vadd.f32 %v5121_v32, %v5109_v31 }
 0x162   :  { %5363 = vmatpush.bf16.msra.mxu3 %v8792_v3  ;;  %v10245_v43 = vld [vmem:[%s15618_s1 + $0x1104] sm:$0xf]  ;;  %v8613_v56 = vld [vmem:[%s15618_s1 + $0x1110] sm:$0xf0]  ;;  %v5110_v3 = vpop.f32.mrf.mxu3  ;;  %v8488_v24 = vor.u32 %v10213_v52, %v8485_v53 }
 0x163   :  { %5373 = vmatpush.bf16.msrb.mxu0 %v8968_v8  ;;  %v10277_v57 = vld [vmem:[%s15618_s1 + $0x1204] sm:$0xf]  ;;  %v8741_v58 = vld [vmem:[%s15618_s1 + $0x1210] sm:$0xf0]  ;;  %v8616_v25 = vor.u32 %v10245_v43, %v8613_v56 }
 0x164   :  { %5338 = vmatpush.bf16.msra.mxu1 %v8520_v33  ;;  %v10321_v61 = vld [vmem:[%s15618_s1 + $0x1364] sm:$0xf]  ;;  %v8917_v62 = vld [vmem:[%s15618_s1 + $0x1370] sm:$0xf0]  ;;  %v8744_v29 = vor.u32 %v10277_v57, %v8741_v58 }
 0x165   :  { %5351 = vmatpush.bf16.msra.mxu2 %v8648_v35  ;;  %v10369_v63 = vld [vmem:[%s15618_s1 + $0x14e4] sm:$0xf]  ;;  %v9109_v8 = vld [vmem:[%s15618_s1 + $0x14f0] sm:$0xf0]  ;;  %v8920_v30 = vor.u32 %v10321_v61, %v8917_v62 }
 0x166   :  { %5364 = vmatpush.bf16.msra.mxu3 %v8776_v38  ;;  %v10401_v10 = vld [vmem:[%s15618_s1 + $0x15e4] sm:$0xf]  ;;  %v9237_v11 = vld [vmem:[%s15618_s1 + $0x15f0] sm:$0xf0]  ;;  %v9112_v23 = vor.u32 %v10369_v63, %v9109_v8 }
 0x167   :  { %5374 = vmatpush.bf16.msrb.mxu0 %v8952_v39  ;;  %v10433_v27 = vld [vmem:[%s15618_s1 + $0x16e4] sm:$0xf]  ;;  %v9365_v28 = vld [vmem:[%s15618_s1 + $0x16f0] sm:$0xf0]  ;;  %v9240_v33 = vor.u32 %v10401_v10, %v9237_v11 }
 0x168   :  { %5339 = vmatpush.bf16.msra.mxu1 %v8504_v50  ;;  %v10317_v31 = vld [vmem:[%s15618_s1 + $0x1344] sm:$0xf]  ;;  %v8901_v35 = vld [vmem:[%s15618_s1 + $0x1350] sm:$0xf0]  ;;  %v9368_v37 = vor.u32 %v10433_v27, %v9365_v28  ;;  %v5123_v56 = vpop.f32.mrf.mxu0  ;;  %v10519_v27 = vld [vmem:[%s15619_s2] sm:$0xf] }
 0x169   :  { %5352 = vmatpush.bf16.msra.mxu2 %v8632_v51  ;;  %v10365_v36 = vld [vmem:[%s15618_s1 + $0x14c4] sm:$0xf]  ;;  %v9093_v38 = vld [vmem:[%s15618_s1 + $0x14d0] sm:$0xf0]  ;;  %v8904_v34 = vor.u32 %v10317_v31, %v8901_v35  ;;  %v813_v28 = vperm.slane %v10519_v27, 1 }
 0x16a   :  { %5365 = vmatpush.bf16.msra.mxu3 %v8760_v54  ;;  %v10397_v39 = vld [vmem:[%s15618_s1 + $0x15c4] sm:$0xf]  ;;  %v9221_v40 = vld [vmem:[%s15618_s1 + $0x15d0] sm:$0xf0]  ;;  %v9096_v44 = vor.u32 %v10365_v36, %v9093_v38 }
 0x16b   :  { %5375 = vmatpush.bf16.msrb.mxu0 %v8936_v55  ;;  %v10429_v41 = vld [vmem:[%s15618_s1 + $0x16c4] sm:$0xf]  ;;  %v9349_v42 = vld [vmem:[%s15618_s1 + $0x16d0] sm:$0xf0]  ;;  %v9224_v45 = vor.u32 %v10397_v39, %v9221_v40 }
 0x16c   :  { %5340 = vmatpush.bf16.msra.mxu1 %v8488_v24  ;;  %v10313_v50 = vld [vmem:[%s15618_s1 + $0x1324] sm:$0xf]  ;;  %v8885_v51 = vld [vmem:[%s15618_s1 + $0x1330] sm:$0xf0]  ;;  %v9352_v53 = vor.u32 %v10429_v41, %v9349_v42  ;;  %v5134_v31 = vpop.f32.mrf.mxu1 }
 0x16d   :  { %5353 = vmatpush.bf16.msra.mxu2 %v8616_v25  ;;  %v10361_v52 = vld [vmem:[%s15618_s1 + $0x14a4] sm:$0xf]  ;;  %v9077_v43 = vld [vmem:[%s15618_s1 + $0x14b0] sm:$0xf0]  ;;  %v8888_v59 = vor.u32 %v10313_v50, %v8885_v51 }
 0x16e   :  { %5366 = vmatpush.bf16.msra.mxu3 %v8744_v29  ;;  %v10393_v54 = vld [vmem:[%s15618_s1 + $0x15a4] sm:$0xf]  ;;  %v9205_v55 = vld [vmem:[%s15618_s1 + $0x15b0] sm:$0xf0]  ;;  %v9080_v63 = vor.u32 %v10361_v52, %v9077_v43 }
 0x16f   :  { %5376 = vmatpush.bf16.msrb.mxu0 %v8920_v30  ;;  %5341 = vmatmul.bf16.vlgmr.msra.gmra.mxu1 %v11641_v9  ;;  %v10425_v57 = vld [vmem:[%s15618_s1 + $0x16a4] sm:$0xf]  ;;  %v9333_v58 = vld [vmem:[%s15618_s1 + $0x16b0] sm:$0xf0]  ;;  %v9208_v3 = vor.u32 %v10393_v54, %v9205_v55 }
 0x170   :  { %5385 = vmatpush.bf16.msrb.mxu1 %v9112_v23  ;;  %5354 = vmatmul.bf16.vlgmr.msra.gmra.mxu2 %v11651_v14  ;;  %v10309_v61 = vld [vmem:[%s15618_s1 + $0x1304] sm:$0xf]  ;;  %v8869_v62 = vld [vmem:[%s15618_s1 + $0x1310] sm:$0xf0]  ;;  %v9336_v11 = vor.u32 %v10425_v57, %v9333_v58 }
 0x171   :  { %5398 = vmatpush.bf16.msrb.mxu2 %v9240_v33  ;;  %5367 = vmatmul.bf16.vlgmr.msra.gmra.mxu3 %v11649_v13  ;;  %v10357_v32 = vld [vmem:[%s15618_s1 + $0x1484] sm:$0xf]  ;;  %v9061_v8 = vld [vmem:[%s15618_s1 + $0x1490] sm:$0xf0]  ;;  %v8872_v33 = vor.u32 %v10309_v61, %v8869_v62 }
 0x172   :  { %5411 = vmatpush.bf16.msrb.mxu3 %v9368_v37  ;;  %v10389_v10 = vld [vmem:[%s15618_s1 + $0x1584] sm:$0xf]  ;;  %v9189_v24 = vld [vmem:[%s15618_s1 + $0x1590] sm:$0xf0]  ;;  %v9064_v35 = vor.u32 %v10357_v32, %v9061_v8 }
 0x173   :  { %5377 = vmatpush.bf16.msrb.mxu0 %v8904_v34  ;;  %v10421_v25 = vld [vmem:[%s15618_s1 + $0x1684] sm:$0xf]  ;;  %v9317_v29 = vld [vmem:[%s15618_s1 + $0x1690] sm:$0xf0]  ;;  %v9192_v36 = vor.u32 %v10389_v10, %v9189_v24  ;;  %v5147_v55 = vpop.f32.mrf.mxu2 }
 0x174   :  { %5386 = vmatpush.bf16.msrb.mxu1 %v9096_v44  ;;  %v10465_v30 = vld [vmem:[%s15618_s1 + $0x17e4] sm:$0xf]  ;;  %v9493_v23 = vld [vmem:[%s15618_s1 + $0x17f0] sm:$0xf0]  ;;  %v9320_v39 = vor.u32 %v10421_v25, %v9317_v29  ;;  %v5135_v44 = vadd.f32 %v5134_v31, %v813_v28 }
 0x175   :  { %5399 = vmatpush.bf16.msrb.mxu2 %v9224_v45  ;;  %v10353_v37 = vld [vmem:[%s15618_s1 + $0x1464] sm:$0xf]  ;;  %v9045_v38 = vld [vmem:[%s15618_s1 + $0x1470] sm:$0xf0]  ;;  %v9496_v40 = vor.u32 %v10465_v30, %v9493_v23 }
 0x176   :  { %5412 = vmatpush.bf16.msrb.mxu3 %v9352_v53  ;;  %v10385_v41 = vld [vmem:[%s15618_s1 + $0x1564] sm:$0xf]  ;;  %v9173_v42 = vld [vmem:[%s15618_s1 + $0x1570] sm:$0xf0]  ;;  %v9048_v52 = vor.u32 %v10353_v37, %v9045_v38  ;;  %v5148_v62 = vadd.f32 %v5147_v55, %v5135_v44 }
 0x177   :  { %5378 = vmatpush.bf16.msrb.mxu0 %v8888_v59  ;;  %v10417_v34 = vld [vmem:[%s15618_s1 + $0x1664] sm:$0xf]  ;;  %v9301_v45 = vld [vmem:[%s15618_s1 + $0x1670] sm:$0xf0]  ;;  %v9176_v53 = vor.u32 %v10385_v41, %v9173_v42 }
 0x178   :  { %5387 = vmatpush.bf16.msrb.mxu1 %v9080_v63  ;;  %v10461_v50 = vld [vmem:[%s15618_s1 + $0x17c4] sm:$0xf]  ;;  %v9477_v51 = vld [vmem:[%s15618_s1 + $0x17d0] sm:$0xf0]  ;;  %v9304_v56 = vor.u32 %v10417_v34, %v9301_v45  ;;  %v5160_v63 = vpop.f32.mrf.mxu3 }
 0x179   :  { %5400 = vmatpush.bf16.msrb.mxu2 %v9208_v3  ;;  %v10349_v43 = vld [vmem:[%s15618_s1 + $0x1444] sm:$0xf]  ;;  %v9029_v54 = vld [vmem:[%s15618_s1 + $0x1450] sm:$0xf0]  ;;  %v9480_v57 = vor.u32 %v10461_v50, %v9477_v51  ;;  %v5161_v10 = vadd.f32 %v5160_v63, %v5148_v62 }
 0x17a   :  { %5413 = vmatpush.bf16.msrb.mxu3 %v9336_v11  ;;  %v10381_v58 = vld [vmem:[%s15618_s1 + $0x1544] sm:$0xf]  ;;  %v9157_v59 = vld [vmem:[%s15618_s1 + $0x1550] sm:$0xf0]  ;;  %v5136_v11 = vpop.f32.mrf.mxu1  ;;  %v9032_v24 = vor.u32 %v10349_v43, %v9029_v54 }
 0x17b   :  { %5379 = vmatpush.bf16.msrb.mxu0 %v8872_v33  ;;  %v10413_v61 = vld [vmem:[%s15618_s1 + $0x1644] sm:$0xf]  ;;  %v9285_v3 = vld [vmem:[%s15618_s1 + $0x1650] sm:$0xf0]  ;;  %v9160_v25 = vor.u32 %v10381_v58, %v9157_v59  ;;  %v5173_v38 = vpop.f32.mrf.mxu0  ;;  %v5149_v45 = vpop.f32.mrf.mxu2  ;;  %v6555_v59 = vld [vmem:[%s15618_s1 + $0xe8] sm:$0xf] }
 0x17c   :  { %5388 = vmatpush.bf16.msrb.mxu1 %v9064_v35  ;;  %v10457_v32 = vld [vmem:[%s15618_s1 + $0x17a4] sm:$0xf]  ;;  %v9461_v8 = vld [vmem:[%s15618_s1 + $0x17b0] sm:$0xf0]  ;;  %v9288_v29 = vor.u32 %v10413_v61, %v9285_v3  ;;  %v13005_v44 = vadd.f32 %v5173_v38, %v5161_v10  ;;  %v9732_v61 = vld [vmem:[%s15618_s1 + $0xf4] sm:$0xf0] }
 0x17d   :  { %5401 = vmatpush.bf16.msrb.mxu2 %v9192_v36  ;;  %v10345_v27 = vld [vmem:[%s15618_s1 + $0x1424] sm:$0xf]  ;;  %v9013_v28 = vld [vmem:[%s15618_s1 + $0x1430] sm:$0xf0]  ;;  %v9464_v30 = vor.u32 %v10457_v32, %v9461_v8  ;;  %v6683_v3 = vld [vmem:[%s15618_s1 + $0x1e8] sm:$0xf] }
 0x17e   :  { %5414 = vmatpush.bf16.msrb.mxu3 %v9320_v39  ;;  %5380 = vmatmul.bf16.vlgmr.msrb.gmra.mxu0 %v11653_v18  ;;  %v10377_v23 = vld [vmem:[%s15618_s1 + $0x1524] sm:$0xf]  ;;  %v9141_v33 = vld [vmem:[%s15618_s1 + $0x1530] sm:$0xf0]  ;;  %v9016_v39 = vor.u32 %v10345_v27, %v9013_v28  ;;  %v9764_v32 = vld [vmem:[%s15618_s1 + $0x1f4] sm:$0xf0] }
 0x17f   :  { %5424 = vmatpush.bf16.msra.mxu0 %v9496_v40  ;;  %v10409_v31 = vld [vmem:[%s15618_s1 + $0x1624] sm:$0xf]  ;;  %v9269_v35 = vld [vmem:[%s15618_s1 + $0x1630] sm:$0xf0]  ;;  %v9144_v40 = vor.u32 %v10377_v23, %v9141_v33  ;;  %v6539_v23 = vld [vmem:[%s15618_s1 + $0xc8] sm:$0xf] }
 0x180   :  { %5389 = vmatpush.bf16.msrb.mxu1 %v9048_v52  ;;  %v10453_v36 = vld [vmem:[%s15618_s1 + $0x1784] sm:$0xf]  ;;  %v9445_v37 = vld [vmem:[%s15618_s1 + $0x1790] sm:$0xf0]  ;;  %v9272_v50 = vor.u32 %v10409_v31, %v9269_v35  ;;  %v5162_v54 = vpop.f32.mrf.mxu3  ;;  %v9728_v33 = vld [vmem:[%s15618_s1 + $0xd4] sm:$0xf0] }
 0x181   :  { %5402 = vmatpush.bf16.msrb.mxu2 %v9176_v53  ;;  %v10341_v41 = vld [vmem:[%s15618_s1 + $0x1404] sm:$0xf]  ;;  %v8997_v42 = vld [vmem:[%s15618_s1 + $0x1410] sm:$0xf0]  ;;  %v9448_v51 = vor.u32 %v10453_v36, %v9445_v37  ;;  %v6667_v35 = vld [vmem:[%s15618_s1 + $0x1c8] sm:$0xf] }
 0x182   :  { %5415 = vmatpush.bf16.msrb.mxu3 %v9304_v56  ;;  %v10373_v34 = vld [vmem:[%s15618_s1 + $0x1504] sm:$0xf]  ;;  %v9125_v52 = vld [vmem:[%s15618_s1 + $0x1510] sm:$0xf0]  ;;  %v9000_v62 = vor.u32 %v10341_v41, %v8997_v42  ;;  %v9760_v36 = vld [vmem:[%s15618_s1 + $0x1d4] sm:$0xf0] }
 0x183   :  { %5425 = vmatpush.bf16.msra.mxu0 %v9480_v57  ;;  %v10405_v53 = vld [vmem:[%s15618_s1 + $0x1604] sm:$0xf]  ;;  %v9253_v43 = vld [vmem:[%s15618_s1 + $0x1610] sm:$0xf0]  ;;  %v9128_v63 = vor.u32 %v10373_v34, %v9125_v52  ;;  %v5175_v31 = vpop.f32.mrf.mxu0  ;;  %v6668_v34 = vor.u32 %v9760_v36, %v6667_v35  ;;  %v6651_v52 = vld [vmem:[%s15618_s1 + $0x1a8] sm:$0xf] }
 0x184   :  { %5390 = vmatpush.bf16.msrb.mxu1 %v9032_v24  ;;  %v10449_v55 = vld [vmem:[%s15618_s1 + $0x1764] sm:$0xf]  ;;  %v9429_v56 = vld [vmem:[%s15618_s1 + $0x1770] sm:$0xf0]  ;;  %v9256_v8 = vor.u32 %v10405_v53, %v9253_v43  ;;  %v6556_v24 = vor.u32 %v9732_v61, %v6555_v59  ;;  %v9756_v53 = vld [vmem:[%s15618_s1 + $0x1b4] sm:$0xf0] }
 0x185   :  { %5403 = vmatpush.bf16.msrb.mxu2 %v9160_v25  ;;  %v10481_v57 = vld [vmem:[%s15618_s1 + $0x1864] sm:$0xf]  ;;  %v9557_v58 = vld [vmem:[%s15618_s1 + $0x1870] sm:$0xf0]  ;;  %v9432_v10 = vor.u32 %v10449_v55, %v9429_v56  ;;  %v6652_v61 = vor.u32 %v9756_v53, %v6651_v52  ;;  %v6491_v31 = vld [vmem:[%s15618_s1 + $0x68] sm:$0xf] }
 0x186   :  { %5416 = vmatpush.bf16.msrb.mxu3 %v9288_v29  ;;  %v9560_v11 = vor.u32 %v10481_v57, %v9557_v58  ;;  %v10445_v25 = vld [vmem:[%s15618_s1 + $0x1744] sm:$0xf]  ;;  %v9413_v27 = vld [vmem:[%s15618_s1 + $0x1750] sm:$0xf0]  ;;  %v6684_v29 = vor.u32 %v9764_v32, %v6683_v3  ;;  %v6635_v3 = vld [vmem:[%s15618_s1 + $0x188] sm:$0xf] }
 0x187   :  { %5426 = vmatpush.bf16.msra.mxu0 %v9464_v30  ;;  %v10477_v28 = vld [vmem:[%s15618_s1 + $0x1844] sm:$0xf]  ;;  %v9541_v30 = vld [vmem:[%s15618_s1 + $0x1850] sm:$0xf0]  ;;  %v9416_v37 = vor.u32 %v10445_v25, %v9413_v27  ;;  %v9752_v32 = vld [vmem:[%s15618_s1 + $0x194] sm:$0xf0] }
 0x188   :  { %5391 = vmatpush.bf16.msrb.mxu1 %v9016_v39  ;;  %v9544_v38 = vor.u32 %v10477_v28, %v9541_v30  ;;  %v6540_v39 = vor.u32 %v9728_v33, %v6539_v23  ;;  %v9397_v41 = vld [vmem:[%s15618_s1 + $0x1730] sm:$0xf0]  ;;  %v10473_v42 = vld [vmem:[%s15618_s1 + $0x1824] sm:$0xf]  ;;  %v9828_v25 = vld [vmem:[%s15618_s1 + $0x3f4] sm:$0xf0]  ;;  %v6636_v23 = vor.u32 %v9752_v32, %v6635_v3 }
 0x189   :  { %5404 = vmatpush.bf16.msrb.mxu2 %v9144_v40  ;;  %v10441_v40 = vld [vmem:[%s15618_s1 + $0x1724] sm:$0xf]  ;;  %v9525_v45 = vld [vmem:[%s15618_s1 + $0x1830] sm:$0xf0]  ;;  %v9716_v35 = vld [vmem:[%s15618_s1 + $0x74] sm:$0xf0] }
 0x18a   :  { %5417 = vmatpush.bf16.msrb.mxu3 %v9272_v50  ;;  %v6523_v50 = vld [vmem:[%s15618_s1 + $0xa8] sm:$0xf]  ;;  %v9400_v43 = vor.u32 %v10441_v40, %v9397_v41  ;;  %v10437_v54 = vld [vmem:[%s15618_s1 + $0x1704] sm:$0xf]  ;;  %v9528_v55 = vor.u32 %v10473_v42, %v9525_v45  ;;  %v9381_v57 = vld [vmem:[%s15618_s1 + $0x1710] sm:$0xf0]  ;;  %v6492_v42 = vor.u32 %v9716_v35, %v6491_v31 }
 0x18b   :  { %5427 = vmatpush.bf16.msra.mxu0 %v9448_v51  ;;  %v9724_v51 = vld [vmem:[%s15618_s1 + $0xb4] sm:$0xf0]  ;;  %v10469_v58 = vld [vmem:[%s15618_s1 + $0x1804] sm:$0xf]  ;;  %v9509_v59 = vld [vmem:[%s15618_s1 + $0x1810] sm:$0xf0] }
 0x18c   :  { %5392 = vmatpush.bf16.msrb.mxu1 %v9000_v62  ;;  %v6524_v56 = vor.u32 %v9724_v51, %v6523_v50  ;;  %v6507_v62 = vld [vmem:[%s15618_s1 + $0x88] sm:$0xf]  ;;  %v5186_v27 = vpop.f32.mrf.mxu1  ;;  %v9512_v28 = vor.u32 %v10469_v58, %v9509_v59  ;;  %v9824_v41 = vld [vmem:[%s15618_s1 + $0x3d4] sm:$0xf0] }
 0x18d   :  { %5405 = vmatpush.bf16.msrb.mxu2 %v9128_v63  ;;  %v9720_v63 = vld [vmem:[%s15618_s1 + $0x94] sm:$0xf0]  ;;  %v5187_v30 = vadd.f32 %v5186_v27, %v13005_v44  ;;  %v6619_v36 = vld [vmem:[%s15618_s1 + $0x168] sm:$0xf] }
 0x18e   :  { %5418 = vmatpush.bf16.msrb.mxu3 %v9256_v8  ;;  %v6811_v8 = vld [vmem:[%s15618_s1 + $0x2e8] sm:$0xf]  ;;  %v9748_v44 = vld [vmem:[%s15618_s1 + $0x174] sm:$0xf0] }
 0x18f   :  { %5428 = vmatpush.bf16.msra.mxu0 %v9432_v10  ;;  %5393 = vmatmul.bf16.vlgmr.msrb.gmra.mxu1 %v11734_v4  ;;  %v9796_v10 = vld [vmem:[%s15618_s1 + $0x2f4] sm:$0xf0]  ;;  %v6923_v40 = vld [vmem:[%s15618_s1 + $0x3c8] sm:$0xf]  ;;  %v6620_v45 = vor.u32 %v9748_v44, %v6619_v36 }
 0x190   :  { %5441 = vmatpush.bf16.msra.mxu1 %v9560_v11  ;;  %5406 = vmatmul.bf16.vlgmr.msrb.gmra.mxu2 %v11738_v6  ;;  %v9384_v11 = vor.u32 %v10437_v54, %v9381_v57  ;;  %v6812_v33 = vor.u32 %v9796_v10, %v6811_v8  ;;  %v6475_v51 = vld [vmem:[%s15618_s1 + $0x48] sm:$0xf]  ;;  %v9712_v52 = vld [vmem:[%s15618_s1 + $0x54] sm:$0xf0] }
 0x191   :  { %5450 = vmatpush.bf16.msra.mxu2 %v6556_v24  ;;  %5419 = vmatmul.bf16.vlgmr.msrb.gmra.mxu3 %v11736_v5  ;;  %v6939_v24 = vld [vmem:[%s15618_s1 + $0x3e8] sm:$0xf]  ;;  %v9788_v58 = vld [vmem:[%s15618_s1 + $0x2b4] sm:$0xf0]  ;;  %v6476_v3 = vor.u32 %v9712_v52, %v6475_v51 }
 0x192   :  { %5463 = vmatpush.bf16.msra.mxu3 %v6684_v29  ;;  %v6508_v29 = vor.u32 %v9720_v63, %v6507_v62  ;;  %v6603_v53 = vld [vmem:[%s15618_s1 + $0x148] sm:$0xf]  ;;  %v9740_v27 = vld [vmem:[%s15618_s1 + $0x134] sm:$0xf0] }
 0x193   :  { %5429 = vmatpush.bf16.msra.mxu0 %v9416_v37  ;;  %v6940_v37 = vor.u32 %v9828_v25, %v6939_v24  ;;  %v6779_v57 = vld [vmem:[%s15618_s1 + $0x2a8] sm:$0xf]  ;;  %v9816_v31 = vld [vmem:[%s15618_s1 + $0x394] sm:$0xf0] }
 0x194   :  { %5442 = vmatpush.bf16.msra.mxu1 %v9544_v38  ;;  %v6795_v38 = vld [vmem:[%s15618_s1 + $0x2c8] sm:$0xf]  ;;  %v5212_v54 = vpop.f32.mrf.mxu3  ;;  %v5188_v63 = vpop.f32.mrf.mxu1  ;;  %v6780_v8 = vor.u32 %v9788_v58, %v6779_v57  ;;  %v9780_v51 = vld [vmem:[%s15618_s1 + $0x274] sm:$0xf0] }
 0x195   :  { %5451 = vmatpush.bf16.msra.mxu2 %v6540_v39  ;;  %v9792_v39 = vld [vmem:[%s15618_s1 + $0x2d4] sm:$0xf0]  ;;  %v6907_v59 = vld [vmem:[%s15618_s1 + $0x3a8] sm:$0xf] }
 0x196   :  { %5464 = vmatpush.bf16.msra.mxu3 %v6668_v34  ;;  %v5199_v34 = vpop.f32.mrf.mxu2  ;;  %v6796_v50 = vor.u32 %v9792_v39, %v6795_v38  ;;  %v6459_v10 = vld [vmem:[%s15618_s1 + $0x28] sm:$0xf]  ;;  %v9892_v57 = vld [vmem:[%s15618_s1 + $0x5f4] sm:$0xf0] }
 0x197   :  { %5430 = vmatpush.bf16.msra.mxu0 %v9400_v43  ;;  %v5200_v43 = vadd.f32 %v5199_v34, %v5187_v30  ;;  %v6587_v24 = vld [vmem:[%s15618_s1 + $0x128] sm:$0xf]  ;;  %v10520_v30 = vld [vmem:[#allocation1] sm:$0xff] }
 0x198   :  { %5443 = vmatpush.bf16.msra.mxu1 %v9528_v55  ;;  %v6924_v55 = vor.u32 %v9824_v41, %v6923_v40  ;;  %v6588_v38 = vor.u32 %v9740_v27, %v6587_v24  ;;  %v9704_v40 = vld [vmem:[%s15618_s1 + $0x14] sm:$0xf0]  ;;  %v6571_v41 = vld [vmem:[%s15618_s1 + $0x108] sm:$0xf] }
 0x199   :  { %5452 = vmatpush.bf16.msra.mxu2 %v6524_v56  ;;  %v9744_v56 = vld [vmem:[%s15618_s1 + $0x154] sm:$0xf0]  ;;  %v5213_v62 = vadd.f32 %v5212_v54, %v5200_v43  ;;  %v6875_v52 = vld [vmem:[%s15618_s1 + $0x368] sm:$0xf] }
 0x19a   :  { %5465 = vmatpush.bf16.msra.mxu3 %v6652_v61  ;;  %v9820_v61 = vld [vmem:[%s15618_s1 + $0x3b4] sm:$0xf0]  ;;  %v6604_v32 = vor.u32 %v9744_v56, %v6603_v53  ;;  %v7067_v43 = vld [vmem:[%s15618_s1 + $0x4e8] sm:$0xf] }
 0x19b   :  { %5431 = vmatpush.bf16.msra.mxu0 %v9384_v11  ;;  %v9708_v11 = vld [vmem:[%s15618_s1 + $0x34] sm:$0xf0]  ;;  %v6908_v25 = vor.u32 %v9820_v61, %v6907_v59  ;;  %v7195_v56 = vld [vmem:[%s15618_s1 + $0x5e8] sm:$0xf] }
 0x19c   :  { %5444 = vmatpush.bf16.msra.mxu1 %v9512_v28  ;;  %v6763_v28 = vld [vmem:[%s15618_s1 + $0x288] sm:$0xf]  ;;  %v6460_v35 = vor.u32 %v9708_v11, %v6459_v10  ;;  %v5214_v34 = vpop.f32.mrf.mxu3  ;;  %v9812_v53 = vld [vmem:[%s15618_s1 + $0x374] sm:$0xf0] }
 0x19d   :  { %5453 = vmatpush.bf16.msra.mxu2 %v6508_v29  ;;  %v9784_v29 = vld [vmem:[%s15618_s1 + $0x294] sm:$0xf0]  ;;  %v6876_v61 = vor.u32 %v9812_v53, %v6875_v52  ;;  %v6731_v63 = vld [vmem:[%s15618_s1 + $0x248] sm:$0xf] }
 0x19e   :  { %5466 = vmatpush.bf16.msra.mxu3 %v6636_v23  ;;  %5432 = vmatmul.bf16.vlgmr.msra.gmra.mxu0 %v11740_v7  ;;  %v5225_v23 = vpop.f32.mrf.mxu0  ;;  %v5201_v44 = vpop.f32.mrf.mxu2  ;;  %v6764_v39 = vor.u32 %v9784_v29, %v6763_v28  ;;  %v9860_v54 = vld [vmem:[%s15618_s1 + $0x4f4] sm:$0xf0]  ;;  %v7051_v11 = vld [vmem:[%s15618_s1 + $0x4c8] sm:$0xf] }
 0x19f   :  { %5476 = vmatpush.bf16.msrb.mxu0 %v6812_v33  ;;  %9570 = vmatmul.msk.bf16.vlgmr.msra.gmra.mxu1 %vm4797_vm0, %v10520_v30  ;;  %v6891_v33 = vld [vmem:[%s15618_s1 + $0x388] sm:$0xf]  ;;  %v13202_v36 = vadd.f32 %v5225_v23, %v5213_v62  ;;  %v7068_v62 = vor.u32 %v9860_v54, %v7067_v43  ;;  %v9808_v10 = vld [vmem:[%s15618_s1 + $0x354] sm:$0xf0] }
 0x1a0   :  { %5489 = vmatpush.bf16.msrb.mxu1 %v6940_v37  ;;  %v6443_v37 = vld [vmem:[%s15618_s1 + $0x8] sm:$0xf]  ;;  %v9856_v24 = vld [vmem:[%s15618_s1 + $0x4d4] sm:$0xf0] }
 0x1a1   :  { %5454 = vmatpush.bf16.msra.mxu2 %v6492_v42  ;;  %v9736_v42 = vld [vmem:[%s15618_s1 + $0x114] sm:$0xf0]  ;;  %v7179_v27 = vld [vmem:[%s15618_s1 + $0x5c8] sm:$0xf]  ;;  %v7052_v23 = vor.u32 %v9856_v24, %v7051_v11 }
 0x1a2   :  { %5467 = vmatpush.bf16.msra.mxu3 %v6620_v45  ;;  %v6892_v45 = vor.u32 %v9816_v31, %v6891_v33  ;;  %v6572_v58 = vor.u32 %v9736_v42, %v6571_v41  ;;  %v9888_v28 = vld [vmem:[%s15618_s1 + $0x5d4] sm:$0xf0]  ;;  %v6715_v33 = vld [vmem:[%s15618_s1 + $0x228] sm:$0xf] }
 0x1a3   :  { %5477 = vmatpush.bf16.msrb.mxu0 %v6796_v50  ;;  %v6747_v50 = vld [vmem:[%s15618_s1 + $0x268] sm:$0xf]  ;;  %v9772_v31 = vld [vmem:[%s15618_s1 + $0x234] sm:$0xf0] }
 0x1a4   :  { %5490 = vmatpush.bf16.msrb.mxu1 %v6924_v55  ;;  %v6444_v55 = vor.u32 %v9704_v40, %v6443_v37  ;;  %v6748_v59 = vor.u32 %v9780_v51, %v6747_v50  ;;  %v7180_v37 = vor.u32 %v9888_v28, %v7179_v27  ;;  %v9804_v44 = vld [vmem:[%s15618_s1 + $0x334] sm:$0xf0]  ;;  %v7163_v40 = vld [vmem:[%s15618_s1 + $0x5a8] sm:$0xf]  ;;  %v6716_v42 = vor.u32 %v9772_v31, %v6715_v33 }
 0x1a5   :  { %5455 = vmatpush.bf16.msra.mxu2 %v6476_v3  ;;  %v9776_v3 = vld [vmem:[%s15618_s1 + $0x254] sm:$0xf0]  ;;  %v6699_v34 = vld [vmem:[%s15618_s1 + $0x208] sm:$0xf] }
 0x1a6   :  { %5468 = vmatpush.bf16.msra.mxu3 %v6604_v32  ;;  %v6859_v32 = vld [vmem:[%s15618_s1 + $0x348] sm:$0xf]  ;;  %v6732_v29 = vor.u32 %v9776_v3, %v6731_v63  ;;  %v9884_v41 = vld [vmem:[%s15618_s1 + $0x5b4] sm:$0xf0] }
 0x1a7   :  { %5478 = vmatpush.bf16.msrb.mxu0 %v6780_v8  ;;  %v7196_v8 = vor.u32 %v9892_v57, %v7195_v56  ;;  %v6860_v30 = vor.u32 %v9808_v10, %v6859_v32  ;;  %v9768_v51 = vld [vmem:[%s15618_s1 + $0x214] sm:$0xf0]  ;;  %v6827_v52 = vld [vmem:[%s15618_s1 + $0x308] sm:$0xf]  ;;  %v7164_v43 = vor.u32 %v9884_v41, %v7163_v40 }
 0x1a8   :  { %5491 = vmatpush.bf16.msrb.mxu1 %v6908_v25  ;;  %v5227_v25 = vpop.f32.mrf.mxu0  ;;  %v9800_v53 = vld [vmem:[%s15618_s1 + $0x314] sm:$0xf0]  ;;  %v7019_v54 = vld [vmem:[%s15618_s1 + $0x488] sm:$0xf]  ;;  %v6700_v63 = vor.u32 %v9768_v51, %v6699_v34 }
 0x1a9   :  { %5456 = vmatpush.bf16.msra.mxu2 %v6460_v35  ;;  %v6843_v35 = vld [vmem:[%s15618_s1 + $0x328] sm:$0xf]  ;;  %v9956_v32 = vld [vmem:[%s15618_s1 + $0x7f4] sm:$0xf0] }
 0x1aa   :  { %5469 = vmatpush.bf16.msra.mxu3 %v6588_v38  ;;  %v7035_v38 = vld [vmem:[%s15618_s1 + $0x4a8] sm:$0xf]  ;;  %v9844_v25 = vld [vmem:[%s15618_s1 + $0x474] sm:$0xf0] }
 0x1ab   :  { %5479 = vmatpush.bf16.msrb.mxu0 %v6764_v39  ;;  %v9852_v39 = vld [vmem:[%s15618_s1 + $0x4b4] sm:$0xf0]  ;;  %v7147_v56 = vld [vmem:[%s15618_s1 + $0x588] sm:$0xf] }
 0x1ac   :  { %5492 = vmatpush.bf16.msrb.mxu1 %v6892_v45  ;;  %v6844_v45 = vor.u32 %v9804_v44, %v6843_v35  ;;  %v7036_v50 = vor.u32 %v9852_v39, %v7035_v38  ;;  %v5238_v57 = vpop.f32.mrf.mxu1  ;;  %v7451_v3 = vld [vmem:[%s15618_s1 + $0x7e8] sm:$0xf]  ;;  %v9952_v31 = vld [vmem:[%s15618_s1 + $0x7d4] sm:$0xf0] }
 0x1ad   :  { %5457 = vmatpush.bf16.msra.mxu2 %v6444_v55  ;;  %v9848_v55 = vld [vmem:[%s15618_s1 + $0x494] sm:$0xf0]  ;;  %v7131_v27 = vld [vmem:[%s15618_s1 + $0x568] sm:$0xf]  ;;  %v7452_v28 = vor.u32 %v9956_v32, %v7451_v3 }
 0x1ae   :  { %5470 = vmatpush.bf16.msra.mxu3 %v6572_v58  ;;  %v9880_v58 = vld [vmem:[%s15618_s1 + $0x594] sm:$0xf0]  ;;  %v7020_v10 = vor.u32 %v9848_v55, %v7019_v54  ;;  %v7435_v33 = vld [vmem:[%s15618_s1 + $0x7c8] sm:$0xf] }
 0x1af   :  { %5480 = vmatpush.bf16.msrb.mxu0 %v6748_v59  ;;  %v7323_v59 = vld [vmem:[%s15618_s1 + $0x6e8] sm:$0xf]  ;;  %v7148_v11 = vor.u32 %v9880_v58, %v7147_v56  ;;  %v9840_v41 = vld [vmem:[%s15618_s1 + $0x454] sm:$0xf0] }
 0x1b0   :  { %5493 = vmatpush.bf16.msrb.mxu1 %v6876_v61  ;;  %5458 = vmatmul.bf16.vlgmr.msra.gmra.mxu2 %v10887_v21  ;;  %v9924_v61 = vld [vmem:[%s15618_s1 + $0x6f4] sm:$0xf0]  ;;  %v6987_v40 = vld [vmem:[%s15618_s1 + $0x448] sm:$0xf] }
 0x1b1   :  { %5502 = vmatpush.bf16.msrb.mxu2 %v7068_v62  ;;  %5471 = vmatmul.bf16.vlgmr.msra.gmra.mxu3 %v10898_v26  ;;  %v5239_v62 = vadd.f32 %v5238_v57, %v13202_v36  ;;  %v7324_v24 = vor.u32 %v9924_v61, %v7323_v59  ;;  %v7003_v36 = vld [vmem:[%s15618_s1 + $0x468] sm:$0xf]  ;;  %v9948_v54 = vld [vmem:[%s15618_s1 + $0x7b4] sm:$0xf0]  ;;  %v6988_v56 = vor.u32 %v9840_v41, %v6987_v40 }
 0x1b2   :  { %5515 = vmatpush.bf16.msrb.mxu3 %v7196_v8  ;;  %v6828_v8 = vor.u32 %v9800_v53, %v6827_v52  ;;  %v7004_v35 = vor.u32 %v9844_v25, %v7003_v36  ;;  %v7291_v51 = vld [vmem:[%s15618_s1 + $0x6a8] sm:$0xf]  ;;  %v9916_v52 = vld [vmem:[%s15618_s1 + $0x6b4] sm:$0xf0] }
 0x1b3   :  { %5481 = vmatpush.bf16.msrb.mxu0 %v6732_v29  ;;  %v9876_v29 = vld [vmem:[%s15618_s1 + $0x574] sm:$0xf0]  ;;  %v5251_v44 = vpop.f32.mrf.mxu2  ;;  %v7292_v58 = vor.u32 %v9916_v52, %v7291_v51  ;;  %v6971_v59 = vld [vmem:[%s15618_s1 + $0x428] sm:$0xf] }
 0x1b4   :  { %5494 = vmatpush.bf16.msrb.mxu1 %v6860_v30  ;;  %v7307_v30 = vld [vmem:[%s15618_s1 + $0x6c8] sm:$0xf]  ;;  %v5264_v39 = vpop.f32.mrf.mxu3  ;;  %v5252_v34 = vadd.f32 %v5251_v44, %v5239_v62  ;;  %v5240_v53 = vpop.f32.mrf.mxu1  ;;  %v9836_v61 = vld [vmem:[%s15618_s1 + $0x434] sm:$0xf0] }
 0x1b5   :  { %5503 = vmatpush.bf16.msrb.mxu2 %v7052_v23  ;;  %v9920_v23 = vld [vmem:[%s15618_s1 + $0x6d4] sm:$0xf0]  ;;  %v7099_v62 = vld [vmem:[%s15618_s1 + $0x528] sm:$0xf]  ;;  %v6972_v25 = vor.u32 %v9836_v61, %v6971_v59 }
 0x1b6   :  { %5516 = vmatpush.bf16.msrb.mxu3 %v7180_v37  ;;  %v7132_v37 = vor.u32 %v9876_v29, %v7131_v27  ;;  %v7308_v38 = vor.u32 %v9920_v23, %v7307_v30  ;;  %v5265_v55 = vadd.f32 %v5264_v39, %v5252_v34  ;;  %v9868_v3 = vld [vmem:[%s15618_s1 + $0x534] sm:$0xf0]  ;;  %v7275_v32 = vld [vmem:[%s15618_s1 + $0x688] sm:$0xf] }
 0x1b7   :  { %5482 = vmatpush.bf16.msrb.mxu0 %v6716_v42  ;;  %v7115_v42 = vld [vmem:[%s15618_s1 + $0x548] sm:$0xf]  ;;  %v9832_v30 = vld [vmem:[%s15618_s1 + $0x414] sm:$0xf0] }
 0x1b8   :  { %5495 = vmatpush.bf16.msrb.mxu1 %v6844_v45  ;;  %v7436_v45 = vor.u32 %v9952_v31, %v7435_v33  ;;  %v6955_v27 = vld [vmem:[%s15618_s1 + $0x408] sm:$0xf]  ;;  %v9864_v33 = vld [vmem:[%s15618_s1 + $0x514] sm:$0xf0] }
 0x1b9   :  { %5504 = vmatpush.bf16.msrb.mxu2 %v7036_v50  ;;  %v9872_v50 = vld [vmem:[%s15618_s1 + $0x554] sm:$0xf0]  ;;  %v7083_v23 = vld [vmem:[%s15618_s1 + $0x508] sm:$0xf]  ;;  %v6956_v34 = vor.u32 %v9832_v30, %v6955_v27 }
 0x1ba   :  { %5517 = vmatpush.bf16.msrb.mxu3 %v7164_v43  ;;  %v7419_v43 = vld [vmem:[%s15618_s1 + $0x7a8] sm:$0xf]  ;;  %v7116_v57 = vor.u32 %v9872_v50, %v7115_v42  ;;  %v9940_v40 = vld [vmem:[%s15618_s1 + $0x774] sm:$0xf0]  ;;  %v7084_v51 = vor.u32 %v9864_v33, %v7083_v23 }
 0x1bb   :  { %5483 = vmatpush.bf16.msrb.mxu0 %v6700_v63  ;;  %v7420_v63 = vor.u32 %v9948_v54, %v7419_v43  ;;  %v5253_v31 = vpop.f32.mrf.mxu2  ;;  %v7259_v44 = vld [vmem:[%s15618_s1 + $0x668] sm:$0xf]  ;;  %v9988_v42 = vld [vmem:[%s15618_s1 + $0x8f4] sm:$0xf0] }
 0x1bc   :  { %5496 = vmatpush.bf16.msrb.mxu1 %v6828_v8  ;;  %v9912_v8 = vld [vmem:[%s15618_s1 + $0x694] sm:$0xf0]  ;;  %v7387_v39 = vld [vmem:[%s15618_s1 + $0x768] sm:$0xf] }
 0x1bd   :  { %5505 = vmatpush.bf16.msrb.mxu2 %v7020_v10  ;;  %v5277_v10 = vpop.f32.mrf.mxu0  ;;  %v7276_v29 = vor.u32 %v9912_v8, %v7275_v32  ;;  %v7579_v41 = vld [vmem:[%s15618_s1 + $0x8e8] sm:$0xf]  ;;  %v10020_v50 = vld [vmem:[%s15618_s1 + $0x9f4] sm:$0xf0]  ;;  %v7388_v53 = vor.u32 %v9940_v40, %v7387_v39 }
 0x1be   :  { %5518 = vmatpush.bf16.msrb.mxu3 %v7148_v11  ;;  %5484 = vmatmul.bf16.vlgmr.msrb.gmra.mxu0 %v10885_v20  ;;  %v7403_v11 = vld [vmem:[%s15618_s1 + $0x788] sm:$0xf]  ;;  %v13401_v36 = vadd.f32 %v5277_v10, %v5265_v55  ;;  %v7580_v43 = vor.u32 %v9988_v42, %v7579_v41  ;;  %v9904_v55 = vld [vmem:[%s15618_s1 + $0x654] sm:$0xf0] }
 0x1bf   :  { %5528 = vmatpush.bf16.msra.mxu0 %v7324_v24  ;;  %5497 = vmatmul.bf16.vlgmr.msrb.gmra.mxu1 %v10889_v22  ;;  %v9944_v24 = vld [vmem:[%s15618_s1 + $0x794] sm:$0xf0]  ;;  %v7243_v54 = vld [vmem:[%s15618_s1 + $0x648] sm:$0xf] }
 0x1c0   :  { %5541 = vmatpush.bf16.msra.mxu1 %v7452_v28  ;;  %v7100_v28 = vor.u32 %v9868_v3, %v7099_v62  ;;  %v7563_v59 = vld [vmem:[%s15618_s1 + $0x8c8] sm:$0xf]  ;;  %v9984_v61 = vld [vmem:[%s15618_s1 + $0x8d4] sm:$0xf0]  ;;  %v7244_v32 = vor.u32 %v9904_v55, %v7243_v54 }
 0x1c1   :  { %5506 = vmatpush.bf16.msrb.mxu2 %v7004_v35  ;;  %v5266_v35 = vpop.f32.mrf.mxu3  ;;  %v10016_v3 = vld [vmem:[%s15618_s1 + $0x9d4] sm:$0xf0]  ;;  %v7564_v10 = vor.u32 %v9984_v61, %v7563_v59  ;;  %v7675_v23 = vld [vmem:[%s15618_s1 + $0x9a8] sm:$0xf] }
 0x1c2   :  { %5519 = vmatpush.bf16.msrb.mxu3 %v7132_v37  ;;  %v7404_v37 = vor.u32 %v9944_v24, %v7403_v11  ;;  %v7227_v11 = vld [vmem:[%s15618_s1 + $0x628] sm:$0xf]  ;;  %v9900_v24 = vld [vmem:[%s15618_s1 + $0x634] sm:$0xf0] }
 0x1c3   :  { %5529 = vmatpush.bf16.msra.mxu0 %v7308_v38  ;;  %v9908_v38 = vld [vmem:[%s15618_s1 + $0x674] sm:$0xf0]  ;;  %v7228_v31 = vor.u32 %v9900_v24, %v7227_v11  ;;  %v7211_v35 = vld [vmem:[%s15618_s1 + $0x608] sm:$0xf] }
 0x1c4   :  { %5542 = vmatpush.bf16.msra.mxu1 %v7436_v45  ;;  %v7707_v45 = vld [vmem:[%s15618_s1 + $0x9e8] sm:$0xf]  ;;  %v7260_v52 = vor.u32 %v9908_v38, %v7259_v44  ;;  %v9980_v30 = vld [vmem:[%s15618_s1 + $0x8b4] sm:$0xf0] }
 0x1c5   :  { %5507 = vmatpush.bf16.msrb.mxu2 %v6988_v56  ;;  %v7371_v56 = vld [vmem:[%s15618_s1 + $0x748] sm:$0xf]  ;;  %v5279_v62 = vpop.f32.mrf.mxu0  ;;  %v10012_v33 = vld [vmem:[%s15618_s1 + $0x9b4] sm:$0xf0] }
 0x1c6   :  { %5520 = vmatpush.bf16.msrb.mxu3 %v7116_v57  ;;  %v7708_v57 = vor.u32 %v10020_v50, %v7707_v45  ;;  %v9896_v38 = vld [vmem:[%s15618_s1 + $0x614] sm:$0xf0]  ;;  %v7339_v39 = vld [vmem:[%s15618_s1 + $0x708] sm:$0xf]  ;;  %v7676_v41 = vor.u32 %v10012_v33, %v7675_v23 }
 0x1c7   :  { %5530 = vmatpush.bf16.msra.mxu0 %v7292_v58  ;;  %v9936_v58 = vld [vmem:[%s15618_s1 + $0x754] sm:$0xf0]  ;;  %v7531_v42 = vld [vmem:[%s15618_s1 + $0x888] sm:$0xf]  ;;  %v7212_v54 = vor.u32 %v9896_v38, %v7211_v35 }
 0x1c8   :  { %5543 = vmatpush.bf16.msra.mxu1 %v7420_v63  ;;  %v7691_v63 = vld [vmem:[%s15618_s1 + $0x9c8] sm:$0xf]  ;;  %v7372_v8 = vor.u32 %v9936_v58, %v7371_v56  ;;  %v9928_v40 = vld [vmem:[%s15618_s1 + $0x714] sm:$0xf0] }
 0x1c9   :  { %5508 = vmatpush.bf16.msrb.mxu2 %v6972_v25  ;;  %v7355_v25 = vld [vmem:[%s15618_s1 + $0x728] sm:$0xf]  ;;  %v7692_v27 = vor.u32 %v10016_v3, %v7691_v63  ;;  %v10084_v56 = vld [vmem:[%s15618_s1 + $0xbf4] sm:$0xf0] }
 0x1ca   :  { %5521 = vmatpush.bf16.msrb.mxu3 %v7100_v28  ;;  %v9932_v28 = vld [vmem:[%s15618_s1 + $0x734] sm:$0xf0]  ;;  %v7659_v45 = vld [vmem:[%s15618_s1 + $0x988] sm:$0xf] }
 0x1cb   :  { %5531 = vmatpush.bf16.msra.mxu0 %v7276_v29  ;;  %v7547_v29 = vld [vmem:[%s15618_s1 + $0x8a8] sm:$0xf]  ;;  %v9972_v62 = vld [vmem:[%s15618_s1 + $0x874] sm:$0xf0] }
 0x1cc   :  { %5544 = vmatpush.bf16.msra.mxu1 %v7404_v37  ;;  %v7356_v37 = vor.u32 %v9932_v28, %v7355_v25  ;;  %v7548_v44 = vor.u32 %v9980_v30, %v7547_v29  ;;  %v5290_v50 = vpop.f32.mrf.mxu1  ;;  %v7963_v55 = vld [vmem:[%s15618_s1 + $0xbe8] sm:$0xf]  ;;  %v10080_v24 = vld [vmem:[%s15618_s1 + $0xbd4] sm:$0xf0] }
 0x1cd   :  { %5509 = vmatpush.bf16.msrb.mxu2 %v6956_v34  ;;  %v9976_v34 = vld [vmem:[%s15618_s1 + $0x894] sm:$0xf0]  ;;  %v7643_v63 = vld [vmem:[%s15618_s1 + $0x968] sm:$0xf]  ;;  %v7964_v3 = vor.u32 %v10084_v56, %v7963_v55 }
 0x1ce   :  { %5522 = vmatpush.bf16.msrb.mxu3 %v7084_v51  ;;  %v10008_v51 = vld [vmem:[%s15618_s1 + $0x994] sm:$0xf0]  ;;  %v7532_v58 = vor.u32 %v9976_v34, %v7531_v42  ;;  %v7947_v11 = vld [vmem:[%s15618_s1 + $0xbc8] sm:$0xf] }
 0x1cf   :  { %5532 = vmatpush.bf16.msra.mxu0 %v7260_v52  ;;  %v7835_v52 = vld [vmem:[%s15618_s1 + $0xae8] sm:$0xf]  ;;  %v7660_v59 = vor.u32 %v10008_v51, %v7659_v45  ;;  %v9968_v33 = vld [vmem:[%s15618_s1 + $0x854] sm:$0xf0] }
 0x1d0   :  { %5545 = vmatpush.bf16.msra.mxu1 %v7388_v53  ;;  %5510 = vmatmul.bf16.vlgmr.msrb.gmra.mxu2 %v10980_v0  ;;  %v10052_v53 = vld [vmem:[%s15618_s1 + $0xaf4] sm:$0xf0]  ;;  %v7499_v23 = vld [vmem:[%s15618_s1 + $0x848] sm:$0xf] }
 0x1d1   :  { %5554 = vmatpush.bf16.msra.mxu2 %v7580_v43  ;;  %5523 = vmatmul.bf16.vlgmr.msrb.gmra.mxu3 %v10984_v2  ;;  %v5291_v43 = vadd.f32 %v5290_v50, %v13401_v36  ;;  %v7836_v61 = vor.u32 %v10052_v53, %v7835_v52  ;;  %v7515_v36 = vld [vmem:[%s15618_s1 + $0x868] sm:$0xf]  ;;  %v10076_v42 = vld [vmem:[%s15618_s1 + $0xbb4] sm:$0xf0]  ;;  %v7500_v45 = vor.u32 %v9968_v33, %v7499_v23 }
 0x1d2   :  { %5567 = vmatpush.bf16.msra.mxu3 %v7708_v57  ;;  %v7340_v57 = vor.u32 %v9928_v40, %v7339_v39  ;;  %v7516_v25 = vor.u32 %v9972_v62, %v7515_v36  ;;  %v7803_v38 = vld [vmem:[%s15618_s1 + $0xaa8] sm:$0xf]  ;;  %v10044_v39 = vld [vmem:[%s15618_s1 + $0xab4] sm:$0xf0] }
 0x1d3   :  { %5533 = vmatpush.bf16.msra.mxu0 %v7244_v32  ;;  %v10004_v32 = vld [vmem:[%s15618_s1 + $0x974] sm:$0xf0]  ;;  %v5303_v28 = vpop.f32.mrf.mxu2  ;;  %v7804_v51 = vor.u32 %v10044_v39, %v7803_v38  ;;  %v7483_v52 = vld [vmem:[%s15618_s1 + $0x828] sm:$0xf] }
 0x1d4   :  { %5546 = vmatpush.bf16.msra.mxu1 %v7372_v8  ;;  %v7819_v8 = vld [vmem:[%s15618_s1 + $0xac8] sm:$0xf]  ;;  %v5316_v30 = vpop.f32.mrf.mxu3  ;;  %v5304_v35 = vadd.f32 %v5303_v28, %v5291_v43  ;;  %v5292_v40 = vpop.f32.mrf.mxu1  ;;  %v9964_v53 = vld [vmem:[%s15618_s1 + $0x834] sm:$0xf0] }
 0x1d5   :  { %5555 = vmatpush.bf16.msra.mxu2 %v7564_v10  ;;  %v10048_v10 = vld [vmem:[%s15618_s1 + $0xad4] sm:$0xf0]  ;;  %v7611_v43 = vld [vmem:[%s15618_s1 + $0x928] sm:$0xf]  ;;  %v7484_v62 = vor.u32 %v9964_v53, %v7483_v52 }
 0x1d6   :  { %5568 = vmatpush.bf16.msra.mxu3 %v7692_v27  ;;  %v7644_v27 = vor.u32 %v10004_v32, %v7643_v63  ;;  %v7820_v29 = vor.u32 %v10048_v10, %v7819_v8  ;;  %v5317_v34 = vadd.f32 %v5316_v30, %v5304_v35  ;;  %v9996_v55 = vld [vmem:[%s15618_s1 + $0x934] sm:$0xf0]  ;;  %v7787_v56 = vld [vmem:[%s15618_s1 + $0xa88] sm:$0xf] }
 0x1d7   :  { %5534 = vmatpush.bf16.msra.mxu0 %v7228_v31  ;;  %v7627_v31 = vld [vmem:[%s15618_s1 + $0x948] sm:$0xf]  ;;  %v9960_v8 = vld [vmem:[%s15618_s1 + $0x814] sm:$0xf0] }
 0x1d8   :  { %5547 = vmatpush.bf16.msra.mxu1 %v7356_v37  ;;  %v7948_v37 = vor.u32 %v10080_v24, %v7947_v11  ;;  %v7467_v63 = vld [vmem:[%s15618_s1 + $0x808] sm:$0xf]  ;;  %v9992_v11 = vld [vmem:[%s15618_s1 + $0x914] sm:$0xf0] }
 0x1d9   :  { %5556 = vmatpush.bf16.msra.mxu2 %v7548_v44  ;;  %v10000_v44 = vld [vmem:[%s15618_s1 + $0x954] sm:$0xf0]  ;;  %v7595_v10 = vld [vmem:[%s15618_s1 + $0x908] sm:$0xf]  ;;  %v7468_v35 = vor.u32 %v9960_v8, %v7467_v63 }
 0x1da   :  { %5569 = vmatpush.bf16.msra.mxu3 %v7676_v41  ;;  %v7931_v41 = vld [vmem:[%s15618_s1 + $0xba8] sm:$0xf]  ;;  %v7628_v50 = vor.u32 %v10000_v44, %v7627_v31  ;;  %v10068_v23 = vld [vmem:[%s15618_s1 + $0xb74] sm:$0xf0]  ;;  %v7596_v38 = vor.u32 %v9992_v11, %v7595_v10 }
 0x1db   :  { %5535 = vmatpush.bf16.msra.mxu0 %v7212_v54  ;;  %v7932_v54 = vor.u32 %v10076_v42, %v7931_v41  ;;  %v5305_v24 = vpop.f32.mrf.mxu2  ;;  %v7771_v28 = vld [vmem:[%s15618_s1 + $0xa68] sm:$0xf]  ;;  %v10116_v31 = vld [vmem:[%s15618_s1 + $0xcf4] sm:$0xf0] }
 0x1dc   :  { %5548 = vmatpush.bf16.msra.mxu1 %v7340_v57  ;;  %v10040_v57 = vld [vmem:[%s15618_s1 + $0xa94] sm:$0xf0]  ;;  %v7899_v30 = vld [vmem:[%s15618_s1 + $0xb68] sm:$0xf] }
 0x1dd   :  { %5557 = vmatpush.bf16.msra.mxu2 %v7532_v58  ;;  %v5329_v58 = vpop.f32.mrf.mxu0  ;;  %v7788_v32 = vor.u32 %v10040_v57, %v7787_v56  ;;  %v8091_v33 = vld [vmem:[%s15618_s1 + $0xce8] sm:$0xf]  ;;  %v10148_v44 = vld [vmem:[%s15618_s1 + $0xdf4] sm:$0xf0]  ;;  %v7900_v40 = vor.u32 %v10068_v23, %v7899_v30 }
 0x1de   :  { %5570 = vmatpush.bf16.msra.mxu3 %v7660_v59  ;;  %5536 = vmatmul.bf16.vlgmr.msra.gmra.mxu0 %v10975_v60  ;;  %v7915_v59 = vld [vmem:[%s15618_s1 + $0xb88] sm:$0xf]  ;;  %v13600_v36 = vadd.f32 %v5329_v58, %v5317_v34  ;;  %v8092_v41 = vor.u32 %v10116_v31, %v8091_v33  ;;  %v10032_v34 = vld [vmem:[%s15618_s1 + $0xa54] sm:$0xf0] }
 0x1df   :  { %5580 = vmatpush.bf16.msrb.mxu0 %v7836_v61  ;;  %5549 = vmatmul.bf16.vlgmr.msra.gmra.mxu1 %v10982_v1  ;;  %v10072_v61 = vld [vmem:[%s15618_s1 + $0xb94] sm:$0xf0]  ;;  %v7755_v42 = vld [vmem:[%s15618_s1 + $0xa48] sm:$0xf] }
 0x1e0   :  { %5593 = vmatpush.bf16.msrb.mxu1 %v7964_v3  ;;  %v7612_v3 = vor.u32 %v9996_v55, %v7611_v43  ;;  %v8075_v52 = vld [vmem:[%s15618_s1 + $0xcc8] sm:$0xf]  ;;  %v10112_v53 = vld [vmem:[%s15618_s1 + $0xcd4] sm:$0xf0]  ;;  %v7756_v56 = vor.u32 %v10032_v34, %v7755_v42 }
 0x1e1   :  { %5558 = vmatpush.bf16.msra.mxu2 %v7516_v25  ;;  %v5318_v25 = vpop.f32.mrf.mxu3  ;;  %v10144_v55 = vld [vmem:[%s15618_s1 + $0xdd4] sm:$0xf0]  ;;  %v8076_v58 = vor.u32 %v10112_v53, %v8075_v52  ;;  %v8187_v10 = vld [vmem:[%s15618_s1 + $0xda8] sm:$0xf] }
 0x1e2   :  { %5571 = vmatpush.bf16.msra.mxu3 %v7644_v27  ;;  %v7916_v27 = vor.u32 %v10072_v61, %v7915_v59  ;;  %v7739_v59 = vld [vmem:[%s15618_s1 + $0xa28] sm:$0xf]  ;;  %v10028_v61 = vld [vmem:[%s15618_s1 + $0xa34] sm:$0xf0] }
 0x1e3   :  { %5581 = vmatpush.bf16.msrb.mxu0 %v7820_v29  ;;  %v10036_v29 = vld [vmem:[%s15618_s1 + $0xa74] sm:$0xf0]  ;;  %v7740_v24 = vor.u32 %v10028_v61, %v7739_v59  ;;  %v7723_v25 = vld [vmem:[%s15618_s1 + $0xa08] sm:$0xf] }
 0x1e4   :  { %5594 = vmatpush.bf16.msrb.mxu1 %v7948_v37  ;;  %v8219_v37 = vld [vmem:[%s15618_s1 + $0xde8] sm:$0xf]  ;;  %v7772_v39 = vor.u32 %v10036_v29, %v7771_v28  ;;  %v10108_v8 = vld [vmem:[%s15618_s1 + $0xcb4] sm:$0xf0] }
 0x1e5   :  { %5559 = vmatpush.bf16.msra.mxu2 %v7500_v45  ;;  %v7883_v45 = vld [vmem:[%s15618_s1 + $0xb48] sm:$0xf]  ;;  %v5331_v43 = vpop.f32.mrf.mxu0  ;;  %v10140_v11 = vld [vmem:[%s15618_s1 + $0xdb4] sm:$0xf0] }
 0x1e6   :  { %5572 = vmatpush.bf16.msra.mxu3 %v7628_v50  ;;  %v8220_v50 = vor.u32 %v10148_v44, %v8219_v37  ;;  %v10024_v29 = vld [vmem:[%s15618_s1 + $0xa14] sm:$0xf0]  ;;  %v7851_v30 = vld [vmem:[%s15618_s1 + $0xb08] sm:$0xf]  ;;  %v8188_v33 = vor.u32 %v10140_v11, %v8187_v10 }
 0x1e7   :  { %5582 = vmatpush.bf16.msrb.mxu0 %v7804_v51  ;;  %v10064_v51 = vld [vmem:[%s15618_s1 + $0xb54] sm:$0xf0]  ;;  %v8043_v31 = vld [vmem:[%s15618_s1 + $0xc88] sm:$0xf]  ;;  %v7724_v42 = vor.u32 %v10024_v29, %v7723_v25 }
 0x1e8   :  { %5595 = vmatpush.bf16.msrb.mxu1 %v7932_v54  ;;  %v8203_v54 = vld [vmem:[%s15618_s1 + $0xdc8] sm:$0xf]  ;;  %v7884_v57 = vor.u32 %v10064_v51, %v7883_v45  ;;  %v10056_v23 = vld [vmem:[%s15618_s1 + $0xb14] sm:$0xf0] }
 0x1e9   :  { %5560 = vmatpush.bf16.msra.mxu2 %v7484_v62  ;;  %v7867_v62 = vld [vmem:[%s15618_s1 + $0xb28] sm:$0xf]  ;;  %v8204_v63 = vor.u32 %v10144_v55, %v8203_v54  ;;  %v10212_v45 = vld [vmem:[%s15618_s1 + $0xff4] sm:$0xf0] }
 0x1ea   :  { %5573 = vmatpush.bf16.msra.mxu3 %v7612_v3  ;;  %v10060_v3 = vld [vmem:[%s15618_s1 + $0xb34] sm:$0xf0]  ;;  %v8171_v37 = vld [vmem:[%s15618_s1 + $0xd88] sm:$0xf] }
 0x1eb   :  { %5583 = vmatpush.bf16.msrb.mxu0 %v7788_v32  ;;  %v8059_v32 = vld [vmem:[%s15618_s1 + $0xca8] sm:$0xf]  ;;  %v10100_v43 = vld [vmem:[%s15618_s1 + $0xc74] sm:$0xf0] }
 0x1ec   :  { %5596 = vmatpush.bf16.msrb.mxu1 %v7916_v27  ;;  %v7868_v27 = vor.u32 %v10060_v3, %v7867_v62  ;;  %v8060_v28 = vor.u32 %v10108_v8, %v8059_v32  ;;  %v5342_v44 = vpop.f32.mrf.mxu1  ;;  %v8475_v34 = vld [vmem:[%s15618_s1 + $0xfe8] sm:$0xf]  ;;  %v10208_v61 = vld [vmem:[%s15618_s1 + $0xfd4] sm:$0xf0] }
 0x1ed   :  { %5561 = vmatpush.bf16.msra.mxu2 %v7468_v35  ;;  %v10104_v35 = vld [vmem:[%s15618_s1 + $0xc94] sm:$0xf0]  ;;  %v8155_v54 = vld [vmem:[%s15618_s1 + $0xd68] sm:$0xf]  ;;  %v8476_v55 = vor.u32 %v10212_v45, %v8475_v34 }
 0x1ee   :  { %5574 = vmatpush.bf16.msra.mxu3 %v7596_v38  ;;  %v10136_v38 = vld [vmem:[%s15618_s1 + $0xd94] sm:$0xf0]  ;;  %v8044_v51 = vor.u32 %v10104_v35, %v8043_v31  ;;  %v8459_v59 = vld [vmem:[%s15618_s1 + $0xfc8] sm:$0xf] }
 0x1ef   :  { %5584 = vmatpush.bf16.msrb.mxu0 %v7772_v39  ;;  %v8347_v39 = vld [vmem:[%s15618_s1 + $0xee8] sm:$0xf]  ;;  %v8172_v52 = vor.u32 %v10136_v38, %v8171_v37  ;;  %v10096_v11 = vld [vmem:[%s15618_s1 + $0xc54] sm:$0xf0] }
 0x1f0   :  { %5597 = vmatpush.bf16.msrb.mxu1 %v7900_v40  ;;  %5562 = vmatmul.bf16.vlgmr.msra.gmra.mxu2 %v11230_v12  ;;  %v10180_v40 = vld [vmem:[%s15618_s1 + $0xef4] sm:$0xf0]  ;;  %v8011_v10 = vld [vmem:[%s15618_s1 + $0xc48] sm:$0xf] }
 0x1f1   :  { %5606 = vmatpush.bf16.msrb.mxu2 %v8092_v41  ;;  %5575 = vmatmul.bf16.vlgmr.msra.gmra.mxu3 %v11240_v16  ;;  %v5343_v41 = vadd.f32 %v5342_v44, %v13600_v36  ;;  %v8348_v53 = vor.u32 %v10180_v40, %v8347_v39  ;;  %v8027_v36 = vld [vmem:[%s15618_s1 + $0xc68] sm:$0xf]  ;;  %v10204_v31 = vld [vmem:[%s15618_s1 + $0xfb4] sm:$0xf0]  ;;  %v8012_v37 = vor.u32 %v10096_v11, %v8011_v10 }
 0x1f2   :  { %5619 = vmatpush.bf16.msrb.mxu3 %v8220_v50  ;;  %v7852_v50 = vor.u32 %v10056_v23, %v7851_v30  ;;  %v8028_v62 = vor.u32 %v10100_v43, %v8027_v36  ;;  %v8315_v29 = vld [vmem:[%s15618_s1 + $0xea8] sm:$0xf]  ;;  %v10172_v30 = vld [vmem:[%s15618_s1 + $0xeb4] sm:$0xf0] }
 0x1f3   :  { %5585 = vmatpush.bf16.msrb.mxu0 %v7756_v56  ;;  %v10132_v56 = vld [vmem:[%s15618_s1 + $0xd74] sm:$0xf0]  ;;  %v5355_v3 = vpop.f32.mrf.mxu2  ;;  %v8316_v38 = vor.u32 %v10172_v30, %v8315_v29  ;;  %v7995_v39 = vld [vmem:[%s15618_s1 + $0xc28] sm:$0xf] }
 0x1f4   :  { %5598 = vmatpush.bf16.msrb.mxu1 %v7884_v57  ;;  %v8331_v57 = vld [vmem:[%s15618_s1 + $0xec8] sm:$0xf]  ;;  %v5368_v8 = vpop.f32.mrf.mxu3  ;;  %v5356_v25 = vadd.f32 %v5355_v3, %v5343_v41  ;;  %v5344_v23 = vpop.f32.mrf.mxu1  ;;  %v10092_v40 = vld [vmem:[%s15618_s1 + $0xc34] sm:$0xf0] }
 0x1f5   :  { %5607 = vmatpush.bf16.msrb.mxu2 %v8076_v58  ;;  %v10176_v58 = vld [vmem:[%s15618_s1 + $0xed4] sm:$0xf0]  ;;  %v8123_v41 = vld [vmem:[%s15618_s1 + $0xd28] sm:$0xf]  ;;  %v7996_v43 = vor.u32 %v10092_v40, %v7995_v39 }
 0x1f6   :  { %5620 = vmatpush.bf16.msrb.mxu3 %v8204_v63  ;;  %v8156_v63 = vor.u32 %v10132_v56, %v8155_v54  ;;  %v8332_v32 = vor.u32 %v10176_v58, %v8331_v57  ;;  %v5369_v35 = vadd.f32 %v5368_v8, %v5356_v25  ;;  %v10124_v34 = vld [vmem:[%s15618_s1 + $0xd34] sm:$0xf0]  ;;  %v8299_v45 = vld [vmem:[%s15618_s1 + $0xe88] sm:$0xf] }
 0x1f7   :  { %5586 = vmatpush.bf16.msrb.mxu0 %v7740_v24  ;;  %v8139_v24 = vld [vmem:[%s15618_s1 + $0xd48] sm:$0xf]  ;;  %v10088_v57 = vld [vmem:[%s15618_s1 + $0xc14] sm:$0xf0] }
 0x1f8   :  { %5599 = vmatpush.bf16.msrb.mxu1 %v7868_v27  ;;  %v8460_v27 = vor.u32 %v10208_v61, %v8459_v59  ;;  %v7979_v54 = vld [vmem:[%s15618_s1 + $0xc08] sm:$0xf]  ;;  %v10120_v59 = vld [vmem:[%s15618_s1 + $0xd14] sm:$0xf0] }
 0x1f9   :  { %5608 = vmatpush.bf16.msrb.mxu2 %v8060_v28  ;;  %v10128_v28 = vld [vmem:[%s15618_s1 + $0xd54] sm:$0xf0]  ;;  %v8107_v58 = vld [vmem:[%s15618_s1 + $0xd08] sm:$0xf]  ;;  %v7980_v25 = vor.u32 %v10088_v57, %v7979_v54 }
 0x1fa   :  { %5621 = vmatpush.bf16.msrb.mxu3 %v8188_v33  ;;  %v8443_v33 = vld [vmem:[%s15618_s1 + $0xfa8] sm:$0xf]  ;;  %v8140_v44 = vor.u32 %v10128_v28, %v8139_v24  ;;  %v10196_v10 = vld [vmem:[%s15618_s1 + $0xf74] sm:$0xf0]  ;;  %v8108_v29 = vor.u32 %v10120_v59, %v8107_v58 }
 0x1fb   :  { %5587 = vmatpush.bf16.msrb.mxu0 %v7724_v42  ;;  %v8444_v42 = vor.u32 %v10204_v31, %v8443_v33  ;;  %v5357_v61 = vpop.f32.mrf.mxu2  ;;  %v8283_v3 = vld [vmem:[%s15618_s1 + $0xe68] sm:$0xf]  ;;  %v10244_v24 = vld [vmem:[%s15618_s1 + $0x10f4] sm:$0xf0] }
 0x1fc   :  { %5600 = vmatpush.bf16.msrb.mxu1 %v7852_v50  ;;  %v10168_v50 = vld [vmem:[%s15618_s1 + $0xe94] sm:$0xf0]  ;;  %v8411_v8 = vld [vmem:[%s15618_s1 + $0xf68] sm:$0xf] }
 0x1fd   :  { %5609 = vmatpush.bf16.msrb.mxu2 %v8044_v51  ;;  %v5381_v51 = vpop.f32.mrf.mxu0  ;;  %v8300_v56 = vor.u32 %v10168_v50, %v8299_v45  ;;  %v8603_v11 = vld [vmem:[%s15618_s1 + $0x10e8] sm:$0xf]  ;;  %v10276_v28 = vld [vmem:[%s15618_s1 + $0x11f4] sm:$0xf0]  ;;  %v8412_v23 = vor.u32 %v10196_v10, %v8411_v8 }
 0x1fe   :  { %5622 = vmatpush.bf16.msrb.mxu3 %v8172_v52  ;;  %5588 = vmatmul.bf16.vlgmr.msrb.gmra.mxu0 %v11238_v15  ;;  %v8427_v52 = vld [vmem:[%s15618_s1 + $0xf88] sm:$0xf]  ;;  %v13799_v36 = vadd.f32 %v5381_v51, %v5369_v35  ;;  %v8604_v33 = vor.u32 %v10244_v24, %v8603_v11  ;;  %v10160_v35 = vld [vmem:[%s15618_s1 + $0xe54] sm:$0xf0] }
 0x1ff   :  { %5632 = vmatpush.bf16.msra.mxu0 %v8348_v53  ;;  %5601 = vmatmul.bf16.vlgmr.msrb.gmra.mxu1 %v11242_v17  ;;  %v10200_v53 = vld [vmem:[%s15618_s1 + $0xf94] sm:$0xf0]  ;;  %v8267_v31 = vld [vmem:[%s15618_s1 + $0xe48] sm:$0xf] }
 0x200   :  { %5645 = vmatpush.bf16.msra.mxu1 %v8476_v55  ;;  %v8124_v55 = vor.u32 %v10124_v34, %v8123_v41  ;;  %v8587_v39 = vld [vmem:[%s15618_s1 + $0x10c8] sm:$0xf]  ;;  %v10240_v40 = vld [vmem:[%s15618_s1 + $0x10d4] sm:$0xf0]  ;;  %v8268_v45 = vor.u32 %v10160_v35, %v8267_v31 }
 0x201   :  { %5610 = vmatpush.bf16.msrb.mxu2 %v8028_v62  ;;  %v5370_v62 = vpop.f32.mrf.mxu3  ;;  %v10272_v34 = vld [vmem:[%s15618_s1 + $0x11d4] sm:$0xf0]  ;;  %v8588_v51 = vor.u32 %v10240_v40, %v8587_v39  ;;  %v8699_v58 = vld [vmem:[%s15618_s1 + $0x11a8] sm:$0xf] }
 0x202   :  { %5623 = vmatpush.bf16.msrb.mxu3 %v8156_v63  ;;  %v8428_v63 = vor.u32 %v10200_v53, %v8427_v52  ;;  %v8251_v52 = vld [vmem:[%s15618_s1 + $0xe28] sm:$0xf]  ;;  %v10156_v53 = vld [vmem:[%s15618_s1 + $0xe34] sm:$0xf0] }
 0x203   :  { %5633 = vmatpush.bf16.msra.mxu0 %v8332_v32  ;;  %v10164_v32 = vld [vmem:[%s15618_s1 + $0xe74] sm:$0xf0]  ;;  %v8252_v61 = vor.u32 %v10156_v53, %v8251_v52  ;;  %v8235_v62 = vld [vmem:[%s15618_s1 + $0xe08] sm:$0xf] }
 0x204   :  { %5646 = vmatpush.bf16.msra.mxu1 %v8460_v27  ;;  %v8731_v27 = vld [vmem:[%s15618_s1 + $0x11e8] sm:$0xf]  ;;  %v8284_v30 = vor.u32 %v10164_v32, %v8283_v3  ;;  %v10236_v57 = vld [vmem:[%s15618_s1 + $0x10b4] sm:$0xf0] }
 0x205   :  { %5611 = vmatpush.bf16.msrb.mxu2 %v8012_v37  ;;  %v8395_v37 = vld [vmem:[%s15618_s1 + $0xf48] sm:$0xf]  ;;  %v5383_v41 = vpop.f32.mrf.mxu0  ;;  %v10268_v59 = vld [vmem:[%s15618_s1 + $0x11b4] sm:$0xf0] }
 0x206   :  { %5624 = vmatpush.bf16.msrb.mxu3 %v8140_v44  ;;  %v8732_v44 = vor.u32 %v10276_v28, %v8731_v27  ;;  %v10152_v32 = vld [vmem:[%s15618_s1 + $0xe14] sm:$0xf0]  ;;  %v8363_v8 = vld [vmem:[%s15618_s1 + $0xf08] sm:$0xf]  ;;  %v8700_v11 = vor.u32 %v10268_v59, %v8699_v58 }
 0x207   :  { %5634 = vmatpush.bf16.msra.mxu0 %v8316_v38  ;;  %v10192_v38 = vld [vmem:[%s15618_s1 + $0xf54] sm:$0xf0]  ;;  %v8555_v24 = vld [vmem:[%s15618_s1 + $0x1088] sm:$0xf]  ;;  %v8236_v31 = vor.u32 %v10152_v32, %v8235_v62 }
 0x208   :  { %5647 = vmatpush.bf16.msra.mxu1 %v8444_v42  ;;  %v8715_v42 = vld [vmem:[%s15618_s1 + $0x11c8] sm:$0xf]  ;;  %v8396_v50 = vor.u32 %v10192_v38, %v8395_v37  ;;  %v10184_v10 = vld [vmem:[%s15618_s1 + $0xf14] sm:$0xf0] }
 0x209   :  { %5612 = vmatpush.bf16.msrb.mxu2 %v7996_v43  ;;  %v8379_v43 = vld [vmem:[%s15618_s1 + $0xf28] sm:$0xf]  ;;  %v8716_v54 = vor.u32 %v10272_v34, %v8715_v42  ;;  %v10340_v37 = vld [vmem:[%s15618_s1 + $0x13f4] sm:$0xf0] }
 0x20a   :  { %5625 = vmatpush.bf16.msrb.mxu3 %v8124_v55  ;;  %v10188_v55 = vld [vmem:[%s15618_s1 + $0xf34] sm:$0xf0]  ;;  %v8683_v27 = vld [vmem:[%s15618_s1 + $0x1188] sm:$0xf] }
 0x20b   :  { %5635 = vmatpush.bf16.msra.mxu0 %v8300_v56  ;;  %v8571_v56 = vld [vmem:[%s15618_s1 + $0x10a8] sm:$0xf]  ;;  %v10228_v41 = vld [vmem:[%s15618_s1 + $0x1074] sm:$0xf0] }
 0x20c   :  { %5648 = vmatpush.bf16.msra.mxu1 %v8428_v63  ;;  %v8380_v63 = vor.u32 %v10188_v55, %v8379_v43  ;;  %v8572_v3 = vor.u32 %v10236_v57, %v8571_v56  ;;  %v5394_v28 = vpop.f32.mrf.mxu1  ;;  %v8987_v35 = vld [vmem:[%s15618_s1 + $0x13e8] sm:$0xf]  ;;  %v10336_v53 = vld [vmem:[%s15618_s1 + $0x13d4] sm:$0xf0] }
 0x20d   :  { %5613 = vmatpush.bf16.msrb.mxu2 %v7980_v25  ;;  %v10232_v25 = vld [vmem:[%s15618_s1 + $0x1094] sm:$0xf0]  ;;  %v8667_v42 = vld [vmem:[%s15618_s1 + $0x1168] sm:$0xf]  ;;  %v8988_v34 = vor.u32 %v10340_v37, %v8987_v35 }
 0x20e   :  { %5626 = vmatpush.bf16.msrb.mxu3 %v8108_v29  ;;  %v10264_v29 = vld [vmem:[%s15618_s1 + $0x1194] sm:$0xf0]  ;;  %v8556_v38 = vor.u32 %v10232_v25, %v8555_v24  ;;  %v8971_v52 = vld [vmem:[%s15618_s1 + $0x13c8] sm:$0xf] }
 0x20f   :  { %5636 = vmatpush.bf16.msra.mxu0 %v8284_v30  ;;  %v8859_v30 = vld [vmem:[%s15618_s1 + $0x12e8] sm:$0xf]  ;;  %v8684_v39 = vor.u32 %v10264_v29, %v8683_v27  ;;  %v10224_v59 = vld [vmem:[%s15618_s1 + $0x1054] sm:$0xf0] }
 0x210   :  { %5649 = vmatpush.bf16.msra.mxu1 %v8412_v23  ;;  %5614 = vmatmul.bf16.vlgmr.msrb.gmra.mxu2 %v11404_v46  ;;  %v10308_v23 = vld [vmem:[%s15618_s1 + $0x12f4] sm:$0xf0]  ;;  %v8523_v58 = vld [vmem:[%s15618_s1 + $0x1048] sm:$0xf] }
 0x211   :  { %5658 = vmatpush.bf16.msra.mxu2 %v8604_v33  ;;  %5627 = vmatmul.bf16.vlgmr.msrb.gmra.mxu3 %v11408_v48  ;;  %v5395_v33 = vadd.f32 %v5394_v28, %v13799_v36  ;;  %v8860_v40 = vor.u32 %v10308_v23, %v8859_v30  ;;  %v8539_v36 = vld [vmem:[%s15618_s1 + $0x1068] sm:$0xf]  ;;  %v10256_v32 = vld [vmem:[%s15618_s1 + $0x1154] sm:$0xf0]  ;;  %v8524_v27 = vor.u32 %v10224_v59, %v8523_v58 }
 0x212   :  { %5671 = vmatpush.bf16.msra.mxu3 %v8732_v44  ;;  %v8364_v44 = vor.u32 %v10184_v10, %v8363_v8  ;;  %v8540_v43 = vor.u32 %v10228_v41, %v8539_v36  ;;  %v8827_v8 = vld [vmem:[%s15618_s1 + $0x12a8] sm:$0xf]  ;;  %v10300_v10 = vld [vmem:[%s15618_s1 + $0x12b4] sm:$0xf0] }
 0x213   :  { %5637 = vmatpush.bf16.msra.mxu0 %v8268_v45  ;;  %v10260_v45 = vld [vmem:[%s15618_s1 + $0x1174] sm:$0xf0]  ;;  %v5407_v55 = vpop.f32.mrf.mxu2  ;;  %v8828_v29 = vor.u32 %v10300_v10, %v8827_v8  ;;  %v8507_v30 = vld [vmem:[%s15618_s1 + $0x1028] sm:$0xf] }
 0x214   :  { %5650 = vmatpush.bf16.msra.mxu1 %v8396_v50  ;;  %v8843_v50 = vld [vmem:[%s15618_s1 + $0x12c8] sm:$0xf]  ;;  %v5420_v57 = vpop.f32.mrf.mxu3  ;;  %v5408_v62 = vadd.f32 %v5407_v55, %v5395_v33  ;;  %v10332_v24 = vld [vmem:[%s15618_s1 + $0x13b4] sm:$0xf0] }
 0x215   :  { %5659 = vmatpush.bf16.msra.mxu2 %v8588_v51  ;;  %v10304_v51 = vld [vmem:[%s15618_s1 + $0x12d4] sm:$0xf0]  ;;  %v8635_v33 = vld [vmem:[%s15618_s1 + $0x1128] sm:$0xf] }
 0x216   :  { %5672 = vmatpush.bf16.msra.mxu3 %v8716_v54  ;;  %v8668_v54 = vor.u32 %v10260_v45, %v8667_v42  ;;  %v8844_v56 = vor.u32 %v10304_v51, %v8843_v50  ;;  %v5421_v25 = vadd.f32 %v5420_v57, %v5408_v62  ;;  %v10220_v23 = vld [vmem:[%s15618_s1 + $0x1034] sm:$0xf0]  ;;  %v8811_v37 = vld [vmem:[%s15618_s1 + $0x1288] sm:$0xf] }
 0x217   :  { %5638 = vmatpush.bf16.msra.mxu0 %v8252_v61  ;;  %v8651_v61 = vld [vmem:[%s15618_s1 + $0x1148] sm:$0xf]  ;;  %v10252_v35 = vld [vmem:[%s15618_s1 + $0x1134] sm:$0xf0]  ;;  %v8508_v41 = vor.u32 %v10220_v23, %v8507_v30 }
 0x218   :  { %5651 = vmatpush.bf16.msra.mxu1 %v8380_v63  ;;  %v8972_v63 = vor.u32 %v10336_v53, %v8971_v52  ;;  %v8652_v28 = vor.u32 %v10256_v32, %v8651_v61  ;;  %v8491_v42 = vld [vmem:[%s15618_s1 + $0x1008] sm:$0xf]  ;;  %v10216_v50 = vld [vmem:[%s15618_s1 + $0x1014] sm:$0xf0] }
 0x219   :  { %5660 = vmatpush.bf16.msra.mxu2 %v8572_v3  ;;  %v5396_v3 = vpop.f32.mrf.mxu1  ;;  %v8619_v51 = vld [vmem:[%s15618_s1 + $0x1108] sm:$0xf]  ;;  %v10248_v52 = vld [vmem:[%s15618_s1 + $0x1114] sm:$0xf0] }
 0x21a   :  { %5673 = vmatpush.bf16.msra.mxu3 %v8700_v11  ;;  %v8955_v11 = vld [vmem:[%s15618_s1 + $0x13a8] sm:$0xf]  ;;  %v10324_v58 = vld [vmem:[%s15618_s1 + $0x1374] sm:$0xf0]  ;;  %v8620_v10 = vor.u32 %v10248_v52, %v8619_v51 }
 0x21b   :  { %5639 = vmatpush.bf16.msra.mxu0 %v8236_v31  ;;  %v8956_v31 = vor.u32 %v10332_v24, %v8955_v11  ;;  %v8795_v55 = vld [vmem:[%s15618_s1 + $0x1268] sm:$0xf]  ;;  %v10372_v61 = vld [vmem:[%s15618_s1 + $0x14f4] sm:$0xf0] }
 0x21c   :  { %5652 = vmatpush.bf16.msra.mxu1 %v8364_v44  ;;  %v10296_v44 = vld [vmem:[%s15618_s1 + $0x1294] sm:$0xf0]  ;;  %v5422_v53 = vpop.f32.mrf.mxu3  ;;  %v8923_v57 = vld [vmem:[%s15618_s1 + $0x1368] sm:$0xf] }
 0x21d   :  { %5661 = vmatpush.bf16.msra.mxu2 %v8556_v38  ;;  %v5433_v38 = vpop.f32.mrf.mxu0  ;;  %v8812_v45 = vor.u32 %v10296_v44, %v8811_v37  ;;  %v9115_v59 = vld [vmem:[%s15618_s1 + $0x14e8] sm:$0xf]  ;;  %v10404_v32 = vld [vmem:[%s15618_s1 + $0x15f4] sm:$0xf0]  ;;  %v8924_v24 = vor.u32 %v10324_v58, %v8923_v57 }
 0x21e   :  { %5674 = vmatpush.bf16.msra.mxu3 %v8684_v39  ;;  %5640 = vmatmul.bf16.vlgmr.msra.gmra.mxu0 %v11406_v47  ;;  %v8939_v39 = vld [vmem:[%s15618_s1 + $0x1388] sm:$0xf]  ;;  %v5434_v36 = vadd.f32 %v5433_v38, %v5421_v25  ;;  %v9116_v25 = vor.u32 %v10372_v61, %v9115_v59  ;;  %v10320_v23 = vld [vmem:[%s15618_s1 + $0x1354] sm:$0xf0] }
 0x21f   :  { %5684 = vmatpush.bf16.msrb.mxu0 %v8860_v40  ;;  %5653 = vmatmul.bf16.vlgmr.msra.gmra.mxu1 %v11410_v49  ;;  %v10328_v40 = vld [vmem:[%s15618_s1 + $0x1394] sm:$0xf0]  ;;  %v9243_v3 = vld [vmem:[%s15618_s1 + $0x15e8] sm:$0xf] }
 0x220   :  { %5697 = vmatpush.bf16.msrb.mxu1 %v8988_v34  ;;  %v8636_v34 = vor.u32 %v10252_v35, %v8635_v33  ;;  %v9244_v30 = vor.u32 %v10404_v32, %v9243_v3  ;;  %v9099_v33 = vld [vmem:[%s15618_s1 + $0x14c8] sm:$0xf]  ;;  %v10400_v44 = vld [vmem:[%s15618_s1 + $0x15d4] sm:$0xf0] }
 0x221   :  { %5662 = vmatpush.bf16.msra.mxu2 %v8540_v43  ;;  %v5409_v43 = vpop.f32.mrf.mxu2  ;;  %v5446_v62 = vpop.f32.mrf.mxu1  ;;  %v9227_v37 = vld [vmem:[%s15618_s1 + $0x15c8] sm:$0xf]  ;;  %v10364_v51 = vld [vmem:[%s15618_s1 + $0x14b4] sm:$0xf0] }
 0x222   :  { %5675 = vmatpush.bf16.msra.mxu3 %v8668_v54  ;;  %v8940_v54 = vor.u32 %v10328_v40, %v8939_v39  ;;  %v14034_v8 = vadd.f32 %v5446_v62, %v5434_v36  ;;  %v8763_v36 = vld [vmem:[%s15618_s1 + $0x1228] sm:$0xf]  ;;  %v10396_v53 = vld [vmem:[%s15618_s1 + $0x15b4] sm:$0xf0] }
 0x223   :  { %5685 = vmatpush.bf16.msrb.mxu0 %v8844_v56  ;;  %v10292_v56 = vld [vmem:[%s15618_s1 + $0x1274] sm:$0xf0]  ;;  %v9211_v52 = vld [vmem:[%s15618_s1 + $0x15a8] sm:$0xf] }
 0x224   :  { %5698 = vmatpush.bf16.msrb.mxu1 %v8972_v63  ;;  %v8492_v63 = vor.u32 %v10216_v50, %v8491_v42  ;;  %v8796_v11 = vor.u32 %v10292_v56, %v8795_v55  ;;  %v8891_v42 = vld [vmem:[%s15618_s1 + $0x1328] sm:$0xf]  ;;  %v10280_v58 = vld [vmem:[%s15618_s1 + $0x1214] sm:$0xf0]  ;;  %v9212_v62 = vor.u32 %v10396_v53, %v9211_v52 }
 0x225   :  { %5663 = vmatpush.bf16.msra.mxu2 %v8524_v27  ;;  %v8779_v27 = vld [vmem:[%s15618_s1 + $0x1248] sm:$0xf]  ;;  %v5435_v35 = vpop.f32.mrf.mxu0  ;;  %v10312_v61 = vld [vmem:[%s15618_s1 + $0x1314] sm:$0xf0] }
 0x226   :  { %5676 = vmatpush.bf16.msra.mxu3 %v8652_v28  ;;  %v10288_v28 = vld [vmem:[%s15618_s1 + $0x1254] sm:$0xf0]  ;;  %v9083_v50 = vld [vmem:[%s15618_s1 + $0x14a8] sm:$0xf] }
 0x227   :  { %5686 = vmatpush.bf16.msrb.mxu0 %v8828_v29  ;;  %v8907_v29 = vld [vmem:[%s15618_s1 + $0x1348] sm:$0xf]  ;;  %v8780_v38 = vor.u32 %v10288_v28, %v8779_v27  ;;  %v9084_v57 = vor.u32 %v10364_v51, %v9083_v50  ;;  %v10360_v3 = vld [vmem:[%s15618_s1 + $0x1494] sm:$0xf0] }
 0x228   :  { %5699 = vmatpush.bf16.msrb.mxu1 %v8956_v31  ;;  %v10368_v31 = vld [vmem:[%s15618_s1 + $0x14d4] sm:$0xf0]  ;;  %v8908_v39 = vor.u32 %v10320_v23, %v8907_v29  ;;  %v8747_v55 = vld [vmem:[%s15618_s1 + $0x1208] sm:$0xf] }
 0x229   :  { %5664 = vmatpush.bf16.msra.mxu2 %v8508_v41  ;;  %v9100_v40 = vor.u32 %v10368_v31, %v9099_v33  ;;  %v10284_v41 = vld [vmem:[%s15618_s1 + $0x1234] sm:$0xf0]  ;;  %v5448_v43 = vpop.f32.mrf.mxu1  ;;  %v8875_v59 = vld [vmem:[%s15618_s1 + $0x1308] sm:$0xf] }
 0x22a   :  { %5677 = vmatpush.bf16.msra.mxu3 %v8636_v34  ;;  %v9228_v34 = vor.u32 %v10400_v44, %v9227_v37  ;;  %v9195_v32 = vld [vmem:[%s15618_s1 + $0x1588] sm:$0xf]  ;;  %v10468_v28 = vld [vmem:[%s15618_s1 + $0x17f4] sm:$0xf0]  ;;  %v8876_v29 = vor.u32 %v10312_v61, %v8875_v59  ;;  %v10521_v44 = vld [vmem:[%s15619_s2] sm:$0xf] }
 0x22b   :  { %5687 = vmatpush.bf16.msrb.mxu0 %v8812_v45  ;;  %v10316_v45 = vld [vmem:[%s15618_s1 + $0x1334] sm:$0xf0]  ;;  %v9499_v27 = vld [vmem:[%s15618_s1 + $0x17e8] sm:$0xf] }
 0x22c   :  { %5700 = vmatpush.bf16.msrb.mxu1 %v8940_v54  ;;  %v8764_v54 = vor.u32 %v10284_v41, %v8763_v36  ;;  %v8892_v56 = vor.u32 %v10316_v45, %v8891_v42  ;;  %v9051_v23 = vld [vmem:[%s15618_s1 + $0x1468] sm:$0xf]  ;;  %v10356_v35 = vld [vmem:[%s15618_s1 + $0x1474] sm:$0xf0] }
 0x22d   :  { %5665 = vmatpush.bf16.msra.mxu2 %v8492_v63  ;;  %v9067_v63 = vld [vmem:[%s15618_s1 + $0x1488] sm:$0xf]  ;;  %v10432_v41 = vld [vmem:[%s15618_s1 + $0x16d4] sm:$0xf0]  ;;  %v9052_v45 = vor.u32 %v10356_v35, %v9051_v23 }
 0x22e   :  { %5678 = vmatpush.bf16.msra.mxu3 %v8620_v10  ;;  %v10392_v10 = vld [vmem:[%s15618_s1 + $0x1594] sm:$0xf0]  ;;  %v9179_v37 = vld [vmem:[%s15618_s1 + $0x1568] sm:$0xf] }
 0x22f   :  { %5688 = vmatpush.bf16.msrb.mxu0 %v8796_v11  ;;  %v9371_v11 = vld [vmem:[%s15618_s1 + $0x16e8] sm:$0xf]  ;;  %v9196_v33 = vor.u32 %v10392_v10, %v9195_v32  ;;  %v10352_v43 = vld [vmem:[%s15618_s1 + $0x1454] sm:$0xf0] }
 0x230   :  { %5701 = vmatpush.bf16.msrb.mxu1 %v8924_v24  ;;  %5666 = vmatmul.bf16.vlgmr.msra.gmra.mxu2 %v11641_v9  ;;  %v10436_v24 = vld [vmem:[%s15618_s1 + $0x16f4] sm:$0xf0]  ;;  %v9355_v36 = vld [vmem:[%s15618_s1 + $0x16c8] sm:$0xf] }
 0x231   :  { %5710 = vmatpush.bf16.msrb.mxu2 %v9116_v25  ;;  %5679 = vmatmul.bf16.vlgmr.msra.gmra.mxu3 %v11651_v14  ;;  %v8748_v25 = vor.u32 %v10280_v58, %v8747_v55  ;;  %v9372_v31 = vor.u32 %v10436_v24, %v9371_v11  ;;  %v9483_v42 = vld [vmem:[%s15618_s1 + $0x17c8] sm:$0xf]  ;;  %v9356_v52 = vor.u32 %v10432_v41, %v9355_v36  ;;  %v10384_v58 = vld [vmem:[%s15618_s1 + $0x1554] sm:$0xf0] }
 0x232   :  { %5723 = vmatpush.bf16.msrb.mxu3 %v9244_v30  ;;  %v9068_v30 = vor.u32 %v10360_v3, %v9067_v63  ;;  %v9035_v53 = vld [vmem:[%s15618_s1 + $0x1448] sm:$0xf]  ;;  %v10428_v61 = vld [vmem:[%s15618_s1 + $0x16b4] sm:$0xf0] }
 0x233   :  { %5689 = vmatpush.bf16.msrb.mxu0 %v8780_v38  ;;  %v814_v38 = vperm.slane %v10521_v44, 2  ;;  %v5459_v50 = vpop.f32.mrf.mxu2  ;;  %v9339_v59 = vld [vmem:[%s15618_s1 + $0x16a8] sm:$0xf]  ;;  %v10460_v63 = vld [vmem:[%s15618_s1 + $0x17b4] sm:$0xf0]  ;;  %v9036_v32 = vor.u32 %v10352_v43, %v9035_v53 }
 0x234   :  { %5702 = vmatpush.bf16.msrb.mxu1 %v8908_v39  ;;  %v9500_v39 = vor.u32 %v10468_v28, %v9499_v27  ;;  %v9340_v11 = vor.u32 %v10428_v61, %v9339_v59  ;;  %v9019_v24 = vld [vmem:[%s15618_s1 + $0x1428] sm:$0xf]  ;;  %v10424_v23 = vld [vmem:[%s15618_s1 + $0x1694] sm:$0xf0]  ;;  %v9730_v59 = vld [vmem:[%s15618_s1 + $0xec] sm:$0xf] }
 0x235   :  { %5711 = vmatpush.bf16.msrb.mxu2 %v9100_v40  ;;  %v10388_v40 = vld [vmem:[%s15618_s1 + $0x1574] sm:$0xf0]  ;;  %v5460_v55 = vadd.f32 %v5459_v50, %v814_v38  ;;  %v9147_v27 = vld [vmem:[%s15618_s1 + $0x1528] sm:$0xf]  ;;  %v6557_v61 = vld [vmem:[%s15618_s1 + $0xf8] sm:$0xf0] }
 0x236   :  { %5724 = vmatpush.bf16.msrb.mxu3 %v9228_v34  ;;  %v10464_v34 = vld [vmem:[%s15618_s1 + $0x17d4] sm:$0xf0]  ;;  %v9180_v51 = vor.u32 %v10388_v40, %v9179_v37  ;;  %v9003_v44 = vld [vmem:[%s15618_s1 + $0x1408] sm:$0xf] }
 0x237   :  { %5690 = vmatpush.bf16.msrb.mxu0 %v8764_v54  ;;  %v9163_v54 = vld [vmem:[%s15618_s1 + $0x1548] sm:$0xf]  ;;  %v10420_v53 = vld [vmem:[%s15618_s1 + $0x1674] sm:$0xf0] }
 0x238   :  { %5703 = vmatpush.bf16.msrb.mxu1 %v8892_v56  ;;  %v5472_v56 = vpop.f32.mrf.mxu3  ;;  %v9164_v10 = vor.u32 %v10384_v58, %v9163_v54  ;;  %v9435_v43 = vld [vmem:[%s15618_s1 + $0x1768] sm:$0xf] }
 0x239   :  { %5712 = vmatpush.bf16.msrb.mxu2 %v9084_v57  ;;  %v9484_v57 = vor.u32 %v10464_v34, %v9483_v42  ;;  %v5473_v3 = vadd.f32 %v5472_v56, %v5460_v55  ;;  %v10344_v42 = vld [vmem:[%s15618_s1 + $0x1414] sm:$0xf0]  ;;  %v9131_v34 = vld [vmem:[%s15618_s1 + $0x1508] sm:$0xf] }
 0x23a   :  { %5725 = vmatpush.bf16.msrb.mxu3 %v9212_v62  ;;  %v9467_v62 = vld [vmem:[%s15618_s1 + $0x17a8] sm:$0xf]  ;;  %v10452_v55 = vld [vmem:[%s15618_s1 + $0x1774] sm:$0xf0]  ;;  %v9004_v58 = vor.u32 %v10344_v42, %v9003_v44 }
 0x23b   :  { %5691 = vmatpush.bf16.msrb.mxu0 %v8748_v25  ;;  %v10348_v25 = vld [vmem:[%s15618_s1 + $0x1434] sm:$0xf0]  ;;  %v9468_v28 = vor.u32 %v10460_v63, %v9467_v62  ;;  %v5485_v35 = vpop.f32.mrf.mxu0  ;;  %v5461_v40 = vpop.f32.mrf.mxu2  ;;  %v9563_v56 = vld [vmem:[%s15618_s1 + $0x1868] sm:$0xf] }
 0x23c   :  { %5704 = vmatpush.bf16.msrb.mxu1 %v8876_v29  ;;  %v10380_v29 = vld [vmem:[%s15618_s1 + $0x1534] sm:$0xf0]  ;;  %v9020_v37 = vor.u32 %v10348_v25, %v9019_v24  ;;  %v5486_v38 = vadd.f32 %v5485_v35, %v5473_v3  ;;  %v9436_v3 = vor.u32 %v10452_v55, %v9435_v43  ;;  %v9419_v24 = vld [vmem:[%s15618_s1 + $0x1748] sm:$0xf]  ;;  %v6560_v25 = vor.u32 %v9730_v59, %v6557_v61 }
 0x23d   :  { %5713 = vmatpush.bf16.msrb.mxu2 %v9068_v30  ;;  %v9323_v30 = vld [vmem:[%s15618_s1 + $0x1688] sm:$0xf]  ;;  %v9148_v36 = vor.u32 %v10380_v29, %v9147_v27  ;;  %v10448_v27 = vld [vmem:[%s15618_s1 + $0x1754] sm:$0xf0] }
 0x23e   :  { %5726 = vmatpush.bf16.msrb.mxu3 %v9196_v33  ;;  %5692 = vmatmul.bf16.vlgmr.msrb.gmra.mxu0 %v11649_v13  ;;  %v9451_v33 = vld [vmem:[%s15618_s1 + $0x1788] sm:$0xf]  ;;  %v9324_v41 = vor.u32 %v10424_v23, %v9323_v30  ;;  %v10480_v29 = vld [vmem:[%s15618_s1 + $0x1854] sm:$0xf0]  ;;  %v9726_v23 = vld [vmem:[%s15618_s1 + $0xcc] sm:$0xf] }
 0x23f   :  { %5736 = vmatpush.bf16.msra.mxu0 %v9372_v31  ;;  %5705 = vmatmul.bf16.vlgmr.msrb.gmra.mxu1 %v11653_v18  ;;  %v10456_v31 = vld [vmem:[%s15618_s1 + $0x1794] sm:$0xf0]  ;;  %v9403_v40 = vld [vmem:[%s15618_s1 + $0x1728] sm:$0xf] }
 0x240   :  { %5749 = vmatpush.bf16.msra.mxu1 %v9500_v39  ;;  %v5498_v39 = vpop.f32.mrf.mxu1  ;;  %v5474_v50 = vpop.f32.mrf.mxu3  ;;  %v9531_v42 = vld [vmem:[%s15618_s1 + $0x1828] sm:$0xf]  ;;  %v10472_v61 = vld [vmem:[%s15618_s1 + $0x1814] sm:$0xf0] }
 0x241   :  { %5714 = vmatpush.bf16.msrb.mxu2 %v9052_v45  ;;  %v10376_v45 = vld [vmem:[%s15618_s1 + $0x1514] sm:$0xf0]  ;;  %v14220_v54 = vadd.f32 %v5498_v39, %v5486_v38  ;;  %v9275_v38 = vld [vmem:[%s15618_s1 + $0x1628] sm:$0xf]  ;;  %v6525_v50 = vld [vmem:[%s15618_s1 + $0xb8] sm:$0xf0] }
 0x242   :  { %5727 = vmatpush.bf16.msrb.mxu3 %v9180_v51  ;;  %v9452_v51 = vor.u32 %v10456_v31, %v9451_v33  ;;  %v9132_v62 = vor.u32 %v10376_v45, %v9131_v34  ;;  %v6541_v33 = vld [vmem:[%s15618_s1 + $0xd8] sm:$0xf0]  ;;  %v10412_v39 = vld [vmem:[%s15618_s1 + $0x1634] sm:$0xf0]  ;;  %v9722_v45 = vld [vmem:[%s15618_s1 + $0xac] sm:$0xf] }
 0x243   :  { %5737 = vmatpush.bf16.msra.mxu0 %v9356_v52  ;;  %v9307_v52 = vld [vmem:[%s15618_s1 + $0x1668] sm:$0xf]  ;;  %v5487_v30 = vpop.f32.mrf.mxu0  ;;  %v10476_v34 = vld [vmem:[%s15618_s1 + $0x1834] sm:$0xf0]  ;;  %v6528_v59 = vor.u32 %v9722_v45, %v6525_v50  ;;  %v9710_v50 = vld [vmem:[%s15618_s1 + $0x4c] sm:$0xf] }
 0x244   :  { %5750 = vmatpush.bf16.msra.mxu1 %v9484_v57  ;;  %v10484_v57 = vld [vmem:[%s15618_s1 + $0x1874] sm:$0xf0]  ;;  %v9308_v63 = vor.u32 %v10420_v53, %v9307_v52  ;;  %v9259_v52 = vld [vmem:[%s15618_s1 + $0x1608] sm:$0xf]  ;;  %v9532_v55 = vor.u32 %v10476_v34, %v9531_v42 }
 0x245   :  { %5715 = vmatpush.bf16.msrb.mxu2 %v9036_v32  ;;  %v9564_v32 = vor.u32 %v10484_v57, %v9563_v56  ;;  %v10408_v53 = vld [vmem:[%s15618_s1 + $0x1614] sm:$0xf0]  ;;  %v9387_v56 = vld [vmem:[%s15618_s1 + $0x1708] sm:$0xf] }
 0x246   :  { %5728 = vmatpush.bf16.msrb.mxu3 %v9164_v10  ;;  %v9291_v10 = vld [vmem:[%s15618_s1 + $0x1648] sm:$0xf]  ;;  %v10440_v57 = vld [vmem:[%s15618_s1 + $0x1714] sm:$0xf0] }
 0x247   :  { %5738 = vmatpush.bf16.msra.mxu0 %v9340_v11  ;;  %v10416_v11 = vld [vmem:[%s15618_s1 + $0x1654] sm:$0xf0] }
 0x248   :  { %5751 = vmatpush.bf16.msra.mxu1 %v9468_v28  ;;  %v9547_v28 = vld [vmem:[%s15618_s1 + $0x1848] sm:$0xf]  ;;  %v5500_v31 = vpop.f32.mrf.mxu1  ;;  %v9292_v35 = vor.u32 %v10416_v11, %v9291_v10  ;;  %v9794_v10 = vld [vmem:[%s15618_s1 + $0x2ec] sm:$0xf]  ;;  %v9260_v11 = vor.u32 %v10408_v53, %v9259_v52 }
 0x249   :  { %5716 = vmatpush.bf16.msrb.mxu2 %v9020_v37  ;;  %v9420_v37 = vor.u32 %v10448_v27, %v9419_v24  ;;  %v9548_v44 = vor.u32 %v10480_v29, %v9547_v28  ;;  %v6813_v24 = vld [vmem:[%s15618_s1 + $0x2f8] sm:$0xf0]  ;;  %v9388_v28 = vor.u32 %v10440_v57, %v9387_v56  ;;  %v9754_v56 = vld [vmem:[%s15618_s1 + $0x1ac] sm:$0xf] }
 0x24a   :  { %5729 = vmatpush.bf16.msrb.mxu3 %v9148_v36  ;;  %v6544_v36 = vor.u32 %v9726_v23, %v6541_v33  ;;  %v6941_v27 = vld [vmem:[%s15618_s1 + $0x3f8] sm:$0xf0]  ;;  %v9714_v33 = vld [vmem:[%s15618_s1 + $0x6c] sm:$0xf] }
 0x24b   :  { %5739 = vmatpush.bf16.msra.mxu0 %v9324_v41  ;;  %v10444_v41 = vld [vmem:[%s15618_s1 + $0x1734] sm:$0xf0]  ;;  %v6493_v31 = vld [vmem:[%s15618_s1 + $0x78] sm:$0xf0] }
 0x24c   :  { %5752 = vmatpush.bf16.msra.mxu1 %v9452_v51  ;;  %v9276_v51 = vor.u32 %v10412_v39, %v9275_v38  ;;  %v9404_v43 = vor.u32 %v10444_v41, %v9403_v40  ;;  %v6669_v38 = vld [vmem:[%s15618_s1 + $0x1d8] sm:$0xf0]  ;;  %v9790_v39 = vld [vmem:[%s15618_s1 + $0x2cc] sm:$0xf]  ;;  %v6496_v34 = vor.u32 %v9714_v33, %v6493_v31 }
 0x24d   :  { %5717 = vmatpush.bf16.msrb.mxu2 %v9004_v58  ;;  %v9515_v58 = vld [vmem:[%s15618_s1 + $0x1808] sm:$0xf]  ;;  %v6797_v40 = vld [vmem:[%s15618_s1 + $0x2d8] sm:$0xf0]  ;;  %v9814_v33 = vld [vmem:[%s15618_s1 + $0x38c] sm:$0xf] }
 0x24e   :  { %5730 = vmatpush.bf16.msrb.mxu3 %v9132_v62  ;;  %v9718_v62 = vld [vmem:[%s15618_s1 + $0x8c] sm:$0xf]  ;;  %v9516_v29 = vor.u32 %v10472_v61, %v9515_v58  ;;  %v6925_v41 = vld [vmem:[%s15618_s1 + $0x3d8] sm:$0xf0] }
 0x24f   :  { %5740 = vmatpush.bf16.msra.mxu0 %v9308_v63  ;;  %v6509_v63 = vld [vmem:[%s15618_s1 + $0x98] sm:$0xf0]  ;;  %v9786_v58 = vld [vmem:[%s15618_s1 + $0x2ac] sm:$0xf] }
 0x250   :  { %5753 = vmatpush.bf16.msra.mxu1 %v9436_v3  ;;  %5718 = vmatmul.bf16.vlgmr.msrb.gmra.mxu2 %v11734_v4  ;;  %v9762_v3 = vld [vmem:[%s15618_s1 + $0x1ec] sm:$0xf]  ;;  %v6512_v30 = vor.u32 %v9718_v62, %v6509_v63  ;;  %v6653_v57 = vld [vmem:[%s15618_s1 + $0x1b8] sm:$0xf0] }
 0x251   :  { %5766 = vmatpush.bf16.msra.mxu2 %v9564_v32  ;;  %5731 = vmatmul.bf16.vlgmr.msrb.gmra.mxu3 %v11738_v6  ;;  %v6685_v32 = vld [vmem:[%s15618_s1 + $0x1f8] sm:$0xf0] }
 0x252   :  { %5775 = vmatpush.bf16.msra.mxu3 %v6560_v25  ;;  %v9826_v25 = vld [vmem:[%s15618_s1 + $0x3ec] sm:$0xf]  ;;  %v6688_v23 = vor.u32 %v9762_v3, %v6685_v32  ;;  %v6909_v61 = vld [vmem:[%s15618_s1 + $0x3b8] sm:$0xf0]  ;;  %v6656_v3 = vor.u32 %v9754_v56, %v6653_v57 }
 0x253   :  { %5741 = vmatpush.bf16.msra.mxu0 %v9292_v35  ;;  %v6816_v35 = vor.u32 %v9794_v10, %v6813_v24  ;;  %v5511_v42 = vpop.f32.mrf.mxu2  ;;  %v9706_v32 = vld [vmem:[%s15618_s1 + $0x2c] sm:$0xf]  ;;  %v6461_v10 = vld [vmem:[%s15618_s1 + $0x38] sm:$0xf0] }
 0x254   :  { %5754 = vmatpush.bf16.msra.mxu1 %v9420_v37  ;;  %v6944_v37 = vor.u32 %v9826_v25, %v6941_v27  ;;  %v5512_v52 = vadd.f32 %v5511_v42, %v14220_v54  ;;  %v5524_v53 = vpop.f32.mrf.mxu3  ;;  %v6781_v54 = vld [vmem:[%s15618_s1 + $0x2b8] sm:$0xf0]  ;;  %v9750_v25 = vld [vmem:[%s15618_s1 + $0x18c] sm:$0xf] }
 0x255   :  { %5767 = vmatpush.bf16.msra.mxu2 %v9548_v44  ;;  %v9758_v44 = vld [vmem:[%s15618_s1 + $0x1cc] sm:$0xf]  ;;  %v6637_v27 = vld [vmem:[%s15618_s1 + $0x198] sm:$0xf0] }
 0x256   :  { %5776 = vmatpush.bf16.msra.mxu3 %v6544_v36  ;;  %v9822_v36 = vld [vmem:[%s15618_s1 + $0x3cc] sm:$0xf]  ;;  %v6672_v45 = vor.u32 %v9758_v44, %v6669_v38  ;;  %v5525_v62 = vadd.f32 %v5524_v53, %v5512_v52  ;;  %v6893_v31 = vld [vmem:[%s15618_s1 + $0x398] sm:$0xf0]  ;;  %v6464_v38 = vor.u32 %v9706_v32, %v6461_v10 }
 0x257   :  { %5742 = vmatpush.bf16.msra.mxu0 %v9276_v51  ;;  %v6477_v51 = vld [vmem:[%s15618_s1 + $0x58] sm:$0xf0]  ;;  %v9778_v52 = vld [vmem:[%s15618_s1 + $0x26c] sm:$0xf] }
 0x258   :  { %5755 = vmatpush.bf16.msra.mxu1 %v9404_v43  ;;  %v6800_v43 = vor.u32 %v9790_v39, %v6797_v40  ;;  %v6480_v63 = vor.u32 %v9710_v50, %v6477_v51  ;;  %v6640_v39 = vor.u32 %v9750_v25, %v6637_v27  ;;  %v9702_v40 = vld [vmem:[%s15618_s1 + $0xc] sm:$0xf]  ;;  %v6621_v51 = vld [vmem:[%s15618_s1 + $0x178] sm:$0xf0] }
 0x259   :  { %5768 = vmatpush.bf16.msra.mxu2 %v9532_v55  ;;  %v6928_v55 = vor.u32 %v9822_v36, %v6925_v41  ;;  %v6445_v36 = vld [vmem:[%s15618_s1 + $0x18] sm:$0xf0]  ;;  %v9746_v50 = vld [vmem:[%s15618_s1 + $0x16c] sm:$0xf] }
 0x25a   :  { %5777 = vmatpush.bf16.msra.mxu3 %v6528_v59  ;;  %v9818_v59 = vld [vmem:[%s15618_s1 + $0x3ac] sm:$0xf]  ;;  %v6749_v53 = vld [vmem:[%s15618_s1 + $0x278] sm:$0xf0] }
 0x25b   :  { %5743 = vmatpush.bf16.msra.mxu0 %v9260_v11  ;;  %v6784_v11 = vor.u32 %v9786_v58, %v6781_v54  ;;  %v6912_v24 = vor.u32 %v9818_v59, %v6909_v61  ;;  %v5513_v44 = vpop.f32.mrf.mxu2  ;;  %v9858_v56 = vld [vmem:[%s15618_s1 + $0x4ec] sm:$0xf]  ;;  %v7069_v57 = vld [vmem:[%s15618_s1 + $0x4f8] sm:$0xf0]  ;;  %v6448_v58 = vor.u32 %v9702_v40, %v6445_v36  ;;  %v6624_v54 = vor.u32 %v9746_v50, %v6621_v51 }
 0x25c   :  { %5756 = vmatpush.bf16.msra.mxu1 %v9388_v28  ;;  %v9782_v28 = vld [vmem:[%s15618_s1 + $0x28c] sm:$0xf]  ;;  %v5526_v41 = vpop.f32.mrf.mxu3  ;;  %v6752_v59 = vor.u32 %v9778_v52, %v6749_v53  ;;  %v7072_v32 = vor.u32 %v9858_v56, %v7069_v57  ;;  %v6733_v10 = vld [vmem:[%s15618_s1 + $0x258] sm:$0xf0] }
 0x25d   :  { %5769 = vmatpush.bf16.msra.mxu2 %v9516_v29  ;;  %v10522_v29 = vld [vmem:[#allocation1] sm:$0xff]  ;;  %v9854_v27 = vld [vmem:[%s15618_s1 + $0x4cc] sm:$0xf]  ;;  %v6845_v40 = vld [vmem:[%s15618_s1 + $0x338] sm:$0xf0] }
 0x25e   :  { %5778 = vmatpush.bf16.msra.mxu3 %v6512_v30  ;;  %5744 = vmatmul.bf16.vlgmr.msra.gmra.mxu0 %v11736_v5  ;;  %v5537_v30 = vpop.f32.mrf.mxu0  ;;  %v9850_v36 = vld [vmem:[%s15618_s1 + $0x4ac] sm:$0xf]  ;;  %v7037_v41 = vld [vmem:[%s15618_s1 + $0x4b8] sm:$0xf0] }
 0x25f   :  { %5788 = vmatpush.bf16.msrb.mxu0 %v6688_v23  ;;  %5757 = vmatmul.bf16.vlgmr.msra.gmra.mxu1 %v11740_v7  ;;  %v6765_v23 = vld [vmem:[%s15618_s1 + $0x298] sm:$0xf0]  ;;  %v9766_v53 = vld [vmem:[%s15618_s1 + $0x20c] sm:$0xf] }
 0x260   :  { %5801 = vmatpush.bf16.msrb.mxu1 %v6816_v35  ;;  %9571 = vmatmul.msk.bf16.vlgmr.msra.gmra.mxu2 %vm4797_vm0, %v10522_v29  ;;  %v5538_v35 = vadd.f32 %v5537_v30, %v5525_v62  ;;  %v6768_v42 = vor.u32 %v9782_v28, %v6765_v23  ;;  %v9742_v62 = vld [vmem:[%s15618_s1 + $0x14c] sm:$0xf]  ;;  %v7053_v28 = vld [vmem:[%s15618_s1 + $0x4d8] sm:$0xf0] }
 0x261   :  { %5814 = vmatpush.bf16.msrb.mxu2 %v6944_v37  ;;  %v5550_v37 = vpop.f32.mrf.mxu1  ;;  %v7056_v44 = vor.u32 %v9854_v27, %v7053_v28  ;;  %v6573_v50 = vld [vmem:[%s15618_s1 + $0x118] sm:$0xf0]  ;;  %v9846_v57 = vld [vmem:[%s15618_s1 + $0x48c] sm:$0xf] }
 0x262   :  { %5779 = vmatpush.bf16.msra.mxu3 %v6496_v34  ;;  %v6896_v34 = vor.u32 %v9814_v33, %v6893_v31  ;;  %v9738_v31 = vld [vmem:[%s15618_s1 + $0x12c] sm:$0xf]  ;;  %v6829_v56 = vld [vmem:[%s15618_s1 + $0x318] sm:$0xf0] }
 0x263   :  { %5789 = vmatpush.bf16.msrb.mxu0 %v6672_v45  ;;  %v14411_v45 = vadd.f32 %v5550_v37, %v5538_v35  ;;  %v6589_v35 = vld [vmem:[%s15618_s1 + $0x138] sm:$0xf0]  ;;  %v9770_v37 = vld [vmem:[%s15618_s1 + $0x22c] sm:$0xf] }
 0x264   :  { %5802 = vmatpush.bf16.msrb.mxu1 %v6800_v43  ;;  %v9810_v43 = vld [vmem:[%s15618_s1 + $0x36c] sm:$0xf]  ;;  %v7005_v28 = vld [vmem:[%s15618_s1 + $0x478] sm:$0xf0] }
 0x265   :  { %5815 = vmatpush.bf16.msrb.mxu2 %v6928_v55  ;;  %v6877_v55 = vld [vmem:[%s15618_s1 + $0x378] sm:$0xf0]  ;;  %v9842_v27 = vld [vmem:[%s15618_s1 + $0x46c] sm:$0xf] }
 0x266   :  { %5780 = vmatpush.bf16.msra.mxu3 %v6480_v63  ;;  %v6880_v61 = vor.u32 %v9810_v43, %v6877_v55  ;;  %v6605_v63 = vld [vmem:[%s15618_s1 + $0x158] sm:$0xf0]  ;;  %v5539_v25 = vpop.f32.mrf.mxu0  ;;  %v9798_v43 = vld [vmem:[%s15618_s1 + $0x30c] sm:$0xf]  ;;  %v7040_v55 = vor.u32 %v9850_v36, %v7037_v41 }
 0x267   :  { %5790 = vmatpush.bf16.msrb.mxu0 %v6656_v3  ;;  %v9774_v3 = vld [vmem:[%s15618_s1 + $0x24c] sm:$0xf]  ;;  %v6608_v30 = vor.u32 %v9742_v62, %v6605_v63  ;;  %v7325_v63 = vld [vmem:[%s15618_s1 + $0x6f8] sm:$0xf0] }
 0x268   :  { %5803 = vmatpush.bf16.msrb.mxu1 %v6784_v11  ;;  %v9806_v11 = vld [vmem:[%s15618_s1 + $0x34c] sm:$0xf]  ;;  %v6736_v23 = vor.u32 %v9774_v3, %v6733_v10 }
 0x269   :  { %5816 = vmatpush.bf16.msrb.mxu2 %v6912_v24  ;;  %v6861_v24 = vld [vmem:[%s15618_s1 + $0x358] sm:$0xf0]  ;;  %v5552_v29 = vpop.f32.mrf.mxu1  ;;  %v9954_v3 = vld [vmem:[%s15618_s1 + $0x7ec] sm:$0xf] }
 0x26a   :  { %5781 = vmatpush.bf16.msra.mxu3 %v6464_v38  ;;  %v6864_v33 = vor.u32 %v9806_v11, %v6861_v24  ;;  %v6717_v38 = vld [vmem:[%s15618_s1 + $0x238] sm:$0xf0]  ;;  %v6832_v11 = vor.u32 %v9798_v43, %v6829_v56 }
 0x26b   :  { %5791 = vmatpush.bf16.msrb.mxu0 %v6640_v39  ;;  %v9802_v39 = vld [vmem:[%s15618_s1 + $0x32c] sm:$0xf]  ;;  %v6720_v51 = vor.u32 %v9770_v37, %v6717_v38  ;;  %v7293_v43 = vld [vmem:[%s15618_s1 + $0x6b8] sm:$0xf0] }
 0x26c   :  { %5804 = vmatpush.bf16.msrb.mxu1 %v6768_v42  ;;  %v6592_v42 = vor.u32 %v9738_v31, %v6589_v35  ;;  %v6848_v52 = vor.u32 %v9802_v39, %v6845_v40  ;;  %v9918_v31 = vld [vmem:[%s15618_s1 + $0x6cc] sm:$0xf]  ;;  %v7309_v35 = vld [vmem:[%s15618_s1 + $0x6d8] sm:$0xf0]  ;;  %v7008_v39 = vor.u32 %v9842_v27, %v7005_v28 }
 0x26d   :  { %5817 = vmatpush.bf16.msrb.mxu2 %v6896_v34  ;;  %v9734_v34 = vld [vmem:[%s15618_s1 + $0x10c] sm:$0xf]  ;;  %v7421_v56 = vld [vmem:[%s15618_s1 + $0x7b8] sm:$0xf0] }
 0x26e   :  { %5782 = vmatpush.bf16.msra.mxu3 %v6448_v58  ;;  %v7021_v58 = vld [vmem:[%s15618_s1 + $0x498] sm:$0xf0]  ;;  %v6576_v62 = vor.u32 %v9734_v34, %v6573_v50  ;;  %v9950_v37 = vld [vmem:[%s15618_s1 + $0x7cc] sm:$0xf]  ;;  %v7312_v50 = vor.u32 %v9918_v31, %v7309_v35 }
 0x26f   :  { %5792 = vmatpush.bf16.msrb.mxu0 %v6624_v54  ;;  %v9890_v54 = vld [vmem:[%s15618_s1 + $0x5ec] sm:$0xf]  ;;  %v7024_v24 = vor.u32 %v9846_v57, %v7021_v58  ;;  %v6989_v34 = vld [vmem:[%s15618_s1 + $0x458] sm:$0xf0] }
 0x270   :  { %5805 = vmatpush.bf16.msrb.mxu1 %v6752_v59  ;;  %v7197_v59 = vld [vmem:[%s15618_s1 + $0x5f8] sm:$0xf0] }
 0x271   :  { %5818 = vmatpush.bf16.msrb.mxu2 %v6880_v61  ;;  %5783 = vmatmul.bf16.vlgmr.msra.gmra.mxu3 %v10887_v21  ;;  %v6701_v21 = vld [vmem:[%s15618_s1 + $0x218] sm:$0xf0]  ;;  %v9922_v61 = vld [vmem:[%s15618_s1 + $0x6ec] sm:$0xf]  ;;  %v7200_v25 = vor.u32 %v9890_v54, %v7197_v59 }
 0x272   :  { %5827 = vmatpush.bf16.msrb.mxu3 %v7072_v32  ;;  %v7453_v32 = vld [vmem:[%s15618_s1 + $0x7f8] sm:$0xf0]  ;;  %v6704_v10 = vor.u32 %v9766_v53, %v6701_v21  ;;  %v7328_v29 = vor.u32 %v9922_v61, %v7325_v63  ;;  %v9914_v53 = vld [vmem:[%s15618_s1 + $0x6ac] sm:$0xf] }
 0x273   :  { %5793 = vmatpush.bf16.msrb.mxu0 %v6608_v30  ;;  %v7456_v30 = vor.u32 %v9954_v3, %v7453_v32  ;;  %v5563_v38 = vpop.f32.mrf.mxu2  ;;  %v9834_v54 = vld [vmem:[%s15618_s1 + $0x42c] sm:$0xf]  ;;  %v6973_v59 = vld [vmem:[%s15618_s1 + $0x438] sm:$0xf0]  ;;  %v7296_v61 = vor.u32 %v9914_v53, %v7293_v43 }
 0x274   :  { %5806 = vmatpush.bf16.msrb.mxu1 %v6736_v23  ;;  %v9886_v23 = vld [vmem:[%s15618_s1 + $0x5cc] sm:$0xf]  ;;  %v5564_v40 = vadd.f32 %v5563_v38, %v14411_v45  ;;  %v5576_v41 = vpop.f32.mrf.mxu3  ;;  %v7165_v45 = vld [vmem:[%s15618_s1 + $0x5b8] sm:$0xf0]  ;;  %v6976_v27 = vor.u32 %v9834_v54, %v6973_v59 }
 0x275   :  { %5819 = vmatpush.bf16.msrb.mxu2 %v6864_v33  ;;  %v7181_v33 = vld [vmem:[%s15618_s1 + $0x5d8] sm:$0xf0]  ;;  %v9942_v32 = vld [vmem:[%s15618_s1 + $0x78c] sm:$0xf] }
 0x276   :  { %5828 = vmatpush.bf16.msrb.mxu3 %v7056_v44  ;;  %v7437_v44 = vld [vmem:[%s15618_s1 + $0x7d8] sm:$0xf0]  ;;  %v7184_v36 = vor.u32 %v9886_v23, %v7181_v33  ;;  %v5577_v21 = vadd.f32 %v5576_v41, %v5564_v40  ;;  %v9906_v38 = vld [vmem:[%s15618_s1 + $0x66c] sm:$0xf] }
 0x277   :  { %5794 = vmatpush.bf16.msrb.mxu0 %v6592_v42  ;;  %v9838_v42 = vld [vmem:[%s15618_s1 + $0x44c] sm:$0xf]  ;;  %v7277_v3 = vld [vmem:[%s15618_s1 + $0x698] sm:$0xf0] }
 0x278   :  { %5807 = vmatpush.bf16.msrb.mxu1 %v6720_v51  ;;  %v7440_v51 = vor.u32 %v9950_v37, %v7437_v44  ;;  %v6992_v57 = vor.u32 %v9838_v42, %v6989_v34  ;;  %v9874_v37 = vld [vmem:[%s15618_s1 + $0x56c] sm:$0xf]  ;;  %v7133_v44 = vld [vmem:[%s15618_s1 + $0x578] sm:$0xf0] }
 0x279   :  { %5820 = vmatpush.bf16.msrb.mxu2 %v6848_v52  ;;  %v9882_v52 = vld [vmem:[%s15618_s1 + $0x5ac] sm:$0xf]  ;;  %v7581_v42 = vld [vmem:[%s15618_s1 + $0x8f8] sm:$0xf0] }
 0x27a   :  { %5829 = vmatpush.bf16.msrb.mxu3 %v7040_v55  ;;  %v9946_v55 = vld [vmem:[%s15618_s1 + $0x7ac] sm:$0xf]  ;;  %v7168_v58 = vor.u32 %v9882_v52, %v7165_v45  ;;  %v7117_v53 = vld [vmem:[%s15618_s1 + $0x558] sm:$0xf0] }
 0x27b   :  { %5795 = vmatpush.bf16.msrb.mxu0 %v6576_v62  ;;  %v9910_v62 = vld [vmem:[%s15618_s1 + $0x68c] sm:$0xf]  ;;  %v5589_v63 = vpop.f32.mrf.mxu0  ;;  %v7565_v59 = vld [vmem:[%s15618_s1 + $0x8d8] sm:$0xf0] }
 0x27c   :  { %5808 = vmatpush.bf16.msrb.mxu1 %v6704_v10  ;;  %v7405_v10 = vld [vmem:[%s15618_s1 + $0x798] sm:$0xf0]  ;;  %v5578_v23 = vpop.f32.mrf.mxu3  ;;  %v7280_v33 = vor.u32 %v9910_v62, %v7277_v3  ;;  %v9938_v40 = vld [vmem:[%s15618_s1 + $0x76c] sm:$0xf] }
 0x27d   :  { %5821 = vmatpush.bf16.msrb.mxu2 %v6832_v11  ;;  %v5590_v11 = vadd.f32 %v5589_v63, %v5577_v21  ;;  %v7408_v31 = vor.u32 %v9942_v32, %v7405_v10  ;;  %v9986_v41 = vld [vmem:[%s15618_s1 + $0x8ec] sm:$0xf]  ;;  %v7101_v63 = vld [vmem:[%s15618_s1 + $0x538] sm:$0xf0] }
 0x27e   :  { %5830 = vmatpush.bf16.msrb.mxu3 %v7024_v24  ;;  %5796 = vmatmul.bf16.vlgmr.msrb.gmra.mxu0 %v10898_v26  ;;  %v7149_v26 = vld [vmem:[%s15618_s1 + $0x598] sm:$0xf0]  ;;  %v5602_v24 = vpop.f32.mrf.mxu1  ;;  %v9870_v45 = vld [vmem:[%s15618_s1 + $0x54c] sm:$0xf]  ;;  %v7584_v43 = vor.u32 %v9986_v41, %v7581_v42 }
 0x27f   :  { %5840 = vmatpush.bf16.msra.mxu0 %v7200_v25  ;;  %5809 = vmatmul.bf16.vlgmr.msrb.gmra.mxu1 %v10885_v20  ;;  %v9878_v20 = vld [vmem:[%s15618_s1 + $0x58c] sm:$0xf]  ;;  %v5565_v25 = vpop.f32.mrf.mxu2  ;;  %v14610_v35 = vadd.f32 %v5602_v24, %v5590_v11  ;;  %v7229_v10 = vld [vmem:[%s15618_s1 + $0x638] sm:$0xf0] }
 0x280   :  { %5853 = vmatpush.bf16.msra.mxu1 %v7328_v29  ;;  %5822 = vmatmul.bf16.vlgmr.msrb.gmra.mxu2 %v10889_v22  ;;  %v7424_v22 = vor.u32 %v9946_v55, %v7421_v56  ;;  %v7152_v28 = vor.u32 %v9878_v20, %v7149_v26  ;;  %v9830_v29 = vld [vmem:[%s15618_s1 + $0x40c] sm:$0xf]  ;;  %v7245_v55 = vld [vmem:[%s15618_s1 + $0x658] sm:$0xf0] }
 0x281   :  { %5866 = vmatpush.bf16.msra.mxu2 %v7456_v30  ;;  %v6957_v30 = vld [vmem:[%s15618_s1 + $0x418] sm:$0xf0]  ;;  %v9902_v21 = vld [vmem:[%s15618_s1 + $0x64c] sm:$0xf] }
 0x282   :  { %5831 = vmatpush.bf16.msrb.mxu3 %v7008_v39  ;;  %v7261_v39 = vld [vmem:[%s15618_s1 + $0x678] sm:$0xf0]  ;;  %v6960_v34 = vor.u32 %v9830_v29, %v6957_v30  ;;  %v9934_v56 = vld [vmem:[%s15618_s1 + $0x74c] sm:$0xf]  ;;  %v7248_v20 = vor.u32 %v9902_v21, %v7245_v55 }
 0x283   :  { %5841 = vmatpush.bf16.msra.mxu0 %v7184_v36  ;;  %v7389_v36 = vld [vmem:[%s15618_s1 + $0x778] sm:$0xf0]  ;;  %v9982_v54 = vld [vmem:[%s15618_s1 + $0x8cc] sm:$0xf] }
 0x284   :  { %5854 = vmatpush.bf16.msra.mxu1 %v7312_v50  ;;  %v7136_v50 = vor.u32 %v9874_v37, %v7133_v44  ;;  %v7392_v52 = vor.u32 %v9938_v40, %v7389_v36  ;;  %v9866_v62 = vld [vmem:[%s15618_s1 + $0x52c] sm:$0xf]  ;;  %v7568_v32 = vor.u32 %v9982_v54, %v7565_v59  ;;  %v7357_v24 = vld [vmem:[%s15618_s1 + $0x738] sm:$0xf0] }
 0x285   :  { %5867 = vmatpush.bf16.msra.mxu2 %v7440_v51  ;;  %v7264_v51 = vor.u32 %v9906_v38, %v7261_v39  ;;  %v9898_v3 = vld [vmem:[%s15618_s1 + $0x62c] sm:$0xf]  ;;  %v7085_v30 = vld [vmem:[%s15618_s1 + $0x518] sm:$0xf0] }
 0x286   :  { %5832 = vmatpush.bf16.msrb.mxu3 %v6992_v57  ;;  %v7373_v57 = vld [vmem:[%s15618_s1 + $0x758] sm:$0xf0]  ;;  %v9930_v11 = vld [vmem:[%s15618_s1 + $0x72c] sm:$0xf] }
 0x287   :  { %5842 = vmatpush.bf16.msra.mxu0 %v7168_v58  ;;  %v5591_v58 = vpop.f32.mrf.mxu0  ;;  %v7376_v26 = vor.u32 %v9934_v56, %v7373_v57  ;;  %v9978_v25 = vld [vmem:[%s15618_s1 + $0x8ac] sm:$0xf]  ;;  %v7360_v23 = vor.u32 %v9930_v11, %v7357_v24  ;;  %v7341_v38 = vld [vmem:[%s15618_s1 + $0x718] sm:$0xf0] }
 0x288   :  { %5855 = vmatpush.bf16.msra.mxu1 %v7296_v61  ;;  %v5604_v61 = vpop.f32.mrf.mxu1  ;;  %v9862_v29 = vld [vmem:[%s15618_s1 + $0x50c] sm:$0xf]  ;;  %v7533_v40 = vld [vmem:[%s15618_s1 + $0x898] sm:$0xf0] }
 0x289   :  { %5868 = vmatpush.bf16.msra.mxu2 %v7424_v22  ;;  %v7120_v22 = vor.u32 %v9870_v45, %v7117_v53  ;;  %v9926_v37 = vld [vmem:[%s15618_s1 + $0x70c] sm:$0xf]  ;;  %v7709_v41 = vld [vmem:[%s15618_s1 + $0x9f8] sm:$0xf0] }
 0x28a   :  { %5833 = vmatpush.bf16.msrb.mxu3 %v6976_v27  ;;  %v7549_v27 = vld [vmem:[%s15618_s1 + $0x8b8] sm:$0xf0]  ;;  %v9974_v39 = vld [vmem:[%s15618_s1 + $0x88c] sm:$0xf]  ;;  %v7344_v53 = vor.u32 %v9926_v37, %v7341_v38 }
 0x28b   :  { %5843 = vmatpush.bf16.msra.mxu0 %v7152_v28  ;;  %v7104_v28 = vor.u32 %v9866_v62, %v7101_v63  ;;  %v7552_v44 = vor.u32 %v9978_v25, %v7549_v27  ;;  %v10018_v36 = vld [vmem:[%s15618_s1 + $0x9ec] sm:$0xf]  ;;  %v7536_v21 = vor.u32 %v9974_v39, %v7533_v40  ;;  %v7517_v56 = vld [vmem:[%s15618_s1 + $0x878] sm:$0xf0] }
 0x28c   :  { %5856 = vmatpush.bf16.msra.mxu1 %v7280_v33  ;;  %v9894_v33 = vld [vmem:[%s15618_s1 + $0x60c] sm:$0xf]  ;;  %v7693_v59 = vld [vmem:[%s15618_s1 + $0x9d8] sm:$0xf0] }
 0x28d   :  { %5869 = vmatpush.bf16.msra.mxu2 %v7408_v31  ;;  %v7213_v31 = vld [vmem:[%s15618_s1 + $0x618] sm:$0xf0]  ;;  %v10050_v42 = vld [vmem:[%s15618_s1 + $0xaec] sm:$0xf] }
 0x28e   :  { %5834 = vmatpush.bf16.msrb.mxu3 %v6960_v34  ;;  %v7088_v34 = vor.u32 %v9862_v29, %v7085_v30  ;;  %v7216_v45 = vor.u32 %v9894_v33, %v7213_v31  ;;  %v9970_v55 = vld [vmem:[%s15618_s1 + $0x86c] sm:$0xf]  ;;  %v7501_v24 = vld [vmem:[%s15618_s1 + $0x858] sm:$0xf0] }
 0x28f   :  { %5844 = vmatpush.bf16.msra.mxu0 %v7136_v50  ;;  %v7837_v50 = vld [vmem:[%s15618_s1 + $0xaf8] sm:$0xf0]  ;;  %v10014_v54 = vld [vmem:[%s15618_s1 + $0x9cc] sm:$0xf]  ;;  %v7520_v63 = vor.u32 %v9970_v55, %v7517_v56 }
 0x290   :  { %5857 = vmatpush.bf16.msra.mxu1 %v7264_v51  ;;  %v10082_v51 = vld [vmem:[%s15618_s1 + $0xbec] sm:$0xf]  ;;  %v7840_v57 = vor.u32 %v10050_v42, %v7837_v50  ;;  %v7933_v33 = vld [vmem:[%s15618_s1 + $0xbb8] sm:$0xf0] }
 0x291   :  { %5870 = vmatpush.bf16.msra.mxu2 %v7392_v52  ;;  %5835 = vmatmul.bf16.vlgmr.msrb.gmra.mxu3 %v10980_v0  ;;  %v7232_v0 = vor.u32 %v9898_v3, %v7229_v10  ;;  %v7965_v52 = vld [vmem:[%s15618_s1 + $0xbf8] sm:$0xf0]  ;;  %v10046_v61 = vld [vmem:[%s15618_s1 + $0xacc] sm:$0xf] }
 0x292   :  { %5879 = vmatpush.bf16.msra.mxu3 %v7584_v43  ;;  %v7712_v43 = vor.u32 %v10018_v36, %v7709_v41  ;;  %v7968_v58 = vor.u32 %v10082_v51, %v7965_v52  ;;  %v9966_v11 = vld [vmem:[%s15618_s1 + $0x84c] sm:$0xf]  ;;  %v7485_v37 = vld [vmem:[%s15618_s1 + $0x838] sm:$0xf0] }
 0x293   :  { %5845 = vmatpush.bf16.msra.mxu0 %v7120_v22  ;;  %v7821_v22 = vld [vmem:[%s15618_s1 + $0xad8] sm:$0xf0]  ;;  %v5615_v62 = vpop.f32.mrf.mxu2  ;;  %v10042_v29 = vld [vmem:[%s15618_s1 + $0xaac] sm:$0xf] }
 0x294   :  { %5858 = vmatpush.bf16.msra.mxu1 %v7248_v20  ;;  %v10078_v20 = vld [vmem:[%s15618_s1 + $0xbcc] sm:$0xf]  ;;  %v5616_v3 = vadd.f32 %v5615_v62, %v14610_v35  ;;  %v5628_v10 = vpop.f32.mrf.mxu3  ;;  %v7824_v25 = vor.u32 %v10046_v61, %v7821_v22  ;;  %v7677_v35 = vld [vmem:[%s15618_s1 + $0x9b8] sm:$0xf0] }
 0x295   :  { %5871 = vmatpush.bf16.msra.mxu2 %v7376_v26  ;;  %v7949_v26 = vld [vmem:[%s15618_s1 + $0xbd8] sm:$0xf0]  ;;  %v10038_v40 = vld [vmem:[%s15618_s1 + $0xa8c] sm:$0xf] }
 0x296   :  { %5880 = vmatpush.bf16.msra.mxu3 %v7568_v32  ;;  %v7696_v32 = vor.u32 %v10014_v54, %v7693_v59  ;;  %v7952_v27 = vor.u32 %v10078_v20, %v7949_v26  ;;  %v5629_v30 = vadd.f32 %v5628_v10, %v5616_v3  ;;  %v7661_v39 = vld [vmem:[%s15618_s1 + $0x998] sm:$0xf0]  ;;  %v10070_v42 = vld [vmem:[%s15618_s1 + $0xb8c] sm:$0xf] }
 0x297   :  { %5846 = vmatpush.bf16.msra.mxu0 %v7104_v28  ;;  %v10010_v28 = vld [vmem:[%s15618_s1 + $0x9ac] sm:$0xf]  ;;  %v7789_v41 = vld [vmem:[%s15618_s1 + $0xa98] sm:$0xf0] }
 0x298   :  { %5859 = vmatpush.bf16.msra.mxu1 %v7232_v0  ;;  %v7805_v0 = vld [vmem:[%s15618_s1 + $0xab8] sm:$0xf0]  ;;  %v7680_v31 = vor.u32 %v10010_v28, %v7677_v35  ;;  %v7792_v56 = vor.u32 %v10038_v40, %v7789_v41  ;;  %v10002_v54 = vld [vmem:[%s15618_s1 + $0x96c] sm:$0xf] }
 0x299   :  { %5872 = vmatpush.bf16.msra.mxu2 %v7360_v23  ;;  %v10074_v23 = vld [vmem:[%s15618_s1 + $0xbac] sm:$0xf]  ;;  %v7645_v59 = vld [vmem:[%s15618_s1 + $0x978] sm:$0xf0] }
 0x29a   :  { %5881 = vmatpush.bf16.msra.mxu3 %v7552_v44  ;;  %v7808_v44 = vor.u32 %v10042_v29, %v7805_v0  ;;  %v7936_v38 = vor.u32 %v10074_v23, %v7933_v33  ;;  %v10034_v61 = vld [vmem:[%s15618_s1 + $0xa6c] sm:$0xf]  ;;  %v7773_v22 = vld [vmem:[%s15618_s1 + $0xa78] sm:$0xf0] }
 0x29b   :  { %5847 = vmatpush.bf16.msra.mxu0 %v7088_v34  ;;  %v5641_v36 = vpop.f32.mrf.mxu0  ;;  %v7917_v34 = vld [vmem:[%s15618_s1 + $0xb98] sm:$0xf0]  ;;  %v5617_v52 = vpop.f32.mrf.mxu2  ;;  %v10066_v20 = vld [vmem:[%s15618_s1 + $0xb6c] sm:$0xf]  ;;  %v7776_v10 = vor.u32 %v10034_v61, %v7773_v22 }
 0x29c   :  { %5860 = vmatpush.bf16.msra.mxu1 %v7216_v45  ;;  %v5642_v50 = vadd.f32 %v5641_v36, %v5629_v30  ;;  %v5654_v51 = vpop.f32.mrf.mxu1  ;;  %v5630_v55 = vpop.f32.mrf.mxu3  ;;  %v7901_v26 = vld [vmem:[%s15618_s1 + $0xb78] sm:$0xf0]  ;;  %v10114_v62 = vld [vmem:[%s15618_s1 + $0xcec] sm:$0xf] }
 0x29d   :  { %5873 = vmatpush.bf16.msra.mxu2 %v7344_v53  ;;  %v7757_v35 = vld [vmem:[%s15618_s1 + $0xa58] sm:$0xf0]  ;;  %v10062_v29 = vld [vmem:[%s15618_s1 + $0xb4c] sm:$0xf] }
 0x29e   :  { %5882 = vmatpush.bf16.msra.mxu3 %v7536_v21  ;;  %5848 = vmatmul.bf16.vlgmr.msra.gmra.mxu0 %v10984_v2  ;;  %v9962_v2 = vld [vmem:[%s15618_s1 + $0x82c] sm:$0xf]  ;;  %v7885_v30 = vld [vmem:[%s15618_s1 + $0xb58] sm:$0xf0] }
 0x29f   :  { %5892 = vmatpush.bf16.msrb.mxu0 %v7712_v43  ;;  %5861 = vmatmul.bf16.vlgmr.msra.gmra.mxu1 %v10975_v60  ;;  %v10006_v60 = vld [vmem:[%s15618_s1 + $0x98c] sm:$0xf]  ;;  %v7488_v45 = vor.u32 %v9962_v2, %v7485_v37  ;;  %v7469_v43 = vld [vmem:[%s15618_s1 + $0x818] sm:$0xf0]  ;;  %v7888_v37 = vor.u32 %v10062_v29, %v7885_v30 }
 0x2a0   :  { %5905 = vmatpush.bf16.msrb.mxu1 %v7840_v57  ;;  %5874 = vmatmul.bf16.vlgmr.msra.gmra.mxu2 %v10982_v1  ;;  %v7504_v1 = vor.u32 %v9966_v11, %v7501_v24  ;;  %v7664_v53 = vor.u32 %v10006_v60, %v7661_v39  ;;  %v9958_v21 = vld [vmem:[%s15618_s1 + $0x80c] sm:$0xf]  ;;  %v7920_v57 = vor.u32 %v10070_v42, %v7917_v34  ;;  %v8077_v33 = vld [vmem:[%s15618_s1 + $0xcd8] sm:$0xf0] }
 0x2a1   :  { %5918 = vmatpush.bf16.msrb.mxu2 %v7968_v58  ;;  %v14809_v58 = vadd.f32 %v5654_v51, %v5642_v50  ;;  %v7472_v3 = vor.u32 %v9958_v21, %v7469_v43  ;;  %v7904_v11 = vor.u32 %v10066_v20, %v7901_v26  ;;  %v9998_v24 = vld [vmem:[%s15618_s1 + $0x94c] sm:$0xf]  ;;  %v7741_v40 = vld [vmem:[%s15618_s1 + $0xa38] sm:$0xf0] }
 0x2a2   :  { %5883 = vmatpush.bf16.msra.mxu3 %v7520_v63  ;;  %v8093_v63 = vld [vmem:[%s15618_s1 + $0xcf8] sm:$0xf0]  ;;  %v10110_v23 = vld [vmem:[%s15618_s1 + $0xccc] sm:$0xf] }
 0x2a3   :  { %5893 = vmatpush.bf16.msrb.mxu0 %v7696_v32  ;;  %v7648_v32 = vor.u32 %v10002_v54, %v7645_v59  ;;  %v8096_v28 = vor.u32 %v10114_v62, %v8093_v63  ;;  %v5643_v0 = vpop.f32.mrf.mxu0  ;;  %v10026_v60 = vld [vmem:[%s15618_s1 + $0xa2c] sm:$0xf]  ;;  %v8080_v39 = vor.u32 %v10110_v23, %v8077_v33  ;;  %v7869_v41 = vld [vmem:[%s15618_s1 + $0xb38] sm:$0xf0] }
 0x2a4   :  { %5906 = vmatpush.bf16.msrb.mxu1 %v7824_v25  ;;  %v7629_v25 = vld [vmem:[%s15618_s1 + $0x958] sm:$0xf0]  ;;  %v10058_v36 = vld [vmem:[%s15618_s1 + $0xb2c] sm:$0xf] }
 0x2a5   :  { %5919 = vmatpush.bf16.msrb.mxu2 %v7952_v27  ;;  %v10030_v27 = vld [vmem:[%s15618_s1 + $0xa4c] sm:$0xf]  ;;  %v8061_v34 = vld [vmem:[%s15618_s1 + $0xcb8] sm:$0xf0] }
 0x2a6   :  { %5884 = vmatpush.bf16.msra.mxu3 %v7504_v1  ;;  %v5656_v1 = vpop.f32.mrf.mxu1  ;;  %v7760_v2 = vor.u32 %v10030_v27, %v7757_v35  ;;  %v10106_v42 = vld [vmem:[%s15618_s1 + $0xcac] sm:$0xf]  ;;  %v7597_v52 = vld [vmem:[%s15618_s1 + $0x918] sm:$0xf0] }
 0x2a7   :  { %5894 = vmatpush.bf16.msrb.mxu0 %v7680_v31  ;;  %v7632_v31 = vor.u32 %v9998_v24, %v7629_v25  ;;  %v9990_v51 = vld [vmem:[%s15618_s1 + $0x90c] sm:$0xf]  ;;  %v7725_v21 = vld [vmem:[%s15618_s1 + $0xa18] sm:$0xf0]  ;;  %v8064_v55 = vor.u32 %v10106_v42, %v8061_v34 }
 0x2a8   :  { %5907 = vmatpush.bf16.msrb.mxu1 %v7808_v44  ;;  %v9994_v44 = vld [vmem:[%s15618_s1 + $0x92c] sm:$0xf]  ;;  %v8045_v54 = vld [vmem:[%s15618_s1 + $0xc98] sm:$0xf0]  ;;  %v7600_v20 = vor.u32 %v9990_v51, %v7597_v52 }
 0x2a9   :  { %5920 = vmatpush.bf16.msrb.mxu2 %v7936_v38  ;;  %v7613_v38 = vld [vmem:[%s15618_s1 + $0x938] sm:$0xf0]  ;;  %v10054_v43 = vld [vmem:[%s15618_s1 + $0xb0c] sm:$0xf] }
 0x2aa   :  { %5885 = vmatpush.bf16.msra.mxu3 %v7488_v45  ;;  %v7616_v50 = vor.u32 %v9994_v44, %v7613_v38  ;;  %v7872_v45 = vor.u32 %v10058_v36, %v7869_v41  ;;  %v10146_v59 = vld [vmem:[%s15618_s1 + $0xdec] sm:$0xf]  ;;  %v8221_v61 = vld [vmem:[%s15618_s1 + $0xdf8] sm:$0xf0] }
 0x2ab   :  { %5895 = vmatpush.bf16.msrb.mxu0 %v7664_v53  ;;  %v10022_v53 = vld [vmem:[%s15618_s1 + $0xa0c] sm:$0xf]  ;;  %v8349_v26 = vld [vmem:[%s15618_s1 + $0xef8] sm:$0xf0] }
 0x2ac   :  { %5908 = vmatpush.bf16.msrb.mxu1 %v7792_v56  ;;  %v7853_v56 = vld [vmem:[%s15618_s1 + $0xb18] sm:$0xf0]  ;;  %v10178_v22 = vld [vmem:[%s15618_s1 + $0xeec] sm:$0xf] }
 0x2ad   :  { %5921 = vmatpush.bf16.msrb.mxu2 %v7920_v57  ;;  %v10102_v57 = vld [vmem:[%s15618_s1 + $0xc8c] sm:$0xf]  ;;  %v8477_v63 = vld [vmem:[%s15618_s1 + $0xff8] sm:$0xf0]  ;;  %v8352_v27 = vor.u32 %v10178_v22, %v8349_v26 }
 0x2ae   :  { %5886 = vmatpush.bf16.msra.mxu3 %v7472_v3  ;;  %v10210_v62 = vld [vmem:[%s15618_s1 + $0xfec] sm:$0xf]  ;;  %v7728_v3 = vor.u32 %v10022_v53, %v7725_v21  ;;  %v8029_v25 = vld [vmem:[%s15618_s1 + $0xc78] sm:$0xf0] }
 0x2af   :  { %5896 = vmatpush.bf16.msrb.mxu0 %v7648_v32  ;;  %v7856_v32 = vor.u32 %v10054_v43, %v7853_v56  ;;  %v10098_v24 = vld [vmem:[%s15618_s1 + $0xc6c] sm:$0xf]  ;;  %v8205_v29 = vld [vmem:[%s15618_s1 + $0xdd8] sm:$0xf0] }
 0x2b0   :  { %5909 = vmatpush.bf16.msrb.mxu1 %v7776_v10  ;;  %v8048_v10 = vor.u32 %v10102_v57, %v8045_v54  ;;  %v10142_v35 = vld [vmem:[%s15618_s1 + $0xdcc] sm:$0xf]  ;;  %v8333_v0 = vld [vmem:[%s15618_s1 + $0xed8] sm:$0xf0] }
 0x2b1   :  { %5922 = vmatpush.bf16.msrb.mxu2 %v7904_v11  ;;  %5887 = vmatmul.bf16.vlgmr.msra.gmra.mxu3 %v11230_v12  ;;  %v7744_v12 = vor.u32 %v10026_v60, %v7741_v40  ;;  %v8224_v11 = vor.u32 %v10146_v59, %v8221_v61  ;;  %v10174_v30 = vld [vmem:[%s15618_s1 + $0xecc] sm:$0xf]  ;;  %v8461_v33 = vld [vmem:[%s15618_s1 + $0xfd8] sm:$0xf0] }
 0x2b2   :  { %5931 = vmatpush.bf16.msrb.mxu3 %v8096_v28  ;;  %v8480_v28 = vor.u32 %v10210_v62, %v8477_v63  ;;  %v10206_v23 = vld [vmem:[%s15618_s1 + $0xfcc] sm:$0xf]  ;;  %v8013_v60 = vld [vmem:[%s15618_s1 + $0xc58] sm:$0xf0] }
 0x2b3   :  { %5897 = vmatpush.bf16.msrb.mxu0 %v7632_v31  ;;  %v5667_v1 = vpop.f32.mrf.mxu2  ;;  %v8032_v31 = vor.u32 %v10098_v24, %v8029_v25  ;;  %v10094_v38 = vld [vmem:[%s15618_s1 + $0xc4c] sm:$0xf]  ;;  %v8464_v40 = vor.u32 %v10206_v23, %v8461_v33  ;;  %v8317_v34 = vld [vmem:[%s15618_s1 + $0xeb8] sm:$0xf0] }
 0x2b4   :  { %5910 = vmatpush.bf16.msrb.mxu1 %v7760_v2  ;;  %v5668_v2 = vadd.f32 %v5667_v1, %v14809_v58  ;;  %v5680_v44 = vpop.f32.mrf.mxu3  ;;  %v10138_v36 = vld [vmem:[%s15618_s1 + $0xdac] sm:$0xf]  ;;  %v8189_v58 = vld [vmem:[%s15618_s1 + $0xdb8] sm:$0xf0] }
 0x2b5   :  { %5923 = vmatpush.bf16.msrb.mxu2 %v7888_v37  ;;  %v8208_v37 = vor.u32 %v10142_v35, %v8205_v29  ;;  %v10170_v41 = vld [vmem:[%s15618_s1 + $0xeac] sm:$0xf]  ;;  %v8445_v51 = vld [vmem:[%s15618_s1 + $0xfb8] sm:$0xf0]  ;;  %v8192_v52 = vor.u32 %v10138_v36, %v8189_v58 }
 0x2b6   :  { %5932 = vmatpush.bf16.msrb.mxu3 %v8080_v39  ;;  %v8336_v39 = vor.u32 %v10174_v30, %v8333_v0  ;;  %v5681_v42 = vadd.f32 %v5680_v44, %v5668_v2  ;;  %v8173_v21 = vld [vmem:[%s15618_s1 + $0xd98] sm:$0xf0]  ;;  %v10166_v43 = vld [vmem:[%s15618_s1 + $0xe8c] sm:$0xf] }
 0x2b7   :  { %5898 = vmatpush.bf16.msrb.mxu0 %v7616_v50  ;;  %v10202_v50 = vld [vmem:[%s15618_s1 + $0xfac] sm:$0xf]  ;;  %v8301_v56 = vld [vmem:[%s15618_s1 + $0xe98] sm:$0xf0] }
 0x2b8   :  { %5911 = vmatpush.bf16.msrb.mxu1 %v7744_v12  ;;  %v7997_v12 = vld [vmem:[%s15618_s1 + $0xc38] sm:$0xf0]  ;;  %v8448_v53 = vor.u32 %v10202_v50, %v8445_v51  ;;  %v10198_v57 = vld [vmem:[%s15618_s1 + $0xf8c] sm:$0xf] }
 0x2b9   :  { %5924 = vmatpush.bf16.msrb.mxu2 %v7872_v45  ;;  %v8320_v45 = vor.u32 %v10170_v41, %v8317_v34  ;;  %v8429_v54 = vld [vmem:[%s15618_s1 + $0xf98] sm:$0xf0]  ;;  %v10086_v62 = vld [vmem:[%s15618_s1 + $0xc0c] sm:$0xf] }
 0x2ba   :  { %5933 = vmatpush.bf16.msrb.mxu3 %v8064_v55  ;;  %v7981_v63 = vld [vmem:[%s15618_s1 + $0xc18] sm:$0xf0]  ;;  %v10130_v24 = vld [vmem:[%s15618_s1 + $0xd6c] sm:$0xf] }
 0x2bb   :  { %5899 = vmatpush.bf16.msrb.mxu0 %v7600_v20  ;;  %v5693_v55 = vpop.f32.mrf.mxu0  ;;  %v5669_v22 = vpop.f32.mrf.mxu2  ;;  %v8157_v25 = vld [vmem:[%s15618_s1 + $0xd78] sm:$0xf0]  ;;  %v10194_v35 = vld [vmem:[%s15618_s1 + $0xf6c] sm:$0xf]  ;;  %v7984_v23 = vor.u32 %v10086_v62, %v7981_v63 }
 0x2bc   :  { %5912 = vmatpush.bf16.msrb.mxu1 %v7728_v3  ;;  %v5694_v59 = vadd.f32 %v5693_v55, %v5681_v42  ;;  %v5706_v61 = vpop.f32.mrf.mxu1  ;;  %v5682_v3 = vpop.f32.mrf.mxu3  ;;  %v8413_v29 = vld [vmem:[%s15618_s1 + $0xf78] sm:$0xf0]  ;;  %v10242_v30 = vld [vmem:[%s15618_s1 + $0x10ec] sm:$0xf]  ;;  %v8160_v33 = vor.u32 %v10130_v24, %v8157_v25 }
 0x2bd   :  { %5925 = vmatpush.bf16.msrb.mxu2 %v7856_v32  ;;  %v8304_v32 = vor.u32 %v10166_v43, %v8301_v56  ;;  %v8605_v0 = vld [vmem:[%s15618_s1 + $0x10f8] sm:$0xf0]  ;;  %v10126_v2 = vld [vmem:[%s15618_s1 + $0xd4c] sm:$0xf] }
 0x2be   :  { %5934 = vmatpush.bf16.msrb.mxu3 %v8048_v10  ;;  %5900 = vmatmul.bf16.vlgmr.msrb.gmra.mxu0 %v11240_v16  ;;  %v8016_v16 = vor.u32 %v10094_v38, %v8013_v60  ;;  %v8432_v10 = vor.u32 %v10198_v57, %v8429_v54  ;;  %v10158_v44 = vld [vmem:[%s15618_s1 + $0xe4c] sm:$0xf]  ;;  %v8608_v38 = vor.u32 %v10242_v30, %v8605_v0  ;;  %v8269_v60 = vld [vmem:[%s15618_s1 + $0xe58] sm:$0xf0] }
 0x2bf   :  { %5944 = vmatpush.bf16.msra.mxu0 %v8224_v11  ;;  %5913 = vmatmul.bf16.vlgmr.msrb.gmra.mxu1 %v11238_v15  ;;  %v10134_v15 = vld [vmem:[%s15618_s1 + $0xd8c] sm:$0xf]  ;;  %v15008_v11 = vadd.f32 %v5706_v61, %v5694_v59  ;;  %v8589_v41 = vld [vmem:[%s15618_s1 + $0x10d8] sm:$0xf0]  ;;  %v8272_v50 = vor.u32 %v10158_v44, %v8269_v60 }
 0x2c0   :  { %5957 = vmatpush.bf16.msra.mxu1 %v8352_v27  ;;  %5926 = vmatmul.bf16.vlgmr.msrb.gmra.mxu2 %v11242_v17  ;;  %v10090_v17 = vld [vmem:[%s15618_s1 + $0xc2c] sm:$0xf]  ;;  %v8176_v26 = vor.u32 %v10134_v15, %v8173_v21  ;;  %v8381_v15 = vld [vmem:[%s15618_s1 + $0xf38] sm:$0xf0] }
 0x2c1   :  { %5970 = vmatpush.bf16.msra.mxu2 %v8480_v28  ;;  %v8000_v20 = vor.u32 %v10090_v17, %v7997_v12  ;;  %v10162_v27 = vld [vmem:[%s15618_s1 + $0xe6c] sm:$0xf]  ;;  %v8285_v28 = vld [vmem:[%s15618_s1 + $0xe78] sm:$0xf0] }
 0x2c2   :  { %5935 = vmatpush.bf16.msrb.mxu3 %v8032_v31  ;;  %v8288_v1 = vor.u32 %v10162_v27, %v8285_v28  ;;  %v8416_v31 = vor.u32 %v10194_v35, %v8413_v29  ;;  %v10238_v58 = vld [vmem:[%s15618_s1 + $0x10cc] sm:$0xf]  ;;  %v8573_v43 = vld [vmem:[%s15618_s1 + $0x10b8] sm:$0xf0] }
 0x2c3   :  { %5945 = vmatpush.bf16.msra.mxu0 %v8208_v37  ;;  %v8141_v37 = vld [vmem:[%s15618_s1 + $0xd58] sm:$0xf0]  ;;  %v5695_v36 = vpop.f32.mrf.mxu0  ;;  %v10154_v17 = vld [vmem:[%s15618_s1 + $0xe2c] sm:$0xf]  ;;  %v8592_v12 = vor.u32 %v10238_v58, %v8589_v41 }
 0x2c4   :  { %5958 = vmatpush.bf16.msra.mxu1 %v8336_v39  ;;  %v10190_v39 = vld [vmem:[%s15618_s1 + $0xf4c] sm:$0xf]  ;;  %v5708_v42 = vpop.f32.mrf.mxu1  ;;  %v8144_v34 = vor.u32 %v10126_v2, %v8141_v37  ;;  %v8109_v57 = vld [vmem:[%s15618_s1 + $0xd18] sm:$0xf0] }
 0x2c5   :  { %5971 = vmatpush.bf16.msra.mxu2 %v8464_v40  ;;  %v8397_v40 = vld [vmem:[%s15618_s1 + $0xf58] sm:$0xf0]  ;;  %v10234_v21 = vld [vmem:[%s15618_s1 + $0x10ac] sm:$0xf] }
 0x2c6   :  { %5936 = vmatpush.bf16.msrb.mxu3 %v8016_v16  ;;  %v8400_v51 = vor.u32 %v10190_v39, %v8397_v40  ;;  %v10122_v16 = vld [vmem:[%s15618_s1 + $0xd2c] sm:$0xf]  ;;  %v8237_v61 = vld [vmem:[%s15618_s1 + $0xe18] sm:$0xf0] }
 0x2c7   :  { %5946 = vmatpush.bf16.msra.mxu0 %v8192_v52  ;;  %v8125_v52 = vld [vmem:[%s15618_s1 + $0xd38] sm:$0xf0]  ;;  %v10118_v56 = vld [vmem:[%s15618_s1 + $0xd0c] sm:$0xf] }
 0x2c8   :  { %5959 = vmatpush.bf16.msra.mxu1 %v8320_v45  ;;  %v8253_v45 = vld [vmem:[%s15618_s1 + $0xe38] sm:$0xf0]  ;;  %v8128_v55 = vor.u32 %v10122_v16, %v8125_v52  ;;  %v10150_v59 = vld [vmem:[%s15618_s1 + $0xe0c] sm:$0xf]  ;;  %v8112_v24 = vor.u32 %v10118_v56, %v8109_v57 }
 0x2c9   :  { %5972 = vmatpush.bf16.msra.mxu2 %v8448_v53  ;;  %v10186_v53 = vld [vmem:[%s15618_s1 + $0xf2c] sm:$0xf]  ;;  %v8557_v63 = vld [vmem:[%s15618_s1 + $0x1098] sm:$0xf0]  ;;  %v8240_v35 = vor.u32 %v10150_v59, %v8237_v61 }
 0x2ca   :  { %5937 = vmatpush.bf16.msrb.mxu3 %v8000_v20  ;;  %v8384_v54 = vor.u32 %v10186_v53, %v8381_v15  ;;  %v10182_v22 = vld [vmem:[%s15618_s1 + $0xf0c] sm:$0xf]  ;;  %v8576_v20 = vor.u32 %v10234_v21, %v8573_v43  ;;  %v8861_v25 = vld [vmem:[%s15618_s1 + $0x12f8] sm:$0xf0] }
 0x2cb   :  { %5947 = vmatpush.bf16.msra.mxu0 %v8176_v26  ;;  %v8365_v26 = vld [vmem:[%s15618_s1 + $0xf18] sm:$0xf0]  ;;  %v10230_v62 = vld [vmem:[%s15618_s1 + $0x108c] sm:$0xf] }
 0x2cc   :  { %5960 = vmatpush.bf16.msra.mxu1 %v8304_v32  ;;  %v10274_v3 = vld [vmem:[%s15618_s1 + $0x11ec] sm:$0xf]  ;;  %v8733_v32 = vld [vmem:[%s15618_s1 + $0x11f8] sm:$0xf0]  ;;  %v8368_v29 = vor.u32 %v10182_v22, %v8365_v26  ;;  %v8560_v30 = vor.u32 %v10230_v62, %v8557_v63 }
 0x2cd   :  { %5973 = vmatpush.bf16.msra.mxu2 %v8432_v10  ;;  %v10306_v10 = vld [vmem:[%s15618_s1 + $0x12ec] sm:$0xf]  ;;  %v8989_v28 = vld [vmem:[%s15618_s1 + $0x13f8] sm:$0xf0]  ;;  %v8736_v0 = vor.u32 %v10274_v3, %v8733_v32 }
 0x2ce   :  { %5938 = vmatpush.bf16.msrb.mxu3 %v7984_v23  ;;  %v10338_v27 = vld [vmem:[%s15618_s1 + $0x13ec] sm:$0xf]  ;;  %v8717_v37 = vld [vmem:[%s15618_s1 + $0x11d8] sm:$0xf0] }
 0x2cf   :  { %5948 = vmatpush.bf16.msra.mxu0 %v8160_v33  ;;  %v10226_v23 = vld [vmem:[%s15618_s1 + $0x106c] sm:$0xf]  ;;  %v8541_v33 = vld [vmem:[%s15618_s1 + $0x1078] sm:$0xf0] }
 0x2d0   :  { %5961 = vmatpush.bf16.msra.mxu1 %v8288_v1  ;;  %v8864_v1 = vor.u32 %v10306_v10, %v8861_v25  ;;  %v10270_v2 = vld [vmem:[%s15618_s1 + $0x11cc] sm:$0xf]  ;;  %v8973_v39 = vld [vmem:[%s15618_s1 + $0x13d8] sm:$0xf0]  ;;  %v8544_v36 = vor.u32 %v10226_v23, %v8541_v33 }
 0x2d1   :  { %5974 = vmatpush.bf16.msra.mxu2 %v8416_v31  ;;  %5939 = vmatmul.bf16.vlgmr.msrb.gmra.mxu3 %v11404_v46  ;;  %v8256_v46 = vor.u32 %v10154_v17, %v8253_v45  ;;  %v8992_v31 = vor.u32 %v10338_v27, %v8989_v28  ;;  %v10302_v44 = vld [vmem:[%s15618_s1 + $0x12cc] sm:$0xf]  ;;  %v8720_v41 = vor.u32 %v10270_v2, %v8717_v37  ;;  %v8829_v45 = vld [vmem:[%s15618_s1 + $0x12b8] sm:$0xf0] }
 0x2d2   :  { %5983 = vmatpush.bf16.msra.mxu3 %v8608_v38  ;;  %v8845_v38 = vld [vmem:[%s15618_s1 + $0x12d8] sm:$0xf0]  ;;  %v10334_v60 = vld [vmem:[%s15618_s1 + $0x13cc] sm:$0xf] }
 0x2d3   :  { %5949 = vmatpush.bf16.msra.mxu0 %v8144_v34  ;;  %v5719_v40 = vpop.f32.mrf.mxu2  ;;  %v10222_v34 = vld [vmem:[%s15618_s1 + $0x104c] sm:$0xf]  ;;  %v8976_v16 = vor.u32 %v10334_v60, %v8973_v39  ;;  %v8957_v15 = vld [vmem:[%s15618_s1 + $0x13b8] sm:$0xf0] }
 0x2d4   :  { %5962 = vmatpush.bf16.msra.mxu1 %v8272_v50  ;;  %v5720_v58 = vadd.f32 %v5719_v40, %v15008_v11  ;;  %v5732_v42 = vpop.f32.mrf.mxu3  ;;  %v8525_v50 = vld [vmem:[%s15618_s1 + $0x1058] sm:$0xf0]  ;;  %v10266_v52 = vld [vmem:[%s15618_s1 + $0x11ac] sm:$0xf] }
 0x2d5   :  { %5975 = vmatpush.bf16.msra.mxu2 %v8400_v51  ;;  %v8848_v51 = vor.u32 %v10302_v44, %v8845_v38  ;;  %v8701_v11 = vld [vmem:[%s15618_s1 + $0x11b8] sm:$0xf0]  ;;  %v10298_v17 = vld [vmem:[%s15618_s1 + $0x12ac] sm:$0xf] }
 0x2d6   :  { %5984 = vmatpush.bf16.msra.mxu3 %v8592_v12  ;;  %v5733_v12 = vadd.f32 %v5732_v42, %v5720_v58  ;;  %v10330_v53 = vld [vmem:[%s15618_s1 + $0x13ac] sm:$0xf]  ;;  %v8704_v21 = vor.u32 %v10266_v52, %v8701_v11  ;;  %v8509_v43 = vld [vmem:[%s15618_s1 + $0x1038] sm:$0xf0] }
 0x2d7   :  { %5950 = vmatpush.bf16.msra.mxu0 %v8128_v55  ;;  %v8832_v55 = vor.u32 %v10298_v17, %v8829_v45  ;;  %v8960_v56 = vor.u32 %v10330_v53, %v8957_v15  ;;  %v8685_v57 = vld [vmem:[%s15618_s1 + $0x1198] sm:$0xf0]  ;;  %v10326_v59 = vld [vmem:[%s15618_s1 + $0x138c] sm:$0xf] }
 0x2d8   :  { %5963 = vmatpush.bf16.msra.mxu1 %v8256_v46  ;;  %v10294_v46 = vld [vmem:[%s15618_s1 + $0x128c] sm:$0xf]  ;;  %v8941_v61 = vld [vmem:[%s15618_s1 + $0x1398] sm:$0xf0] }
 0x2d9   :  { %5976 = vmatpush.bf16.msra.mxu2 %v8384_v54  ;;  %v8813_v54 = vld [vmem:[%s15618_s1 + $0x1298] sm:$0xf0]  ;;  %v10214_v32 = vld [vmem:[%s15618_s1 + $0x100c] sm:$0xf]  ;;  %v8944_v27 = vor.u32 %v10326_v59, %v8941_v61 }
 0x2da   :  { %5985 = vmatpush.bf16.msra.mxu3 %v8576_v20  ;;  %v8493_v10 = vld [vmem:[%s15618_s1 + $0x1018] sm:$0xf0]  ;;  %v8816_v25 = vor.u32 %v10294_v46, %v8813_v54  ;;  %v10258_v28 = vld [vmem:[%s15618_s1 + $0x116c] sm:$0xf] }
 0x2db   :  { %5951 = vmatpush.bf16.msra.mxu0 %v8112_v24  ;;  %v5745_v22 = vpop.f32.mrf.mxu0  ;;  %v5721_v20 = vpop.f32.mrf.mxu2  ;;  %v10322_v23 = vld [vmem:[%s15618_s1 + $0x136c] sm:$0xf]  ;;  %v8925_v33 = vld [vmem:[%s15618_s1 + $0x1378] sm:$0xf0]  ;;  %v8496_v2 = vor.u32 %v10214_v32, %v8493_v10 }
 0x2dc   :  { %5964 = vmatpush.bf16.msra.mxu1 %v8240_v35  ;;  %v5746_v26 = vadd.f32 %v5745_v22, %v5733_v12  ;;  %v5758_v3 = vpop.f32.mrf.mxu1  ;;  %v5734_v24 = vpop.f32.mrf.mxu3  ;;  %v8669_v35 = vld [vmem:[%s15618_s1 + $0x1178] sm:$0xf0]  ;;  %v8928_v38 = vor.u32 %v10322_v23, %v8925_v33  ;;  %v10254_v60 = vld [vmem:[%s15618_s1 + $0x114c] sm:$0xf] }
 0x2dd   :  { %5977 = vmatpush.bf16.msra.mxu2 %v8368_v29  ;;  %v10290_v29 = vld [vmem:[%s15618_s1 + $0x126c] sm:$0xf]  ;;  %v8672_v37 = vor.u32 %v10258_v28, %v8669_v35  ;;  %v8653_v39 = vld [vmem:[%s15618_s1 + $0x1158] sm:$0xf0] }
 0x2de   :  { %5986 = vmatpush.bf16.msra.mxu3 %v8560_v30  ;;  %5952 = vmatmul.bf16.vlgmr.msra.gmra.mxu0 %v11408_v48  ;;  %v8528_v48 = vor.u32 %v10222_v34, %v8525_v50  ;;  %v5759_v30 = vadd.f32 %v5758_v3, %v5746_v26  ;;  %v10286_v40 = vld [vmem:[%s15618_s1 + $0x124c] sm:$0xf]  ;;  %v8781_v58 = vld [vmem:[%s15618_s1 + $0x1258] sm:$0xf0] }
 0x2df   :  { %5996 = vmatpush.bf16.msrb.mxu0 %v8736_v0  ;;  %5965 = vmatmul.bf16.vlgmr.msra.gmra.mxu1 %v11406_v47  ;;  %v10262_v47 = vld [vmem:[%s15618_s1 + $0x118c] sm:$0xf]  ;;  %v8797_v0 = vld [vmem:[%s15618_s1 + $0x1278] sm:$0xf0]  ;;  %v8784_v17 = vor.u32 %v10286_v40, %v8781_v58 }
 0x2e0   :  { %6009 = vmatpush.bf16.msrb.mxu1 %v8864_v1  ;;  %5978 = vmatmul.bf16.vlgmr.msra.gmra.mxu2 %v11410_v49  ;;  %v10218_v49 = vld [vmem:[%s15618_s1 + $0x102c] sm:$0xf]  ;;  %v8688_v63 = vor.u32 %v10262_v47, %v8685_v57  ;;  %v8800_v44 = vor.u32 %v10290_v29, %v8797_v0  ;;  %v8909_v42 = vld [vmem:[%s15618_s1 + $0x1358] sm:$0xf0] }
 0x2e1   :  { %6022 = vmatpush.bf16.msrb.mxu2 %v8992_v31  ;;  %v8512_v62 = vor.u32 %v10218_v49, %v8509_v43  ;;  %v10370_v1 = vld [vmem:[%s15618_s1 + $0x14ec] sm:$0xf]  ;;  %v9117_v31 = vld [vmem:[%s15618_s1 + $0x14f8] sm:$0xf0] }
 0x2e2   :  { %5987 = vmatpush.bf16.msra.mxu3 %v8544_v36  ;;  %v9120_v36 = vor.u32 %v10370_v1, %v9117_v31  ;;  %v10366_v34 = vld [vmem:[%s15618_s1 + $0x14cc] sm:$0xf]  ;;  %v9101_v50 = vld [vmem:[%s15618_s1 + $0x14d8] sm:$0xf0] }
 0x2e3   :  { %5997 = vmatpush.bf16.msrb.mxu0 %v8720_v41  ;;  %v10318_v41 = vld [vmem:[%s15618_s1 + $0x134c] sm:$0xf]  ;;  %v5771_v11 = vpop.f32.mrf.mxu2  ;;  %v8637_v53 = vld [vmem:[%s15618_s1 + $0x1138] sm:$0xf0] }
 0x2e4   :  { %6010 = vmatpush.bf16.msrb.mxu1 %v8848_v51  ;;  %v5747_v51 = vpop.f32.mrf.mxu0  ;;  %v5760_v52 = vpop.f32.mrf.mxu1  ;;  %v8912_v12 = vor.u32 %v10318_v41, %v8909_v42  ;;  %v10250_v45 = vld [vmem:[%s15618_s1 + $0x112c] sm:$0xf]  ;;  %v8765_v49 = vld [vmem:[%s15618_s1 + $0x1238] sm:$0xf0] }
 0x2e5   :  { %6023 = vmatpush.bf16.msrb.mxu2 %v8976_v16  ;;  %v8656_v16 = vor.u32 %v10254_v60, %v8653_v39  ;;  %v10282_v15 = vld [vmem:[%s15618_s1 + $0x122c] sm:$0xf]  ;;  %v9085_v47 = vld [vmem:[%s15618_s1 + $0x14b8] sm:$0xf0]  ;;  %v8640_v57 = vor.u32 %v10250_v45, %v8637_v53 }
 0x2e6   :  { %5988 = vmatpush.bf16.msra.mxu3 %v8528_v48  ;;  %v15264_v48 = vadd.f32 %v5771_v11, %v5759_v30  ;;  %v10314_v43 = vld [vmem:[%s15618_s1 + $0x132c] sm:$0xf]  ;;  %v8621_v54 = vld [vmem:[%s15618_s1 + $0x1118] sm:$0xf0] }
 0x2e7   :  { %5998 = vmatpush.bf16.msrb.mxu0 %v8704_v21  ;;  %v9104_v21 = vor.u32 %v10366_v34, %v9101_v50  ;;  %v10246_v46 = vld [vmem:[%s15618_s1 + $0x110c] sm:$0xf]  ;;  %v8749_v22 = vld [vmem:[%s15618_s1 + $0x1218] sm:$0xf0]  ;;  %v10523_v50 = vld [vmem:[%s15619_s2] sm:$0xf] }
 0x2e8   :  { %6011 = vmatpush.bf16.msrb.mxu1 %v8832_v55  ;;  %v8893_v55 = vld [vmem:[%s15618_s1 + $0x1338] sm:$0xf0]  ;;  %v10278_v61 = vld [vmem:[%s15618_s1 + $0x120c] sm:$0xf]  ;;  %v815_v51 = vperm.slane %v10523_v50, 3 }
 0x2e9   :  { %6024 = vmatpush.bf16.msrb.mxu2 %v8960_v56  ;;  %v10362_v56 = vld [vmem:[%s15618_s1 + $0x14ac] sm:$0xf]  ;;  %v8896_v59 = vor.u32 %v10314_v43, %v8893_v55  ;;  %v9069_v3 = vld [vmem:[%s15618_s1 + $0x1498] sm:$0xf0]  ;;  %v8752_v29 = vor.u32 %v10278_v61, %v8749_v22 }
 0x2ea   :  { %5989 = vmatpush.bf16.msra.mxu3 %v8512_v62  ;;  %v10310_v20 = vld [vmem:[%s15618_s1 + $0x130c] sm:$0xf]  ;;  %v9088_v26 = vor.u32 %v10362_v56, %v9085_v47  ;;  %v8877_v62 = vld [vmem:[%s15618_s1 + $0x1318] sm:$0xf0] }
 0x2eb   :  { %5999 = vmatpush.bf16.msrb.mxu0 %v8688_v63  ;;  %v10358_v63 = vld [vmem:[%s15618_s1 + $0x148c] sm:$0xf]  ;;  %v9245_v10 = vld [vmem:[%s15618_s1 + $0x15f8] sm:$0xf0]  ;;  %v8880_v30 = vor.u32 %v10310_v20, %v8877_v62  ;;  %v5773_v0 = vpop.f32.mrf.mxu2 }
 0x2ec   :  { %6012 = vmatpush.bf16.msrb.mxu1 %v8816_v25  ;;  %v10402_v32 = vld [vmem:[%s15618_s1 + $0x15ec] sm:$0xf]  ;;  %v8624_v25 = vor.u32 %v10246_v46, %v8621_v54  ;;  %v9501_v35 = vld [vmem:[%s15618_s1 + $0x17f8] sm:$0xf0]  ;;  %v9072_v23 = vor.u32 %v10358_v63, %v9069_v3 }
 0x2ed   :  { %6025 = vmatpush.bf16.msrb.mxu2 %v8944_v27  ;;  %v10434_v24 = vld [vmem:[%s15618_s1 + $0x16ec] sm:$0xf]  ;;  %v9373_v27 = vld [vmem:[%s15618_s1 + $0x16f8] sm:$0xf0]  ;;  %v9248_v33 = vor.u32 %v10402_v32, %v9245_v10 }
 0x2ee   :  { %5990 = vmatpush.bf16.msra.mxu3 %v8496_v2  ;;  %v10466_v28 = vld [vmem:[%s15618_s1 + $0x17ec] sm:$0xf]  ;;  %v9053_v31 = vld [vmem:[%s15618_s1 + $0x1478] sm:$0xf0]  ;;  %v9376_v2 = vor.u32 %v10434_v24, %v9373_v27 }
 0x2ef   :  { %6000 = vmatpush.bf16.msrb.mxu0 %v8672_v37  ;;  %v10354_v1 = vld [vmem:[%s15618_s1 + $0x146c] sm:$0xf]  ;;  %v9504_v37 = vor.u32 %v10466_v28, %v9501_v35  ;;  %v9357_v39 = vld [vmem:[%s15618_s1 + $0x16d8] sm:$0xf0] }
 0x2f0   :  { %6013 = vmatpush.bf16.msrb.mxu1 %v8800_v44  ;;  %v10398_v44 = vld [vmem:[%s15618_s1 + $0x15cc] sm:$0xf]  ;;  %v9056_v58 = vor.u32 %v10354_v1, %v9053_v31  ;;  %v9037_v34 = vld [vmem:[%s15618_s1 + $0x1458] sm:$0xf0] }
 0x2f1   :  { %6026 = vmatpush.bf16.msrb.mxu2 %v8928_v38  ;;  %5991 = vmatmul.bf16.vlgmr.msra.gmra.mxu3 %v11641_v9  ;;  %v8768_v9 = vor.u32 %v10282_v15, %v8765_v49  ;;  %v9229_v38 = vld [vmem:[%s15618_s1 + $0x15d8] sm:$0xf0]  ;;  %v10430_v60 = vld [vmem:[%s15618_s1 + $0x16cc] sm:$0xf] }
 0x2f2   :  { %6035 = vmatpush.bf16.msrb.mxu3 %v9120_v36  ;;  %v10462_v40 = vld [vmem:[%s15618_s1 + $0x17cc] sm:$0xf]  ;;  %v9485_v36 = vld [vmem:[%s15618_s1 + $0x17d8] sm:$0xf0]  ;;  %v9232_v41 = vor.u32 %v10398_v44, %v9229_v38  ;;  %v9360_v52 = vor.u32 %v10430_v60, %v9357_v39 }
 0x2f3   :  { %6001 = vmatpush.bf16.msrb.mxu0 %v8656_v16  ;;  %v10350_v42 = vld [vmem:[%s15618_s1 + $0x144c] sm:$0xf]  ;;  %v9488_v11 = vor.u32 %v10462_v40, %v9485_v36  ;;  %v9341_v53 = vld [vmem:[%s15618_s1 + $0x16b8] sm:$0xf0] }
 0x2f4   :  { %6014 = vmatpush.bf16.msrb.mxu1 %v8784_v17  ;;  %v5784_v16 = vpop.f32.mrf.mxu3  ;;  %v10394_v17 = vld [vmem:[%s15618_s1 + $0x15ac] sm:$0xf]  ;;  %v9040_v49 = vor.u32 %v10350_v42, %v9037_v34  ;;  %v9021_v43 = vld [vmem:[%s15618_s1 + $0x1438] sm:$0xf0] }
 0x2f5   :  { %6027 = vmatpush.bf16.msrb.mxu2 %v8912_v12  ;;  %v9213_v12 = vld [vmem:[%s15618_s1 + $0x15b8] sm:$0xf0]  ;;  %v10426_v45 = vld [vmem:[%s15618_s1 + $0x16ac] sm:$0xf]  ;;  %v5785_v55 = vadd.f32 %v5784_v16, %v815_v51 }
 0x2f6   :  { %6036 = vmatpush.bf16.msrb.mxu3 %v9104_v21  ;;  %v10458_v15 = vld [vmem:[%s15618_s1 + $0x17ac] sm:$0xf]  ;;  %v9469_v21 = vld [vmem:[%s15618_s1 + $0x17b8] sm:$0xf0]  ;;  %v9344_v56 = vor.u32 %v10426_v45, %v9341_v53 }
 0x2f7   :  { %6002 = vmatpush.bf16.msrb.mxu0 %v8640_v57  ;;  %v9472_v47 = vor.u32 %v10458_v15, %v9469_v21  ;;  %v9197_v57 = vld [vmem:[%s15618_s1 + $0x1598] sm:$0xf0]  ;;  %v10422_v46 = vld [vmem:[%s15618_s1 + $0x168c] sm:$0xf] }
 0x2f8   :  { %6015 = vmatpush.bf16.msrb.mxu1 %v8768_v9  ;;  %v9325_v54 = vld [vmem:[%s15618_s1 + $0x1698] sm:$0xf0]  ;;  %v10454_v9 = vld [vmem:[%s15618_s1 + $0x178c] sm:$0xf] }
 0x2f9   :  { %6028 = vmatpush.bf16.msrb.mxu2 %v8896_v59  ;;  %v9453_v59 = vld [vmem:[%s15618_s1 + $0x1798] sm:$0xf0]  ;;  %v9328_v10 = vor.u32 %v10422_v46, %v9325_v54  ;;  %v10418_v28 = vld [vmem:[%s15618_s1 + $0x166c] sm:$0xf] }
 0x2fa   :  { %6037 = vmatpush.bf16.msrb.mxu3 %v9088_v26  ;;  %v10342_v26 = vld [vmem:[%s15618_s1 + $0x140c] sm:$0xf]  ;;  %v9005_v62 = vld [vmem:[%s15618_s1 + $0x1418] sm:$0xf0]  ;;  %v9456_v24 = vor.u32 %v10454_v9, %v9453_v59 }
 0x2fb   :  { %6003 = vmatpush.bf16.msrb.mxu0 %v8624_v25  ;;  %v5797_v61 = vpop.f32.mrf.mxu0  ;;  %v10386_v25 = vld [vmem:[%s15618_s1 + $0x156c] sm:$0xf]  ;;  %v9181_v27 = vld [vmem:[%s15618_s1 + $0x1578] sm:$0xf0]  ;;  %v9008_v1 = vor.u32 %v10342_v26, %v9005_v62 }
 0x2fc   :  { %6016 = vmatpush.bf16.msrb.mxu1 %v8752_v29  ;;  %v5798_v63 = vadd.f32 %v5797_v61, %v5785_v55  ;;  %v5810_v3 = vpop.f32.mrf.mxu1  ;;  %v5786_v32 = vpop.f32.mrf.mxu3  ;;  %v9309_v35 = vld [vmem:[%s15618_s1 + $0x1678] sm:$0xf0]  ;;  %v10450_v29 = vld [vmem:[%s15618_s1 + $0x176c] sm:$0xf]  ;;  %v9184_v31 = vor.u32 %v10386_v25, %v9181_v27  ;;  %v10491_v25 = vld [vmem:[%s15620_s3 + $0x30] sm:$0xff] }
 0x2fd   :  { %6029 = vmatpush.bf16.msrb.mxu2 %v8880_v30  ;;  %v9437_v30 = vld [vmem:[%s15618_s1 + $0x1778] sm:$0xf0]  ;;  %v10382_v44 = vld [vmem:[%s15618_s1 + $0x154c] sm:$0xf]  ;;  %v10499_v27 = vld [vmem:[%s15620_s3 + $0x70] sm:$0xff] }
 0x2fe   :  { %6038 = vmatpush.bf16.msrb.mxu3 %v9072_v23  ;;  %6004 = vmatmul.bf16.vlgmr.msrb.gmra.mxu0 %v11651_v14  ;;  %v9216_v14 = vor.u32 %v10394_v17, %v9213_v12  ;;  %v5811_v0 = vadd.f32 %v5810_v3, %v5798_v63  ;;  %v10482_v23 = vld [vmem:[%s15618_s1 + $0x186c] sm:$0xf]  ;;  %v9165_v38 = vld [vmem:[%s15618_s1 + $0x1558] sm:$0xf0] }
 0x2ff   :  { %6048 = vmatpush.bf16.msra.mxu0 %v9248_v33  ;;  %6017 = vmatmul.bf16.vlgmr.msrb.gmra.mxu1 %v11649_v13  ;;  %v10390_v13 = vld [vmem:[%s15618_s1 + $0x158c] sm:$0xf]  ;;  %v9565_v33 = vld [vmem:[%s15618_s1 + $0x1878] sm:$0xf0]  ;;  %v9168_v16 = vor.u32 %v10382_v44, %v9165_v38 }
 0x300   :  { %6061 = vmatpush.bf16.msra.mxu1 %v9376_v2  ;;  %6030 = vmatmul.bf16.vlgmr.msrb.gmra.mxu2 %v11653_v18  ;;  %v10346_v18 = vld [vmem:[%s15618_s1 + $0x142c] sm:$0xf]  ;;  %v9200_v20 = vor.u32 %v10390_v13, %v9197_v57  ;;  %v9312_v2 = vor.u32 %v10418_v28, %v9309_v35  ;;  %v9568_v40 = vor.u32 %v10482_v23, %v9565_v33  ;;  %v9293_v36 = vld [vmem:[%s15618_s1 + $0x1658] sm:$0xf0]  ;;  %v10507_v35 = vld [vmem:[%s15620_s3 + $0xb0] sm:$0xff] }
 0x301   :  { %6074 = vmatpush.bf16.msra.mxu2 %v9504_v37  ;;  %v9024_v22 = vor.u32 %v10346_v18, %v9021_v43  ;;  %v9440_v37 = vor.u32 %v10450_v29, %v9437_v30  ;;  %v10414_v60 = vld [vmem:[%s15618_s1 + $0x164c] sm:$0xf]  ;;  %v9549_v50 = vld [vmem:[%s15618_s1 + $0x1858] sm:$0xf0]  ;;  %v10524_v23 = vld [vmem:[#allocation1] sm:$0xff] }
 0x302   :  { %6039 = vmatpush.bf16.msrb.mxu3 %v9056_v58  ;;  %v10446_v58 = vld [vmem:[%s15618_s1 + $0x174c] sm:$0xf]  ;;  %v9149_v45 = vld [vmem:[%s15618_s1 + $0x1538] sm:$0xf0]  ;;  %v10489_v33 = vld [vmem:[%s15620_s3 + $0x20] sm:$0xff] }
 0x303   :  { %6049 = vmatpush.bf16.msra.mxu0 %v9232_v41  ;;  %v5823_v39 = vpop.f32.mrf.mxu2  ;;  %v9421_v41 = vld [vmem:[%s15618_s1 + $0x1758] sm:$0xf0]  ;;  %v10478_v34 = vld [vmem:[%s15618_s1 + $0x184c] sm:$0xf]  ;;  %v5799_v51 = vpop.f32.mrf.mxu0 }
 0x304   :  { %6062 = vmatpush.bf16.msra.mxu1 %v9360_v52  ;;  %v5824_v42 = vadd.f32 %v5823_v39, %v5811_v0  ;;  %v5812_v52 = vpop.f32.mrf.mxu1  ;;  %v9424_v17 = vor.u32 %v10446_v58, %v9421_v41  ;;  %v10378_v12 = vld [vmem:[%s15618_s1 + $0x152c] sm:$0xf]  ;;  %v9552_v15 = vor.u32 %v10478_v34, %v9549_v50  ;;  %v9277_v21 = vld [vmem:[%s15618_s1 + $0x1638] sm:$0xf0]  ;;  %v10487_v41 = vld [vmem:[%s15620_s3 + $0x10] sm:$0xff] }
 0x305   :  { %6075 = vmatpush.bf16.msra.mxu2 %v9488_v11  ;;  %v9296_v11 = vor.u32 %v10414_v60, %v9293_v36  ;;  %v10410_v53 = vld [vmem:[%s15618_s1 + $0x162c] sm:$0xf]  ;;  %v9533_v43 = vld [vmem:[%s15618_s1 + $0x1838] sm:$0xf0]  ;;  %v9152_v55 = vor.u32 %v10378_v12, %v9149_v45  ;;  %v10503_v50 = vld [vmem:[%s15620_s3 + $0x90] sm:$0xff] }
 0x306   :  { %6040 = vmatpush.bf16.msrb.mxu3 %v9040_v49  ;;  %v10442_v49 = vld [vmem:[%s15618_s1 + $0x172c] sm:$0xf]  ;;  %v9261_v9 = vld [vmem:[%s15618_s1 + $0x1618] sm:$0xf0]  ;;  %v10493_v12 = vld [vmem:[%s15620_s3 + $0x40] sm:$0xff] }
 0x307   :  { %6050 = vmatpush.bf16.msra.mxu0 %v9216_v14  ;;  %v9405_v14 = vld [vmem:[%s15618_s1 + $0x1738] sm:$0xf0]  ;;  %v10474_v18 = vld [vmem:[%s15618_s1 + $0x182c] sm:$0xf]  ;;  %v10501_v45 = vld [vmem:[%s15620_s3 + $0x80] sm:$0xff] }
 0x308   :  { %6063 = vmatpush.bf16.msra.mxu1 %v9344_v56  ;;  %v9280_v56 = vor.u32 %v10410_v53, %v9277_v21  ;;  %v10374_v13 = vld [vmem:[%s15618_s1 + $0x150c] sm:$0xf]  ;;  %v9536_v54 = vor.u32 %v10474_v18, %v9533_v43  ;;  %v9389_v61 = vld [vmem:[%s15618_s1 + $0x1718] sm:$0xf0]  ;;  %v6100_v53 = vpack.c.bf16 %v12831_v19, %v12831_v19  ;;  %v6102_v21 = vpack.c.bf16 %v15264_v48, %v15264_v48 }
 0x309   :  { %6076 = vmatpush.bf16.msra.mxu2 %v9472_v47  ;;  %v9408_v47 = vor.u32 %v10442_v49, %v9405_v14  ;;  %v10406_v57 = vld [vmem:[%s15618_s1 + $0x160c] sm:$0xf]  ;;  %v9517_v26 = vld [vmem:[%s15618_s1 + $0x1818] sm:$0xf0] }
 0x30a   :  { %6041 = vmatpush.bf16.msrb.mxu3 %v9024_v22  ;;  %v10438_v59 = vld [vmem:[%s15618_s1 + $0x170c] sm:$0xf]  ;;  %v9264_v62 = vor.u32 %v10406_v57, %v9261_v9  ;;  %v10492_v3 = vld [vmem:[%s15620_s3 + $0x38] sm:$0xff] }
 0x30b   :  { %6051 = vmatpush.bf16.msra.mxu0 %v9200_v20  ;;  %v5825_v46 = vpop.f32.mrf.mxu2  ;;  %v10470_v20 = vld [vmem:[%s15618_s1 + $0x180c] sm:$0xf]  ;;  %v9392_v63 = vor.u32 %v10438_v59, %v9389_v61  ;;  %v10500_v32 = vld [vmem:[%s15620_s3 + $0x78] sm:$0xff] }
 0x30c   :  { %6064 = vmatpush.bf16.msra.mxu1 %v9328_v10  ;;  %v10508_v10 = vld [vmem:[%s15620_s3 + $0xb8] sm:$0xff]  ;;  %v10490_v30 = vld [vmem:[%s15620_s3 + $0x28] sm:$0xff] }
 0x30d   :  { %6077 = vmatpush.bf16.msra.mxu2 %v9456_v24  ;;  %v9520_v24 = vor.u32 %v10470_v20, %v9517_v26  ;;  %v10498_v0 = vld [vmem:[%s15620_s3 + $0x68] sm:$0xff]  ;;  %v10488_v38 = vld [vmem:[%s15620_s3 + $0x18] sm:$0xff] }
 0x30e   :  { %6042 = vmatpush.bf16.msrb.mxu3 %v9008_v1  ;;  %v10497_v1 = vld [vmem:[%s15620_s3 + $0x60] sm:$0xff]  ;;  %v10496_v60 = vld [vmem:[%s15620_s3 + $0x58] sm:$0xff]  ;;  %v10486_v51 = vld [vmem:[%s15620_s3 + $0x8] sm:$0xff] }
 0x30f   :  { %6052 = vmatpush.bf16.msra.mxu0 %v9184_v31  ;;  %v10504_v39 = vld [vmem:[%s15620_s3 + $0x98] sm:$0xff]  ;;  %v10502_v52 = vld [vmem:[%s15620_s3 + $0x88] sm:$0xff] }
 0x310   :  { %6065 = vmatpush.bf16.msra.mxu1 %v9312_v2  ;;  %v10516_v48 = vld [vmem:[%s15620_s3 + $0xf8] sm:$0xff] }
 0x311   :  { %6078 = vmatpush.bf16.msra.mxu2 %v9440_v37  ;;  %6043 = vmatmul.bf16.vlgmr.msrb.gmra.mxu3 %v11734_v4  ;;  %v9133_v4 = vld [vmem:[%s15618_s1 + $0x1518] sm:$0xf0]  ;;  %v10505_v37 = vld [vmem:[%s15620_s3 + $0xa0] sm:$0xff] }
 0x312   :  { %6091 = vmatpush.bf16.msra.mxu3 %v9568_v40  ;;  %v9136_v22 = vor.u32 %v10374_v13, %v9133_v4 }
 0x313   :  { %6053 = vmatpush.bf16.msra.mxu0 %v9168_v16  ;;  %v10494_v16 = vld [vmem:[%s15620_s3 + $0x48] sm:$0xff] }
 0x314   :  { %6066 = vmatpush.bf16.msra.mxu1 %v9296_v11  ;;  %v5836_v28 = vpop.f32.mrf.mxu3 }
 0x315   :  { %6079 = vmatpush.bf16.msra.mxu2 %v9424_v17  ;;  %v5837_v29 = vadd.f32 %v5836_v28, %v5824_v42  ;;  %v10495_v42 = vld [vmem:[%s15620_s3 + $0x50] sm:$0xff]  ;;  %v10485_v17 = vld [vmem:[%s15620_s3] sm:$0xff] }
 0x316   :  { %6092 = vmatpush.bf16.msra.mxu3 %v9552_v15  ;;  %v6101_v15 = vpack.c.bf16 %v14034_v8, %v14034_v8 }
 0x317   :  { %6054 = vmatpush.bf16.msra.mxu0 %v9152_v55 }
 0x318   :  { %6067 = vmatpush.bf16.msra.mxu1 %v9280_v56 }
 0x319   :  { %6080 = vmatpush.bf16.msra.mxu2 %v9408_v47 }
 0x31a   :  { %6093 = vmatpush.bf16.msra.mxu3 %v9536_v54 }
 0x31b   :  { %6055 = vmatpush.bf16.msra.mxu0 %v9136_v22  ;;  %v10515_v22 = vld [vmem:[%s15620_s3 + $0xf0] sm:$0xff] }
 0x31c   :  { %6068 = vmatpush.bf16.msra.mxu1 %v9264_v62  ;;  %v5862_v31 = vpop.f32.mrf.mxu1  ;;  %v5838_v2 = vpop.f32.mrf.mxu3  ;;  %v10514_v62 = vld [vmem:[%s15620_s3 + $0xe8] sm:$0xff] }
 0x31d   :  { %6081 = vmatpush.bf16.msra.mxu2 %v9392_v63 }
 0x31e   :  { %6094 = vmatpush.bf16.msra.mxu3 %v9520_v24  ;;  %6056 = vmatmul.bf16.vlgmr.msra.gmra.mxu0 %v11738_v6  ;;  %v5849_v6 = vpop.f32.mrf.mxu0 }
 0x31f   :  { %6364 = vmatpush.bf16.msrb.mxu0 %v10492_v3  ;;  %6069 = vmatmul.bf16.vlgmr.msra.gmra.mxu1 %v11736_v5  ;;  %v10506_v5 = vld [vmem:[%s15620_s3 + $0xa8] sm:$0xff]  ;;  %v10513_v3 = vld [vmem:[%s15620_s3 + $0xe0] sm:$0xff] }
 0x320   :  { %6377 = vmatpush.bf16.msrb.mxu1 %v10500_v32  ;;  %6082 = vmatmul.bf16.vlgmr.msra.gmra.mxu2 %v11740_v7  ;;  %v5850_v7 = vadd.f32 %v5849_v6, %v5837_v29 }
 0x321   :  { %6390 = vmatpush.bf16.msrb.mxu2 %v10508_v10  ;;  %9572 = vmatmul.msk.bf16.vlgmr.msra.gmra.mxu3 %vm4797_vm0, %v10524_v23  ;;  %v10512_v10 = vld [vmem:[%s15620_s3 + $0xd8] sm:$0xff] }
 0x322   :  { %v5863_v44 = vadd.f32 %v5862_v31, %v5850_v7  ;;  %6403 = vmatpush.bf16.msrb.mxu3 %v10516_v48 }
 0x323   :  { %6365 = vmatpush.bf16.msrb.mxu0 %v10491_v25  ;;  %v5875_v40 = vpop.f32.mrf.mxu2  ;;  %v10511_v25 = vld [vmem:[%s15620_s3 + $0xd0] sm:$0xff] }
 0x324   :  { %6378 = vmatpush.bf16.msrb.mxu1 %v10499_v27  ;;  %v5876_v36 = vadd.f32 %v5875_v40, %v5863_v44  ;;  %v5864_v34 = vpop.f32.mrf.mxu1 }
 0x325   :  { %6391 = vmatpush.bf16.msrb.mxu2 %v10507_v35  ;;  %v10510_v35 = vld [vmem:[%s15620_s3 + $0xc8] sm:$0xff] }
 0x326   :  { %v5851_v58 = vpop.f32.mrf.mxu0  ;;  %6404 = vmatpush.bf16.msrb.mxu3 %v10515_v22 }
 0x327   :  { %6366 = vmatpush.bf16.msrb.mxu0 %v10490_v30 }
 0x328   :  { %6379 = vmatpush.bf16.msrb.mxu1 %v10498_v0  ;;  %v10509_v0 = vld [vmem:[%s15620_s3 + $0xc0] sm:$0xff] }
 0x329   :  { %6392 = vmatpush.bf16.msrb.mxu2 %v10506_v5 }
 0x32a   :  { %6405 = vmatpush.bf16.msrb.mxu3 %v10514_v62 }
 0x32b   :  { %6367 = vmatpush.bf16.msrb.mxu0 %v10489_v33  ;;  %v5877_v11 = vpop.f32.mrf.mxu2 }
 0x32c   :  { %6380 = vmatpush.bf16.msrb.mxu1 %v10497_v1 }
 0x32d   :  { %6393 = vmatpush.bf16.msrb.mxu2 %v10505_v37 }
 0x32e   :  { %6406 = vmatpush.bf16.msrb.mxu3 %v10513_v3 }
 0x32f   :  { %6368 = vmatpush.bf16.msrb.mxu0 %v10488_v38 }
 0x330   :  { %6381 = vmatpush.bf16.msrb.mxu1 %v10496_v60 }
 0x331   :  { %6394 = vmatpush.bf16.msrb.mxu2 %v10504_v39 }
 0x332   :  { %6407 = vmatpush.bf16.msrb.mxu3 %v10512_v10 }
 0x333   :  { %6369 = vmatpush.bf16.msrb.mxu0 %v10487_v41 }
 0x334   :  { %6382 = vmatpush.bf16.msrb.mxu1 %v10495_v42  ;;  %v5888_v49 = vpop.f32.mrf.mxu3 }
 0x335   :  { %6395 = vmatpush.bf16.msrb.mxu2 %v10503_v50  ;;  %v5889_v14 = vadd.f32 %v5888_v49, %v5876_v36 }
 0x336   :  { %6408 = vmatpush.bf16.msrb.mxu3 %v10511_v25 }
 0x337   :  { %6370 = vmatpush.bf16.msrb.mxu0 %v10486_v51 }
 0x338   :  { %6383 = vmatpush.bf16.msrb.mxu1 %v10494_v16 }
 0x339   :  { %6396 = vmatpush.bf16.msrb.mxu2 %v10502_v52 }
 0x33a   :  { %6409 = vmatpush.bf16.msrb.mxu3 %v10510_v35 }
 0x33b   :  { %6371 = vmatpush.bf16.msrb.mxu0 %v10485_v17  ;;  %v5901_v18 = vpop.f32.mrf.mxu0 }
 0x33c   :  { %6384 = vmatpush.bf16.msrb.mxu1 %v10493_v12  ;;  %v5902_v43 = vadd.f32 %v5901_v18, %v5889_v14  ;;  %v5914_v55 = vpop.f32.mrf.mxu1  ;;  %v5890_v56 = vpop.f32.mrf.mxu3 }
 0x33d   :  { %6397 = vmatpush.bf16.msrb.mxu2 %v10501_v45  ;;  %v10518_v45 = vld [vmem:[%s15621_s4] ss:$0 sm:$0xff] }
 0x33e   :  { %6372 = vmatmul.bf16.vlgmr.msrb.gmra.mxu0 %v6100_v53  ;;  %v5915_v47 = vadd.f32 %v5914_v55, %v5902_v43  ;;  %6410 = vmatpush.bf16.msrb.mxu3 %v10509_v0 }
 0x33f   :  { %6385 = vmatmul.bf16.vlgmr.msrb.gmra.mxu1 %v6101_v15 }
 0x340   :  { %6398 = vmatmul.bf16.vlgmr.msrb.gmra.mxu2 %v6102_v21 }
 0x343   :  { %v5927_v13 = vpop.f32.mrf.mxu2  ;;  %v5903_v19 = vpop.f32.mrf.mxu0 }
 0x344   :  { %v5928_v4 = vadd.f32 %v5927_v13, %v5915_v47  ;;  %v5916_v57 = vpop.f32.mrf.mxu1 }
 0x34b   :  { %v5929_v46 = vpop.f32.mrf.mxu2 }
 0x354   :  { %v5940_v8 = vpop.f32.mrf.mxu3 }
 0x355   :  { %v5941_v5 = vadd.f32 %v5940_v8, %v5928_v4 }
 0x35b   :  { %v5953_v54 = vpop.f32.mrf.mxu0 }
 0x35c   :  { %v5966_v9 = vpop.f32.mrf.mxu1  ;;  %v5942_v59 = vpop.f32.mrf.mxu3  ;;  %v5954_v6 = vadd.f32 %v5953_v54, %v5941_v5 }
 0x35e   :  { %v5967_v33 = vadd.f32 %v5966_v9, %v5954_v6 }
 0x363   :  { %v5979_v61 = vpop.f32.mrf.mxu2  ;;  %v5955_v20 = vpop.f32.mrf.mxu0 }
 0x364   :  { %v5968_v26 = vpop.f32.mrf.mxu1  ;;  %v5980_v1 = vadd.f32 %v5979_v61, %v5967_v33 }
 0x36b   :  { %v5981_v63 = vpop.f32.mrf.mxu2 }
 0x374   :  { %v5992_v32 = vpop.f32.mrf.mxu3 }
 0x375   :  { %v5993_v31 = vadd.f32 %v5992_v32, %v5980_v1 }
 0x37b   :  { %v6005_v24 = vpop.f32.mrf.mxu0 }
 0x37c   :  { %v6018_v27 = vpop.f32.mrf.mxu1  ;;  %v5994_v28 = vpop.f32.mrf.mxu3  ;;  %v6006_v2 = vadd.f32 %v6005_v24, %v5993_v31 }
 0x37e   :  { %v6019_v44 = vadd.f32 %v6018_v27, %v6006_v2 }
 0x383   :  { %v6031_v29 = vpop.f32.mrf.mxu2  ;;  %v6007_v30 = vpop.f32.mrf.mxu0 }
 0x384   :  { %v6020_v23 = vpop.f32.mrf.mxu1  ;;  %v6032_v38 = vadd.f32 %v6031_v29, %v6019_v44 }
 0x38b   :  { %v6033_v7 = vpop.f32.mrf.mxu2 }
 0x394   :  { %v6044_v37 = vpop.f32.mrf.mxu3 }
 0x395   :  { %v6045_v60 = vadd.f32 %v6044_v37, %v6032_v38 }
 0x39b   :  { %v6057_v39 = vpop.f32.mrf.mxu0 }
 0x39c   :  { %v6070_v40 = vpop.f32.mrf.mxu1  ;;  %v6046_v36 = vpop.f32.mrf.mxu3  ;;  %v6058_v58 = vadd.f32 %v6057_v39, %v6045_v60 }
 0x39e   :  { %v6071_v41 = vadd.f32 %v6070_v40, %v6058_v58 }
 0x3a3   :  { %v6083_v42 = vpop.f32.mrf.mxu2  ;;  %v6059_v50 = vpop.f32.mrf.mxu0 }
 0x3a4   :  { %v6084_v34 = vadd.f32 %v6083_v42, %v6071_v41  ;;  %v6072_v51 = vpop.f32.mrf.mxu1  ;;  %v6096_v16 = vpop.f32.mrf.mxu3 }
 0x3a6   :  { %v6097_v52 = vadd.f32 %v6096_v16, %v6084_v34 }
 0x3a8   :  { %v6103_v11 = vpack.c.bf16 %v6097_v52, %v6097_v52 }
 0x3aa   :  { %6411 = vmatmul.bf16.vlgmr.msrb.gmra.mxu3 %v6103_v11 }
 0x3ab   :  { %v6085_v17 = vpop.f32.mrf.mxu2 }
 0x3ac   :  { %v6098_v12 = vpop.f32.mrf.mxu3 }
 0x3bb   :  { %v6373_v53 = vpop.f32.mrf.mxu0 }
 0x3bc   :  { %v6386_v15 = vpop.f32.mrf.mxu1  ;;  %v6374_v21 = vadd.f32 %v10518_v45, %v6373_v53 }
 0x3be   :  { %v6387_v49 = vadd.f32 %v6386_v15, %v6374_v21 }
 0x3c3   :  { %v6399_v14 = vpop.f32.mrf.mxu2  ;;  %v6375_v43 = vpop.f32.mrf.mxu0 }
 0x3c4   :  { %v6400_v18 = vadd.f32 %v6399_v14, %v6387_v49  ;;  %v6388_v55 = vpop.f32.mrf.mxu1 }
 0x3cb   :  { %v6401_v56 = vpop.f32.mrf.mxu2 }
 0x42d   :  { %v6412_v47 = vpop.f32.mrf.mxu3 }
 0x42e   :  { %v6413_v13 = vadd.f32 %v6412_v47, %v6400_v18 }
 0x430   :  { %6416 = vst [vmem:[#allocation2] sm:$0x3] %v6413_v13 }
 0x431   :  { %6427 = dma.vmem_to_hbm [thread:$0]  %s6423_s6, 32, %s6425_s9, [#allocation3]  }
 0x435   :  { %v6414_v4 = vpop.f32.mrf.mxu3 }
 0x436   :  { %10549 = dma.done.wait [#allocation3], 32  }
 0x437   :  { %10550 = vsyncadd [#allocation3], 4294967264 }
 0x438   :  { %6432 = vsyncpa [#allocation3], 1 }

</bundles_post_ra>
